<compile_context>
chip_gen: v5e
topology: v5e:2x2
jax: 0.10.0
libtpu: 0.0.40
codegen_flags: <defaults>
</compile_context>

<pallas_src>
import functools

import jax
import jax.numpy as jnp
from jax.experimental import pallas as pl
from jax.experimental.pallas import tpu as pltpu


def _largest_divisor(n, limit):
    """Largest divisor of n that is <= limit (at least 1)."""
    limit = max(1, min(n, limit))
    best = 1
    for d in range(1, limit + 1):
        if n % d == 0:
            best = d
    return best


def _pick_row_tile(rows, inner, budget_rows):
    """Largest divisor d of `rows` with (d * inner) % 128 == 0 and d <= budget.
    Falls back to the full extent (always a legal Pallas block)."""
    budget_rows = max(1, budget_rows)
    best = None
    for d in range(1, rows + 1):
        if rows % d == 0 and (d * inner) % 128 == 0 and d <= budget_rows:
            best = d
    return best if best is not None else rows


@functools.partial(jax.jit, static_argnames=("stride", "pad", "out_pad"))
def upsample_block(x, w_t, bias, gamma, beta, *, stride, pad=0, out_pad=0):
    """x: (N, Cin, H, W) NCHW.  w_t: (Cin, Cout, kH, kW) (ConvTranspose2d layout).
    Returns (N, Cout, Ho, Wo) NCHW, matching PyTorch UpsampleBlock.forward."""
    eps = 1e-5
    n, cin, h, w = x.shape
    _, cout, kh, kw = w_t.shape
    s, p, op = int(stride), int(pad), int(out_pad)

    ho = (h - 1) * s - 2 * p + kh + op
    wo = (w - 1) * s - 2 * p + kw + op
    ch, cw = kh - 1 - p, kw - 1 - p
    assert ch >= 0 and cw >= 0, "padding > kernel_size - 1 not supported"

    hu = -(-ho // s)                 # output rows per phase (padded up)
    wu = -(-wo // s)
    ho_pad, wo_pad = hu * s, wu * s

    # ---- per-phase tap geometry (sub-pixel decomposition of ConvTranspose) ----
    a0h = [(ch - r) % s for r in range(s)]
    a0w = [(cw - r) % s for r in range(s)]
    base_h = [(r - ch + a0h[r]) // s for r in range(s)]
    base_w = [(r - cw + a0w[r]) // s for r in range(s)]
    mh = max(1, max(len(range(a, kh, s)) for a in a0h))
    mw = max(1, max(len(range(a, kw, s)) for a in a0w))
    ntaps = mh * mw
    tap_list = [(m, mb) for m in range(mh) for mb in range(mw)]

    # halo padding of the UN-dilated input so every phase/tap read is in-bounds
    top = max(0, -min(base_h))
    bot = max(0, max(base_h) + hu + mh - 2 - (h - 1))
    left = max(0, -min(base_w))
    right = max(0, max(base_w) + wu + mw - 2 - (w - 1))
    hp, wp = h + top + bot, w + left + right

    row_off = [top + base_h[r] for r in range(s)]        # static (phase loop is static)
    col_off = [left + base_w[r] for r in range(s)]       # static

    # number of valid (non-phase-padding) rows/cols per phase
    hu_valid = [max(0, -(-(ho - r) // s)) for r in range(s)]
    wu_valid = [max(0, -(-(wo - r) // s)) for r in range(s)]
    needs_mask = (ho_pad != ho) or (wo_pad != wo)

    # ---- input NCHW -> NHWC (+ halo pad), bf16 matmul operand ----
    x_nhwc = jnp.transpose(x, (0, 2, 3, 1)).astype(jnp.bfloat16)
    xpad = jnp.pad(x_nhwc, ((0, 0), (top, bot), (left, right), (0, 0)))

    # ---- ConvTranspose weights -> per-phase direct-conv taps (bf16) ----
    # w_flip[a, b, ci, co] = w_t[ci, co, kh-1-a, kw-1-b]
    w_flip = jnp.transpose(jnp.flip(w_t, axis=(2, 3)), (2, 3, 0, 1)).astype(jnp.float32)
    zero_tap = jnp.zeros((cin, cout), jnp.float32)
    w_rows = []
    for rh in range(s):
        w_cols = []
        for rw in range(s):
            taps = []
            for (m, mb) in tap_list:
                a = a0h[rh] + m * s
                b = a0w[rw] + mb * s
                taps.append(w_flip[a, b] if (a < kh and b < kw) else zero_tap)
            w_cols.append(jnp.stack(taps, axis=0))       # (ntaps, cin, cout)
        w_rows.append(jnp.stack(w_cols, axis=0))         # (s, ntaps, cin, cout)
    w_phase = jnp.stack(w_rows, axis=0).astype(jnp.bfloat16)   # (s, s, ntaps, cin, cout)

    # The ConvTranspose bias (per-channel constant added before BatchNorm) cancels
    # exactly in (y - mean)*scale + shift, so it is dropped from the computation.
    del bias

    # ---- fused conv + BN-partial-stats kernel ----
    out_row_bytes = s * wu * s * cout * 2                # bf16 bytes per phase-row of out block
    tu = _largest_divisor(hu, max(1, (4 * 1024 * 1024) // max(1, out_row_bytes)))
    if tu * wu < 256 and hu * out_row_bytes <= 16 * 1024 * 1024:
        tu = hu                                          # guard against degenerate (prime hu) tiling
    ht = hu // tu

    def conv_kernel(x_ref, w_ref, out_ref, ps_ref):
        ti = pl.program_id(1)
        sum_acc = jnp.zeros((1, cout), jnp.float32)
        ssq_acc = jnp.zeros((1, cout), jnp.float32)
        if needs_mask:
            rows_g = jax.lax.broadcasted_iota(jnp.int32, (tu, wu, 1), 0) + ti * tu
            cols_g = jax.lax.broadcasted_iota(jnp.int32, (tu, wu, 1), 1)
        for rh in range(s):                              # static phase-row loop
            row0 = row_off[rh] + ti * tu
            res = []
            for rw in range(s):                          # static phase-col loop
                acc = None
                for t, (m, mb) in enumerate(tap_list):   # per-tap MXU accumulation (no K concat)
                    sl = x_ref[0, pl.ds(row0 + m, tu), pl.ds(col_off[rw] + mb, wu), :]
                    piece = sl.reshape(tu * wu, cin)
                    d = jnp.dot(piece, w_ref[rh, rw, t],
                                preferred_element_type=jnp.float32)
                    acc = d if acc is None else acc + d
                zz = acc
                if needs_mask and (hu_valid[rh] < hu or wu_valid[rw] < wu):
                    m3 = (rows_g < hu_valid[rh]) & (cols_g < wu_valid[rw])
                    zz = jnp.where(m3, acc.reshape(tu, wu, cout), 0.0).reshape(tu * wu, cout)
                sum_acc = sum_acc + jnp.sum(zz, axis=0, keepdims=True)
                ssq_acc = ssq_acc + jnp.sum(zz * zz, axis=0, keepdims=True)
                res.append(acc)
            cat = res[0] if s == 1 else jnp.concatenate(res, axis=-1)   # (tu*wu, s*cout)
            out_ref[0, :, rh, :, :] = cat.astype(out_ref.dtype).reshape(tu, wu, s * cout)
        ps_ref[...] = jnp.concatenate([sum_acc, ssq_acc], axis=0).reshape(1, 1, 2, cout)

    conv_flops = 2 * n * s * s * hu * wu * ntaps * cin * cout
    conv_bytes = (2 * n * hp * wp * cin + 2 * s * s * ntaps * cin * cout
                  + 2 * n * ho_pad * wo_pad * cout + 4 * n * ht * 2 * cout)

    conv6, psums = pl.pallas_call(
        conv_kernel,
        out_shape=(jax.ShapeDtypeStruct((n, hu, s, wu, s * cout), jnp.bfloat16),
                   jax.ShapeDtypeStruct((n, ht, 2, cout), jnp.float32)),
        grid_spec=pltpu.PrefetchScalarGridSpec(
            num_scalar_prefetch=0,
            grid=(n, ht),
            in_specs=[
                pl.BlockSpec((1, hp, wp, cin), lambda ni, ti: (ni, 0, 0, 0)),
                # packed phase weights: fully resident (constant index map -> single DMA)
                pl.BlockSpec((s, s, ntaps, cin, cout), lambda ni, ti: (0, 0, 0, 0, 0)),
            ],
            out_specs=[
                pl.BlockSpec((1, tu, s, wu, s * cout), lambda ni, ti: (ni, ti, 0, 0, 0)),
                pl.BlockSpec((1, 1, 2, cout), lambda ni, ti: (ni, ti, 0, 0)),
            ],
        ),
        compiler_params=pltpu.CompilerParams(
            dimension_semantics=("parallel", "parallel"),
            vmem_limit_bytes=48 * 1024 * 1024),
        cost_estimate=pl.CostEstimate(flops=conv_flops, transcendentals=0,
                                      bytes_accessed=conv_bytes),
    )(xpad, w_phase)

    # ---- BN scale/shift from fused partial sums (tiny; left to XLA) ----
    tot = jnp.sum(psums, axis=(0, 1))                    # (2, cout) f32
    inv_count = 1.0 / float(n * ho * wo)
    mean = tot[0] * inv_count
    var = tot[1] * inv_count - mean * mean               # biased variance (batch stats)
    inv = jax.lax.rsqrt(var + eps)
    scale = gamma.astype(jnp.float32) * inv
    shift = beta.astype(jnp.float32) - mean * scale
    ss = jnp.stack([scale, shift], axis=0)               # (2, cout) f32

    # Row-major reshape of the phase layout IS the NHWC conv output (free).
    conv_y = conv6.reshape(n, ho_pad, wo_pad, cout)

    # ---- normalize + ReLU + NCHW transpose, tiled over rows and channels ----
    c_tile = 128 if (cout % 128 == 0) else cout
    ct = cout // c_tile
    bn_row_bytes = wo_pad * c_tile * (2 + 4)             # bf16 read + f32 write per row
    th = _pick_row_tile(ho_pad, wo_pad, (4 * 1024 * 1024) // max(1, bn_row_bytes))
    ht2 = ho_pad // th

    def bn_apply_kernel(y_ref, ss_ref, o_ref):
        y = y_ref[0].astype(jnp.float32)                 # (th, wo_pad, c_tile)
        z = jnp.maximum(y * ss_ref[0:1, :] + ss_ref[1:2, :], 0.0)
        z2 = z.reshape(th * wo_pad, c_tile)              # leading-dim merge (lane dim unchanged)
        # in-kernel 2-D transpose -> channel-major write (replaces the XLA NHWC->NCHW transpose)
        o_ref[...] = jnp.transpose(z2).reshape(1, c_tile, th * wo_pad)

    out_flat = pl.pallas_call(
        bn_apply_kernel,
        out_shape=jax.ShapeDtypeStruct((n, cout, ho_pad * wo_pad), jnp.float32),
        grid_spec=pltpu.PrefetchScalarGridSpec(
            num_scalar_prefetch=0,
            grid=(n, ht2, ct),
            in_specs=[
                pl.BlockSpec((1, th, wo_pad, c_tile), lambda ni, ti, cj: (ni, ti, 0, cj)),
                pl.BlockSpec((2, c_tile), lambda ni, ti, cj: (0, cj)),
            ],
            out_specs=pl.BlockSpec((1, c_tile, th * wo_pad),
                                   lambda ni, ti, cj: (ni, cj, ti)),
        ),
        compiler_params=pltpu.CompilerParams(
            dimension_semantics=("parallel", "parallel", "parallel"),
            vmem_limit_bytes=48 * 1024 * 1024),
        cost_estimate=pl.CostEstimate(
            flops=3 * n * ho_pad * wo_pad * cout, transcendentals=0,
            bytes_accessed=(2 + 4) * n * ho_pad * wo_pad * cout),
    )(conv_y, ss)

    out = out_flat.reshape(n, cout, ho_pad, wo_pad)      # free row-major reinterpretation
    if ho_pad != ho or wo_pad != wo:
        out = out[:, :, :ho, :wo]                        # crop phase padding (odd-size case only)
    return out


# ----------------------------------------------------------------------------
# Pure-JAX f32 reference (correctness sanity check)
# ----------------------------------------------------------------------------
def reference(x, w_t, bias, gamma, beta, *, stride, pad=0, out_pad=0, eps=1e-5):
    kh, kw = w_t.shape[2], w_t.shape[3]
    w_conv = jnp.transpose(jnp.flip(w_t, axis=(2, 3)), (1, 0, 2, 3))  # OIHW
    y = jax.lax.conv_general_dilated(
        x, w_conv, window_strides=(1, 1),
        padding=[(kh - 1 - pad, kh - 1 - pad + out_pad),
                 (kw - 1 - pad, kw - 1 - pad + out_pad)],
        lhs_dilation=(stride, stride),
        dimension_numbers=("NCHW", "OIHW", "NCHW"))
    y = y + bias[None, :, None, None]
    mean = y.mean(axis=(0, 2, 3), keepdims=True)
    var = jnp.square(y - mean).mean(axis=(0, 2, 3), keepdims=True)
    out = (gamma[None, :, None, None] * (y - mean) * jax.lax.rsqrt(var + eps)
           + beta[None, :, None, None])
    return jnp.maximum(out, 0.0)


if __name__ == "__main__":
    def run_case(key, n, cin, h, w, cout, k, stride, pad, out_pad):
        kx, kw_, kb, kg, kbt = jax.random.split(key, 5)
        x = jax.random.normal(kx, (n, cin, h, w), jnp.float32)
        bound = 1.0 / float(cout * k * k) ** 0.5
        w_t = jax.random.uniform(kw_, (cin, cout, k, k), jnp.float32, -bound, bound)
        bias = jax.random.uniform(kb, (cout,), jnp.float32, -bound, bound)
        gamma = 1.0 + 0.1 * jax.random.normal(kg, (cout,), jnp.float32)
        beta = 0.1 * jax.random.normal(kbt, (cout,), jnp.float32)

        out = upsample_block(x, w_t, bias, gamma, beta,
                             stride=stride, pad=pad, out_pad=out_pad)
        out = jax.block_until_ready(out)

        ref = reference(x, w_t, bias, gamma, beta,
                        stride=stride, pad=pad, out_pad=out_pad)
        ho = (h - 1) * stride - 2 * pad + k + out_pad
        wo = (w - 1) * stride - 2 * pad + k + out_pad
        assert out.shape == (n, cout, ho, wo), out.shape
        err = jnp.max(jnp.abs(out - ref))
        # bf16 matmul operands + bf16 conv intermediate -> relaxed tolerance (deliberate).
        assert jnp.allclose(out, ref, atol=5e-2, rtol=5e-2), f"max abs err {err}"

    key = jax.random.PRNGKey(0)
    k1, k2 = jax.random.split(key)
    # UpsampleBlock(in_planes=4, out_planes=8, kernel_size=4, stride=2, pad=1)
    run_case(k1, 2, 4, 16, 16, 8, 4, 2, 1, 0)
    # odd output size: exercises zero-padded phase taps + masked BN statistics + crop
    run_case(k2, 2, 4, 8, 8, 8, 3, 2, 0, 0)

    print("KERNEL_OK")
</pallas_src>

<mosaic_0001>
module attributes {stable_mosaic.version = 11 : i64} {
  func.func @conv_kernel(%arg0: i32, %arg1: i32, %arg2: memref<1x18x18x4xbf16, #tpu.memory_space<vmem>>, %arg3: memref<2x2x4x4x8xbf16, #tpu.memory_space<vmem>>, %arg4: memref<1x16x2x16x16xbf16, #tpu.memory_space<vmem>>, %arg5: memref<1x1x2x8xf32, #tpu.memory_space<vmem>>) attributes {dimension_semantics = [#tpu.dimension_semantics<parallel>, #tpu.dimension_semantics<parallel>], iteration_bounds = array<i64: 2, 1>, scalar_prefetch = 0 : i64, scratch_operands = 0 : i64, tpu.core_type = #tpu.core_type<tc>, window_params = [{transform_indices = @transform_0, window_bounds = array<i64: 1, 18, 18, 4>}, {pipeline_mode = #tpu.pipeline_mode<synchronous>, transform_indices = @transform_1, window_bounds = array<i64: 2, 2, 4, 4, 8>}, {transform_indices = @transform_2, window_bounds = array<i64: 1, 16, 2, 16, 16>}, {transform_indices = @transform_3, window_bounds = array<i64: 1, 1, 2, 8>}]} {
    %cst = arith.constant 0.000000e+00 : f32
    %0 = vector.broadcast %cst : f32 to vector<1x8xf32>
    %cst_0 = arith.constant 0.000000e+00 : f32
    %1 = vector.broadcast %cst_0 : f32 to vector<1x8xf32>
    %c16_i32 = arith.constant 16 : i32
    %2 = arith.muli %arg1, %c16_i32 : i32
    %c0_i32 = arith.constant 0 : i32
    %3 = arith.addi %c0_i32, %2 : i32
    %c0_i32_1 = arith.constant 0 : i32
    %4 = arith.addi %3, %c0_i32_1 : i32
    %c0 = arith.constant 0 : index
    %5 = arith.index_cast %4 : i32 to index
    %c0_2 = arith.constant 0 : index
    %c0_3 = arith.constant 0 : index
    %6 = vector.load %arg2[%c0, %5, %c0_2, %c0_3] : memref<1x18x18x4xbf16, #tpu.memory_space<vmem>>, vector<1x16x16x4xbf16>
    %7 = vector.shape_cast %6 : vector<1x16x16x4xbf16> to vector<16x16x4xbf16>
    %8 = vector.shape_cast %7 : vector<16x16x4xbf16> to vector<256x4xbf16>
    %c0_4 = arith.constant 0 : index
    %c0_5 = arith.constant 0 : index
    %c0_6 = arith.constant 0 : index
    %c0_7 = arith.constant 0 : index
    %c0_8 = arith.constant 0 : index
    %9 = vector.load %arg3[%c0_4, %c0_5, %c0_6, %c0_7, %c0_8] : memref<2x2x4x4x8xbf16, #tpu.memory_space<vmem>>, vector<1x1x1x4x8xbf16>
    %10 = vector.shape_cast %9 : vector<1x1x1x4x8xbf16> to vector<4x8xbf16>
    %cst_9 = arith.constant dense<0.000000e+00> : vector<256x8xf32>
    %11 = tpu.matmul %8, %10, %cst_9 {dimension_numbers = #tpu.dot_dimension_numbers<[1], [0], [0], [1], [0, 0, 1, 1], [], []>} : vector<256x4xbf16>, vector<4x8xbf16>, vector<256x8xf32> -> vector<256x8xf32>
    %c0_i32_10 = arith.constant 0 : i32
    %12 = arith.addi %3, %c0_i32_10 : i32
    %c0_11 = arith.constant 0 : index
    %13 = arith.index_cast %12 : i32 to index
    %c1 = arith.constant 1 : index
    %c0_12 = arith.constant 0 : index
    %14 = vector.load %arg2[%c0_11, %13, %c1, %c0_12] : memref<1x18x18x4xbf16, #tpu.memory_space<vmem>>, vector<1x16x16x4xbf16>
    %15 = vector.shape_cast %14 : vector<1x16x16x4xbf16> to vector<16x16x4xbf16>
    %16 = vector.shape_cast %15 : vector<16x16x4xbf16> to vector<256x4xbf16>
    %c0_13 = arith.constant 0 : index
    %c0_14 = arith.constant 0 : index
    %c1_15 = arith.constant 1 : index
    %c0_16 = arith.constant 0 : index
    %c0_17 = arith.constant 0 : index
    %17 = vector.load %arg3[%c0_13, %c0_14, %c1_15, %c0_16, %c0_17] : memref<2x2x4x4x8xbf16, #tpu.memory_space<vmem>>, vector<1x1x1x4x8xbf16>
    %18 = vector.shape_cast %17 : vector<1x1x1x4x8xbf16> to vector<4x8xbf16>
    %cst_18 = arith.constant dense<0.000000e+00> : vector<256x8xf32>
    %19 = tpu.matmul %16, %18, %cst_18 {dimension_numbers = #tpu.dot_dimension_numbers<[1], [0], [0], [1], [0, 0, 1, 1], [], []>} : vector<256x4xbf16>, vector<4x8xbf16>, vector<256x8xf32> -> vector<256x8xf32>
    %20 = arith.addf %11, %19 : vector<256x8xf32>
    %c1_i32 = arith.constant 1 : i32
    %21 = arith.addi %3, %c1_i32 : i32
    %c0_19 = arith.constant 0 : index
    %22 = arith.index_cast %21 : i32 to index
    %c0_20 = arith.constant 0 : index
    %c0_21 = arith.constant 0 : index
    %23 = vector.load %arg2[%c0_19, %22, %c0_20, %c0_21] : memref<1x18x18x4xbf16, #tpu.memory_space<vmem>>, vector<1x16x16x4xbf16>
    %24 = vector.shape_cast %23 : vector<1x16x16x4xbf16> to vector<16x16x4xbf16>
    %25 = vector.shape_cast %24 : vector<16x16x4xbf16> to vector<256x4xbf16>
    %c0_22 = arith.constant 0 : index
    %c0_23 = arith.constant 0 : index
    %c2 = arith.constant 2 : index
    %c0_24 = arith.constant 0 : index
    %c0_25 = arith.constant 0 : index
    %26 = vector.load %arg3[%c0_22, %c0_23, %c2, %c0_24, %c0_25] : memref<2x2x4x4x8xbf16, #tpu.memory_space<vmem>>, vector<1x1x1x4x8xbf16>
    %27 = vector.shape_cast %26 : vector<1x1x1x4x8xbf16> to vector<4x8xbf16>
    %cst_26 = arith.constant dense<0.000000e+00> : vector<256x8xf32>
    %28 = tpu.matmul %25, %27, %cst_26 {dimension_numbers = #tpu.dot_dimension_numbers<[1], [0], [0], [1], [0, 0, 1, 1], [], []>} : vector<256x4xbf16>, vector<4x8xbf16>, vector<256x8xf32> -> vector<256x8xf32>
    %29 = arith.addf %20, %28 : vector<256x8xf32>
    %c1_i32_27 = arith.constant 1 : i32
    %30 = arith.addi %3, %c1_i32_27 : i32
    %c0_28 = arith.constant 0 : index
    %31 = arith.index_cast %30 : i32 to index
    %c1_29 = arith.constant 1 : index
    %c0_30 = arith.constant 0 : index
    %32 = vector.load %arg2[%c0_28, %31, %c1_29, %c0_30] : memref<1x18x18x4xbf16, #tpu.memory_space<vmem>>, vector<1x16x16x4xbf16>
    %33 = vector.shape_cast %32 : vector<1x16x16x4xbf16> to vector<16x16x4xbf16>
    %34 = vector.shape_cast %33 : vector<16x16x4xbf16> to vector<256x4xbf16>
    %c0_31 = arith.constant 0 : index
    %c0_32 = arith.constant 0 : index
    %c3 = arith.constant 3 : index
    %c0_33 = arith.constant 0 : index
    %c0_34 = arith.constant 0 : index
    %35 = vector.load %arg3[%c0_31, %c0_32, %c3, %c0_33, %c0_34] : memref<2x2x4x4x8xbf16, #tpu.memory_space<vmem>>, vector<1x1x1x4x8xbf16>
    %36 = vector.shape_cast %35 : vector<1x1x1x4x8xbf16> to vector<4x8xbf16>
    %cst_35 = arith.constant dense<0.000000e+00> : vector<256x8xf32>
    %37 = tpu.matmul %34, %36, %cst_35 {dimension_numbers = #tpu.dot_dimension_numbers<[1], [0], [0], [1], [0, 0, 1, 1], [], []>} : vector<256x4xbf16>, vector<4x8xbf16>, vector<256x8xf32> -> vector<256x8xf32>
    %38 = arith.addf %29, %37 : vector<256x8xf32>
    %cst_36 = arith.constant dense<0.000000e+00> : vector<8xf32>
    %39 = vector.multi_reduction <add>, %38, %cst_36 [0] : vector<256x8xf32> to vector<8xf32>
    %40 = vector.shape_cast %39 : vector<8xf32> to vector<1x8xf32>
    %41 = arith.addf %0, %40 : vector<1x8xf32>
    %42 = arith.mulf %38, %38 : vector<256x8xf32>
    %cst_37 = arith.constant dense<0.000000e+00> : vector<8xf32>
    %43 = vector.multi_reduction <add>, %42, %cst_37 [0] : vector<256x8xf32> to vector<8xf32>
    %44 = vector.shape_cast %43 : vector<8xf32> to vector<1x8xf32>
    %45 = arith.addf %1, %44 : vector<1x8xf32>
    %c0_i32_38 = arith.constant 0 : i32
    %46 = arith.addi %3, %c0_i32_38 : i32
    %c0_39 = arith.constant 0 : index
    %47 = arith.index_cast %46 : i32 to index
    %c1_40 = arith.constant 1 : index
    %c0_41 = arith.constant 0 : index
    %48 = vector.load %arg2[%c0_39, %47, %c1_40, %c0_41] : memref<1x18x18x4xbf16, #tpu.memory_space<vmem>>, vector<1x16x16x4xbf16>
    %49 = vector.shape_cast %48 : vector<1x16x16x4xbf16> to vector<16x16x4xbf16>
    %50 = vector.shape_cast %49 : vector<16x16x4xbf16> to vector<256x4xbf16>
    %c0_42 = arith.constant 0 : index
    %c1_43 = arith.constant 1 : index
    %c0_44 = arith.constant 0 : index
    %c0_45 = arith.constant 0 : index
    %c0_46 = arith.constant 0 : index
    %51 = vector.load %arg3[%c0_42, %c1_43, %c0_44, %c0_45, %c0_46] : memref<2x2x4x4x8xbf16, #tpu.memory_space<vmem>>, vector<1x1x1x4x8xbf16>
    %52 = vector.shape_cast %51 : vector<1x1x1x4x8xbf16> to vector<4x8xbf16>
    %cst_47 = arith.constant dense<0.000000e+00> : vector<256x8xf32>
    %53 = tpu.matmul %50, %52, %cst_47 {dimension_numbers = #tpu.dot_dimension_numbers<[1], [0], [0], [1], [0, 0, 1, 1], [], []>} : vector<256x4xbf16>, vector<4x8xbf16>, vector<256x8xf32> -> vector<256x8xf32>
    %c0_i32_48 = arith.constant 0 : i32
    %54 = arith.addi %3, %c0_i32_48 : i32
    %c0_49 = arith.constant 0 : index
    %55 = arith.index_cast %54 : i32 to index
    %c2_50 = arith.constant 2 : index
    %c0_51 = arith.constant 0 : index
    %56 = vector.load %arg2[%c0_49, %55, %c2_50, %c0_51] : memref<1x18x18x4xbf16, #tpu.memory_space<vmem>>, vector<1x16x16x4xbf16>
    %57 = vector.shape_cast %56 : vector<1x16x16x4xbf16> to vector<16x16x4xbf16>
    %58 = vector.shape_cast %57 : vector<16x16x4xbf16> to vector<256x4xbf16>
    %c0_52 = arith.constant 0 : index
    %c1_53 = arith.constant 1 : index
    %c1_54 = arith.constant 1 : index
    %c0_55 = arith.constant 0 : index
    %c0_56 = arith.constant 0 : index
    %59 = vector.load %arg3[%c0_52, %c1_53, %c1_54, %c0_55, %c0_56] : memref<2x2x4x4x8xbf16, #tpu.memory_space<vmem>>, vector<1x1x1x4x8xbf16>
    %60 = vector.shape_cast %59 : vector<1x1x1x4x8xbf16> to vector<4x8xbf16>
    %cst_57 = arith.constant dense<0.000000e+00> : vector<256x8xf32>
    %61 = tpu.matmul %58, %60, %cst_57 {dimension_numbers = #tpu.dot_dimension_numbers<[1], [0], [0], [1], [0, 0, 1, 1], [], []>} : vector<256x4xbf16>, vector<4x8xbf16>, vector<256x8xf32> -> vector<256x8xf32>
    %62 = arith.addf %53, %61 : vector<256x8xf32>
    %c1_i32_58 = arith.constant 1 : i32
    %63 = arith.addi %3, %c1_i32_58 : i32
    %c0_59 = arith.constant 0 : index
    %64 = arith.index_cast %63 : i32 to index
    %c1_60 = arith.constant 1 : index
    %c0_61 = arith.constant 0 : index
    %65 = vector.load %arg2[%c0_59, %64, %c1_60, %c0_61] : memref<1x18x18x4xbf16, #tpu.memory_space<vmem>>, vector<1x16x16x4xbf16>
    %66 = vector.shape_cast %65 : vector<1x16x16x4xbf16> to vector<16x16x4xbf16>
    %67 = vector.shape_cast %66 : vector<16x16x4xbf16> to vector<256x4xbf16>
    %c0_62 = arith.constant 0 : index
    %c1_63 = arith.constant 1 : index
    %c2_64 = arith.constant 2 : index
    %c0_65 = arith.constant 0 : index
    %c0_66 = arith.constant 0 : index
    %68 = vector.load %arg3[%c0_62, %c1_63, %c2_64, %c0_65, %c0_66] : memref<2x2x4x4x8xbf16, #tpu.memory_space<vmem>>, vector<1x1x1x4x8xbf16>
    %69 = vector.shape_cast %68 : vector<1x1x1x4x8xbf16> to vector<4x8xbf16>
    %cst_67 = arith.constant dense<0.000000e+00> : vector<256x8xf32>
    %70 = tpu.matmul %67, %69, %cst_67 {dimension_numbers = #tpu.dot_dimension_numbers<[1], [0], [0], [1], [0, 0, 1, 1], [], []>} : vector<256x4xbf16>, vector<4x8xbf16>, vector<256x8xf32> -> vector<256x8xf32>
    %71 = arith.addf %62, %70 : vector<256x8xf32>
    %c1_i32_68 = arith.constant 1 : i32
    %72 = arith.addi %3, %c1_i32_68 : i32
    %c0_69 = arith.constant 0 : index
    %73 = arith.index_cast %72 : i32 to index
    %c2_70 = arith.constant 2 : index
    %c0_71 = arith.constant 0 : index
    %74 = vector.load %arg2[%c0_69, %73, %c2_70, %c0_71] : memref<1x18x18x4xbf16, #tpu.memory_space<vmem>>, vector<1x16x16x4xbf16>
    %75 = vector.shape_cast %74 : vector<1x16x16x4xbf16> to vector<16x16x4xbf16>
    %76 = vector.shape_cast %75 : vector<16x16x4xbf16> to vector<256x4xbf16>
    %c0_72 = arith.constant 0 : index
    %c1_73 = arith.constant 1 : index
    %c3_74 = arith.constant 3 : index
    %c0_75 = arith.constant 0 : index
    %c0_76 = arith.constant 0 : index
    %77 = vector.load %arg3[%c0_72, %c1_73, %c3_74, %c0_75, %c0_76] : memref<2x2x4x4x8xbf16, #tpu.memory_space<vmem>>, vector<1x1x1x4x8xbf16>
    %78 = vector.shape_cast %77 : vector<1x1x1x4x8xbf16> to vector<4x8xbf16>
    %cst_77 = arith.constant dense<0.000000e+00> : vector<256x8xf32>
    %79 = tpu.matmul %76, %78, %cst_77 {dimension_numbers = #tpu.dot_dimension_numbers<[1], [0], [0], [1], [0, 0, 1, 1], [], []>} : vector<256x4xbf16>, vector<4x8xbf16>, vector<256x8xf32> -> vector<256x8xf32>
    %80 = arith.addf %71, %79 : vector<256x8xf32>
    %cst_78 = arith.constant dense<0.000000e+00> : vector<8xf32>
    %81 = vector.multi_reduction <add>, %80, %cst_78 [0] : vector<256x8xf32> to vector<8xf32>
    %82 = vector.shape_cast %81 : vector<8xf32> to vector<1x8xf32>
    %83 = arith.addf %41, %82 : vector<1x8xf32>
    %84 = arith.mulf %80, %80 : vector<256x8xf32>
    %cst_79 = arith.constant dense<0.000000e+00> : vector<8xf32>
    %85 = vector.multi_reduction <add>, %84, %cst_79 [0] : vector<256x8xf32> to vector<8xf32>
    %86 = vector.shape_cast %85 : vector<8xf32> to vector<1x8xf32>
    %87 = arith.addf %45, %86 : vector<1x8xf32>
    %88 = tpu.concatenate %38, %80 in 1 : vector<256x8xf32>, vector<256x8xf32> -> vector<256x16xf32>
    %89 = arith.truncf %88 : vector<256x16xf32> to vector<256x16xbf16>
    %90 = vector.shape_cast %89 : vector<256x16xbf16> to vector<16x16x16xbf16>
    %c0_80 = arith.constant 0 : index
    %c0_81 = arith.constant 0 : index
    %c0_82 = arith.constant 0 : index
    %c0_83 = arith.constant 0 : index
    %c0_84 = arith.constant 0 : index
    %91 = vector.load %arg4[%c0_80, %c0_81, %c0_82, %c0_83, %c0_84] : memref<1x16x2x16x16xbf16, #tpu.memory_space<vmem>>, vector<1x16x1x16x16xbf16>
    %92 = vector.shape_cast %91 : vector<1x16x1x16x16xbf16> to vector<16x16x16xbf16>
    %93 = vector.shape_cast %90 : vector<16x16x16xbf16> to vector<1x16x1x16x16xbf16>
    tpu.vector_store %arg4[%c0_80, %c0_81, %c0_82, %c0_83, %c0_84], %93 {strides = array<i32>} : memref<1x16x2x16x16xbf16, #tpu.memory_space<vmem>>, vector<1x16x1x16x16xbf16>,
    %c16_i32_85 = arith.constant 16 : i32
    %94 = arith.muli %arg1, %c16_i32_85 : i32
    %c1_i32_86 = arith.constant 1 : i32
    %95 = arith.addi %c1_i32_86, %94 : i32
    %c0_i32_87 = arith.constant 0 : i32
    %96 = arith.addi %95, %c0_i32_87 : i32
    %c0_88 = arith.constant 0 : index
    %97 = arith.index_cast %96 : i32 to index
    %c0_89 = arith.constant 0 : index
    %c0_90 = arith.constant 0 : index
    %98 = vector.load %arg2[%c0_88, %97, %c0_89, %c0_90] : memref<1x18x18x4xbf16, #tpu.memory_space<vmem>>, vector<1x16x16x4xbf16>
    %99 = vector.shape_cast %98 : vector<1x16x16x4xbf16> to vector<16x16x4xbf16>
    %100 = vector.shape_cast %99 : vector<16x16x4xbf16> to vector<256x4xbf16>
    %c1_91 = arith.constant 1 : index
    %c0_92 = arith.constant 0 : index
    %c0_93 = arith.constant 0 : index
    %c0_94 = arith.constant 0 : index
    %c0_95 = arith.constant 0 : index
    %101 = vector.load %arg3[%c1_91, %c0_92, %c0_93, %c0_94, %c0_95] : memref<2x2x4x4x8xbf16, #tpu.memory_space<vmem>>, vector<1x1x1x4x8xbf16>
    %102 = vector.shape_cast %101 : vector<1x1x1x4x8xbf16> to vector<4x8xbf16>
    %cst_96 = arith.constant dense<0.000000e+00> : vector<256x8xf32>
    %103 = tpu.matmul %100, %102, %cst_96 {dimension_numbers = #tpu.dot_dimension_numbers<[1], [0], [0], [1], [0, 0, 1, 1], [], []>} : vector<256x4xbf16>, vector<4x8xbf16>, vector<256x8xf32> -> vector<256x8xf32>
    %c0_i32_97 = arith.constant 0 : i32
    %104 = arith.addi %95, %c0_i32_97 : i32
    %c0_98 = arith.constant 0 : index
    %105 = arith.index_cast %104 : i32 to index
    %c1_99 = arith.constant 1 : index
    %c0_100 = arith.constant 0 : index
    %106 = vector.load %arg2[%c0_98, %105, %c1_99, %c0_100] : memref<1x18x18x4xbf16, #tpu.memory_space<vmem>>, vector<1x16x16x4xbf16>
    %107 = vector.shape_cast %106 : vector<1x16x16x4xbf16> to vector<16x16x4xbf16>
    %108 = vector.shape_cast %107 : vector<16x16x4xbf16> to vector<256x4xbf16>
    %c1_101 = arith.constant 1 : index
    %c0_102 = arith.constant 0 : index
    %c1_103 = arith.constant 1 : index
    %c0_104 = arith.constant 0 : index
    %c0_105 = arith.constant 0 : index
    %109 = vector.load %arg3[%c1_101, %c0_102, %c1_103, %c0_104, %c0_105] : memref<2x2x4x4x8xbf16, #tpu.memory_space<vmem>>, vector<1x1x1x4x8xbf16>
    %110 = vector.shape_cast %109 : vector<1x1x1x4x8xbf16> to vector<4x8xbf16>
    %cst_106 = arith.constant dense<0.000000e+00> : vector<256x8xf32>
    %111 = tpu.matmul %108, %110, %cst_106 {dimension_numbers = #tpu.dot_dimension_numbers<[1], [0], [0], [1], [0, 0, 1, 1], [], []>} : vector<256x4xbf16>, vector<4x8xbf16>, vector<256x8xf32> -> vector<256x8xf32>
    %112 = arith.addf %103, %111 : vector<256x8xf32>
    %c1_i32_107 = arith.constant 1 : i32
    %113 = arith.addi %95, %c1_i32_107 : i32
    %c0_108 = arith.constant 0 : index
    %114 = arith.index_cast %113 : i32 to index
    %c0_109 = arith.constant 0 : index
    %c0_110 = arith.constant 0 : index
    %115 = vector.load %arg2[%c0_108, %114, %c0_109, %c0_110] : memref<1x18x18x4xbf16, #tpu.memory_space<vmem>>, vector<1x16x16x4xbf16>
    %116 = vector.shape_cast %115 : vector<1x16x16x4xbf16> to vector<16x16x4xbf16>
    %117 = vector.shape_cast %116 : vector<16x16x4xbf16> to vector<256x4xbf16>
    %c1_111 = arith.constant 1 : index
    %c0_112 = arith.constant 0 : index
    %c2_113 = arith.constant 2 : index
    %c0_114 = arith.constant 0 : index
    %c0_115 = arith.constant 0 : index
    %118 = vector.load %arg3[%c1_111, %c0_112, %c2_113, %c0_114, %c0_115] : memref<2x2x4x4x8xbf16, #tpu.memory_space<vmem>>, vector<1x1x1x4x8xbf16>
    %119 = vector.shape_cast %118 : vector<1x1x1x4x8xbf16> to vector<4x8xbf16>
    %cst_116 = arith.constant dense<0.000000e+00> : vector<256x8xf32>
    %120 = tpu.matmul %117, %119, %cst_116 {dimension_numbers = #tpu.dot_dimension_numbers<[1], [0], [0], [1], [0, 0, 1, 1], [], []>} : vector<256x4xbf16>, vector<4x8xbf16>, vector<256x8xf32> -> vector<256x8xf32>
    %121 = arith.addf %112, %120 : vector<256x8xf32>
    %c1_i32_117 = arith.constant 1 : i32
    %122 = arith.addi %95, %c1_i32_117 : i32
    %c0_118 = arith.constant 0 : index
    %123 = arith.index_cast %122 : i32 to index
    %c1_119 = arith.constant 1 : index
    %c0_120 = arith.constant 0 : index
    %124 = vector.load %arg2[%c0_118, %123, %c1_119, %c0_120] : memref<1x18x18x4xbf16, #tpu.memory_space<vmem>>, vector<1x16x16x4xbf16>
    %125 = vector.shape_cast %124 : vector<1x16x16x4xbf16> to vector<16x16x4xbf16>
    %126 = vector.shape_cast %125 : vector<16x16x4xbf16> to vector<256x4xbf16>
    %c1_121 = arith.constant 1 : index
    %c0_122 = arith.constant 0 : index
    %c3_123 = arith.constant 3 : index
    %c0_124 = arith.constant 0 : index
    %c0_125 = arith.constant 0 : index
    %127 = vector.load %arg3[%c1_121, %c0_122, %c3_123, %c0_124, %c0_125] : memref<2x2x4x4x8xbf16, #tpu.memory_space<vmem>>, vector<1x1x1x4x8xbf16>
    %128 = vector.shape_cast %127 : vector<1x1x1x4x8xbf16> to vector<4x8xbf16>
    %cst_126 = arith.constant dense<0.000000e+00> : vector<256x8xf32>
    %129 = tpu.matmul %126, %128, %cst_126 {dimension_numbers = #tpu.dot_dimension_numbers<[1], [0], [0], [1], [0, 0, 1, 1], [], []>} : vector<256x4xbf16>, vector<4x8xbf16>, vector<256x8xf32> -> vector<256x8xf32>
    %130 = arith.addf %121, %129 : vector<256x8xf32>
    %cst_127 = arith.constant dense<0.000000e+00> : vector<8xf32>
    %131 = vector.multi_reduction <add>, %130, %cst_127 [0] : vector<256x8xf32> to vector<8xf32>
    %132 = vector.shape_cast %131 : vector<8xf32> to vector<1x8xf32>
    %133 = arith.addf %83, %132 : vector<1x8xf32>
    %134 = arith.mulf %130, %130 : vector<256x8xf32>
    %cst_128 = arith.constant dense<0.000000e+00> : vector<8xf32>
    %135 = vector.multi_reduction <add>, %134, %cst_128 [0] : vector<256x8xf32> to vector<8xf32>
    %136 = vector.shape_cast %135 : vector<8xf32> to vector<1x8xf32>
    %137 = arith.addf %87, %136 : vector<1x8xf32>
    %c0_i32_129 = arith.constant 0 : i32
    %138 = arith.addi %95, %c0_i32_129 : i32
    %c0_130 = arith.constant 0 : index
    %139 = arith.index_cast %138 : i32 to index
    %c1_131 = arith.constant 1 : index
    %c0_132 = arith.constant 0 : index
    %140 = vector.load %arg2[%c0_130, %139, %c1_131, %c0_132] : memref<1x18x18x4xbf16, #tpu.memory_space<vmem>>, vector<1x16x16x4xbf16>
    %141 = vector.shape_cast %140 : vector<1x16x16x4xbf16> to vector<16x16x4xbf16>
    %142 = vector.shape_cast %141 : vector<16x16x4xbf16> to vector<256x4xbf16>
    %c1_133 = arith.constant 1 : index
    %c1_134 = arith.constant 1 : index
    %c0_135 = arith.constant 0 : index
    %c0_136 = arith.constant 0 : index
    %c0_137 = arith.constant 0 : index
    %143 = vector.load %arg3[%c1_133, %c1_134, %c0_135, %c0_136, %c0_137] : memref<2x2x4x4x8xbf16, #tpu.memory_space<vmem>>, vector<1x1x1x4x8xbf16>
    %144 = vector.shape_cast %143 : vector<1x1x1x4x8xbf16> to vector<4x8xbf16>
    %cst_138 = arith.constant dense<0.000000e+00> : vector<256x8xf32>
    %145 = tpu.matmul %142, %144, %cst_138 {dimension_numbers = #tpu.dot_dimension_numbers<[1], [0], [0], [1], [0, 0, 1, 1], [], []>} : vector<256x4xbf16>, vector<4x8xbf16>, vector<256x8xf32> -> vector<256x8xf32>
    %c0_i32_139 = arith.constant 0 : i32
    %146 = arith.addi %95, %c0_i32_139 : i32
    %c0_140 = arith.constant 0 : index
    %147 = arith.index_cast %146 : i32 to index
    %c2_141 = arith.constant 2 : index
    %c0_142 = arith.constant 0 : index
    %148 = vector.load %arg2[%c0_140, %147, %c2_141, %c0_142] : memref<1x18x18x4xbf16, #tpu.memory_space<vmem>>, vector<1x16x16x4xbf16>
    %149 = vector.shape_cast %148 : vector<1x16x16x4xbf16> to vector<16x16x4xbf16>
    %150 = vector.shape_cast %149 : vector<16x16x4xbf16> to vector<256x4xbf16>
    %c1_143 = arith.constant 1 : index
    %c1_144 = arith.constant 1 : index
    %c1_145 = arith.constant 1 : index
    %c0_146 = arith.constant 0 : index
    %c0_147 = arith.constant 0 : index
    %151 = vector.load %arg3[%c1_143, %c1_144, %c1_145, %c0_146, %c0_147] : memref<2x2x4x4x8xbf16, #tpu.memory_space<vmem>>, vector<1x1x1x4x8xbf16>
    %152 = vector.shape_cast %151 : vector<1x1x1x4x8xbf16> to vector<4x8xbf16>
    %cst_148 = arith.constant dense<0.000000e+00> : vector<256x8xf32>
    %153 = tpu.matmul %150, %152, %cst_148 {dimension_numbers = #tpu.dot_dimension_numbers<[1], [0], [0], [1], [0, 0, 1, 1], [], []>} : vector<256x4xbf16>, vector<4x8xbf16>, vector<256x8xf32> -> vector<256x8xf32>
    %154 = arith.addf %145, %153 : vector<256x8xf32>
    %c1_i32_149 = arith.constant 1 : i32
    %155 = arith.addi %95, %c1_i32_149 : i32
    %c0_150 = arith.constant 0 : index
    %156 = arith.index_cast %155 : i32 to index
    %c1_151 = arith.constant 1 : index
    %c0_152 = arith.constant 0 : index
    %157 = vector.load %arg2[%c0_150, %156, %c1_151, %c0_152] : memref<1x18x18x4xbf16, #tpu.memory_space<vmem>>, vector<1x16x16x4xbf16>
    %158 = vector.shape_cast %157 : vector<1x16x16x4xbf16> to vector<16x16x4xbf16>
    %159 = vector.shape_cast %158 : vector<16x16x4xbf16> to vector<256x4xbf16>
    %c1_153 = arith.constant 1 : index
    %c1_154 = arith.constant 1 : index
    %c2_155 = arith.constant 2 : index
    %c0_156 = arith.constant 0 : index
    %c0_157 = arith.constant 0 : index
    %160 = vector.load %arg3[%c1_153, %c1_154, %c2_155, %c0_156, %c0_157] : memref<2x2x4x4x8xbf16, #tpu.memory_space<vmem>>, vector<1x1x1x4x8xbf16>
    %161 = vector.shape_cast %160 : vector<1x1x1x4x8xbf16> to vector<4x8xbf16>
    %cst_158 = arith.constant dense<0.000000e+00> : vector<256x8xf32>
    %162 = tpu.matmul %159, %161, %cst_158 {dimension_numbers = #tpu.dot_dimension_numbers<[1], [0], [0], [1], [0, 0, 1, 1], [], []>} : vector<256x4xbf16>, vector<4x8xbf16>, vector<256x8xf32> -> vector<256x8xf32>
    %163 = arith.addf %154, %162 : vector<256x8xf32>
    %c1_i32_159 = arith.constant 1 : i32
    %164 = arith.addi %95, %c1_i32_159 : i32
    %c0_160 = arith.constant 0 : index
    %165 = arith.index_cast %164 : i32 to index
    %c2_161 = arith.constant 2 : index
    %c0_162 = arith.constant 0 : index
    %166 = vector.load %arg2[%c0_160, %165, %c2_161, %c0_162] : memref<1x18x18x4xbf16, #tpu.memory_space<vmem>>, vector<1x16x16x4xbf16>
    %167 = vector.shape_cast %166 : vector<1x16x16x4xbf16> to vector<16x16x4xbf16>
    %168 = vector.shape_cast %167 : vector<16x16x4xbf16> to vector<256x4xbf16>
    %c1_163 = arith.constant 1 : index
    %c1_164 = arith.constant 1 : index
    %c3_165 = arith.constant 3 : index
    %c0_166 = arith.constant 0 : index
    %c0_167 = arith.constant 0 : index
    %169 = vector.load %arg3[%c1_163, %c1_164, %c3_165, %c0_166, %c0_167] : memref<2x2x4x4x8xbf16, #tpu.memory_space<vmem>>, vector<1x1x1x4x8xbf16>
    %170 = vector.shape_cast %169 : vector<1x1x1x4x8xbf16> to vector<4x8xbf16>
    %cst_168 = arith.constant dense<0.000000e+00> : vector<256x8xf32>
    %171 = tpu.matmul %168, %170, %cst_168 {dimension_numbers = #tpu.dot_dimension_numbers<[1], [0], [0], [1], [0, 0, 1, 1], [], []>} : vector<256x4xbf16>, vector<4x8xbf16>, vector<256x8xf32> -> vector<256x8xf32>
    %172 = arith.addf %163, %171 : vector<256x8xf32>
    %cst_169 = arith.constant dense<0.000000e+00> : vector<8xf32>
    %173 = vector.multi_reduction <add>, %172, %cst_169 [0] : vector<256x8xf32> to vector<8xf32>
    %174 = vector.shape_cast %173 : vector<8xf32> to vector<1x8xf32>
    %175 = arith.addf %133, %174 : vector<1x8xf32>
    %176 = arith.mulf %172, %172 : vector<256x8xf32>
    %cst_170 = arith.constant dense<0.000000e+00> : vector<8xf32>
    %177 = vector.multi_reduction <add>, %176, %cst_170 [0] : vector<256x8xf32> to vector<8xf32>
    %178 = vector.shape_cast %177 : vector<8xf32> to vector<1x8xf32>
    %179 = arith.addf %137, %178 : vector<1x8xf32>
    %180 = tpu.concatenate %130, %172 in 1 : vector<256x8xf32>, vector<256x8xf32> -> vector<256x16xf32>
    %181 = arith.truncf %180 : vector<256x16xf32> to vector<256x16xbf16>
    %182 = vector.shape_cast %181 : vector<256x16xbf16> to vector<16x16x16xbf16>
    %c0_171 = arith.constant 0 : index
    %c0_172 = arith.constant 0 : index
    %c1_173 = arith.constant 1 : index
    %c0_174 = arith.constant 0 : index
    %c0_175 = arith.constant 0 : index
    %183 = vector.load %arg4[%c0_171, %c0_172, %c1_173, %c0_174, %c0_175] : memref<1x16x2x16x16xbf16, #tpu.memory_space<vmem>>, vector<1x16x1x16x16xbf16>
    %184 = vector.shape_cast %183 : vector<1x16x1x16x16xbf16> to vector<16x16x16xbf16>
    %185 = vector.shape_cast %182 : vector<16x16x16xbf16> to vector<1x16x1x16x16xbf16>
    tpu.vector_store %arg4[%c0_171, %c0_172, %c1_173, %c0_174, %c0_175], %185 {strides = array<i32>} : memref<1x16x2x16x16xbf16, #tpu.memory_space<vmem>>, vector<1x16x1x16x16xbf16>,
    %186 = tpu.concatenate %175, %179 in 0 : vector<1x8xf32>, vector<1x8xf32> -> vector<2x8xf32>
    %187 = vector.shape_cast %186 : vector<2x8xf32> to vector<1x1x2x8xf32>
    %c0_176 = arith.constant 0 : index
    %c0_177 = arith.constant 0 : index
    %c0_178 = arith.constant 0 : index
    %c0_179 = arith.constant 0 : index
    %188 = vector.load %arg5[%c0_176, %c0_177, %c0_178, %c0_179] : memref<1x1x2x8xf32, #tpu.memory_space<vmem>>, vector<1x1x2x8xf32>
    tpu.vector_store %arg5[%c0_176, %c0_177, %c0_178, %c0_179], %187 {strides = array<i32>} : memref<1x1x2x8xf32, #tpu.memory_space<vmem>>, vector<1x1x2x8xf32>,
    return
  }
  func.func @transform_0(%arg0: i32, %arg1: i32) -> (i32, i32, i32, i32) {
    %c0_i32 = arith.constant 0 : i32
    %c0_i32_0 = arith.constant 0 : i32
    %c0_i32_1 = arith.constant 0 : i32
    %c0_i32_2 = arith.constant 0 : i32
    return %arg0, %c0_i32, %c0_i32_0, %c0_i32_1 : i32, i32, i32, i32
  }
  func.func @transform_1(%arg0: i32, %arg1: i32) -> (i32, i32, i32, i32, i32) {
    %c0_i32 = arith.constant 0 : i32
    %c0_i32_0 = arith.constant 0 : i32
    %c0_i32_1 = arith.constant 0 : i32
    %c0_i32_2 = arith.constant 0 : i32
    %c0_i32_3 = arith.constant 0 : i32
    %c0_i32_4 = arith.constant 0 : i32
    return %c0_i32, %c0_i32_0, %c0_i32_1, %c0_i32_2, %c0_i32_3 : i32, i32, i32, i32, i32
  }
  func.func @transform_2(%arg0: i32, %arg1: i32) -> (i32, i32, i32, i32, i32) {
    %c0_i32 = arith.constant 0 : i32
    %c0_i32_0 = arith.constant 0 : i32
    %c0_i32_1 = arith.constant 0 : i32
    %c0_i32_2 = arith.constant 0 : i32
    return %arg0, %arg1, %c0_i32, %c0_i32_0, %c0_i32_1 : i32, i32, i32, i32, i32
  }
  func.func @transform_3(%arg0: i32, %arg1: i32) -> (i32, i32, i32, i32) {
    %c0_i32 = arith.constant 0 : i32
    %c0_i32_0 = arith.constant 0 : i32
    %c0_i32_1 = arith.constant 0 : i32
    return %arg0, %arg1, %c0_i32, %c0_i32_0 : i32, i32, i32, i32
  }
}

module attributes {stable_mosaic.version = 11 : i64} {
  func.func @bn_apply_kernel(%arg0: i32, %arg1: i32, %arg2: i32, %arg3: memref<1x32x32x8xbf16, #tpu.memory_space<vmem>>, %arg4: memref<2x8xf32, #tpu.memory_space<vmem>>, %arg5: memref<1x8x1024xf32, #tpu.memory_space<vmem>>) attributes {dimension_semantics = [#tpu.dimension_semantics<parallel>, #tpu.dimension_semantics<parallel>, #tpu.dimension_semantics<parallel>], iteration_bounds = array<i64: 2, 1, 1>, scalar_prefetch = 0 : i64, scratch_operands = 0 : i64, tpu.core_type = #tpu.core_type<tc>, window_params = [{transform_indices = @transform_0, window_bounds = array<i64: 1, 32, 32, 8>}, {transform_indices = @transform_1, window_bounds = array<i64: 2, 8>}, {transform_indices = @transform_2, window_bounds = array<i64: 1, 8, 1024>}]} {
    %c0 = arith.constant 0 : index
    %c0_0 = arith.constant 0 : index
    %c0_1 = arith.constant 0 : index
    %c0_2 = arith.constant 0 : index
    %0 = vector.load %arg3[%c0, %c0_0, %c0_1, %c0_2] : memref<1x32x32x8xbf16, #tpu.memory_space<vmem>>, vector<1x32x32x8xbf16>
    %1 = vector.shape_cast %0 : vector<1x32x32x8xbf16> to vector<32x32x8xbf16>
    %2 = arith.extf %1 : vector<32x32x8xbf16> to vector<32x32x8xf32>
    %c0_3 = arith.constant 0 : index
    %c0_4 = arith.constant 0 : index
    %3 = vector.load %arg4[%c0_3, %c0_4] : memref<2x8xf32, #tpu.memory_space<vmem>>, vector<1x8xf32>
    %4 = vector.shape_cast %3 : vector<1x8xf32> to vector<1x1x8xf32>
    %5 = vector.broadcast %4 : vector<1x1x8xf32> to vector<32x32x8xf32>
    %6 = arith.mulf %2, %5 : vector<32x32x8xf32>
    %c1 = arith.constant 1 : index
    %c0_5 = arith.constant 0 : index
    %7 = vector.load %arg4[%c1, %c0_5] : memref<2x8xf32, #tpu.memory_space<vmem>>, vector<1x8xf32>
    %8 = vector.shape_cast %7 : vector<1x8xf32> to vector<1x1x8xf32>
    %9 = vector.broadcast %8 : vector<1x1x8xf32> to vector<32x32x8xf32>
    %10 = arith.addf %6, %9 : vector<32x32x8xf32>
    %cst = arith.constant 0.000000e+00 : f32
    %11 = vector.broadcast %cst : f32 to vector<32x32x8xf32>
    %12 = arith.maximumf %10, %11 : vector<32x32x8xf32>
    %13 = vector.shape_cast %12 : vector<32x32x8xf32> to vector<1024x8xf32>
    %14 = tpu.transpose %13, [1, 0] : vector<1024x8xf32> -> vector<8x1024xf32>
    %15 = vector.shape_cast %14 : vector<8x1024xf32> to vector<1x8x1024xf32>
    %c0_6 = arith.constant 0 : index
    %c0_7 = arith.constant 0 : index
    %c0_8 = arith.constant 0 : index
    %16 = vector.load %arg5[%c0_6, %c0_7, %c0_8] : memref<1x8x1024xf32, #tpu.memory_space<vmem>>, vector<1x8x1024xf32>
    tpu.vector_store %arg5[%c0_6, %c0_7, %c0_8], %15 {strides = array<i32>} : memref<1x8x1024xf32, #tpu.memory_space<vmem>>, vector<1x8x1024xf32>,
    return
  }
  func.func @transform_0(%arg0: i32, %arg1: i32, %arg2: i32) -> (i32, i32, i32, i32) {
    %c0_i32 = arith.constant 0 : i32
    %c0_i32_0 = arith.constant 0 : i32
    return %arg0, %arg1, %c0_i32, %arg2 : i32, i32, i32, i32
  }
  func.func @transform_1(%arg0: i32, %arg1: i32, %arg2: i32) -> (i32, i32) {
    %c0_i32 = arith.constant 0 : i32
    %c0_i32_0 = arith.constant 0 : i32
    return %c0_i32, %arg2 : i32, i32
  }
  func.func @transform_2(%arg0: i32, %arg1: i32, %arg2: i32) -> (i32, i32, i32) {
    %c0_i32 = arith.constant 0 : i32
    return %arg0, %arg2, %arg1 : i32, i32, i32
  }
}

</mosaic_0001>

<bundles_post_ra>
// kernel: upsample_block.3
= control target key start
LH: loop header
LB: loop body
LE: loop exit
PB: predicated region body
PF: predicated region fallthrough
CT: control target
= control target key end

     0   :  { %s1666_s9 = smov 0   ;;  %s1668_s10 = smov 0   ;;  %s2055_s0 = inlined_call_operand.vmem [shape: bf16[2,32,32,8], index: 0, kind: input, shape index: {}]   ;;  %s2056_s1 = inlined_call_operand.vmem [shape: f32[2,8], index: 1, kind: input, shape index: {}]   ;;  %s2057_s2 = inlined_call_operand.vmem [shape: f32[2,8,1024], index: 2, kind: output, shape index: {}]  }
   0x1   :  { %s1670_s11 = smov 0  }
   0x2 LB: > { %s31_s12 = sadd.s32 1, %s1645_s10  ;;  %p1271_p0 = scmp.ge.s32.totalorder %s1649_s11, 1  ;;  %s1649_s11 = sphi %s1670_s11, %s12_s11   ;;  %s1645_s10 = sphi %s1668_s10, %s2059_s10   ;;  %s1641_s9 = sphi %s1666_s9, %s2058_s9  }
   0x3   : > { %p33_p1 = scmp.ge.s32.totalorder %s31_s12, 2  ;;  %p157_p2 = scmp.lt.s32.totalorder %s1649_s11, 3 }
   0x5   : > { %s2061_s12 = smov (%p33_p1, %s31_s12), 0  ;;  %p158_p3 = pnand %p1271_p0, %p157_p2 }
   0x6   : > { %p200_p4 = scmp.lt.s32.totalorder (!%p158_p3), %s1641_s9, 1 }
   0x7   : > { %161 = sbr.rel (%p158_p3) target bundleno = 447 (0x1bf), region = 28 }
   0xc   : > { %s2063_s9 = smov (!%p200_p4, %s1641_s9), 1  ;;  %v1695_v0 = vld [vmem:[%s2056_s1] ss:$0 sm:$0xff]  ;;  %v1702_v4 = vld [vmem:[%s2056_s1 + $0x1] ss:$0 sm:$0xff] }
   0xd   : > { %s1278_s13 = sshll.u32 %s2063_s9, 9  ;;  %s1279_s25 = sshll.u32 %s2063_s9, 6 }
   0xe   : > { %s1690_s16 = scalar_lea.vmem %s2055_s0, %s1278_s13  ;;  %s2017_s28 = scalar_lea.vmem %s2057_s2, %s1279_s25 }
   0xf   : > { %v1543_v1 = vld [vmem:[%s1690_s16 + $0x40] sm:$0xff]   ;;  %v1544_v14 = vld [vmem:[%s1690_s16 + $0x48] sm:$0xff]   ;;  %v1545_v34 = vld [vmem:[%s1690_s16 + $0x50] sm:$0xff]  }
  0x10   : > { %v1281_v2 = vld [vmem:[%s1690_s16] sm:$0xff]   ;;  %v1314_v3 = vunpack.c.l.bf16 %v1543_v1  ;;  %v1315_v6 = vunpack.c.h.bf16 %v1543_v1  ;;  %v1536_v15 = vld [vmem:[%s1690_s16 + $0x8] sm:$0xff]   ;;  %v1318_v20 = vunpack.c.l.bf16 %v1544_v14  ;;  %v1319_v28 = vunpack.c.h.bf16 %v1544_v14  ;;  %v1537_v35 = vld [vmem:[%s1690_s16 + $0x10] sm:$0xff]  }
  0x11   : > { %v1282_v5 = vunpack.c.l.bf16 %v1281_v2  ;;  %v1283_v7 = vunpack.c.h.bf16 %v1281_v2  ;;  %v1286_v21 = vunpack.c.l.bf16 %v1536_v15  ;;  %v1287_v29 = vunpack.c.h.bf16 %v1536_v15  ;;  %v1546_v52 = vld [vmem:[%s1690_s16 + $0x58] sm:$0xff]  }
  0x12   : > { %v505_v8 = vmul.f32 %v1695_v0, %v1314_v3  ;;  %v506_v12 = vmul.f32 %v1695_v0, %v1315_v6  ;;  %v507_v24 = vmul.f32 %v1695_v0, %v1318_v20  ;;  %v508_v32 = vmul.f32 %v1695_v0, %v1319_v28  ;;  %v1538_v53 = vld [vmem:[%s1690_s16 + $0x18] sm:$0xff]  }
  0x13   : > { %v489_v9 = vmul.f32 %v1695_v0, %v1282_v5  ;;  %v490_v13 = vmul.f32 %v1695_v0, %v1283_v7  ;;  %v491_v25 = vmul.f32 %v1695_v0, %v1286_v21  ;;  %v492_v33 = vmul.f32 %v1695_v0, %v1287_v29 }
  0x14   : > { %v635_v10 = vadd.f32 %v1702_v4, %v505_v8  ;;  %v636_v18 = vadd.f32 %v1702_v4, %v506_v12  ;;  %v637_v26 = vadd.f32 %v1702_v4, %v507_v24  ;;  %v638_v36 = vadd.f32 %v1702_v4, %v508_v32  ;;  %v1547_v8 = vld [vmem:[%s1690_s16 + $0x60] sm:$0xff]  }
  0x15   : > { %v619_v11 = vadd.f32 %v1702_v4, %v489_v9  ;;  %v620_v19 = vadd.f32 %v1702_v4, %v490_v13  ;;  %v621_v27 = vadd.f32 %v1702_v4, %v491_v25  ;;  %v622_v37 = vadd.f32 %v1702_v4, %v492_v33  ;;  %v1539_v9 = vld [vmem:[%s1690_s16 + $0x20] sm:$0xff]  }
  0x16   : > { %v763_v16 = vmax.f32 %v635_v10, 0.0  ;;  %v764_v22 = vmax.f32 %v636_v18, 0.0  ;;  %v765_v30 = vmax.f32 %v637_v26, 0.0  ;;  %v1322_v38 = vunpack.c.l.bf16 %v1545_v34  ;;  %v1548_v26 = vld [vmem:[%s1690_s16 + $0x68] sm:$0xff]  }
  0x17   : > { %v747_v17 = vmax.f32 %v619_v11, 0.0  ;;  %v748_v23 = vmax.f32 %v620_v19, 0.0  ;;  %v749_v31 = vmax.f32 %v621_v27, 0.0  ;;  %v1290_v39 = vunpack.c.l.bf16 %v1537_v35  ;;  %v1540_v27 = vld [vmem:[%s1690_s16 + $0x28] sm:$0xff]  }
  0x18   : > { %907 = vxpose.xlu1.b32.start [1/16] (narrow) %v763_v16, 8  ;;  %v766_v40 = vmax.f32 %v638_v36, 0.0  ;;  %v750_v41 = vmax.f32 %v622_v37, 0.0  ;;  %v509_v42 = vmul.f32 %v1695_v0, %v1322_v38  ;;  %v1323_v46 = vunpack.c.h.bf16 %v1545_v34 }
  0x19   : > { %875 = vxpose.xlu0.b32.start [1/16] (narrow) %v747_v17, 8  ;;  %v493_v43 = vmul.f32 %v1695_v0, %v1290_v39  ;;  %v1291_v47 = vunpack.c.h.bf16 %v1537_v35  ;;  %v1326_v56 = vunpack.c.l.bf16 %v1546_v52  ;;  %v1294_v57 = vunpack.c.l.bf16 %v1538_v53 }
  0x1a   : > { %v639_v44 = vadd.f32 %v1702_v4, %v509_v42  ;;  %v510_v50 = vmul.f32 %v1695_v0, %v1323_v46  ;;  %v1327_v1 = vunpack.c.h.bf16 %v1546_v52  ;;  %v1295_v2 = vunpack.c.h.bf16 %v1538_v53 }
  0x1b   : > { %v623_v45 = vadd.f32 %v1702_v4, %v493_v43  ;;  %v494_v51 = vmul.f32 %v1695_v0, %v1291_v47  ;;  %v511_v60 = vmul.f32 %v1695_v0, %v1326_v56  ;;  %v495_v61 = vmul.f32 %v1695_v0, %v1294_v57 }
  0x1c   : > { %v767_v48 = vmax.f32 %v639_v44, 0.0  ;;  %v640_v54 = vadd.f32 %v1702_v4, %v510_v50  ;;  %v512_v6 = vmul.f32 %v1695_v0, %v1327_v1  ;;  %v496_v7 = vmul.f32 %v1695_v0, %v1295_v2  ;;  %v1549_v44 = vld [vmem:[%s1690_s16 + $0x70] sm:$0xff]  }
  0x1d   : > { %v751_v49 = vmax.f32 %v623_v45, 0.0  ;;  %v624_v55 = vadd.f32 %v1702_v4, %v494_v51  ;;  %v641_v62 = vadd.f32 %v1702_v4, %v511_v60  ;;  %v625_v63 = vadd.f32 %v1702_v4, %v495_v61  ;;  %v1541_v45 = vld [vmem:[%s1690_s16 + $0x30] sm:$0xff]  }
  0x1e   : > { %v768_v58 = vmax.f32 %v640_v54, 0.0  ;;  %v642_v10 = vadd.f32 %v1702_v4, %v512_v6  ;;  %v626_v11 = vadd.f32 %v1702_v4, %v496_v7  ;;  %v1330_v12 = vunpack.c.l.bf16 %v1547_v8  ;;  %v1551_v6 = vld [vmem:[%s1690_s16 + $0x80] sm:$0xff]  }
  0x1f   : > { %v752_v59 = vmax.f32 %v624_v55, 0.0  ;;  %v769_v3 = vmax.f32 %v641_v62, 0.0  ;;  %v753_v5 = vmax.f32 %v625_v63, 0.0  ;;  %v1298_v13 = vunpack.c.l.bf16 %v1539_v9  ;;  %v1550_v62 = vld [vmem:[%s1690_s16 + $0x78] sm:$0xff]  }
  0x20   : > { %908 = vxpose.xlu1.b32.cont [2/16] (narrow) %v764_v22, 8  ;;  %v770_v14 = vmax.f32 %v642_v10, 0.0  ;;  %v754_v15 = vmax.f32 %v626_v11, 0.0  ;;  %v513_v16 = vmul.f32 %v1695_v0, %v1330_v12  ;;  %v1331_v20 = vunpack.c.h.bf16 %v1547_v8  ;;  %v1542_v63 = vld [vmem:[%s1690_s16 + $0x38] sm:$0xff]  }
  0x21   : > { %876 = vxpose.xlu0.b32.cont [2/16] (narrow) %v748_v23, 8  ;;  %v497_v17 = vmul.f32 %v1695_v0, %v1298_v13  ;;  %v1299_v21 = vunpack.c.h.bf16 %v1539_v9  ;;  %v1335_v38 = vunpack.c.h.bf16 %v1548_v26  ;;  %v1303_v39 = vunpack.c.h.bf16 %v1540_v27 }
  0x22   : > { %v643_v18 = vadd.f32 %v1702_v4, %v513_v16  ;;  %v514_v24 = vmul.f32 %v1695_v0, %v1331_v20  ;;  %v1339_v56 = vunpack.c.h.bf16 %v1549_v44  ;;  %v1307_v57 = vunpack.c.h.bf16 %v1541_v45 }
  0x23   : > { %v627_v19 = vadd.f32 %v1702_v4, %v497_v17  ;;  %v498_v25 = vmul.f32 %v1695_v0, %v1299_v21  ;;  %v516_v42 = vmul.f32 %v1695_v0, %v1335_v38  ;;  %v500_v43 = vmul.f32 %v1695_v0, %v1303_v39 }
  0x24   : > { %v771_v22 = vmax.f32 %v643_v18, 0.0  ;;  %v644_v28 = vadd.f32 %v1702_v4, %v514_v24  ;;  %v518_v60 = vmul.f32 %v1695_v0, %v1339_v56  ;;  %v502_v61 = vmul.f32 %v1695_v0, %v1307_v57  ;;  %v1567_v24 = vld [vmem:[%s1690_s16 + $0x100] sm:$0xff]  }
  0x25   : > { %v755_v23 = vmax.f32 %v627_v19, 0.0  ;;  %v628_v29 = vadd.f32 %v1702_v4, %v498_v25  ;;  %v646_v46 = vadd.f32 %v1702_v4, %v516_v42  ;;  %v630_v47 = vadd.f32 %v1702_v4, %v500_v43  ;;  %v1559_v25 = vld [vmem:[%s1690_s16 + $0xc0] sm:$0xff]  }
  0x26   : > { %v772_v32 = vmax.f32 %v644_v28, 0.0  ;;  %v648_v1 = vadd.f32 %v1702_v4, %v518_v60  ;;  %v632_v2 = vadd.f32 %v1702_v4, %v502_v61  ;;  %v1346_v7 = vunpack.c.l.bf16 %v1551_v6  ;;  %v1553_v60 = vld [vmem:[%s1690_s16 + $0x90] sm:$0xff]  }
  0x27   : > { %v756_v33 = vmax.f32 %v628_v29, 0.0  ;;  %v774_v50 = vmax.f32 %v646_v46, 0.0  ;;  %v758_v51 = vmax.f32 %v630_v47, 0.0  ;;  %v1343_v16 = vunpack.c.h.bf16 %v1550_v62 }
  0x28   : > { %909 = vxpose.xlu1.b32.cont [3/16] (narrow) %v765_v30, 8  ;;  %v1334_v30 = vunpack.c.l.bf16 %v1548_v26  ;;  %v776_v8 = vmax.f32 %v648_v1, 0.0  ;;  %v760_v9 = vmax.f32 %v632_v2, 0.0  ;;  %v521_v12 = vmul.f32 %v1695_v0, %v1346_v7 }
  0x29   : > { %877 = vxpose.xlu0.b32.cont [3/16] (narrow) %v749_v31, 8  ;;  %v1302_v31 = vunpack.c.l.bf16 %v1540_v27  ;;  %v1311_v17 = vunpack.c.h.bf16 %v1542_v63  ;;  %v1347_v19 = vunpack.c.h.bf16 %v1551_v6  ;;  %v1379_v43 = vunpack.c.h.bf16 %v1559_v25 }
  0x2a   : > { %v515_v34 = vmul.f32 %v1695_v0, %v1334_v30  ;;  %v651_v13 = vadd.f32 %v1702_v4, %v521_v12  ;;  %v1410_v30 = vunpack.c.l.bf16 %v1567_v24  ;;  %v1354_v61 = vunpack.c.l.bf16 %v1553_v60 }
  0x2b   : > { %v499_v35 = vmul.f32 %v1695_v0, %v1302_v31  ;;  %v522_v26 = vmul.f32 %v1695_v0, %v1347_v19  ;;  %v1378_v31 = vunpack.c.l.bf16 %v1559_v25  ;;  %v1554_v25 = vld [vmem:[%s1690_s16 + $0x98] sm:$0xff]  }
  0x2c   : > { %v645_v36 = vadd.f32 %v1702_v4, %v515_v34  ;;  %v779_v18 = vmax.f32 %v651_v13, 0.0 }
  0x2d   : > { %v629_v37 = vadd.f32 %v1702_v4, %v499_v35  ;;  %v652_v27 = vadd.f32 %v1702_v4, %v522_v26  ;;  %v537_v38 = vmul.f32 %v1695_v0, %v1378_v31  ;;  %v1358_v26 = vunpack.c.l.bf16 %v1554_v25 }
  0x2e   : > { %939 = vxpose.xlu2.b32.start [1/16] (narrow) %v779_v18, 8 }
  0x2f   : > { %v527_v31 = vmul.f32 %v1695_v0, %v1358_v26 }
  0x30   : > { %910 = vxpose.xlu1.b32.cont [4/16] (narrow) %v766_v40, 8  ;;  %v773_v40 = vmax.f32 %v645_v36, 0.0 }
  0x31   : > { %878 = vxpose.xlu0.b32.cont [4/16] (narrow) %v750_v41, 8  ;;  %v757_v41 = vmax.f32 %v629_v37, 0.0  ;;  %v553_v37 = vmul.f32 %v1695_v0, %v1410_v30 }
  0x33   : > { %v683_v42 = vadd.f32 %v1702_v4, %v553_v37 }
  0x35   : > { %v811_v47 = vmax.f32 %v683_v42, 0.0 }
  0x38   : > { %911 = vxpose.xlu1.b32.cont [5/16] (narrow) %v767_v48, 8  ;;  %v1338_v48 = vunpack.c.l.bf16 %v1549_v44  ;;  %v667_v44 = vadd.f32 %v1702_v4, %v537_v38  ;;  %v1359_v38 = vunpack.c.h.bf16 %v1554_v25 }
  0x39   : > { %879 = vxpose.xlu0.b32.cont [5/16] (narrow) %v751_v49, 8  ;;  %v1306_v49 = vunpack.c.l.bf16 %v1541_v45 }
  0x3a   : > { %v517_v52 = vmul.f32 %v1695_v0, %v1338_v48  ;;  %v795_v48 = vmax.f32 %v667_v44, 0.0  ;;  %v1562_v44 = vld [vmem:[%s1690_s16 + $0xd8] sm:$0xff]  }
  0x3b   : > { %v501_v53 = vmul.f32 %v1695_v0, %v1306_v49 }
  0x3c   : > { %v647_v54 = vadd.f32 %v1702_v4, %v517_v52  ;;  %v1560_v52 = vld [vmem:[%s1690_s16 + $0xc8] sm:$0xff]  }
  0x3d   : > { %v631_v55 = vadd.f32 %v1702_v4, %v501_v53 }
  0x40   : > { %912 = vxpose.xlu1.b32.cont [6/16] (narrow) %v768_v58, 8  ;;  %v775_v58 = vmax.f32 %v647_v54, 0.0 }
  0x41   : > { %880 = vxpose.xlu0.b32.cont [6/16] (narrow) %v752_v59, 8  ;;  %v759_v59 = vmax.f32 %v631_v55, 0.0 }
  0x48   : > { %913 = vxpose.xlu1.b32.cont [7/16] (narrow) %v769_v3, 8  ;;  %v1342_v3 = vunpack.c.l.bf16 %v1550_v62 }
  0x49   : > { %881 = vxpose.xlu0.b32.cont [7/16] (narrow) %v753_v5, 8  ;;  %v1310_v5 = vunpack.c.l.bf16 %v1542_v63 }
  0x4a   : > { %v519_v10 = vmul.f32 %v1695_v0, %v1342_v3  ;;  %v525_v3 = vmul.f32 %v1695_v0, %v1354_v61 }
  0x4b   : > { %v503_v11 = vmul.f32 %v1695_v0, %v1310_v5 }
  0x4c   : > { %v655_v5 = vadd.f32 %v1702_v4, %v525_v3 }
  0x50   : > { %914 = vxpose.xlu1.b32.cont [8/16] (narrow) %v770_v14, 8  ;;  %v649_v14 = vadd.f32 %v1702_v4, %v519_v10  ;;  %v783_v10 = vmax.f32 %v655_v5, 0.0 }
  0x51   : > { %882 = vxpose.xlu0.b32.cont [8/16] (narrow) %v754_v15, 8  ;;  %v633_v15 = vadd.f32 %v1702_v4, %v503_v11  ;;  %v1355_v11 = vunpack.c.h.bf16 %v1553_v60 }
  0x52   : > { %v777_v20 = vmax.f32 %v649_v14, 0.0 }
  0x53   : > { %v761_v21 = vmax.f32 %v633_v15, 0.0  ;;  %v526_v18 = vmul.f32 %v1695_v0, %v1355_v11 }
  0x55   : > { %v656_v19 = vadd.f32 %v1702_v4, %v526_v18 }
  0x58   : > { %915 = vxpose.xlu1.b32.cont [9/16] (narrow) %v771_v22, 8  ;;  %v520_v22 = vmul.f32 %v1695_v0, %v1343_v16  ;;  %v1569_v16 = vld [vmem:[%s1690_s16 + $0x110] sm:$0xff]  }
  0x59   : > { %883 = vxpose.xlu0.b32.cont [9/16] (narrow) %v755_v23, 8  ;;  %v504_v23 = vmul.f32 %v1695_v0, %v1311_v17  ;;  %v1561_v17 = vld [vmem:[%s1690_s16 + $0xd0] sm:$0xff]  }
  0x5a   : > { %v650_v28 = vadd.f32 %v1702_v4, %v520_v22  ;;  %v1418_v22 = vunpack.c.l.bf16 %v1569_v16 }
  0x5b   : > { %v634_v29 = vadd.f32 %v1702_v4, %v504_v23  ;;  %v1386_v23 = vunpack.c.l.bf16 %v1561_v17 }
  0x5c   : > { %v778_v35 = vmax.f32 %v650_v28, 0.0 }
  0x5d   : > { %v762_v36 = vmax.f32 %v634_v29, 0.0  ;;  %v557_v29 = vmul.f32 %v1695_v0, %v1418_v22  ;;  %v541_v30 = vmul.f32 %v1695_v0, %v1386_v23 }
  0x60   : > { %916 = vxpose.xlu1.b32.cont [10/16] (narrow) %v772_v32, 8  ;;  %v780_v32 = vmax.f32 %v652_v27, 0.0 }
  0x61   : > { %884 = vxpose.xlu0.b32.cont [10/16] (narrow) %v756_v33, 8  ;;  %v1552_v33 = vld [vmem:[%s1690_s16 + $0x88] sm:$0xff]  }
  0x62   : > { %940 = vxpose.xlu2.b32.cont [2/16] (narrow) %v780_v32, 8  ;;  %v1350_v34 = vunpack.c.l.bf16 %v1552_v33  ;;  %v1351_v46 = vunpack.c.h.bf16 %v1552_v33  ;;  %v657_v32 = vadd.f32 %v1702_v4, %v527_v31  ;;  %v687_v33 = vadd.f32 %v1702_v4, %v557_v29 }
  0x64   : > { %v523_v39 = vmul.f32 %v1695_v0, %v1350_v34  ;;  %v524_v53 = vmul.f32 %v1695_v0, %v1351_v46  ;;  %v671_v34 = vadd.f32 %v1702_v4, %v541_v30  ;;  %v785_v37 = vmax.f32 %v657_v32, 0.0 }
  0x66   : > { %v654_v54 = vadd.f32 %v1702_v4, %v524_v53 }
  0x68   : > { %917 = vxpose.xlu1.b32.cont [11/16] (narrow) %v773_v40, 8  ;;  %v653_v40 = vadd.f32 %v1702_v4, %v523_v39  ;;  %v815_v39 = vmax.f32 %v687_v33, 0.0 }
  0x69   : > { %885 = vxpose.xlu0.b32.cont [11/16] (narrow) %v757_v41, 8  ;;  %v1411_v41 = vunpack.c.h.bf16 %v1567_v24  ;;  %v784_v24 = vmax.f32 %v656_v19, 0.0 }
  0x6a   : > { %v781_v45 = vmax.f32 %v653_v40, 0.0  ;;  %v799_v40 = vmax.f32 %v671_v34, 0.0 }
  0x6b   : > { %v554_v49 = vmul.f32 %v1695_v0, %v1411_v41 }
  0x6c   : > { %941 = vxpose.xlu2.b32.cont [3/16] (narrow) %v781_v45, 8  ;;  %v528_v45 = vmul.f32 %v1695_v0, %v1359_v38 }
  0x6d   : > { %v684_v55 = vadd.f32 %v1702_v4, %v554_v49 }
  0x6e   : > { %v658_v46 = vadd.f32 %v1702_v4, %v528_v45 }
  0x6f   : > { %v812_v62 = vmax.f32 %v684_v55, 0.0 }
  0x70   : > { %918 = vxpose.xlu1.b32.cont [12/16] (narrow) %v774_v50, 8  ;;  %v538_v50 = vmul.f32 %v1695_v0, %v1379_v43  ;;  %v1570_v43 = vld [vmem:[%s1690_s16 + $0x118] sm:$0xff]  }
  0x71   : > { %886 = vxpose.xlu0.b32.cont [12/16] (narrow) %v758_v51, 8  ;;  %v1568_v51 = vld [vmem:[%s1690_s16 + $0x108] sm:$0xff]   ;;  %v1422_v49 = vunpack.c.l.bf16 %v1570_v43 }
  0x72   : > { %v668_v56 = vadd.f32 %v1702_v4, %v538_v50  ;;  %v1414_v57 = vunpack.c.l.bf16 %v1568_v51  ;;  %v1390_v50 = vunpack.c.l.bf16 %v1562_v44 }
  0x74   : > { %v796_v63 = vmax.f32 %v668_v56, 0.0  ;;  %v555_v1 = vmul.f32 %v1695_v0, %v1414_v57  ;;  %v559_v56 = vmul.f32 %v1695_v0, %v1422_v49  ;;  %v543_v57 = vmul.f32 %v1695_v0, %v1390_v50 }
  0x76   : > { %v685_v6 = vadd.f32 %v1702_v4, %v555_v1  ;;  %v689_v60 = vadd.f32 %v1702_v4, %v559_v56  ;;  %v673_v61 = vadd.f32 %v1702_v4, %v543_v57 }
  0x78   : > { %919 = vxpose.xlu1.b32.cont [13/16] (narrow) %v775_v58, 8  ;;  %v1382_v58 = vunpack.c.l.bf16 %v1560_v52  ;;  %v813_v12 = vmax.f32 %v685_v6, 0.0  ;;  %v817_v3 = vmax.f32 %v689_v60, 0.0  ;;  %v801_v5 = vmax.f32 %v673_v61, 0.0 }
  0x79   : > { %887 = vxpose.xlu0.b32.cont [13/16] (narrow) %v759_v59, 8  ;;  %v782_v59 = vmax.f32 %v654_v54, 0.0 }
  0x7a   : > { %v539_v2 = vmul.f32 %v1695_v0, %v1382_v58 }
  0x7b   : > { %942 = vxpose.xlu2.b32.cont [4/16] (narrow) %v782_v59, 8 }
  0x7c   : > { %v669_v7 = vadd.f32 %v1702_v4, %v539_v2 }
  0x7e   : > { %v797_v13 = vmax.f32 %v669_v7, 0.0 }
  0x80   : > { %920 = vxpose.xlu1.b32.cont [14/16] (narrow) %v776_v8, 8  ;;  %v1415_v8 = vunpack.c.h.bf16 %v1568_v51  ;;  %v786_v51 = vmax.f32 %v658_v46, 0.0 }
  0x81   : > { %888 = vxpose.xlu0.b32.cont [14/16] (narrow) %v760_v9, 8  ;;  %v1383_v9 = vunpack.c.h.bf16 %v1560_v52  ;;  %v1555_v52 = vld [vmem:[%s1690_s16 + $0xa0] sm:$0xff]  }
  0x82   : > { %v556_v14 = vmul.f32 %v1695_v0, %v1415_v8  ;;  %v1362_v53 = vunpack.c.l.bf16 %v1555_v52  ;;  %v1363_v2 = vunpack.c.h.bf16 %v1555_v52  ;;  %v1571_v8 = vld [vmem:[%s1690_s16 + $0x120] sm:$0xff]  }
  0x83   : > { %943 = vxpose.xlu2.b32.cont [5/16] (narrow) %v783_v10, 8  ;;  %v540_v15 = vmul.f32 %v1695_v0, %v1383_v9  ;;  %v1563_v9 = vld [vmem:[%s1690_s16 + $0xe0] sm:$0xff]  }
  0x84   : > { %v529_v58 = vmul.f32 %v1695_v0, %v1362_v53  ;;  %v530_v10 = vmul.f32 %v1695_v0, %v1363_v2 }
  0x86   : > { %v659_v59 = vadd.f32 %v1702_v4, %v529_v58  ;;  %v660_v11 = vadd.f32 %v1702_v4, %v530_v10 }
  0x88   : > { %921 = vxpose.xlu1.b32.cont [15/16] (narrow) %v777_v20, 8  ;;  %v686_v20 = vadd.f32 %v1702_v4, %v556_v14  ;;  %v787_v1 = vmax.f32 %v659_v59, 0.0  ;;  %v1426_v14 = vunpack.c.l.bf16 %v1571_v8 }
  0x89   : > { %889 = vxpose.xlu0.b32.cont [15/16] (narrow) %v761_v21, 8  ;;  %v670_v21 = vadd.f32 %v1702_v4, %v540_v15  ;;  %v1394_v15 = vunpack.c.l.bf16 %v1563_v9 }
  0x8a   : > { %v814_v27 = vmax.f32 %v686_v20, 0.0 }
  0x8b   : > { %944 = vxpose.xlu2.b32.cont [6/16] (narrow) %v784_v24, 8  ;;  %v798_v28 = vmax.f32 %v670_v21, 0.0  ;;  %v561_v21 = vmul.f32 %v1695_v0, %v1426_v14  ;;  %v545_v22 = vmul.f32 %v1695_v0, %v1394_v15 }
  0x8d   : > { %v691_v25 = vadd.f32 %v1702_v4, %v561_v21  ;;  %v675_v26 = vadd.f32 %v1702_v4, %v545_v22 }
  0x8f   : > { %v819_v31 = vmax.f32 %v691_v25, 0.0  ;;  %v803_v32 = vmax.f32 %v675_v26, 0.0 }
  0x90   : > { %922 = vxpose.xlu1.b32.end [16/16] (narrow) %v778_v35, 8  ;;  %v1419_v35 = vunpack.c.h.bf16 %v1569_v16  ;;  %v788_v16 = vmax.f32 %v660_v11, 0.0 }
  0x91   : > { %890 = vxpose.xlu0.b32.end [16/16] (narrow) %v762_v36, 8  ;;  %v1387_v36 = vunpack.c.h.bf16 %v1561_v17  ;;  %v1556_v17 = vld [vmem:[%s1690_s16 + $0xa8] sm:$0xff]  }
  0x92   : > { %v558_v41 = vmul.f32 %v1695_v0, %v1419_v35  ;;  %v1366_v18 = vunpack.c.l.bf16 %v1556_v17  ;;  %v1367_v30 = vunpack.c.h.bf16 %v1556_v17  ;;  %v1572_v35 = vld [vmem:[%s1690_s16 + $0x128] sm:$0xff]  }
  0x93   : > { %945 = vxpose.xlu2.b32.cont [7/16] (narrow) %v785_v37, 8  ;;  %v542_v42 = vmul.f32 %v1695_v0, %v1387_v36  ;;  %v1564_v36 = vld [vmem:[%s1690_s16 + $0xe8] sm:$0xff]  }
  0x94   : > { %v531_v23 = vmul.f32 %v1695_v0, %v1366_v18  ;;  %v532_v37 = vmul.f32 %v1695_v0, %v1367_v30 }
  0x96   : > { %v661_v24 = vadd.f32 %v1702_v4, %v531_v23  ;;  %v662_v38 = vadd.f32 %v1702_v4, %v532_v37 }
  0x98   : > { %1003 = vxpose.xlu1.b32.start [1/16] (narrow) %v811_v47, 8  ;;  %v688_v47 = vadd.f32 %v1702_v4, %v558_v41  ;;  %v789_v29 = vmax.f32 %v661_v24, 0.0  ;;  %v1430_v41 = vunpack.c.l.bf16 %v1572_v35 }
  0x99   : > { %971 = vxpose.xlu0.b32.start [1/16] (narrow) %v795_v48, 8  ;;  %v672_v48 = vadd.f32 %v1702_v4, %v542_v42  ;;  %v1398_v42 = vunpack.c.l.bf16 %v1564_v36 }
  0x9a   : > { %v816_v54 = vmax.f32 %v688_v47, 0.0 }
  0x9b   : > { %946 = vxpose.xlu2.b32.cont [8/16] (narrow) %v786_v51, 8  ;;  %v800_v55 = vmax.f32 %v672_v48, 0.0  ;;  %v563_v48 = vmul.f32 %v1695_v0, %v1430_v41  ;;  %v547_v49 = vmul.f32 %v1695_v0, %v1398_v42 }
  0x9d   : > { %v693_v52 = vadd.f32 %v1702_v4, %v563_v48  ;;  %v677_v53 = vadd.f32 %v1702_v4, %v547_v49 }
  0x9f   : > { %v821_v58 = vmax.f32 %v693_v52, 0.0  ;;  %v805_v59 = vmax.f32 %v677_v53, 0.0 }
  0xa0   : > { %1004 = vxpose.xlu1.b32.cont [2/16] (narrow) %v812_v62, 8  ;;  %v1423_v62 = vunpack.c.h.bf16 %v1570_v43  ;;  %v790_v43 = vmax.f32 %v662_v38, 0.0 }
  0xa1   : > { %972 = vxpose.xlu0.b32.cont [2/16] (narrow) %v796_v63, 8  ;;  %v1391_v63 = vunpack.c.h.bf16 %v1562_v44  ;;  %v1557_v44 = vld [vmem:[%s1690_s16 + $0xb0] sm:$0xff]  }
  0xa2   : > { %v560_v6 = vmul.f32 %v1695_v0, %v1423_v62  ;;  %v1370_v45 = vunpack.c.l.bf16 %v1557_v44  ;;  %v1371_v57 = vunpack.c.h.bf16 %v1557_v44  ;;  %v1573_v62 = vld [vmem:[%s1690_s16 + $0x130] sm:$0xff]  }
  0xa3   : > { %947 = vxpose.xlu2.b32.cont [9/16] (narrow) %v787_v1, 8  ;;  %v544_v7 = vmul.f32 %v1695_v0, %v1391_v63  ;;  %v1565_v63 = vld [vmem:[%s1690_s16 + $0xf0] sm:$0xff]  }
  0xa4   : > { %v533_v50 = vmul.f32 %v1695_v0, %v1370_v45  ;;  %v534_v1 = vmul.f32 %v1695_v0, %v1371_v57 }
  0xa6   : > { %v663_v51 = vadd.f32 %v1702_v4, %v533_v50  ;;  %v664_v2 = vadd.f32 %v1702_v4, %v534_v1 }
  0xa8   : > { %1005 = vxpose.xlu1.b32.cont [3/16] (narrow) %v813_v12, 8  ;;  %v690_v12 = vadd.f32 %v1702_v4, %v560_v6  ;;  %v791_v56 = vmax.f32 %v663_v51, 0.0  ;;  %v1434_v6 = vunpack.c.l.bf16 %v1573_v62 }
  0xa9   : > { %973 = vxpose.xlu0.b32.cont [3/16] (narrow) %v797_v13, 8  ;;  %v674_v13 = vadd.f32 %v1702_v4, %v544_v7  ;;  %v1402_v7 = vunpack.c.l.bf16 %v1565_v63 }
  0xaa   : > { %v818_v19 = vmax.f32 %v690_v12, 0.0 }
  0xab   : > { %948 = vxpose.xlu2.b32.cont [10/16] (narrow) %v788_v16, 8  ;;  %v802_v20 = vmax.f32 %v674_v13, 0.0  ;;  %v565_v13 = vmul.f32 %v1695_v0, %v1434_v6  ;;  %v549_v14 = vmul.f32 %v1695_v0, %v1402_v7 }
  0xad   : > { %v695_v17 = vadd.f32 %v1702_v4, %v565_v13  ;;  %v679_v18 = vadd.f32 %v1702_v4, %v549_v14 }
  0xaf   : > { %v823_v23 = vmax.f32 %v695_v17, 0.0  ;;  %v807_v24 = vmax.f32 %v679_v18, 0.0 }
  0xb0   : > { %1006 = vxpose.xlu1.b32.cont [4/16] (narrow) %v814_v27, 8  ;;  %v1427_v27 = vunpack.c.h.bf16 %v1571_v8  ;;  %v792_v8 = vmax.f32 %v664_v2, 0.0 }
  0xb1   : > { %974 = vxpose.xlu0.b32.cont [4/16] (narrow) %v798_v28, 8  ;;  %v1395_v28 = vunpack.c.h.bf16 %v1563_v9  ;;  %v1558_v9 = vld [vmem:[%s1690_s16 + $0xb8] sm:$0xff]  }
  0xb2   : > { %v562_v33 = vmul.f32 %v1695_v0, %v1427_v27  ;;  %v1374_v10 = vunpack.c.l.bf16 %v1558_v9  ;;  %v1375_v22 = vunpack.c.h.bf16 %v1558_v9  ;;  %v1574_v27 = vld [vmem:[%s1690_s16 + $0x138] sm:$0xff]  }
  0xb3   : > { %949 = vxpose.xlu2.b32.cont [11/16] (narrow) %v789_v29, 8  ;;  %v546_v34 = vmul.f32 %v1695_v0, %v1395_v28  ;;  %v1566_v28 = vld [vmem:[%s1690_s16 + $0xf8] sm:$0xff]  }
  0xb4   : > { %v535_v15 = vmul.f32 %v1695_v0, %v1374_v10  ;;  %v536_v29 = vmul.f32 %v1695_v0, %v1375_v22 }
  0xb6   : > { %v665_v16 = vadd.f32 %v1702_v4, %v535_v15  ;;  %v666_v30 = vadd.f32 %v1702_v4, %v536_v29 }
  0xb8   : > { %1007 = vxpose.xlu1.b32.cont [5/16] (narrow) %v815_v39, 8  ;;  %v692_v39 = vadd.f32 %v1702_v4, %v562_v33  ;;  %v793_v21 = vmax.f32 %v665_v16, 0.0  ;;  %v1438_v33 = vunpack.c.l.bf16 %v1574_v27 }
  0xb9   : > { %975 = vxpose.xlu0.b32.cont [5/16] (narrow) %v799_v40, 8  ;;  %v676_v40 = vadd.f32 %v1702_v4, %v546_v34  ;;  %v1406_v34 = vunpack.c.l.bf16 %v1566_v28 }
  0xba   : > { %v820_v46 = vmax.f32 %v692_v39, 0.0 }
  0xbb   : > { %950 = vxpose.xlu2.b32.cont [12/16] (narrow) %v790_v43, 8  ;;  %v804_v47 = vmax.f32 %v676_v40, 0.0  ;;  %v567_v40 = vmul.f32 %v1695_v0, %v1438_v33  ;;  %v551_v41 = vmul.f32 %v1695_v0, %v1406_v34 }
  0xbd   : > { %v697_v44 = vadd.f32 %v1702_v4, %v567_v40  ;;  %v681_v45 = vadd.f32 %v1702_v4, %v551_v41 }
  0xbf   : > { %v825_v50 = vmax.f32 %v697_v44, 0.0  ;;  %v809_v51 = vmax.f32 %v681_v45, 0.0 }
  0xc0   : > { %1008 = vxpose.xlu1.b32.cont [6/16] (narrow) %v816_v54, 8  ;;  %v1431_v54 = vunpack.c.h.bf16 %v1572_v35  ;;  %v794_v35 = vmax.f32 %v666_v30, 0.0 }
  0xc1   : > { %976 = vxpose.xlu0.b32.cont [6/16] (narrow) %v800_v55, 8  ;;  %v1399_v55 = vunpack.c.h.bf16 %v1564_v36  ;;  %v1575_v36 = vld [vmem:[%s1690_s16 + $0x140] sm:$0xff]  }
  0xc2   : > { %v564_v60 = vmul.f32 %v1695_v0, %v1431_v54  ;;  %v1442_v37 = vunpack.c.l.bf16 %v1575_v36  ;;  %v1443_v48 = vunpack.c.h.bf16 %v1575_v36  ;;  %v1591_v54 = vld [vmem:[%s1690_s16 + $0x1c0] sm:$0xff]  }
  0xc3   : > { %951 = vxpose.xlu2.b32.cont [13/16] (narrow) %v791_v56, 8  ;;  %v548_v61 = vmul.f32 %v1695_v0, %v1399_v55  ;;  %v1583_v55 = vld [vmem:[%s1690_s16 + $0x180] sm:$0xff]   ;;  %v1507_v9 = vunpack.c.h.bf16 %v1591_v54 }
  0xc4   : > { %v569_v42 = vmul.f32 %v1695_v0, %v1442_v37  ;;  %v570_v56 = vmul.f32 %v1695_v0, %v1443_v48 }
  0xc5   : > { %v602_v17 = vmul.f32 %v1695_v0, %v1507_v9 }
  0xc6   : > { %v699_v43 = vadd.f32 %v1702_v4, %v569_v42  ;;  %v700_v57 = vadd.f32 %v1702_v4, %v570_v56 }
  0xc8   : > { %1009 = vxpose.xlu1.b32.cont [7/16] (narrow) %v817_v3, 8  ;;  %v694_v3 = vadd.f32 %v1702_v4, %v564_v60  ;;  %v827_v49 = vmax.f32 %v699_v43, 0.0  ;;  %v1506_v60 = vunpack.c.l.bf16 %v1591_v54 }
  0xc9   : > { %977 = vxpose.xlu0.b32.cont [7/16] (narrow) %v801_v5, 8  ;;  %v678_v5 = vadd.f32 %v1702_v4, %v548_v61  ;;  %v1474_v61 = vunpack.c.l.bf16 %v1583_v55 }
  0xca   : > { %v822_v11 = vmax.f32 %v694_v3, 0.0 }
  0xcb   : > { %952 = vxpose.xlu2.b32.cont [14/16] (narrow) %v792_v8, 8  ;;  %v806_v12 = vmax.f32 %v678_v5, 0.0  ;;  %v601_v5 = vmul.f32 %v1695_v0, %v1506_v60  ;;  %v585_v6 = vmul.f32 %v1695_v0, %v1474_v61 }
  0xcd   : > { %v731_v10 = vadd.f32 %v1702_v4, %v601_v5 }
  0xcf   : > { %v859_v15 = vmax.f32 %v731_v10, 0.0 }
  0xd0   : > { %1010 = vxpose.xlu1.b32.cont [8/16] (narrow) %v818_v19, 8  ;;  %v1435_v19 = vunpack.c.h.bf16 %v1573_v62  ;;  %v828_v62 = vmax.f32 %v700_v57, 0.0 }
  0xd1   : > { %978 = vxpose.xlu0.b32.cont [8/16] (narrow) %v802_v20, 8  ;;  %v1403_v20 = vunpack.c.h.bf16 %v1565_v63  ;;  %v1576_v63 = vld [vmem:[%s1690_s16 + $0x148] sm:$0xff]  }
  0xd2   : > { %v566_v25 = vmul.f32 %v1695_v0, %v1435_v19  ;;  %v1446_v1 = vunpack.c.l.bf16 %v1576_v63  ;;  %v1447_v14 = vunpack.c.h.bf16 %v1576_v63  ;;  %v1592_v19 = vld [vmem:[%s1690_s16 + $0x1c8] sm:$0xff]  }
  0xd3   : > { %953 = vxpose.xlu2.b32.cont [15/16] (narrow) %v793_v21, 8  ;;  %v550_v26 = vmul.f32 %v1695_v0, %v1403_v20  ;;  %v1584_v20 = vld [vmem:[%s1690_s16 + $0x188] sm:$0xff]  }
  0xd4   : > { %v571_v7 = vmul.f32 %v1695_v0, %v1446_v1  ;;  %v572_v21 = vmul.f32 %v1695_v0, %v1447_v14 }
  0xd6   : > { %v701_v8 = vadd.f32 %v1702_v4, %v571_v7  ;;  %v702_v22 = vadd.f32 %v1702_v4, %v572_v21 }
  0xd8   : > { %1011 = vxpose.xlu1.b32.cont [9/16] (narrow) %v819_v31, 8  ;;  %v696_v31 = vadd.f32 %v1702_v4, %v566_v25  ;;  %v829_v13 = vmax.f32 %v701_v8, 0.0  ;;  %v1510_v25 = vunpack.c.l.bf16 %v1592_v19 }
  0xd9   : > { %979 = vxpose.xlu0.b32.cont [9/16] (narrow) %v803_v32, 8  ;;  %v680_v32 = vadd.f32 %v1702_v4, %v550_v26  ;;  %v1478_v26 = vunpack.c.l.bf16 %v1584_v20 }
  0xda   : > { %v824_v38 = vmax.f32 %v696_v31, 0.0 }
  0xdb   : > { %954 = vxpose.xlu2.b32.end [16/16] (narrow) %v794_v35, 8  ;;  %v808_v39 = vmax.f32 %v680_v32, 0.0  ;;  %v603_v32 = vmul.f32 %v1695_v0, %v1510_v25  ;;  %v587_v33 = vmul.f32 %v1695_v0, %v1478_v26 }
  0xdd   : > { %v733_v36 = vadd.f32 %v1702_v4, %v603_v32  ;;  %v717_v37 = vadd.f32 %v1702_v4, %v587_v33 }
  0xdf   : > { %v861_v42 = vmax.f32 %v733_v36, 0.0  ;;  %v845_v43 = vmax.f32 %v717_v37, 0.0 }
  0xe0   : > { %1012 = vxpose.xlu1.b32.cont [10/16] (narrow) %v820_v46, 8  ;;  %v1439_v46 = vunpack.c.h.bf16 %v1574_v27  ;;  %v830_v27 = vmax.f32 %v702_v22, 0.0 }
  0xe1   : > { %980 = vxpose.xlu0.b32.cont [10/16] (narrow) %v804_v47, 8  ;;  %v1407_v47 = vunpack.c.h.bf16 %v1566_v28  ;;  %v1577_v28 = vld [vmem:[%s1690_s16 + $0x150] sm:$0xff]  }
  0xe2   : > { %v568_v52 = vmul.f32 %v1695_v0, %v1439_v46  ;;  %v1450_v29 = vunpack.c.l.bf16 %v1577_v28  ;;  %v1451_v41 = vunpack.c.h.bf16 %v1577_v28  ;;  %v1593_v46 = vld [vmem:[%s1690_s16 + $0x1d0] sm:$0xff]  }
  0xe3   : > { %1035 = vxpose.xlu2.b32.start [1/16] (narrow) %v827_v49, 8  ;;  %v552_v53 = vmul.f32 %v1695_v0, %v1407_v47  ;;  %v1585_v47 = vld [vmem:[%s1690_s16 + $0x190] sm:$0xff]  }
  0xe4   : > { %v573_v34 = vmul.f32 %v1695_v0, %v1450_v29  ;;  %v574_v48 = vmul.f32 %v1695_v0, %v1451_v41 }
  0xe6   : > { %v703_v35 = vadd.f32 %v1702_v4, %v573_v34  ;;  %v704_v49 = vadd.f32 %v1702_v4, %v574_v48 }
  0xe8   : > { %1013 = vxpose.xlu1.b32.cont [11/16] (narrow) %v821_v58, 8  ;;  %v698_v58 = vadd.f32 %v1702_v4, %v568_v52  ;;  %v831_v40 = vmax.f32 %v703_v35, 0.0  ;;  %v1514_v52 = vunpack.c.l.bf16 %v1593_v46  ;;  %v832_v54 = vmax.f32 %v704_v49, 0.0 }
  0xe9   : > { %981 = vxpose.xlu0.b32.cont [11/16] (narrow) %v805_v59, 8  ;;  %v682_v59 = vadd.f32 %v1702_v4, %v552_v53  ;;  %v1482_v53 = vunpack.c.l.bf16 %v1585_v47 }
  0xea   : > { %v826_v2 = vmax.f32 %v698_v58, 0.0 }
  0xeb   : > { %1036 = vxpose.xlu2.b32.cont [2/16] (narrow) %v828_v62, 8  ;;  %v810_v3 = vmax.f32 %v682_v59, 0.0 }
  0xf0   : > { %1014 = vxpose.xlu1.b32.cont [12/16] (narrow) %v822_v11, 8  ;;  %v1475_v11 = vunpack.c.h.bf16 %v1583_v55  ;;  %v1578_v55 = vld [vmem:[%s1690_s16 + $0x158] sm:$0xff]  }
  0xf1   : > { %982 = vxpose.xlu0.b32.cont [12/16] (narrow) %v806_v12, 8  ;;  %v715_v12 = vadd.f32 %v1702_v4, %v585_v6  ;;  %v1454_v56 = vunpack.c.l.bf16 %v1578_v55  ;;  %v1455_v6 = vunpack.c.h.bf16 %v1578_v55 }
  0xf2   : > { %v586_v18 = vmul.f32 %v1695_v0, %v1475_v11  ;;  %v1594_v11 = vld [vmem:[%s1690_s16 + $0x1d8] sm:$0xff]  }
  0xf3   : > { %1037 = vxpose.xlu2.b32.cont [3/16] (narrow) %v829_v13, 8  ;;  %v843_v16 = vmax.f32 %v715_v12, 0.0  ;;  %v1586_v12 = vld [vmem:[%s1690_s16 + $0x198] sm:$0xff]  }
  0xf8   : > { %1015 = vxpose.xlu1.b32.cont [13/16] (narrow) %v823_v23, 8  ;;  %v732_v23 = vadd.f32 %v1702_v4, %v602_v17  ;;  %v1518_v17 = vunpack.c.l.bf16 %v1594_v11 }
  0xf9   : > { %983 = vxpose.xlu0.b32.cont [13/16] (narrow) %v807_v24, 8  ;;  %v716_v24 = vadd.f32 %v1702_v4, %v586_v18  ;;  %v1486_v18 = vunpack.c.l.bf16 %v1586_v12 }
  0xfa   : > { %v860_v30 = vmax.f32 %v732_v23, 0.0 }
  0xfb   : > { %1038 = vxpose.xlu2.b32.cont [4/16] (narrow) %v830_v27, 8  ;;  %v844_v31 = vmax.f32 %v716_v24, 0.0 }
 0x100   : > { %1016 = vxpose.xlu1.b32.cont [14/16] (narrow) %v824_v38, 8  ;;  %v1511_v38 = vunpack.c.h.bf16 %v1592_v19 }
 0x101   : > { %984 = vxpose.xlu0.b32.cont [14/16] (narrow) %v808_v39, 8  ;;  %v1479_v39 = vunpack.c.h.bf16 %v1584_v20  ;;  %v1579_v20 = vld [vmem:[%s1690_s16 + $0x160] sm:$0xff]  }
 0x102   : > { %v604_v44 = vmul.f32 %v1695_v0, %v1511_v38  ;;  %v1458_v21 = vunpack.c.l.bf16 %v1579_v20  ;;  %v1459_v33 = vunpack.c.h.bf16 %v1579_v20  ;;  %v1595_v38 = vld [vmem:[%s1690_s16 + $0x1e0] sm:$0xff]  }
 0x103   : > { %1039 = vxpose.xlu2.b32.cont [5/16] (narrow) %v831_v40, 8  ;;  %v588_v45 = vmul.f32 %v1695_v0, %v1479_v39  ;;  %v1943_v0 = vld [vmem:[%s2056_s1] ss:$0 sm:$0xff] }
 0x104   : > { %v605_v59 = vmul.f32 %v1943_v0, %v1514_v52  ;;  %v589_v60 = vmul.f32 %v1943_v0, %v1482_v53  ;;  %v575_v61 = vmul.f32 %v1943_v0, %v1454_v56  ;;  %v576_v13 = vmul.f32 %v1943_v0, %v1455_v6  ;;  %v1587_v39 = vld [vmem:[%s1690_s16 + $0x1a0] sm:$0xff]  }
 0x105   : > { %v607_v24 = vmul.f32 %v1943_v0, %v1518_v17  ;;  %v591_v25 = vmul.f32 %v1943_v0, %v1486_v18  ;;  %v577_v26 = vmul.f32 %v1943_v0, %v1458_v21  ;;  %v578_v40 = vmul.f32 %v1943_v0, %v1459_v33 }
 0x108   : > { %1017 = vxpose.xlu1.b32.cont [15/16] (narrow) %v825_v50, 8  ;;  %v734_v50 = vadd.f32 %v1702_v4, %v604_v44  ;;  %v1522_v44 = vunpack.c.l.bf16 %v1595_v38 }
 0x109   : > { %985 = vxpose.xlu0.b32.cont [15/16] (narrow) %v809_v51, 8  ;;  %v718_v51 = vadd.f32 %v1702_v4, %v588_v45  ;;  %v1951_v4 = vld [vmem:[%s2056_s1 + $0x1] ss:$0 sm:$0xff]  ;;  %v1490_v45 = vunpack.c.l.bf16 %v1587_v39 }
 0x10a   : > { %v862_v57 = vmax.f32 %v734_v50, 0.0  ;;  %v705_v62 = vadd.f32 %v1951_v4, %v575_v61  ;;  %v735_v63 = vadd.f32 %v1951_v4, %v605_v59  ;;  %v719_v1 = vadd.f32 %v1951_v4, %v589_v60 }
 0x10b   : > { %1040 = vxpose.xlu2.b32.cont [6/16] (narrow) %v832_v54, 8  ;;  %v846_v58 = vmax.f32 %v718_v51, 0.0  ;;  %v706_v14 = vadd.f32 %v1951_v4, %v576_v13  ;;  %v707_v27 = vadd.f32 %v1951_v4, %v577_v26  ;;  %v737_v28 = vadd.f32 %v1951_v4, %v607_v24 }
 0x10c   : > { %v833_v5 = vmax.f32 %v705_v62, 0.0  ;;  %v863_v7 = vmax.f32 %v735_v63, 0.0  ;;  %v847_v8 = vmax.f32 %v719_v1, 0.0  ;;  %v721_v29 = vadd.f32 %v1951_v4, %v591_v25 }
 0x10d   : > { %v834_v19 = vmax.f32 %v706_v14, 0.0  ;;  %v835_v32 = vmax.f32 %v707_v27, 0.0  ;;  %v865_v34 = vmax.f32 %v737_v28, 0.0  ;;  %v708_v41 = vadd.f32 %v1951_v4, %v578_v40 }
 0x10e   : > { %v849_v35 = vmax.f32 %v721_v29, 0.0  ;;  %v609_v51 = vmul.f32 %v1943_v0, %v1522_v44  ;;  %v593_v52 = vmul.f32 %v1943_v0, %v1490_v45 }
 0x110   : > { %1018 = vxpose.xlu1.b32.end [16/16] (narrow) %v826_v2, 8  ;;  %v1515_v2 = vunpack.c.h.bf16 %v1593_v46  ;;  %v836_v46 = vmax.f32 %v708_v41, 0.0  ;;  %v739_v55 = vadd.f32 %v1951_v4, %v609_v51  ;;  %v723_v56 = vadd.f32 %v1951_v4, %v593_v52  ;;  %v923_v52 = vpop.trf.xlu1 }
 0x111   : > { %986 = vxpose.xlu0.b32.end [16/16] (narrow) %v810_v3, 8  ;;  %v1483_v3 = vunpack.c.h.bf16 %v1585_v47  ;;  %v1580_v47 = vld [vmem:[%s1690_s16 + $0x168] sm:$0xff]   ;;  %1132 = vst [vmem:[%s2017_s28 + $0x8] sm:$0xff] %v923_v52 }
 0x112   : > { %v606_v9 = vmul.f32 %v1943_v0, %v1515_v2  ;;  %v1462_v48 = vunpack.c.l.bf16 %v1580_v47  ;;  %v1463_v60 = vunpack.c.h.bf16 %v1580_v47  ;;  %v867_v61 = vmax.f32 %v739_v55, 0.0  ;;  %v1596_v2 = vld [vmem:[%s1690_s16 + $0x1e8] sm:$0xff]   ;;  %v955_v55 = vpop.trf.xlu2 }
 0x113   : > { %1041 = vxpose.xlu2.b32.cont [7/16] (narrow) %v833_v5, 8  ;;  %v590_v10 = vmul.f32 %v1943_v0, %v1483_v3  ;;  %v851_v62 = vmax.f32 %v723_v56, 0.0  ;;  %v1588_v3 = vld [vmem:[%s1690_s16 + $0x1a8] sm:$0xff]   ;;  %1133 = vst [vmem:[%s2017_s28 + $0x10] sm:$0xff] %v955_v55 }
 0x114   : > { %v579_v53 = vmul.f32 %v1943_v0, %v1462_v48  ;;  %v580_v5 = vmul.f32 %v1943_v0, %v1463_v60 }
 0x116   : > { %v709_v54 = vadd.f32 %v1951_v4, %v579_v53  ;;  %v710_v6 = vadd.f32 %v1951_v4, %v580_v5  ;;  %v891_v53 = vpop.trf.xlu0 }
 0x117   : > { %1131 = vst [vmem:[%s2017_s28] sm:$0xff] %v891_v53 }
 0x118   : > { %1099 = vxpose.xlu1.b32.start [1/16] (narrow) %v859_v15, 8  ;;  %v736_v15 = vadd.f32 %v1951_v4, %v606_v9  ;;  %v837_v59 = vmax.f32 %v709_v54, 0.0  ;;  %v1526_v9 = vunpack.c.l.bf16 %v1596_v2 }
 0x119   : > { %1067 = vxpose.xlu0.b32.start [1/16] (narrow) %v843_v16, 8  ;;  %v720_v16 = vadd.f32 %v1951_v4, %v590_v10  ;;  %v1494_v10 = vunpack.c.l.bf16 %v1588_v3 }
 0x11a   : > { %v864_v22 = vmax.f32 %v736_v15, 0.0 }
 0x11b   : > { %1042 = vxpose.xlu2.b32.cont [8/16] (narrow) %v834_v19, 8  ;;  %v848_v23 = vmax.f32 %v720_v16, 0.0  ;;  %v611_v16 = vmul.f32 %v1943_v0, %v1526_v9  ;;  %v595_v17 = vmul.f32 %v1943_v0, %v1494_v10 }
 0x11d   : > { %v741_v20 = vadd.f32 %v1951_v4, %v611_v16  ;;  %v725_v21 = vadd.f32 %v1951_v4, %v595_v17 }
 0x11f   : > { %v869_v26 = vmax.f32 %v741_v20, 0.0  ;;  %v853_v27 = vmax.f32 %v725_v21, 0.0 }
 0x120   : > { %1100 = vxpose.xlu1.b32.cont [2/16] (narrow) %v860_v30, 8  ;;  %v1519_v30 = vunpack.c.h.bf16 %v1594_v11  ;;  %v838_v11 = vmax.f32 %v710_v6, 0.0 }
 0x121   : > { %1068 = vxpose.xlu0.b32.cont [2/16] (narrow) %v844_v31, 8  ;;  %v1487_v31 = vunpack.c.h.bf16 %v1586_v12  ;;  %v1581_v12 = vld [vmem:[%s1690_s16 + $0x170] sm:$0xff]  }
 0x122   : > { %v608_v36 = vmul.f32 %v1943_v0, %v1519_v30  ;;  %v1466_v13 = vunpack.c.l.bf16 %v1581_v12  ;;  %v1467_v25 = vunpack.c.h.bf16 %v1581_v12  ;;  %v1597_v30 = vld [vmem:[%s1690_s16 + $0x1f0] sm:$0xff]  }
 0x123   : > { %1043 = vxpose.xlu2.b32.cont [9/16] (narrow) %v835_v32, 8  ;;  %v592_v37 = vmul.f32 %v1943_v0, %v1487_v31  ;;  %v1589_v31 = vld [vmem:[%s1690_s16 + $0x1b0] sm:$0xff]   ;;  %v1530_v33 = vunpack.c.l.bf16 %v1597_v30 }
 0x124   : > { %v581_v18 = vmul.f32 %v1943_v0, %v1466_v13  ;;  %v582_v32 = vmul.f32 %v1943_v0, %v1467_v25 }
 0x125   : > { %v613_v40 = vmul.f32 %v1943_v0, %v1530_v33 }
 0x126   : > { %v711_v19 = vadd.f32 %v1951_v4, %v581_v18 }
 0x128   : > { %1101 = vxpose.xlu1.b32.cont [3/16] (narrow) %v861_v42, 8  ;;  %v738_v42 = vadd.f32 %v1951_v4, %v608_v36  ;;  %v839_v24 = vmax.f32 %v711_v19, 0.0 }
 0x129   : > { %1069 = vxpose.xlu0.b32.cont [3/16] (narrow) %v845_v43, 8  ;;  %v722_v43 = vadd.f32 %v1951_v4, %v592_v37  ;;  %v1498_v37 = vunpack.c.l.bf16 %v1589_v31 }
 0x12a   : > { %v866_v49 = vmax.f32 %v738_v42, 0.0 }
 0x12b   : > { %1044 = vxpose.xlu2.b32.cont [10/16] (narrow) %v836_v46, 8  ;;  %v850_v50 = vmax.f32 %v722_v43, 0.0  ;;  %v597_v44 = vmul.f32 %v1943_v0, %v1498_v37  ;;  %v743_v46 = vadd.f32 %v1951_v4, %v613_v40 }
 0x12d   : > { %v727_v48 = vadd.f32 %v1951_v4, %v597_v44 }
 0x130   : > { %1102 = vxpose.xlu1.b32.cont [4/16] (narrow) %v862_v57, 8  ;;  %v1523_v57 = vunpack.c.h.bf16 %v1595_v38 }
 0x131   : > { %1070 = vxpose.xlu0.b32.cont [4/16] (narrow) %v846_v58, 8  ;;  %v1491_v58 = vunpack.c.h.bf16 %v1587_v39  ;;  %v1582_v39 = vld [vmem:[%s1690_s16 + $0x178] sm:$0xff]  }
 0x132   : > { %v610_v63 = vmul.f32 %v1943_v0, %v1523_v57  ;;  %v1470_v41 = vunpack.c.l.bf16 %v1582_v39  ;;  %v1471_v51 = vunpack.c.h.bf16 %v1582_v39  ;;  %v871_v57 = vmax.f32 %v743_v46, 0.0 }
 0x133   : > { %1045 = vxpose.xlu2.b32.cont [11/16] (narrow) %v837_v59, 8  ;;  %v594_v1 = vmul.f32 %v1943_v0, %v1491_v58  ;;  %v855_v58 = vmax.f32 %v727_v48, 0.0 }
 0x134   : > { %v583_v45 = vmul.f32 %v1943_v0, %v1470_v41  ;;  %v584_v56 = vmul.f32 %v1943_v0, %v1471_v51 }
 0x136   : > { %v713_v47 = vadd.f32 %v1951_v4, %v583_v45 }
 0x138   : > { %1103 = vxpose.xlu1.b32.cont [5/16] (narrow) %v863_v7, 8  ;;  %v740_v7 = vadd.f32 %v1951_v4, %v610_v63  ;;  %v841_v54 = vmax.f32 %v713_v47, 0.0  ;;  %v1590_v63 = vld [vmem:[%s1690_s16 + $0x1b8] sm:$0xff]  }
 0x139   : > { %1071 = vxpose.xlu0.b32.cont [5/16] (narrow) %v847_v8, 8  ;;  %v724_v8 = vadd.f32 %v1951_v4, %v594_v1  ;;  %v1502_v6 = vunpack.c.l.bf16 %v1590_v63  ;;  %v1503_v16 = vunpack.c.h.bf16 %v1590_v63 }
 0x13a   : > { %v868_v14 = vmax.f32 %v740_v7, 0.0 }
 0x13b   : > { %1046 = vxpose.xlu2.b32.cont [12/16] (narrow) %v838_v11, 8  ;;  %v852_v15 = vmax.f32 %v724_v8, 0.0  ;;  %v599_v12 = vmul.f32 %v1943_v0, %v1502_v6  ;;  %v600_v20 = vmul.f32 %v1943_v0, %v1503_v16 }
 0x13c   : > { %v1019_v7 = vpop.trf.xlu1 }
 0x13d   : > { %v987_v8 = vpop.trf.xlu0  ;;  %1135 = vst [vmem:[%s2017_s28 + $0x20] sm:$0xff] %v1019_v7 }
 0x13e   : > { %1134 = vst [vmem:[%s2017_s28 + $0x18] sm:$0xff] %v987_v8 }
 0x140   : > { %1104 = vxpose.xlu1.b32.cont [6/16] (narrow) %v864_v22, 8  ;;  %v1527_v22 = vunpack.c.h.bf16 %v1596_v2 }
 0x141   : > { %1072 = vxpose.xlu0.b32.cont [6/16] (narrow) %v848_v23, 8  ;;  %v1495_v23 = vunpack.c.h.bf16 %v1588_v3 }
 0x142   : > { %v612_v28 = vmul.f32 %v1943_v0, %v1527_v22  ;;  %v730_v22 = vadd.f32 %v1951_v4, %v600_v20 }
 0x143   : > { %1047 = vxpose.xlu2.b32.cont [13/16] (narrow) %v839_v24, 8  ;;  %v596_v29 = vmul.f32 %v1943_v0, %v1495_v23 }
 0x144   : > { %v858_v24 = vmax.f32 %v730_v22, 0.0 }
 0x145   : > { %v726_v36 = vadd.f32 %v1951_v4, %v596_v29 }
 0x147   : > { %v854_v43 = vmax.f32 %v726_v36, 0.0 }
 0x148   : > { %1105 = vxpose.xlu1.b32.cont [7/16] (narrow) %v865_v34, 8  ;;  %v712_v34 = vadd.f32 %v1951_v4, %v582_v32 }
 0x149   : > { %1073 = vxpose.xlu0.b32.cont [7/16] (narrow) %v849_v35, 8  ;;  %v742_v35 = vadd.f32 %v1951_v4, %v612_v28 }
 0x14a   : > { %v840_v38 = vmax.f32 %v712_v34, 0.0 }
 0x14b   : > { %v870_v42 = vmax.f32 %v742_v35, 0.0 }
 0x14c   : > { %1048 = vxpose.xlu2.b32.cont [14/16] (narrow) %v840_v38, 8 }
 0x150   : > { %1106 = vxpose.xlu1.b32.cont [8/16] (narrow) %v866_v49, 8  ;;  %v1531_v49 = vunpack.c.h.bf16 %v1597_v30 }
 0x151   : > { %1074 = vxpose.xlu0.b32.cont [8/16] (narrow) %v850_v50, 8  ;;  %v1499_v50 = vunpack.c.h.bf16 %v1589_v31 }
 0x152   : > { %v614_v59 = vmul.f32 %v1943_v0, %v1531_v49 }
 0x153   : > { %v598_v60 = vmul.f32 %v1943_v0, %v1499_v50 }
 0x154   : > { %1049 = vxpose.xlu2.b32.cont [15/16] (narrow) %v841_v54, 8  ;;  %v744_v2 = vadd.f32 %v1951_v4, %v614_v59 }
 0x155   : > { %v728_v3 = vadd.f32 %v1951_v4, %v598_v60 }
 0x156   : > { %v872_v9 = vmax.f32 %v744_v2, 0.0 }
 0x157   : > { %v856_v10 = vmax.f32 %v728_v3, 0.0 }
 0x158   : > { %1107 = vxpose.xlu1.b32.cont [9/16] (narrow) %v867_v61, 8  ;;  %v714_v61 = vadd.f32 %v1951_v4, %v584_v56 }
 0x159   : > { %1075 = vxpose.xlu0.b32.cont [9/16] (narrow) %v851_v62, 8  ;;  %v1598_v62 = vld [vmem:[%s1690_s16 + $0x1f8] sm:$0xff]  }
 0x15a   : > { %v842_v1 = vmax.f32 %v714_v61, 0.0  ;;  %v1534_v5 = vunpack.c.l.bf16 %v1598_v62 }
 0x15c   : > { %1050 = vxpose.xlu2.b32.end [16/16] (narrow) %v842_v1, 8  ;;  %v615_v11 = vmul.f32 %v1943_v0, %v1534_v5 }
 0x15e   : > { %v745_v13 = vadd.f32 %v1951_v4, %v615_v11 }
 0x160   : > { %1108 = vxpose.xlu1.b32.cont [10/16] (narrow) %v868_v14, 8  ;;  %v729_v14 = vadd.f32 %v1951_v4, %v599_v12  ;;  %v873_v17 = vmax.f32 %v745_v13, 0.0 }
 0x161   : > { %1076 = vxpose.xlu0.b32.cont [10/16] (narrow) %v852_v15, 8  ;;  %v1535_v15 = vunpack.c.h.bf16 %v1598_v62 }
 0x162   : > { %v857_v18 = vmax.f32 %v729_v14, 0.0 }
 0x163   : > { %v616_v19 = vmul.f32 %v1943_v0, %v1535_v15 }
 0x165   : > { %v746_v21 = vadd.f32 %v1951_v4, %v616_v19 }
 0x167   : > { %v874_v23 = vmax.f32 %v746_v21, 0.0 }
 0x168   : > { %1109 = vxpose.xlu1.b32.cont [11/16] (narrow) %v869_v26, 8 }
 0x169   : > { %1077 = vxpose.xlu0.b32.cont [11/16] (narrow) %v853_v27, 8 }
 0x170   : > { %1110 = vxpose.xlu1.b32.cont [12/16] (narrow) %v870_v42, 8 }
 0x171   : > { %1078 = vxpose.xlu0.b32.cont [12/16] (narrow) %v854_v43, 8 }
 0x178   : > { %1111 = vxpose.xlu1.b32.cont [13/16] (narrow) %v871_v57, 8 }
 0x179   : > { %1079 = vxpose.xlu0.b32.cont [13/16] (narrow) %v855_v58, 8 }
 0x17d   : > { %v1051_v25 = vpop.trf.xlu2 }
 0x17e   : > { %1136 = vst [vmem:[%s2017_s28 + $0x28] sm:$0xff] %v1051_v25 }
 0x180   : > { %1112 = vxpose.xlu1.b32.cont [14/16] (narrow) %v872_v9, 8 }
 0x181   : > { %1080 = vxpose.xlu0.b32.cont [14/16] (narrow) %v856_v10, 8 }
 0x188   : > { %1113 = vxpose.xlu1.b32.cont [15/16] (narrow) %v873_v17, 8 }
 0x189   : > { %1081 = vxpose.xlu0.b32.cont [15/16] (narrow) %v857_v18, 8 }
 0x190   : > { %1114 = vxpose.xlu1.b32.end [16/16] (narrow) %v874_v23, 8 }
 0x191   : > { %1082 = vxpose.xlu0.b32.end [16/16] (narrow) %v858_v24, 8 }
 0x1bc   : > { %v1115_v26 = vpop.trf.xlu1 }
 0x1bd   : > { %v1083_v27 = vpop.trf.xlu0  ;;  %1138 = vst [vmem:[%s2017_s28 + $0x38] sm:$0xff] %v1115_v26 }
 0x1be   : > { %1137 = vst [vmem:[%s2017_s28 + $0x30] sm:$0xff] %v1083_v27 }
 0x1bf PF: > { %s12_s11 = sadd.s32 1, %s1649_s11   ;;  %s2058_s9 = smov %s1645_s10 }
 0x1c0   : > { %p9_p5 = scmp.ge.s32.totalorder %s12_s11, 4   ;;  %s2059_s10 = smov %s2061_s12 }
 0x1c2   :  { %11 = sbr.rel (!%p9_p5) target bundleno = 2 (0x2), region = 61 }

// kernel: upsample_block.2
= control target key start
LH: loop header
LB: loop body
LE: loop exit
PB: predicated region body
PF: predicated region fallthrough
CT: control target
= control target key end

     0   :  { %s8334_s12 = smov 0   ;;  %s8336_s13 = smov 0   ;;  %s11403_s0 = inlined_call_operand.vmem [shape: bf16[2,18,18,4], index: 0, kind: input, shape index: {}]   ;;  %s11404_s1 = inlined_call_operand.vmem [shape: bf16[2,2,4,4,8], index: 1, kind: input, shape index: {}]   ;;  %s11405_s2 = inlined_call_operand.vmem [shape: bf16[2,16,2,16,16], index: 2, kind: output, shape index: {0}]   ;;  %s11406_s3 = inlined_call_operand.vmem [shape: f32[2,1,2,8], index: 3, kind: output, shape index: {1}]  }
   0x1   :  { %s8338_s14 = smov 0  }
   0x2 LB: > { %s26_s15 = sadd.s32 1, %s8307_s13  ;;  %p7024_p0 = scmp.ge.s32.totalorder %s8311_s14, 1  ;;  %s8311_s14 = sphi %s8338_s14, %s14_s14   ;;  %s8307_s13 = sphi %s8336_s13, %s11615_s13   ;;  %s8303_s12 = sphi %s8334_s12, %s11614_s12  }
   0x3   : > { %p28_p1 = scmp.ge.s32.totalorder %s26_s15, 2  ;;  %p156_p2 = scmp.lt.s32.totalorder %s8311_s14, 3 }
   0x5   : > { %s11617_s15 = smov (%p28_p1, %s26_s15), 0  ;;  %p157_p3 = pnand %p7024_p0, %p156_p2 }
   0x7   : > { %160 = sbr.rel (%p157_p3) target bundleno = 1311 (0x51f), region = 28 }
   0xc   : > { %vm755_vm0 = vcmask 1041408   ;;  %v7158_v0 = vld [vmem:[%s11404_s1 + $0x4] sm:$0x3]  ;;  %p192_p4 = scmp.lt.s32.totalorder %s8303_s12, 1  ;;  %v252_v2 = vld [vmem:[%s11404_s1] sm:$0x3] }
   0xd   : > { %v1235_v1 = vsel %vm755_vm0, %v7158_v0, 0  ;;  %v7029_v3 = vld [vmem:[%s11404_s1 + $0x2] sm:$0x3]  ;;  %v977_v4 = vsel %vm755_vm0, %v252_v2, 0  ;;  %v7287_v6 = vld [vmem:[%s11404_s1 + $0x6] sm:$0x3] }
   0xe   : > { %1244 = vmatpush.bf16.msra.mxu2 %v1235_v1  ;;  %s11619_s12 = smov (!%p192_p4, %s8303_s12), 1  ;;  %v757_v5 = vsel %vm755_vm0, %v7029_v3, 0  ;;  %986 = vmatpush.bf16.msra.mxu1 %v977_v4  ;;  %v1889_v7 = vsel %vm755_vm0, %v7287_v6, 0  ;;  %v7354_v8 = vld [vmem:[%s11404_s1 + $0xc] sm:$0x3]  ;;  %vm706_vm1 = vcmask 31744  }
   0xf   : > { %766 = vmatpush.bf16.msra.mxu0 %v757_v5  ;;  %s7975_s26 = smul.u32 216, %s11619_s12  ;;  %1898 = vmatpush.bf16.msra.mxu3 %v1889_v7  ;;  %v2635_v9 = vsel %vm755_vm0, %v7354_v8, 0  ;;  %v7403_v10 = vld [vmem:[%s11404_s1 + $0xe] sm:$0x3]  ;;  %v7321_v12 = vld [vmem:[%s11404_s1 + $0xa] sm:$0x3] }
  0x10   : > { %v3033_v11 = vsel %vm755_vm0, %v7403_v10, 0  ;;  %v7304_v13 = vld [vmem:[%s11404_s1 + $0x8] sm:$0x3]  ;;  %vm269_vm2 = vsmask.f32 3328  ;;  %v2449_v14 = vsel %vm755_vm0, %v7321_v12, 0 }
  0x11   : > { %s8388_s8 = scalar_lea.vmem %s11403_s0, %s7975_s26  ;;  %v2541_v15 = vsel %vm755_vm0, %v7304_v13, 0  ;;  %vm270_vm3 = vsmask.f32 7440  ;;  %vm2235_vm5 = vcmask 1042432   ;;  %vm2236_vm6 = vcmask 1046532   ;;  %s8313_s21 = smov 8  }
  0x12   : > { %2644 = vmatpush.bf16.msrb.mxu2 %v2635_v9  ;;  %v7927_v16 = vld [vmem:[%s8388_s8 + $0xc] sm:$0xff]  ;;  %v7911_v17 = vld [vmem:[%s8388_s8] sm:$0xff]  ;;  %2550 = vmatpush.bf16.msrb.mxu1 %v2541_v15  ;;  %v253_v20 = vld [vmem:[%s8388_s8 + $0x8] sm:$0x1]  ;;  %vm2012_vm8 = vcmask 64512   ;;  %vm3520_vm9 = vcmask 125952  }
  0x13   : > { %3042 = vmatpush.bf16.msrb.mxu3 %v3033_v11  ;;  %v220_v18 = vld [vmem:[%s8388_s8] sm:$0xf]  ;;  %2458 = vmatpush.bf16.msrb.mxu0 %v2449_v14  ;;  %v221_v19 = vld [vmem:[%s8388_s8 + $0x4] sm:$0xf]  ;;  %v292_v25 = vshll.u32 %v253_v20, 16  ;;  %vm8404_vm4 = vmor %vm269_vm2, %vm270_vm3  ;;  %s7910_s30 = sshll.u32 %s11619_s12, 8 }
  0x14   : > { %v273_v21 = vshrl.u32 %v220_v18, 16  ;;  %v276_v22 = vshll.u32 %v220_v18, 16  ;;  %7223 = vmatmul.msk.bf16.vlgmr.msra.gmra.mxu2 %vm706_vm1, %v7927_v16  ;;  %7110 = vmatmul.msk.bf16.vlgmr.msra.gmra.mxu1 %vm706_vm1, %v7911_v17  ;;  %v282_v23 = vshll.u32 %v221_v19, 16  ;;  %v286_v24 = vshrl.u32 %v221_v19, 16  ;;  %v7239_v26 = vld [vmem:[%s8388_s8 + $0xc] sm:$0xf]  ;;  %vm8862_vm7 = vmor %vm2235_vm5, %vm2236_vm6  ;;  %s9484_s6 = scalar_lea.vmem %s11405_s2, %s7910_s30 }
  0x15   : > { %v7240_v29 = vld [vmem:[%s8388_s8 + $0x10] sm:$0xf]  ;;  %v1407_v30 = vshrl.u32 %v7239_v26, 16  ;;  %v7241_v33 = vld [vmem:[%s8388_s8 + $0x14] sm:$0x1]  ;;  %v1410_v36 = vshll.u32 %v7239_v26, 16 }
  0x16   : > { %v275_v27 = vrot.slane %v273_v21, 4  ;;  %v278_v28 = vrot.slane %v276_v22, 5  ;;  %v284_v31 = vrot.slane %v282_v23, 5  ;;  %v288_v32 = vrot.slane %v286_v24, 4  ;;  %v222_v43 = vld [vmem:[%s8388_s8 + $0xc] sm:$0xf] }
  0x17   : > { %v1409_v35 = vrot.slane %v1407_v30, 4  ;;  %v1416_v37 = vshll.u32 %v7240_v29, 16  ;;  %v294_v40 = vrot.slane %v292_v25, 5  ;;  %v1420_v41 = vshrl.u32 %v7240_v29, 16  ;;  %v223_v47 = vld [vmem:[%s8388_s8 + $0x10] sm:$0xf] }
  0x18   : > { %v279_v34 = vor.u32 %v278_v28, %v275_v27  ;;  %v289_v39 = vor.u32 %v288_v32, %v284_v31  ;;  %v1426_v42 = vshll.u32 %v7241_v33, 16  ;;  %v1412_v45 = vrot.slane %v1410_v36, 5  ;;  %v254_v53 = vld [vmem:[%s8388_s8 + $0x14] sm:$0x1]  ;;  %v7242_v4 = vld [vmem:[%s8388_s8 + $0x18] sm:$0xf] }
  0x19   : > { %v1418_v46 = vrot.slane %v1416_v37, 5  ;;  %v1422_v49 = vrot.slane %v1420_v41, 4  ;;  %v297_v54 = vshrl.u32 %v222_v43, 16  ;;  %v300_v55 = vshll.u32 %v222_v43, 16  ;;  %v7243_v8 = vld [vmem:[%s8388_s8 + $0x1c] sm:$0xf] }
  0x1a   : > { %v280_v44 = vrot.slane %v279_v34, 4  ;;  %v290_v48 = vrot.slane %v289_v39, 4  ;;  %v1428_v50 = vrot.slane %v1426_v42, 5  ;;  %v1413_v52 = vor.u32 %v1412_v45, %v1409_v35  ;;  %v7244_v9 = vld [vmem:[%s8388_s8 + $0x20] sm:$0x1]  ;;  %v7928_v12 = vld [vmem:[%s8388_s8 + $0x18] sm:$0xff] }
  0x1b   : > { %v1423_v58 = vor.u32 %v1422_v49, %v1418_v46  ;;  %v306_v59 = vshll.u32 %v223_v47, 16  ;;  %v299_v62 = vrot.slane %v297_v54, 4  ;;  %v302_v63 = vrot.slane %v300_v55, 5  ;;  %v7912_v13 = vld [vmem:[%s8388_s8 + $0xc] sm:$0xff]  ;;  %v224_v24 = vld [vmem:[%s8388_s8 + $0x18] sm:$0xf] }
  0x1c   : > { %v285_v51 = vsel %vm8404_vm4, %v280_v44, %v284_v31  ;;  %v295_v56 = vsel %vm8404_vm4, %v290_v48, %v294_v40  ;;  %v1414_v61 = vrot.slane %v1413_v52, 4  ;;  %v310_v2 = vshrl.u32 %v223_v47, 16  ;;  %v225_v28 = vld [vmem:[%s8388_s8 + $0x1c] sm:$0xf]  ;;  %v255_v43 = vld [vmem:[%s8388_s8 + $0x20] sm:$0x1] }
  0x1d   : > { %v658_v57 = vunpack.c.l.b16 %v285_v51  ;;  %v659_v60 = vunpack.c.l.b16 %v295_v56  ;;  %v1424_v0 = vrot.slane %v1423_v58, 4  ;;  %v308_v1 = vrot.slane %v306_v59, 5  ;;  %v7246_v52 = vld [vmem:[%s8388_s8 + $0x28] sm:$0xf]  ;;  %v8225_v38 = vld [vmem:[%s8388_s8 + $0x10] sm:$0xf] }
  0x1e   : > { %v316_v3 = vshll.u32 %v254_v53, 16  ;;  %v1419_v6 = vsel %vm8404_vm4, %v1414_v61, %v1418_v46  ;;  %v303_v7 = vor.u32 %v302_v63, %v299_v62  ;;  %v312_v14 = vrot.slane %v310_v2, 4  ;;  %s7028_s7 = sshll.u32 %s11619_s12, 1 }
  0x1f   : > { %v8416_v5 = vpack.c.b16 %v659_v60, %v658_v57  ;;  %v1429_v10 = vsel %vm8404_vm4, %v1424_v0, %v1428_v50  ;;  %v1792_v11 = vunpack.c.l.b16 %v1419_v6  ;;  %v1431_v18 = vshrl.u32 %v7242_v4, 16  ;;  %v7245_v50 = vld [vmem:[%s8388_s8 + $0x24] sm:$0xf]  ;;  %s214_s10 = scalar_lea.vmem %s11406_s3, %s7028_s7 }
  0x20   : > { %v318_v15 = vrot.slane %v316_v3, 5  ;;  %v1793_v16 = vunpack.c.l.b16 %v1429_v10  ;;  %v304_v17 = vrot.slane %v303_v7, 4  ;;  %v1434_v19 = vshll.u32 %v7242_v4, 16 }
  0x21   : > { %7030 = vmatmul.msk.bf16.vlgmr.msra.gmra.mxu0 %vm706_vm1, %v8416_v5  ;;  %v313_v20 = vor.u32 %v312_v14, %v308_v1  ;;  %v1440_v21 = vshll.u32 %v7243_v8, 16  ;;  %v1444_v22 = vshrl.u32 %v7243_v8, 16  ;;  %v1450_v23 = vshll.u32 %v7244_v9, 16  ;;  %v7929_v8 = vld [vmem:[%s8388_s8 + $0x24] sm:$0xff]  ;;  %v7913_v9 = vld [vmem:[%s8388_s8 + $0x18] sm:$0xff] }
  0x22   : > { %v8429_v25 = vpack.c.b16 %v1793_v16, %v1792_v11  ;;  %v1433_v26 = vrot.slane %v1431_v18, 4  ;;  %v1436_v27 = vrot.slane %v1434_v19, 5  ;;  %v309_v29 = vsel %vm8404_vm4, %v304_v17, %v308_v1  ;;  %v7247_v1 = vld [vmem:[%s8388_s8 + $0x2c] sm:$0x1]  ;;  %v226_v16 = vld [vmem:[%s8388_s8 + $0x24] sm:$0xf] }
  0x23   : > { %v314_v30 = vrot.slane %v313_v20, 4  ;;  %v1442_v31 = vrot.slane %v1440_v21, 5  ;;  %v1446_v32 = vrot.slane %v1444_v22, 4  ;;  %v1452_v34 = vrot.slane %v1450_v23, 5  ;;  %v227_v17 = vld [vmem:[%s8388_s8 + $0x28] sm:$0xf] }
  0x24   : > { %7224 = vmatmul.msk.bf16.gmra.mxu2 %vm706_vm1, %v7928_v12  ;;  %7111 = vmatmul.msk.bf16.gmra.mxu1 %vm706_vm1, %v7912_v13  ;;  %v1437_v33 = vor.u32 %v1436_v27, %v1433_v26  ;;  %v321_v35 = vshrl.u32 %v224_v24, 16  ;;  %v324_v39 = vshll.u32 %v224_v24, 16  ;;  %v330_v40 = vshll.u32 %v225_v28, 16 }
  0x25   : > { %7288 = vmatmul.msk.bf16.vlgmr.msra.gmra.mxu3 %vm706_vm1, %v8429_v25  ;;  %v319_v36 = vsel %vm8404_vm4, %v314_v30, %v318_v15  ;;  %v1447_v37 = vor.u32 %v1446_v32, %v1442_v31  ;;  %v660_v41 = vunpack.c.l.b16 %v309_v29  ;;  %v334_v45 = vshrl.u32 %v225_v28, 16  ;;  %v7248_v28 = vld [vmem:[%s8388_s8 + $0x30] sm:$0xf]  ;;  %v7249_v29 = vld [vmem:[%s8388_s8 + $0x34] sm:$0xf] }
  0x26   : > { %v1438_v42 = vrot.slane %v1437_v33, 4  ;;  %v323_v44 = vrot.slane %v321_v35, 4  ;;  %v661_v46 = vunpack.c.l.b16 %v319_v36  ;;  %v326_v48 = vrot.slane %v324_v39, 5  ;;  %v256_v36 = vld [vmem:[%s8388_s8 + $0x2c] sm:$0x1] }
  0x27   : > { %v1448_v47 = vrot.slane %v1447_v37, 4  ;;  %v332_v49 = vrot.slane %v330_v40, 5  ;;  %v336_v51 = vrot.slane %v334_v45, 4  ;;  %v340_v56 = vshll.u32 %v255_v43, 16 }
  0x28   : > { %v1443_v53 = vsel %vm8404_vm4, %v1438_v42, %v1442_v31  ;;  %v327_v55 = vor.u32 %v326_v48, %v323_v44  ;;  %v1455_v57 = vshrl.u32 %v7245_v50, 16  ;;  %v1458_v58 = vshll.u32 %v7245_v50, 16 }
  0x29   : > { %v1453_v54 = vsel %vm8404_vm4, %v1448_v47, %v1452_v34  ;;  %v8447_v59 = vpack.c.b16 %v661_v46, %v660_v41  ;;  %v337_v60 = vor.u32 %v336_v51, %v332_v49  ;;  %v1464_v61 = vshll.u32 %v7246_v52, 16 }
  0x2a   : > { %v1468_v62 = vshrl.u32 %v7246_v52, 16  ;;  %v1794_v63 = vunpack.c.l.b16 %v1443_v53  ;;  %v1795_v0 = vunpack.c.l.b16 %v1453_v54  ;;  %v1457_v2 = vrot.slane %v1455_v57, 4  ;;  %v7250_v54 = vld [vmem:[%s8388_s8 + $0x38] sm:$0x1] }
  0x2b   : > { %v1460_v3 = vrot.slane %v1458_v58, 5  ;;  %v1466_v4 = vrot.slane %v1464_v61, 5  ;;  %v328_v7 = vrot.slane %v327_v55, 4  ;;  %v338_v10 = vrot.slane %v337_v60, 4  ;;  %v7930_v55 = vld [vmem:[%s8388_s8 + $0x30] sm:$0xff] }
  0x2c   : > { %v1470_v6 = vrot.slane %v1468_v62, 4  ;;  %v342_v11 = vrot.slane %v340_v56, 5  ;;  %v1474_v12 = vshll.u32 %v7247_v1, 16  ;;  %v8454_v13 = vpack.c.b16 %v1795_v0, %v1794_v63  ;;  %v7914_v56 = vld [vmem:[%s8388_s8 + $0x24] sm:$0xff]  ;;  %v228_v61 = vld [vmem:[%s8388_s8 + $0x30] sm:$0xf] }
  0x2d   : > { %v1461_v14 = vor.u32 %v1460_v3, %v1457_v2  ;;  %v333_v18 = vsel %vm8404_vm4, %v328_v7, %v332_v49  ;;  %v345_v21 = vshrl.u32 %v226_v16, 16  ;;  %v348_v22 = vshll.u32 %v226_v16, 16  ;;  %v229_v62 = vld [vmem:[%s8388_s8 + $0x34] sm:$0xf] }
  0x2e   : > { %v1471_v15 = vor.u32 %v1470_v6, %v1466_v4  ;;  %v343_v19 = vsel %vm8404_vm4, %v338_v10, %v342_v11  ;;  %v1476_v20 = vrot.slane %v1474_v12, 5  ;;  %v354_v26 = vshll.u32 %v227_v17, 16 }
  0x2f   : > { %v1462_v23 = vrot.slane %v1461_v14, 4  ;;  %v358_v27 = vshrl.u32 %v227_v17, 16  ;;  %v662_v30 = vunpack.c.l.b16 %v333_v18  ;;  %v663_v31 = vunpack.c.l.b16 %v343_v19 }
  0x30   : > { %v1472_v24 = vrot.slane %v1471_v15, 4  ;;  %v347_v32 = vrot.slane %v345_v21, 4  ;;  %v350_v33 = vrot.slane %v348_v22, 5  ;;  %v356_v37 = vrot.slane %v354_v26, 5  ;;  %v7252_v15 = vld [vmem:[%s8388_s8 + $0x40] sm:$0xf] }
  0x31   : > { %7031 = vmatmul.msk.bf16.gmra.mxu0 %vm706_vm1, %v8447_v59  ;;  %v1467_v34 = vsel %vm8404_vm4, %v1462_v23, %v1466_v4  ;;  %v360_v39 = vrot.slane %v358_v27, 4  ;;  %v1479_v40 = vshrl.u32 %v7248_v28, 16  ;;  %v1482_v41 = vshll.u32 %v7248_v28, 16 }
  0x32   : > { %v1477_v35 = vsel %vm8404_vm4, %v1472_v24, %v1476_v20  ;;  %v1488_v42 = vshll.u32 %v7249_v29, 16  ;;  %v1492_v43 = vshrl.u32 %v7249_v29, 16  ;;  %v8473_v44 = vpack.c.b16 %v663_v31, %v662_v30  ;;  %v257_v24 = vld [vmem:[%s8388_s8 + $0x38] sm:$0x1] }
  0x33   : > { %v364_v45 = vshll.u32 %v256_v36, 16  ;;  %v1796_v46 = vunpack.c.l.b16 %v1467_v34  ;;  %v1797_v47 = vunpack.c.l.b16 %v1477_v35  ;;  %v351_v48 = vor.u32 %v350_v33, %v347_v32 }
  0x34   : > { %7225 = vmatmul.msk.bf16.gmra.mxu2 %vm706_vm1, %v7929_v8  ;;  %7112 = vmatmul.msk.bf16.gmra.mxu1 %vm706_vm1, %v7913_v9  ;;  %v361_v49 = vor.u32 %v360_v39, %v356_v37  ;;  %v1481_v50 = vrot.slane %v1479_v40, 4  ;;  %v1484_v51 = vrot.slane %v1482_v41, 5  ;;  %v1490_v52 = vrot.slane %v1488_v42, 5  ;;  %v7251_v8 = vld [vmem:[%s8388_s8 + $0x3c] sm:$0xf] }
  0x35   : > { %7289 = vmatmul.msk.bf16.gmra.mxu3 %vm706_vm1, %v8454_v13  ;;  %v1494_v53 = vrot.slane %v1492_v43, 4  ;;  %v8480_v57 = vpack.c.b16 %v1797_v47, %v1796_v46  ;;  %v352_v58 = vrot.slane %v351_v48, 4  ;;  %v366_v60 = vrot.slane %v364_v45, 5  ;;  %v7253_v41 = vld [vmem:[%s8388_s8 + $0x44] sm:$0x1]  ;;  %v7931_v43 = vld [vmem:[%s8388_s8 + $0x3c] sm:$0xff] }
  0x36   : > { %v362_v63 = vrot.slane %v361_v49, 4  ;;  %v1485_v0 = vor.u32 %v1484_v51, %v1481_v50  ;;  %v1498_v2 = vshll.u32 %v7250_v54, 16  ;;  %v369_v3 = vshrl.u32 %v228_v61, 16  ;;  %v7915_v45 = vld [vmem:[%s8388_s8 + $0x30] sm:$0xff]  ;;  %v230_v50 = vld [vmem:[%s8388_s8 + $0x3c] sm:$0xf] }
  0x37   : > { %v1495_v1 = vor.u32 %v1494_v53, %v1490_v52  ;;  %v372_v4 = vshll.u32 %v228_v61, 16  ;;  %v378_v6 = vshll.u32 %v229_v62, 16  ;;  %v382_v7 = vshrl.u32 %v229_v62, 16  ;;  %v231_v53 = vld [vmem:[%s8388_s8 + $0x40] sm:$0xf] }
  0x38   : > { %v357_v9 = vsel %vm8404_vm4, %v352_v58, %v356_v37  ;;  %v367_v10 = vsel %vm8404_vm4, %v362_v63, %v366_v60  ;;  %v1486_v11 = vrot.slane %v1485_v0, 4  ;;  %v1500_v14 = vrot.slane %v1498_v2, 5  ;;  %v7254_v63 = vld [vmem:[%s8388_s8 + $0x48] sm:$0xf]  ;;  %v7255_v0 = vld [vmem:[%s8388_s8 + $0x4c] sm:$0xf] }
  0x39   : > { %v1496_v12 = vrot.slane %v1495_v1, 4  ;;  %v1503_v16 = vshrl.u32 %v7251_v8, 16  ;;  %v1506_v17 = vshll.u32 %v7251_v8, 16  ;;  %v371_v18 = vrot.slane %v369_v3, 4 }
  0x3a   : > { %v374_v19 = vrot.slane %v372_v4, 5  ;;  %v380_v20 = vrot.slane %v378_v6, 5  ;;  %v384_v21 = vrot.slane %v382_v7, 4  ;;  %v664_v22 = vunpack.c.l.b16 %v357_v9 }
  0x3b   : > { %v665_v23 = vunpack.c.l.b16 %v367_v10  ;;  %v1491_v26 = vsel %vm8404_vm4, %v1486_v11, %v1490_v52  ;;  %v1501_v27 = vsel %vm8404_vm4, %v1496_v12, %v1500_v14  ;;  %v1512_v28 = vshll.u32 %v7252_v15, 16 }
  0x3c   : > { %v1516_v29 = vshrl.u32 %v7252_v15, 16  ;;  %v1505_v30 = vrot.slane %v1503_v16, 4  ;;  %v1508_v31 = vrot.slane %v1506_v17, 5  ;;  %v375_v32 = vor.u32 %v374_v19, %v371_v18  ;;  %v258_v17 = vld [vmem:[%s8388_s8 + $0x44] sm:$0x1] }
  0x3d   : > { %v385_v33 = vor.u32 %v384_v21, %v380_v20  ;;  %v388_v34 = vshll.u32 %v257_v24, 16  ;;  %v8499_v35 = vpack.c.b16 %v665_v23, %v664_v22  ;;  %v1798_v36 = vunpack.c.l.b16 %v1491_v26 }
  0x3e   : > { %v1799_v37 = vunpack.c.l.b16 %v1501_v27  ;;  %v1514_v39 = vrot.slane %v1512_v28, 5  ;;  %v1518_v40 = vrot.slane %v1516_v29, 4  ;;  %v1509_v42 = vor.u32 %v1508_v31, %v1505_v30  ;;  %v7256_v29 = vld [vmem:[%s8388_s8 + $0x50] sm:$0x1]  ;;  %v7932_v30 = vld [vmem:[%s8388_s8 + $0x48] sm:$0xff]  ;;  %v7916_v31 = vld [vmem:[%s8388_s8 + $0x3c] sm:$0xff] }
  0x3f   : > { %v376_v46 = vrot.slane %v375_v32, 4  ;;  %v386_v47 = vrot.slane %v385_v33, 4  ;;  %v390_v48 = vrot.slane %v388_v34, 5  ;;  %v1522_v52 = vshll.u32 %v7253_v41, 16  ;;  %v232_v41 = vld [vmem:[%s8388_s8 + $0x48] sm:$0xf] }
  0x40   : > { %v8506_v49 = vpack.c.b16 %v1799_v37, %v1798_v36  ;;  %v1519_v51 = vor.u32 %v1518_v40, %v1514_v39  ;;  %v1510_v54 = vrot.slane %v1509_v42, 4  ;;  %v393_v58 = vshrl.u32 %v230_v50, 16  ;;  %v233_v42 = vld [vmem:[%s8388_s8 + $0x4c] sm:$0xf] }
  0x41   : > { %7032 = vmatmul.msk.bf16.gmra.mxu0 %vm706_vm1, %v8473_v44  ;;  %v396_v60 = vshll.u32 %v230_v50, 16  ;;  %v402_v61 = vshll.u32 %v231_v53, 16  ;;  %v406_v62 = vshrl.u32 %v231_v53, 16  ;;  %v1524_v2 = vrot.slane %v1522_v52, 5 }
  0x42   : > { %v1520_v1 = vrot.slane %v1519_v51, 4  ;;  %v1515_v6 = vsel %vm8404_vm4, %v1510_v54, %v1514_v39  ;;  %v1527_v7 = vshrl.u32 %v7254_v63, 16  ;;  %v1530_v8 = vshll.u32 %v7254_v63, 16  ;;  %v7257_v54 = vld [vmem:[%s8388_s8 + $0x54] sm:$0xf] }
  0x43   : > { %v1536_v9 = vshll.u32 %v7255_v0, 16  ;;  %v1540_v10 = vshrl.u32 %v7255_v0, 16  ;;  %v395_v11 = vrot.slane %v393_v58, 4  ;;  %v398_v12 = vrot.slane %v396_v60, 5 }
  0x44   : > { %7226 = vmatmul.msk.bf16.gmra.mxu2 %vm706_vm1, %v7930_v55  ;;  %7113 = vmatmul.msk.bf16.gmra.mxu1 %vm706_vm1, %v7914_v56  ;;  %v381_v55 = vsel %vm8404_vm4, %v376_v46, %v380_v20  ;;  %v391_v56 = vsel %vm8404_vm4, %v386_v47, %v390_v48  ;;  %v404_v14 = vrot.slane %v402_v61, 5  ;;  %v408_v15 = vrot.slane %v406_v62, 4 }
  0x45   : > { %7290 = vmatmul.msk.bf16.gmra.mxu3 %vm706_vm1, %v8480_v57  ;;  %v666_v3 = vunpack.c.l.b16 %v381_v55  ;;  %v667_v4 = vunpack.c.l.b16 %v391_v56  ;;  %v1525_v16 = vsel %vm8404_vm4, %v1520_v1, %v1524_v2  ;;  %v1800_v19 = vunpack.c.l.b16 %v1515_v6  ;;  %v7258_v55 = vld [vmem:[%s8388_s8 + $0x58] sm:$0xf]  ;;  %v259_v2 = vld [vmem:[%s8388_s8 + $0x50] sm:$0x1] }
  0x46   : > { %v1529_v20 = vrot.slane %v1527_v7, 4  ;;  %v1532_v21 = vrot.slane %v1530_v8, 5  ;;  %v1538_v22 = vrot.slane %v1536_v9, 5  ;;  %v1542_v23 = vrot.slane %v1540_v10, 4 }
  0x47   : > { %v8525_v18 = vpack.c.b16 %v667_v4, %v666_v3  ;;  %v1801_v24 = vunpack.c.l.b16 %v1525_v16  ;;  %v399_v26 = vor.u32 %v398_v12, %v395_v11  ;;  %v409_v27 = vor.u32 %v408_v15, %v404_v14 }
  0x48   : > { %v412_v28 = vshll.u32 %v258_v17, 16  ;;  %v1533_v32 = vor.u32 %v1532_v21, %v1529_v20  ;;  %v1543_v33 = vor.u32 %v1542_v23, %v1538_v22  ;;  %v1546_v34 = vshll.u32 %v7256_v29, 16  ;;  %v7259_v20 = vld [vmem:[%s8388_s8 + $0x5c] sm:$0x1]  ;;  %v7933_v21 = vld [vmem:[%s8388_s8 + $0x54] sm:$0xff] }
  0x49   : > { %v8532_v36 = vpack.c.b16 %v1801_v24, %v1800_v19  ;;  %v400_v37 = vrot.slane %v399_v26, 4  ;;  %v410_v39 = vrot.slane %v409_v27, 4  ;;  %v417_v50 = vshrl.u32 %v232_v41, 16  ;;  %v234_v23 = vld [vmem:[%s8388_s8 + $0x54] sm:$0xf] }
  0x4a   : > { %v414_v40 = vrot.slane %v412_v28, 5  ;;  %v1548_v46 = vrot.slane %v1546_v34, 5  ;;  %v420_v51 = vshll.u32 %v232_v41, 16  ;;  %v426_v52 = vshll.u32 %v233_v42, 16  ;;  %v235_v28 = vld [vmem:[%s8388_s8 + $0x58] sm:$0xf] }
  0x4b   : > { %v405_v47 = vsel %vm8404_vm4, %v400_v37, %v404_v14  ;;  %v430_v53 = vshrl.u32 %v233_v42, 16  ;;  %v419_v62 = vrot.slane %v417_v50, 4  ;;  %v1551_v0 = vshrl.u32 %v7257_v54, 16  ;;  %v7261_v41 = vld [vmem:[%s8388_s8 + $0x64] sm:$0xf] }
  0x4c   : > { %v415_v48 = vsel %vm8404_vm4, %v410_v39, %v414_v40  ;;  %v668_v56 = vunpack.c.l.b16 %v405_v47  ;;  %v422_v63 = vrot.slane %v420_v51, 5  ;;  %v1554_v1 = vshll.u32 %v7257_v54, 16  ;;  %v7260_v40 = vld [vmem:[%s8388_s8 + $0x60] sm:$0xf] }
  0x4d   : > { %v669_v58 = vunpack.c.l.b16 %v415_v48  ;;  %v428_v3 = vrot.slane %v426_v52, 5  ;;  %v432_v4 = vrot.slane %v430_v53, 4  ;;  %v1560_v6 = vshll.u32 %v7258_v55, 16 }
  0x4e   : > { %v1564_v7 = vshrl.u32 %v7258_v55, 16  ;;  %v423_v11 = vor.u32 %v422_v63, %v419_v62  ;;  %v436_v12 = vshll.u32 %v259_v2, 16  ;;  %v1553_v14 = vrot.slane %v1551_v0, 4 }
  0x4f   : > { %v8551_v8 = vpack.c.b16 %v669_v58, %v668_v56  ;;  %v433_v15 = vor.u32 %v432_v4, %v428_v3  ;;  %v1556_v16 = vrot.slane %v1554_v1, 5  ;;  %v1562_v17 = vrot.slane %v1560_v6, 5 }
  0x50   : > { %v1566_v19 = vrot.slane %v1564_v7, 4  ;;  %v424_v26 = vrot.slane %v423_v11, 4  ;;  %v438_v27 = vrot.slane %v436_v12, 5  ;;  %v444_v34 = vshll.u32 %v234_v23, 16 }
  0x51   : > { %7033 = vmatmul.msk.bf16.gmra.mxu0 %vm706_vm1, %v8499_v35  ;;  %v434_v29 = vrot.slane %v433_v15, 4  ;;  %v450_v37 = vshll.u32 %v235_v28, 16  ;;  %v454_v39 = vshrl.u32 %v235_v28, 16  ;;  %v1575_v48 = vshrl.u32 %v7260_v40, 16 }
  0x52   : > { %v429_v42 = vsel %vm8404_vm4, %v424_v26, %v428_v3  ;;  %v1578_v50 = vshll.u32 %v7260_v40, 16  ;;  %v1584_v51 = vshll.u32 %v7261_v41, 16  ;;  %v1588_v52 = vshrl.u32 %v7261_v41, 16  ;;  %v236_v26 = vld [vmem:[%s8388_s8 + $0x60] sm:$0xf] }
  0x53   : > { %v446_v54 = vrot.slane %v444_v34, 5  ;;  %v452_v55 = vrot.slane %v450_v37, 5  ;;  %v456_v56 = vrot.slane %v454_v39, 4  ;;  %v670_v58 = vunpack.c.l.b16 %v429_v42  ;;  %v7263_v40 = vld [vmem:[%s8388_s8 + $0x6c] sm:$0xf] }
  0x54   : > { %7227 = vmatmul.msk.bf16.gmra.mxu2 %vm706_vm1, %v7931_v43  ;;  %7114 = vmatmul.msk.bf16.gmra.mxu1 %vm706_vm1, %v7915_v45  ;;  %v1534_v43 = vrot.slane %v1533_v32, 4  ;;  %v1544_v45 = vrot.slane %v1543_v33, 4  ;;  %v1570_v32 = vshll.u32 %v7259_v20, 16  ;;  %v441_v33 = vshrl.u32 %v234_v23, 16  ;;  %v7264_v41 = vld [vmem:[%s8388_s8 + $0x70] sm:$0xf] }
  0x55   : > { %7291 = vmatmul.msk.bf16.gmra.mxu3 %vm706_vm1, %v8506_v49  ;;  %v1577_v0 = vrot.slane %v1575_v48, 4  ;;  %v1580_v1 = vrot.slane %v1578_v50, 5  ;;  %v1586_v2 = vrot.slane %v1584_v51, 5  ;;  %v1590_v3 = vrot.slane %v1588_v52, 4 }
  0x56   : > { %v1539_v60 = vsel %vm8404_vm4, %v1534_v43, %v1538_v22  ;;  %v1549_v61 = vsel %vm8404_vm4, %v1544_v45, %v1548_v46  ;;  %v7917_v22 = vld [vmem:[%s8388_s8 + $0x48] sm:$0xff]  ;;  %v439_v43 = vsel %vm8404_vm4, %v434_v29, %v438_v27  ;;  %v1572_v47 = vrot.slane %v1570_v32, 5  ;;  %v237_v27 = vld [vmem:[%s8388_s8 + $0x64] sm:$0xf] }
  0x57   : > { %v1802_v9 = vunpack.c.l.b16 %v1539_v60  ;;  %v1803_v10 = vunpack.c.l.b16 %v1549_v61  ;;  %v443_v53 = vrot.slane %v441_v33, 4  ;;  %v671_v60 = vunpack.c.l.b16 %v439_v43  ;;  %v260_v61 = vld [vmem:[%s8388_s8 + $0x5c] sm:$0x1] }
  0x58   : > { %v457_v6 = vor.u32 %v456_v56, %v452_v55  ;;  %v460_v7 = vshll.u32 %v260_v61, 16  ;;  %v1591_v15 = vor.u32 %v1590_v3, %v1586_v2  ;;  %v465_v33 = vshrl.u32 %v236_v26, 16  ;;  %v261_v56 = vld [vmem:[%s8388_s8 + $0x68] sm:$0x1]  ;;  %v7265_v3 = vld [vmem:[%s8388_s8 + $0x74] sm:$0x1] }
  0x59   : > { %v8559_v24 = vpack.c.b16 %v1803_v10, %v1802_v9  ;;  %v447_v4 = vor.u32 %v446_v54, %v443_v53  ;;  %v7262_v9 = vld [vmem:[%s8388_s8 + $0x68] sm:$0x1]  ;;  %v8578_v10 = vpack.c.b16 %v671_v60, %v670_v58  ;;  %v468_v34 = vshll.u32 %v236_v26, 16 }
  0x5a   : > { %v1592_v29 = vrot.slane %v1591_v15, 4  ;;  %v474_v37 = vshll.u32 %v237_v27, 16  ;;  %v478_v39 = vshrl.u32 %v237_v27, 16  ;;  %v1599_v50 = vshrl.u32 %v7263_v40, 16 }
  0x5b   : > { %v448_v20 = vrot.slane %v447_v4, 4  ;;  %v470_v48 = vrot.slane %v468_v34, 5  ;;  %v1602_v51 = vshll.u32 %v7263_v40, 16  ;;  %v1608_v54 = vshll.u32 %v7264_v41, 16 }
  0x5c   : > { %v476_v52 = vrot.slane %v474_v37, 5  ;;  %v480_v53 = vrot.slane %v478_v39, 4  ;;  %v1618_v15 = vshll.u32 %v7265_v3, 16  ;;  %vm6878_vm10 = vcmask 1040384  }
  0x5d   : > { %v1610_v4 = vrot.slane %v1608_v54, 5  ;;  %vm6880_vm11 = vcmask 58368  }
  0x5e   : > { %v1620_v39 = vrot.slane %v1618_v15, 5 }
  0x61   : > { %7034 = vmatmul.msk.bf16.gmra.mxu0 %vm706_vm1, %v8525_v18 }
  0x64   : > { %7228 = vmatmul.msk.bf16.gmra.mxu2 %vm706_vm1, %v7932_v30  ;;  %7115 = vmatmul.msk.bf16.gmra.mxu1 %vm706_vm1, %v7916_v31  ;;  %v1557_v30 = vor.u32 %v1556_v16, %v1553_v14  ;;  %v1567_v31 = vor.u32 %v1566_v19, %v1562_v17  ;;  %v1581_v14 = vor.u32 %v1580_v1, %v1577_v0  ;;  %v1594_v16 = vshll.u32 %v7262_v9, 16  ;;  %v7918_v19 = vld [vmem:[%s8388_s8 + $0x54] sm:$0xff] }
  0x65   : > { %7292 = vmatmul.msk.bf16.gmra.mxu3 %vm706_vm1, %v8532_v36  ;;  %v1604_v0 = vrot.slane %v1602_v51, 5  ;;  %v481_v1 = vor.u32 %v480_v53, %v476_v52  ;;  %v262_v51 = vld [vmem:[%s8388_s8 + $0x74] sm:$0x1] }
  0x66   : > { %v1558_v45 = vrot.slane %v1557_v30, 4  ;;  %v1568_v46 = vrot.slane %v1567_v31, 4  ;;  %v1582_v28 = vrot.slane %v1581_v14, 4  ;;  %v1596_v30 = vrot.slane %v1594_v16, 5  ;;  %v239_v16 = vld [vmem:[%s8388_s8 + $0x70] sm:$0xf] }
  0x67   : > { %v453_v31 = vsel %vm8404_vm4, %v448_v20, %v452_v55  ;;  %v1612_v55 = vshrl.u32 %v7264_v41, 16  ;;  %v482_v20 = vrot.slane %v481_v1, 4  ;;  %v7268_v1 = vld [vmem:[%s8388_s8 + $0x80] sm:$0x1] }
  0x68   : > { %v1563_v62 = vsel %vm8404_vm4, %v1558_v45, %v1562_v17  ;;  %v1573_v63 = vsel %vm8404_vm4, %v1568_v46, %v1572_v47  ;;  %v7934_v17 = vld [vmem:[%s8388_s8 + $0x60] sm:$0xff]  ;;  %v672_v42 = vunpack.c.l.b16 %v453_v31  ;;  %v1587_v45 = vsel %vm8404_vm4, %v1582_v28, %v1586_v2 }
  0x69   : > { %v1804_v11 = vunpack.c.l.b16 %v1563_v62  ;;  %v1805_v12 = vunpack.c.l.b16 %v1573_v63  ;;  %v1597_v46 = vsel %vm8404_vm4, %v1592_v29, %v1596_v30  ;;  %v467_v47 = vrot.slane %v465_v33, 4  ;;  %v7266_v30 = vld [vmem:[%s8388_s8 + $0x78] sm:$0xf] }
  0x6a   : > { %v1806_v60 = vunpack.c.l.b16 %v1587_v45  ;;  %v1807_v61 = vunpack.c.l.b16 %v1597_v46  ;;  %v1601_v63 = vrot.slane %v1599_v50, 4  ;;  %v484_v2 = vshll.u32 %v261_v56, 16 }
  0x6b   : > { %v8584_v23 = vpack.c.b16 %v1805_v12, %v1804_v11  ;;  %v471_v62 = vor.u32 %v470_v48, %v467_v47  ;;  %v7935_v11 = vld [vmem:[%s8388_s8 + $0x6c] sm:$0xff]  ;;  %v7919_v12 = vld [vmem:[%s8388_s8 + $0x60] sm:$0xff]  ;;  %v498_v28 = vshll.u32 %v239_v16, 16  ;;  %v502_v29 = vshrl.u32 %v239_v16, 16 }
  0x6c   : > { %v8607_v9 = vpack.c.b16 %v1807_v61, %v1806_v60  ;;  %v1605_v14 = vor.u32 %v1604_v0, %v1601_v63  ;;  %v508_v0 = vshll.u32 %v262_v51, 16  ;;  %v1642_v15 = vshll.u32 %v7268_v1, 16 }
  0x6d   : > { %v500_v46 = vrot.slane %v498_v28, 5  ;;  %v504_v47 = vrot.slane %v502_v29, 4 }
  0x6e   : > { %v1606_v31 = vrot.slane %v1605_v14, 4 }
  0x6f   : > { %v505_v63 = vor.u32 %v504_v47, %v500_v46  ;;  %v7270_v47 = vld [vmem:[%s8388_s8 + $0x88] sm:$0xf] }
  0x70   : > { %v1656_v1 = vshll.u32 %v7270_v47, 16 }
  0x71   : > { %7035 = vmatmul.msk.bf16.gmra.mxu0 %vm706_vm1, %v8551_v8 }
  0x74   : > { %7229 = vmatmul.msk.bf16.gmra.mxu2 %vm706_vm1, %v7933_v21  ;;  %7116 = vmatmul.msk.bf16.gmra.mxu1 %vm706_vm1, %v7917_v22  ;;  %v458_v21 = vrot.slane %v457_v6, 4  ;;  %v462_v22 = vrot.slane %v460_v7, 5  ;;  %v1614_v6 = vrot.slane %v1612_v55, 4  ;;  %v238_v7 = vld [vmem:[%s8388_s8 + $0x6c] sm:$0xf] }
  0x75   : > { %7293 = vmatmul.msk.bf16.gmra.mxu3 %vm706_vm1, %v8559_v24  ;;  %v489_v26 = vshrl.u32 %v238_v7, 16  ;;  %v492_v27 = vshll.u32 %v238_v7, 16 }
  0x76   : > { %v463_v32 = vsel %vm8404_vm4, %v458_v21, %v462_v22  ;;  %v486_v21 = vrot.slane %v484_v2, 5  ;;  %v1615_v22 = vor.u32 %v1614_v6, %v1610_v4 }
  0x77   : > { %v673_v43 = vunpack.c.l.b16 %v463_v32  ;;  %v7267_v32 = vld [vmem:[%s8388_s8 + $0x7c] sm:$0xf]  ;;  %v491_v40 = vrot.slane %v489_v26, 4  ;;  %v494_v41 = vrot.slane %v492_v27, 5  ;;  %v7920_v27 = vld [vmem:[%s8388_s8 + $0x6c] sm:$0xff] }
  0x78   : > { %v487_v34 = vsel %vm8404_vm4, %v482_v20, %v486_v21  ;;  %v1616_v37 = vrot.slane %v1615_v22, 4  ;;  %v1632_v48 = vshll.u32 %v7267_v32, 16  ;;  %v1636_v50 = vshrl.u32 %v7267_v32, 16  ;;  %v7936_v26 = vld [vmem:[%s8388_s8 + $0x78] sm:$0xff] }
  0x79   : > { %v8603_v58 = vpack.c.b16 %v673_v43, %v672_v42  ;;  %v1623_v42 = vshrl.u32 %v7266_v30, 16  ;;  %v1626_v43 = vshll.u32 %v7266_v30, 16  ;;  %v675_v55 = vunpack.c.l.b16 %v487_v34  ;;  %v241_v32 = vld [vmem:[%s8388_s8 + $0x7c] sm:$0xf] }
  0x7a   : > { %v1621_v56 = vsel %vm8404_vm4, %v1616_v37, %v1620_v39  ;;  %v495_v60 = vor.u32 %v494_v41, %v491_v40  ;;  %v1634_v2 = vrot.slane %v1632_v48, 5  ;;  %v1638_v3 = vrot.slane %v1636_v50, 4 }
  0x7b   : > { %v1625_v61 = vrot.slane %v1623_v42, 4  ;;  %v506_v20 = vrot.slane %v505_v63, 4  ;;  %v510_v21 = vrot.slane %v508_v0, 5  ;;  %v1644_v39 = vrot.slane %v1642_v15, 5 }
  0x7c   : > { %v1639_v22 = vor.u32 %v1638_v3, %v1634_v2  ;;  %v522_v42 = vshll.u32 %v241_v32, 16 }
  0x7d   : > { %v511_v34 = vsel %vm8404_vm4, %v506_v20, %v510_v21 }
  0x7e   : > { %v1640_v37 = vrot.slane %v1639_v22, 4  ;;  %v677_v50 = vunpack.c.l.b16 %v511_v34  ;;  %v8654_v0 = vrot.slane %v522_v42, 5  ;;  %v242_v34 = vld [vmem:[%s8388_s8 + $0x84] sm:$0xf] }
  0x81   : > { %7036 = vmatmul.msk.bf16.gmra.mxu0 %vm706_vm1, %v8578_v10 }
  0x84   : > { %7230 = vmatmul.msk.bf16.gmra.mxu2 %vm706_vm1, %v7934_v17  ;;  %7117 = vmatmul.msk.bf16.gmra.mxu1 %vm706_vm1, %v7918_v19  ;;  %v472_v19 = vrot.slane %v471_v62, 4  ;;  %v1628_v62 = vrot.slane %v1626_v43, 5  ;;  %v7269_v43 = vld [vmem:[%s8388_s8 + $0x84] sm:$0xf] }
  0x85   : > { %7294 = vmatmul.msk.bf16.gmra.mxu3 %vm706_vm1, %v8584_v23 }
  0x86   : > { %v477_v33 = vsel %vm8404_vm4, %v472_v19, %v476_v52  ;;  %v1611_v52 = vsel %vm8404_vm4, %v1606_v31, %v1610_v4  ;;  %v496_v4 = vrot.slane %v495_v60, 4  ;;  %v1629_v14 = vor.u32 %v1628_v62, %v1625_v61  ;;  %v240_v31 = vld [vmem:[%s8388_s8 + $0x78] sm:$0xf] }
  0x87   : > { %v674_v54 = vunpack.c.l.b16 %v477_v33  ;;  %v1808_v7 = vunpack.c.l.b16 %v1611_v52  ;;  %v513_v40 = vshrl.u32 %v240_v31, 16  ;;  %v516_v41 = vshll.u32 %v240_v31, 16 }
  0x88   : > { %v1630_v33 = vrot.slane %v1629_v14, 4  ;;  %v1645_v52 = vsel %vm8404_vm4, %v1640_v37, %v1644_v39  ;;  %v1650_v60 = vshll.u32 %v7269_v43, 16  ;;  %v243_v37 = vld [vmem:[%s8388_s8 + $0x88] sm:$0xf] }
  0x89   : > { %v8630_v6 = vpack.c.b16 %v675_v55, %v674_v54  ;;  %v515_v62 = vrot.slane %v513_v40, 4  ;;  %v518_v63 = vrot.slane %v516_v41, 5  ;;  %v1811_v14 = vunpack.c.l.b16 %v1645_v52  ;;  %v7937_v40 = vld [vmem:[%s8388_s8 + $0x84] sm:$0xff]  ;;  %v7921_v41 = vld [vmem:[%s8388_s8 + $0x78] sm:$0xff] }
  0x8a   : > { %v1635_v51 = vsel %vm8404_vm4, %v1630_v33, %v1634_v2  ;;  %v1652_v21 = vrot.slane %v1650_v60, 5  ;;  %v540_v52 = vshll.u32 %v242_v34, 16  ;;  %v7272_v60 = vld [vmem:[%s8388_s8 + $0x90] sm:$0xf] }
  0x8b   : > { %v519_v15 = vor.u32 %v518_v63, %v515_v62 }
  0x8d   : > { %v520_v42 = vrot.slane %v519_v15, 4 }
  0x8f   : > { %v525_v62 = vsel %vm8404_vm4, %v520_v42, %v8654_v0 }
  0x91   : > { %7037 = vmatmul.msk.bf16.gmra.mxu0 %vm706_vm1, %v8603_v58  ;;  %v988_v17 = vpop.f32.mrf.mxu1 }
  0x94   : > { %7231 = vmatmul.msk.bf16.gmra.mxu2 %vm706_vm1, %v7935_v11  ;;  %7118 = vmatmul.msk.bf16.gmra.mxu1 %vm706_vm1, %v7919_v12  ;;  %v1809_v11 = vunpack.c.l.b16 %v1621_v56  ;;  %v1647_v56 = vshrl.u32 %v7269_v43, 16 }
  0x95   : > { %7295 = vmatmul.msk.bf16.gmra.mxu3 %vm706_vm1, %v8607_v9 }
  0x96   : > { %v8636_v28 = vpack.c.b16 %v1809_v11, %v1808_v7  ;;  %v1649_v20 = vrot.slane %v1647_v56, 4  ;;  %v546_v56 = vshll.u32 %v243_v37, 16 }
  0x97   : > { %v1246_v45 = vpop.f32.mrf.mxu2 }
  0x98   : > { %v548_v15 = vrot.slane %v546_v56, 5 }
  0x99   : > { %v990_v53 = vpop.f32.mrf.mxu1 }
  0x9e   : > { %v768_v12 = vpop.f32.mrf.mxu0 }
  0x9f   : > { %v989_v16 = vadd.f32 %v988_v17, %v768_v12  ;;  %v1248_v19 = vpop.f32.mrf.mxu2  ;;  %v501_v17 = vsel %vm8404_vm4, %v496_v4, %v500_v46  ;;  %v263_v12 = vld [vmem:[%s8388_s8 + $0x80] sm:$0x1]  ;;  %v1810_v4 = vunpack.c.l.b16 %v1635_v51 }
  0xa0   : > { %v676_v46 = vunpack.c.l.b16 %v501_v17 }
  0xa1   : > { %7038 = vmatmul.msk.bf16.gmra.mxu0 %vm706_vm1, %v8630_v6  ;;  %v1326_v29 = vadd.f32 %v1246_v45, %v989_v16  ;;  %v993_v30 = vpop.f32.mrf.mxu1  ;;  %v526_v45 = vshrl.u32 %v241_v32, 16  ;;  %v532_v16 = vshll.u32 %v263_v12, 16  ;;  %v8665_v33 = vpack.c.b16 %v1811_v14, %v1810_v4 }
  0xa2   : > { %v8659_v22 = vpack.c.b16 %v677_v50, %v676_v46  ;;  %v542_v14 = vrot.slane %v540_v52, 5 }
  0xa3   : > { %v528_v2 = vrot.slane %v526_v45, 4  ;;  %v534_v43 = vrot.slane %v532_v16, 5  ;;  %v1653_v45 = vor.u32 %v1652_v21, %v1649_v20  ;;  %v1674_v16 = vshll.u32 %v7272_v60, 16 }
  0xa4   : > { %7232 = vmatmul.msk.bf16.gmra.mxu2 %vm706_vm1, %v7936_v26  ;;  %7119 = vmatmul.msk.bf16.gmra.mxu1 %vm706_vm1, %v7920_v27  ;;  %v7271_v27 = vld [vmem:[%s8388_s8 + $0x8c] sm:$0x1] }
  0xa5   : > { %7296 = vmatmul.msk.bf16.gmra.mxu3 %vm706_vm1, %v8636_v28  ;;  %v529_v26 = vor.u32 %v528_v2, %v8654_v0  ;;  %v1671_v2 = vshrl.u32 %v7272_v60, 16 }
  0xa6   : > { %v770_v48 = vpop.f32.mrf.mxu0 }
  0xa7   : > { %v991_v54 = vadd.f32 %v990_v53, %v770_v48  ;;  %v1251_v55 = vpop.f32.mrf.mxu2  ;;  %v1660_v53 = vshrl.u32 %v7270_v47, 16  ;;  %v1666_v47 = vshll.u32 %v7271_v27, 16  ;;  %v530_v50 = vrot.slane %v529_v26, 4 }
  0xa8   : > { %v1900_v61 = vpop.f32.mrf.mxu3 }
  0xa9   : > { %v8656_v3 = vadd.f32 %v1900_v61, %v1326_v29  ;;  %v1327_v7 = vadd.f32 %v1248_v19, %v991_v54  ;;  %v995_v11 = vpop.f32.mrf.mxu1  ;;  %v8663_v19 = vrot.slane %v1656_v1, 5  ;;  %v1662_v29 = vrot.slane %v1660_v53, 4  ;;  %v7273_v1 = vld [vmem:[%s8388_s8 + $0x94] sm:$0xf] }
  0xaa   : > { %v537_v54 = vshrl.u32 %v242_v34, 16  ;;  %v550_v61 = vshrl.u32 %v243_v37, 16  ;;  %v1668_v63 = vrot.slane %v1666_v47, 5  ;;  %v1680_v26 = vshll.u32 %v7273_v1, 16 }
  0xab   : > { %11472 = vst [vmem:[#allocation2_spill] sm:$0xff] %v8656_v3  ;;  %v1663_v51 = vor.u32 %v1662_v29, %v8663_v19  ;;  %v1684_v27 = vshrl.u32 %v7273_v1, 16 }
  0xac   : > { %v539_v4 = vrot.slane %v537_v54, 4  ;;  %v552_v0 = vrot.slane %v550_v61, 4  ;;  %v1682_v54 = vrot.slane %v1680_v26, 5 }
  0xad   : > { %v1664_v12 = vrot.slane %v1663_v51, 4  ;;  %v7274_v51 = vld [vmem:[%s8388_s8 + $0x98] sm:$0x1] }
  0xae   : > { %v773_v31 = vpop.f32.mrf.mxu0  ;;  %v543_v42 = vor.u32 %v542_v14, %v539_v4  ;;  %v553_v47 = vor.u32 %v552_v0, %v548_v15  ;;  %v7922_v4 = vld [vmem:[%s8388_s8 + $0x84] sm:$0xff]  ;;  %v244_v14 = vld [vmem:[%s8388_s8 + $0x90] sm:$0xf] }
  0xaf   : > { %v994_v32 = vadd.f32 %v993_v30, %v773_v31  ;;  %v1253_v17 = vpop.f32.mrf.mxu2  ;;  %v678_v31 = vunpack.c.l.b16 %v525_v62  ;;  %v1690_v62 = vshll.u32 %v7274_v51, 16 }
  0xb0   : > { %v1902_v39 = vpop.f32.mrf.mxu3 }
  0xb1   : > { %v8671_v48 = vadd.f32 %v1902_v39, %v1327_v7  ;;  %7039 = vmatmul.msk.bf16.gmra.mxu0 %vm706_vm1, %v8659_v22  ;;  %v1328_v30 = vadd.f32 %v1251_v55, %v994_v32  ;;  %v998_v46 = vpop.f32.mrf.mxu1  ;;  %v535_v55 = vsel %vm8404_vm4, %v530_v50, %v534_v43  ;;  %v1654_v7 = vrot.slane %v1653_v45, 4  ;;  %v264_v32 = vld [vmem:[%s8388_s8 + $0x8c] sm:$0x1] }
  0xb2   : > { %v1673_v43 = vrot.slane %v1671_v2, 4  ;;  %v1676_v45 = vrot.slane %v1674_v16, 5  ;;  %v556_v50 = vshll.u32 %v264_v32, 16 }
  0xb3   : > { %11473 = vst [vmem:[#allocation3_spill] sm:$0xff] %v8671_v48 }
  0xb4   : > { %7233 = vmatmul.msk.bf16.gmra.mxu2 %vm706_vm1, %v7937_v40  ;;  %7120 = vmatmul.msk.bf16.gmra.mxu1 %vm706_vm1, %v7921_v41  ;;  %v679_v40 = vunpack.c.l.b16 %v535_v55  ;;  %v1659_v41 = vsel %vm8404_vm4, %v1654_v7, %v8663_v19  ;;  %v544_v19 = vrot.slane %v543_v42, 4  ;;  %v1677_v61 = vor.u32 %v1676_v45, %v1673_v43  ;;  %v7275_v42 = vld [vmem:[%s8388_s8 + $0x9c] sm:$0xf] }
  0xb5   : > { %7297 = vmatmul.msk.bf16.gmra.mxu3 %vm706_vm1, %v8665_v33  ;;  %v1812_v52 = vunpack.c.l.b16 %v1659_v41  ;;  %v554_v55 = vrot.slane %v553_v47, 4  ;;  %v558_v7 = vrot.slane %v556_v50, 5  ;;  %v564_v41 = vshll.u32 %v244_v14, 16  ;;  %v7276_v50 = vld [vmem:[%s8388_s8 + $0xa0] sm:$0xf] }
  0xb6   : > { %v775_v53 = vpop.f32.mrf.mxu0 }
  0xb7   : > { %v996_v20 = vadd.f32 %v995_v11, %v775_v53  ;;  %v1256_v21 = vpop.f32.mrf.mxu2  ;;  %v1669_v11 = vsel %vm8404_vm4, %v1664_v12, %v1668_v63  ;;  %v7938_v53 = vld [vmem:[%s8388_s8 + $0x90] sm:$0xff]  ;;  %v559_v32 = vsel %vm8404_vm4, %v554_v55, %v558_v7  ;;  %v1698_v55 = vshll.u32 %v7275_v42, 16 }
  0xb8   : > { %v1905_v29 = vpop.f32.mrf.mxu3  ;;  %v1813_v56 = vunpack.c.l.b16 %v1669_v11  ;;  %v681_v45 = vunpack.c.l.b16 %v559_v32 }
  0xb9   : > { %v8688_v34 = vadd.f32 %v1905_v29, %v1328_v30  ;;  %v1329_v37 = vadd.f32 %v1253_v17, %v996_v20  ;;  %v1000_v39 = vpop.f32.mrf.mxu1  ;;  %v1686_v30 = vrot.slane %v1684_v27, 4  ;;  %v8696_v17 = vpack.c.b16 %v679_v40, %v678_v31  ;;  %v245_v27 = vld [vmem:[%s8388_s8 + $0x94] sm:$0xf] }
  0xba   : > { %v8705_v20 = vpack.c.b16 %v1813_v56, %v1812_v52  ;;  %v1678_v29 = vrot.slane %v1677_v61, 4  ;;  %v1692_v31 = vrot.slane %v1690_v62, 5  ;;  %v561_v40 = vshrl.u32 %v244_v14, 16 }
  0xbb   : > { %11474 = vst [vmem:[#allocation4_spill] sm:$0xff] %v8688_v34  ;;  %v1687_v12 = vor.u32 %v1686_v30, %v1682_v54  ;;  %v570_v11 = vshll.u32 %v245_v27, 16  ;;  %v1700_v32 = vrot.slane %v1698_v55, 5  ;;  %v267_v34 = vld [vmem:[%s8388_s8 + $0xb0] sm:$0x1] }
  0xbc   : > { %v1683_v47 = vsel %vm8404_vm4, %v1678_v29, %v1682_v54  ;;  %v563_v56 = vrot.slane %v561_v40, 4  ;;  %v265_v54 = vld [vmem:[%s8388_s8 + $0x98] sm:$0x1] }
  0xbd   : > { %v8722_v61 = vrot.slane %v570_v11, 5  ;;  %v580_v29 = vshll.u32 %v265_v54, 16  ;;  %v246_v11 = vld [vmem:[%s8388_s8 + $0x9c] sm:$0xf] }
  0xbe   : > { %v778_v60 = vpop.f32.mrf.mxu0  ;;  %v585_v54 = vshrl.u32 %v246_v11, 16 }
  0xbf   : > { %v999_v63 = vadd.f32 %v998_v46, %v778_v60  ;;  %v1258_v1 = vpop.f32.mrf.mxu2  ;;  %v549_v46 = vsel %vm8404_vm4, %v544_v19, %v548_v15  ;;  %v566_v60 = vrot.slane %v564_v41, 5 }
  0xc0   : > { %v1907_v2 = vpop.f32.mrf.mxu3  ;;  %v680_v43 = vunpack.c.l.b16 %v549_v46 }
  0xc1   : > { %v8701_v16 = vadd.f32 %v1907_v2, %v1329_v37  ;;  %7040 = vmatmul.msk.bf16.gmra.mxu0 %vm706_vm1, %v8696_v17  ;;  %v1330_v0 = vadd.f32 %v1256_v21, %v999_v63  ;;  %v1003_v26 = vpop.f32.mrf.mxu1  ;;  %v1688_v37 = vrot.slane %v1687_v12, 4  ;;  %v574_v21 = vshrl.u32 %v245_v27, 16 }
  0xc2   : > { %v1695_v63 = vshrl.u32 %v7275_v42, 16  ;;  %v567_v27 = vor.u32 %v566_v60, %v563_v56  ;;  %v7923_v56 = vld [vmem:[%s8388_s8 + $0x90] sm:$0xff] }
  0xc3   : > { %11475 = vst [vmem:[#allocation5_spill] sm:$0xff] %v8701_v16  ;;  %v1693_v52 = vsel %vm8404_vm4, %v1688_v37, %v1692_v31  ;;  %v576_v62 = vrot.slane %v574_v21, 4  ;;  %v8728_v37 = vpack.c.b16 %v681_v45, %v680_v43  ;;  %v7283_v16 = vld [vmem:[%s8388_s8 + $0xbc] sm:$0x1] }
  0xc4   : > { %7234 = vmatmul.msk.bf16.gmra.mxu2 %vm706_vm1, %v7938_v53  ;;  %7121 = vmatmul.msk.bf16.gmra.mxu1 %vm706_vm1, %v7922_v4  ;;  %v1708_v53 = vshrl.u32 %v7276_v50, 16  ;;  %v1814_v4 = vunpack.c.l.b16 %v1683_v47  ;;  %v1815_v14 = vunpack.c.l.b16 %v1693_v52  ;;  %v1697_v31 = vrot.slane %v1695_v63, 4  ;;  %v7939_v52 = vld [vmem:[%s8388_s8 + $0x9c] sm:$0xff] }
  0xc5   : > { %7298 = vmatmul.msk.bf16.gmra.mxu3 %vm706_vm1, %v8705_v20  ;;  %v577_v46 = vor.u32 %v576_v62, %v8722_v61  ;;  %v568_v47 = vrot.slane %v567_v27, 4 }
  0xc6   : > { %v780_v15 = vpop.f32.mrf.mxu0  ;;  %v1710_v40 = vrot.slane %v1708_v53, 4  ;;  %v8734_v42 = vpack.c.b16 %v1815_v14, %v1814_v4  ;;  %v1701_v43 = vor.u32 %v1700_v32, %v1697_v31  ;;  %v7278_v14 = vld [vmem:[%s8388_s8 + $0xa8] sm:$0xf]  ;;  %v587_v32 = vrot.slane %v585_v54, 4 }
  0xc7   : > { %v1001_v51 = vadd.f32 %v1000_v39, %v780_v15  ;;  %v1261_v30 = vpop.f32.mrf.mxu2  ;;  %v1704_v39 = vshll.u32 %v7276_v50, 16  ;;  %v247_v50 = vld [vmem:[%s8388_s8 + $0xa0] sm:$0xf]  ;;  %v578_v60 = vrot.slane %v577_v46, 4  ;;  %v7279_v46 = vld [vmem:[%s8388_s8 + $0xac] sm:$0xf] }
  0xc8   : > { %v1910_v19 = vpop.f32.mrf.mxu3  ;;  %v594_v53 = vshll.u32 %v247_v50, 16  ;;  %v598_v4 = vshrl.u32 %v247_v50, 16  ;;  %v1702_v27 = vrot.slane %v1701_v43, 4  ;;  %v1722_v50 = vshll.u32 %v7278_v14, 16 }
  0xc9   : > { %v8724_v7 = vadd.f32 %v1910_v19, %v1330_v0  ;;  %v1331_v12 = vadd.f32 %v1258_v1, %v1001_v51  ;;  %v1005_v2 = vpop.f32.mrf.mxu1  ;;  %v7277_v0 = vld [vmem:[%s8388_s8 + $0xa4] sm:$0x1]  ;;  %v8731_v1 = vrot.slane %v1704_v39, 5  ;;  %v582_v19 = vrot.slane %v580_v29, 5 }
  0xca   : > { %v1714_v45 = vshll.u32 %v7277_v0, 16  ;;  %v588_v39 = vshll.u32 %v246_v11, 16  ;;  %v1719_v0 = vshrl.u32 %v7278_v14, 16  ;;  %v8755_v11 = vrot.slane %v594_v53, 5 }
  0xcb   : > { %11476 = vst [vmem:[#allocation6_spill] sm:$0xff] %v8724_v7  ;;  %v1711_v55 = vor.u32 %v1710_v40, %v8731_v1 }
  0xcc   : > { %v1716_v31 = vrot.slane %v1714_v45, 5  ;;  %v1707_v45 = vsel %vm8404_vm4, %v1702_v27, %v8731_v1 }
  0xcd   : > { %v1712_v29 = vrot.slane %v1711_v55, 4 }
  0xce   : > { %v783_v41 = vpop.f32.mrf.mxu0 }
  0xcf   : > { %v1004_v21 = vadd.f32 %v1003_v26, %v783_v41  ;;  %v1263_v15 = vpop.f32.mrf.mxu2  ;;  %v590_v41 = vrot.slane %v588_v39, 5  ;;  %v1717_v53 = vsel %vm8404_vm4, %v1712_v29, %v1716_v31 }
  0xd0   : > { %v1912_v51 = vpop.f32.mrf.mxu3 }
  0xd1   : > { %v8739_v62 = vadd.f32 %v1912_v51, %v1331_v12  ;;  %7041 = vmatmul.msk.bf16.gmra.mxu0 %vm706_vm1, %v8728_v37  ;;  %v1332_v26 = vadd.f32 %v1261_v30, %v1004_v21  ;;  %v1008_v63 = vpop.f32.mrf.mxu1  ;;  %v573_v12 = vsel %vm8404_vm4, %v568_v47, %v8722_v61  ;;  %v583_v30 = vsel %vm8404_vm4, %v578_v60, %v582_v19  ;;  %v266_v51 = vld [vmem:[%s8388_s8 + $0xa4] sm:$0x1] }
  0xd2   : > { %v600_v21 = vrot.slane %v598_v4, 4  ;;  %v682_v19 = vunpack.c.l.b16 %v573_v12  ;;  %v683_v43 = vunpack.c.l.b16 %v583_v30  ;;  %v591_v4 = vor.u32 %v590_v41, %v587_v32  ;;  %v7280_v30 = vld [vmem:[%s8388_s8 + $0xb0] sm:$0x1] }
  0xd3   : > { %11477 = vst [vmem:[#allocation7_spill] sm:$0xff] %v8739_v62 }
  0xd4   : > { %7235 = vmatmul.msk.bf16.gmra.mxu2 %vm706_vm1, %v7939_v52  ;;  %7122 = vmatmul.msk.bf16.gmra.mxu1 %vm706_vm1, %v7923_v56  ;;  %v1728_v52 = vshll.u32 %v7279_v46, 16  ;;  %v1732_v56 = vshrl.u32 %v7279_v46, 16  ;;  %v601_v14 = vor.u32 %v600_v21, %v8755_v11  ;;  %v604_v46 = vshll.u32 %v266_v51, 16 }
  0xd5   : > { %7299 = vmatmul.msk.bf16.gmra.mxu3 %vm706_vm1, %v8734_v42  ;;  %v8769_v1 = vpack.c.b16 %v683_v43, %v682_v19 }
  0xd6   : > { %v785_v40 = vpop.f32.mrf.mxu0  ;;  %v8766_v7 = vrot.slane %v1728_v52, 5  ;;  %v1734_v12 = vrot.slane %v1732_v56, 4  ;;  %v602_v29 = vrot.slane %v601_v14, 4  ;;  %v606_v31 = vrot.slane %v604_v46, 5  ;;  %v7940_v52 = vld [vmem:[%s8388_s8 + $0xa8] sm:$0xff]  ;;  %v7924_v56 = vld [vmem:[%s8388_s8 + $0x9c] sm:$0xff] }
  0xd7   : > { %v1006_v61 = vadd.f32 %v1005_v2, %v785_v40  ;;  %v1266_v47 = vpop.f32.mrf.mxu2  ;;  %v1721_v2 = vrot.slane %v1719_v0, 4  ;;  %v1724_v40 = vrot.slane %v1722_v50, 5  ;;  %11479 = vst [vmem:[#allocation9_spill] sm:$0xff] %v8769_v1  ;;  %v1738_v50 = vshll.u32 %v7280_v30, 16 }
  0xd8   : > { %v1915_v60 = vpop.f32.mrf.mxu3  ;;  %v1735_v21 = vor.u32 %v1734_v12, %v8766_v7  ;;  %v607_v14 = vsel %vm8404_vm4, %v602_v29, %v606_v31 }
  0xd9   : > { %v8761_v55 = vadd.f32 %v1915_v60, %v1332_v26  ;;  %v1333_v54 = vadd.f32 %v1263_v15, %v1006_v61  ;;  %v1010_v39 = vpop.f32.mrf.mxu1  ;;  %v1816_v15 = vunpack.c.l.b16 %v1707_v45  ;;  %v1817_v26 = vunpack.c.l.b16 %v1717_v53  ;;  %v248_v60 = vld [vmem:[%s8388_s8 + $0xa8] sm:$0xf] }
  0xda   : > { %v592_v61 = vrot.slane %v591_v4, 4  ;;  %v1725_v32 = vor.u32 %v1724_v40, %v1721_v2  ;;  %v249_v2 = vld [vmem:[%s8388_s8 + $0xac] sm:$0xf]  ;;  %v7282_v40 = vld [vmem:[%s8388_s8 + $0xb8] sm:$0xf]  ;;  %v1740_v12 = vrot.slane %v1738_v50, 5 }
  0xdb   : > { %11478 = vst [vmem:[#allocation8_spill] sm:$0xff] %v8761_v55  ;;  %v8779_v43 = vpack.c.b16 %v1817_v26, %v1816_v15  ;;  %v609_v30 = vshrl.u32 %v248_v60, 16  ;;  %v622_v15 = vshrl.u32 %v249_v2, 16 }
  0xdc   : > { %v597_v4 = vsel %vm8404_vm4, %v592_v61, %v8755_v11  ;;  %v1726_v46 = vrot.slane %v1725_v32, 4  ;;  %v1752_v11 = vshll.u32 %v7282_v40, 16  ;;  %v1756_v61 = vshrl.u32 %v7282_v40, 16 }
  0xdd   : > { %v684_v31 = vunpack.c.l.b16 %v597_v4  ;;  %v685_v32 = vunpack.c.l.b16 %v607_v14  ;;  %v624_v55 = vrot.slane %v622_v15, 4 }
  0xde   : > { %v788_v27 = vpop.f32.mrf.mxu0 }
  0xdf   : > { %v1009_v0 = vadd.f32 %v1008_v63, %v788_v27  ;;  %v1268_v41 = vpop.f32.mrf.mxu2  ;;  %v7281_v63 = vld [vmem:[%s8388_s8 + $0xb4] sm:$0xf]  ;;  %v612_v27 = vshll.u32 %v248_v60, 16 }
  0xe0   : > { %v1917_v51 = vpop.f32.mrf.mxu3  ;;  %v1743_v26 = vshrl.u32 %v7281_v63, 16 }
  0xe1   : > { %v8775_v19 = vadd.f32 %v1917_v51, %v1333_v54  ;;  %7042 = vmatmul.msk.bf16.gmra.mxu0 %vm706_vm1, %v8769_v1  ;;  %v1334_v45 = vadd.f32 %v1266_v47, %v1009_v0  ;;  %v1013_v53 = vpop.f32.mrf.mxu1  ;;  %v1736_v54 = vrot.slane %v1735_v21, 4  ;;  %v618_v47 = vshll.u32 %v249_v2, 16 }
  0xe2   : > { %v1746_v0 = vshll.u32 %v7281_v63, 16  ;;  %v1731_v21 = vsel %vm8404_vm4, %v1726_v46, %v8766_v7  ;;  %v614_v60 = vrot.slane %v612_v27, 5  ;;  %v1745_v40 = vrot.slane %v1743_v26, 4 }
  0xe3   : > { %11480 = vst [vmem:[#allocation10_spill] sm:$0xff] %v8775_v19  ;;  %v620_v63 = vrot.slane %v618_v47, 5  ;;  %v1754_v7 = vrot.slane %v1752_v11, 5  ;;  %v1818_v46 = vunpack.c.l.b16 %v1731_v21  ;;  %v1762_v27 = vshll.u32 %v7283_v16, 16  ;;  %v7941_v21 = vld [vmem:[%s8388_s8 + $0xb4] sm:$0xff] }
  0xe4   : > { %7236 = vmatmul.msk.bf16.gmra.mxu2 %vm706_vm1, %v7940_v52  ;;  %7123 = vmatmul.msk.bf16.gmra.mxu1 %vm706_vm1, %v7924_v56  ;;  %v1741_v52 = vsel %vm8404_vm4, %v1736_v54, %v1740_v12  ;;  %v611_v56 = vrot.slane %v609_v30, 4  ;;  %v1748_v19 = vrot.slane %v1746_v0, 5  ;;  %v628_v30 = vshll.u32 %v267_v34, 16 }
  0xe5   : > { %7300 = vmatmul.msk.bf16.gmra.mxu3 %vm706_vm1, %v8779_v43  ;;  %v1819_v54 = vunpack.c.l.b16 %v1741_v52  ;;  %v625_v12 = vor.u32 %v624_v55, %v620_v63  ;;  %v8802_v47 = vpack.c.b16 %v685_v32, %v684_v31  ;;  %v1764_v34 = vrot.slane %v1762_v27, 5 }
  0xe6   : > { %v790_v29 = vpop.f32.mrf.mxu0  ;;  %v1749_v15 = vor.u32 %v1748_v19, %v1745_v40  ;;  %v630_v55 = vrot.slane %v628_v30, 5 }
  0xe7   : > { %v1011_v50 = vadd.f32 %v1010_v39, %v790_v29  ;;  %v1271_v51 = vpop.f32.mrf.mxu2  ;;  %v1758_v39 = vrot.slane %v1756_v61, 4  ;;  %v615_v29 = vor.u32 %v614_v60, %v611_v56  ;;  %11482 = vst [vmem:[#allocation12_spill] sm:$0xff] %v8802_v47  ;;  %v8805_v61 = vpack.c.b16 %v1819_v54, %v1818_v46  ;;  %v7925_v56 = vld [vmem:[%s8388_s8 + $0xa8] sm:$0xff]  ;;  %v251_v60 = vld [vmem:[%s8388_s8 + $0xb8] sm:$0xf] }
  0xe8   : > { %v1920_v2 = vpop.f32.mrf.mxu3  ;;  %v626_v52 = vrot.slane %v625_v12, 4  ;;  %v1750_v31 = vrot.slane %v1749_v15, 4  ;;  %v7284_v54 = vld [vmem:[%s8388_s8 + $0xc0] sm:$0xf]  ;;  %v642_v30 = vshll.u32 %v251_v60, 16  ;;  %v646_v27 = vshrl.u32 %v251_v60, 16 }
  0xe9   : > { %v8798_v4 = vadd.f32 %v1920_v2, %v1334_v45  ;;  %v1335_v14 = vadd.f32 %v1268_v41, %v1011_v50  ;;  %v1015_v62 = vpop.f32.mrf.mxu1  ;;  %v1759_v45 = vor.u32 %v1758_v39, %v1754_v7  ;;  %v616_v50 = vrot.slane %v615_v29, 4  ;;  %v250_v2 = vld [vmem:[%s8388_s8 + $0xb4] sm:$0xf]  ;;  %11483 = vst [vmem:[#allocation13_spill] sm:$0xff] %v8805_v61  ;;  %v8819_v29 = vld [vmem:[%s8388_s8 + $0x4] sm:$0xf] }
  0xea   : > { %v633_v40 = vshrl.u32 %v250_v2, 16  ;;  %v636_v39 = vshll.u32 %v250_v2, 16  ;;  %v1755_v12 = vsel %vm8404_vm4, %v1750_v31, %v1754_v7  ;;  %v7285_v15 = vld [vmem:[%s8388_s8 + $0xc4] sm:$0xf]  ;;  %v1767_v7 = vshrl.u32 %v7284_v54, 16 }
  0xeb   : > { %11481 = vst [vmem:[#allocation11_spill] sm:$0xff] %v8798_v4  ;;  %v1760_v32 = vrot.slane %v1759_v45, 4  ;;  %v621_v46 = vsel %vm8404_vm4, %v616_v50, %v620_v63  ;;  %v8835_v45 = vld [vmem:[%s8388_s8 + $0x10] sm:$0xf]  ;;  %v1776_v60 = vshll.u32 %v7285_v15, 16 }
  0xec   : > { %v686_v50 = vunpack.c.l.b16 %v621_v46  ;;  %v635_v2 = vrot.slane %v633_v40, 4  ;;  %v8842_v40 = vrot.slane %v642_v30, 5  ;;  %v11492_v1 = vrot.slane %v8835_v45, 5 }
  0xed   : > { %v1765_v63 = vsel %vm8404_vm4, %v1760_v32, %v1764_v34  ;;  %v1820_v34 = vunpack.c.l.b16 %v1755_v12  ;;  %v8163_v12 = vld [vmem:[%s8388_s8 + $0x8] sm:$0x1]  ;;  %v8852_v30 = vrot.slane %v1776_v60, 5 }
  0xee   : > { %v793_v26 = vpop.f32.mrf.mxu0  ;;  %v1821_v32 = vunpack.c.l.b16 %v1765_v63  ;;  %v2243_v63 = vrot.slane %v8163_v12, 5 }
  0xef   : > { %v1014_v41 = vadd.f32 %v1013_v53, %v793_v26  ;;  %v1273_v0 = vpop.f32.mrf.mxu2 }
  0xf0   : > { %v1922_v11 = vpop.f32.mrf.mxu3 }
  0xf1   : > { %v8809_v16 = vadd.f32 %v1922_v11, %v1335_v14  ;;  %7043 = vmatmul.msk.bf16.gmra.mxu0 %vm706_vm1, %v8802_v47  ;;  %v1336_v19 = vadd.f32 %v1271_v51, %v1014_v41  ;;  %v8813_v53 = vpop.f32.mrf.mxu1  ;;  %v631_v51 = vsel %vm8404_vm4, %v626_v52, %v630_v55  ;;  %v638_v11 = vrot.slane %v636_v39, 5  ;;  %v268_v39 = vld [vmem:[%s8388_s8 + $0xbc] sm:$0x1] }
  0xf2   : > { %v687_v52 = vunpack.c.l.b16 %v631_v51  ;;  %v1770_v55 = vshll.u32 %v7284_v54, 16  ;;  %v1780_v14 = vshrl.u32 %v7285_v15, 16 }
  0xf3   : > { %11484 = vst [vmem:[#allocation14_spill] sm:$0xff] %v8809_v16  ;;  %v639_v51 = vor.u32 %v638_v11, %v635_v2  ;;  %v1769_v16 = vrot.slane %v1767_v7, 4  ;;  %v8856_v2 = vpack.c.b16 %v1821_v32, %v1820_v34  ;;  %v2187_v7 = vld [vmem:[%s8388_s8] sm:$0xe] }
  0xf4   : > { %7237 = vmatmul.msk.bf16.gmra.mxu2 %vm706_vm1, %v7941_v21  ;;  %7124 = vmatmul.msk.bf16.gmra.mxu1 %vm706_vm1, %v7925_v56  ;;  %v1772_v15 = vrot.slane %v1770_v55, 5  ;;  %v8854_v3 = vpack.c.b16 %v687_v52, %v686_v50  ;;  %v7371_v55 = vld [vmem:[%s8388_s8 + $0xc] sm:$0xe] }
  0xf5   : > { %7301 = vmatmul.msk.bf16.gmra.mxu3 %vm706_vm1, %v8805_v61  ;;  %v640_v48 = vrot.slane %v639_v51, 4  ;;  %v7387_v34 = vrot.slane %v7371_v55, 9  ;;  %v11490_v51 = vrot.slane %v8819_v29, 5 }
  0xf6   : > { %v795_v41 = vpop.f32.mrf.mxu0 }
  0xf7   : > { %v1016_v21 = vadd.f32 %v1015_v62, %v795_v41  ;;  %v1276_v56 = vpop.f32.mrf.mxu2  ;;  %v648_v62 = vrot.slane %v646_v27, 4  ;;  %v11486_v41 = vrot.slane %v8819_v29, 5  ;;  %v1782_v27 = vrot.slane %v1780_v14, 4 }
  0xf8   : > { %v1925_v31 = vpop.f32.mrf.mxu3  ;;  %v1773_v14 = vor.u32 %v1772_v15, %v1769_v16 }
  0xf9   : > { %v8838_v4 = vadd.f32 %v1925_v31, %v1336_v19  ;;  %v1337_v26 = vadd.f32 %v1273_v0, %v1016_v21  ;;  %v8840_v46 = vpop.f32.mrf.mxu1  ;;  %v2242_v54 = vrot.slane %v11486_v41, 4  ;;  %v11487_v19 = vrot.slane %v8835_v45, 5  ;;  %v8164_v0 = vld [vmem:[%s8388_s8 + $0x14] sm:$0x1] }
  0xfa   : > { %v2827_v21 = vrot.slane %v8164_v0, 5  ;;  %v649_v11 = vor.u32 %v648_v62, %v8842_v40  ;;  %v652_v41 = vshll.u32 %v268_v39, 16  ;;  %v7942_v62 = vld [vmem:[%s8388_s8 + $0xc0] sm:$0xff]  ;;  %v7926_v39 = vld [vmem:[%s8388_s8 + $0xb4] sm:$0xff]  ;;  %v1783_v47 = vor.u32 %v1782_v27, %v8852_v30 }
  0xfb   : > { %11485 = vst [vmem:[#allocation15_spill] sm:$0xff] %v8838_v4  ;;  %v2826_v31 = vrot.slane %v11487_v19, 4  ;;  %v7286_v4 = vld [vmem:[%s8388_s8 + $0xc8] sm:$0x1]  ;;  %v7305_v19 = vrot.slane %v2187_v7, 9 }
  0xfc   : > { %v1786_v50 = vshll.u32 %v7286_v4, 16  ;;  %v650_v61 = vrot.slane %v649_v11, 4  ;;  %v654_v29 = vrot.slane %v652_v41, 5 }
  0xfd   : > { %v2241_v7 = vsel %vm8862_vm7, %v7305_v19, %v11490_v51  ;;  %v2828_v4 = vsel %vm8862_vm7, %v2826_v31, %v2827_v21  ;;  %v2825_v19 = vsel %vm8862_vm7, %v7387_v34, %v11492_v1  ;;  %v645_v1 = vsel %vm8404_vm4, %v640_v48, %v8842_v40 }
  0xfe   : > { %v798_v12 = vpop.f32.mrf.mxu0  ;;  %v2936_v31 = vunpack.c.l.b16 %v2825_v19  ;;  %v1788_v21 = vrot.slane %v1786_v50, 5  ;;  %v655_v41 = vsel %vm8404_vm4, %v650_v61, %v654_v29 }
  0xff   : > { %v1019_v60 = vadd.f32 %v8813_v53, %v798_v12  ;;  %v1278_v0 = vpop.f32.mrf.mxu2  ;;  %v2244_v53 = vsel %vm8862_vm7, %v2242_v54, %v2243_v63  ;;  %v2352_v12 = vunpack.c.l.b16 %v2241_v7  ;;  %v2937_v54 = vunpack.c.l.b16 %v2828_v4 }
 0x100   : > { %v1927_v32 = vpop.f32.mrf.mxu3  ;;  %v2353_v27 = vunpack.c.l.b16 %v2244_v53  ;;  %v688_v53 = vunpack.c.l.b16 %v645_v1  ;;  %v689_v4 = vunpack.c.l.b16 %v655_v41 }
 0x101   : > { %v8877_v16 = vadd.f32 %v1927_v32, %v1337_v26  ;;  %7044 = vmatmul.msk.bf16.gmra.mxu0 %vm706_vm1, %v8854_v3  ;;  %v1338_v15 = vadd.f32 %v1276_v56, %v1019_v60  ;;  %v1023_v55 = vpop.f32.mrf.mxu1  ;;  %v1774_v26 = vrot.slane %v1773_v14, 4  ;;  %v1784_v56 = vrot.slane %v1783_v47, 4  ;;  %v7598_v60 = vld [vmem:[%s11404_s1 + $0x14] sm:$0x3]  ;;  %v7727_v14 = vld [vmem:[%s11404_s1 + $0x16] sm:$0x3] }
 0x102   : > { %v8885_v63 = vpack.c.b16 %v2353_v27, %v2352_v12  ;;  %v8891_v11 = vpack.c.b16 %v2937_v54, %v2936_v31  ;;  %v7469_v47 = vld [vmem:[%s11404_s1 + $0x12] sm:$0x3]  ;;  %v4564_v48 = vsel %vm755_vm0, %v7598_v60, 0  ;;  %v5218_v40 = vsel %vm755_vm0, %v7727_v14, 0  ;;  %v7452_v32 = vld [vmem:[%s11404_s1 + $0x10] sm:$0x3] }
 0x103   : > { %11491 = vst [vmem:[#allocation16_spill] sm:$0xff] %v8877_v16  ;;  %v4086_v61 = vsel %vm755_vm0, %v7469_v47, 0  ;;  %4573 = vmatpush.bf16.msra.mxu2 %v4564_v48  ;;  %5227 = vmatpush.bf16.msra.mxu3 %v5218_v40  ;;  %v1779_v12 = vsel %vm8404_vm4, %v1774_v26, %v8852_v30  ;;  %v1789_v27 = vsel %vm8404_vm4, %v1784_v56, %v1788_v21  ;;  %v8165_v48 = vld [vmem:[%s8388_s8 + $0x10] sm:$0xf] }
 0x104   : > { %7238 = vmatmul.msk.bf16.gmra.mxu2 %vm706_vm1, %v7942_v62  ;;  %7125 = vmatmul.msk.bf16.gmra.mxu1 %vm706_vm1, %v7926_v39  ;;  %v4306_v39 = vsel %vm755_vm0, %v7452_v32, 0  ;;  %v8922_v29 = vpack.c.b16 %v689_v4, %v688_v53  ;;  %v1822_v19 = vunpack.c.l.b16 %v1779_v12  ;;  %v1823_v54 = vunpack.c.l.b16 %v1789_v27  ;;  %v8167_v27 = vld [vmem:[%s8388_s8 + $0x1c] sm:$0xf] }
 0x105   : > { %7302 = vmatmul.msk.bf16.gmra.mxu3 %vm706_vm1, %v8856_v2  ;;  %4095 = vmatpush.bf16.msra.mxu0 %v4086_v61 }
 0x106   : > { %v800_v45 = vpop.f32.mrf.mxu0  ;;  %4315 = vmatpush.bf16.msra.mxu1 %v4306_v39  ;;  %v8928_v1 = vpack.c.b16 %v1823_v54, %v1822_v19  ;;  %v2831_v19 = vrot.slane %v8167_v27, 5  ;;  %v7372_v54 = vld [vmem:[%s8388_s8 + $0x18] sm:$0xe] }
 0x107   : > { %v1021_v50 = vadd.f32 %v8840_v46, %v800_v45  ;;  %v1281_v34 = vpop.f32.mrf.mxu2 }
 0x108   : > { %v1930_v62 = vpop.f32.mrf.mxu3 }
 0x109   : > { %v8915_v51 = vadd.f32 %v1930_v62, %v1338_v15  ;;  %v1339_v7 = vadd.f32 %v1278_v0, %v1021_v50  ;;  %v1025_v46 = vpop.f32.mrf.mxu1 }
 0x10e   : > { %v803_v31 = vpop.f32.mrf.mxu0 }
 0x10f   : > { %v1024_v15 = vadd.f32 %v1023_v55, %v803_v31  ;;  %v1283_v45 = vpop.f32.mrf.mxu2  ;;  %v8168_v31 = vld [vmem:[%s8388_s8 + $0x20] sm:$0x1] }
 0x110   : > { %v1932_v0 = vpop.f32.mrf.mxu3 }
 0x111   : > { %v8924_v60 = vadd.f32 %v1932_v0, %v1339_v7  ;;  %7045 = vmatmul.msk.bf16.gmra.mxu0 %vm706_vm1, %v8922_v29  ;;  %v1340_v30 = vadd.f32 %v1281_v34, %v1024_v15  ;;  %v1028_v26 = vpop.f32.mrf.mxu1  ;;  %v2834_v15 = vrot.slane %v8168_v31, 5  ;;  %v8170_v31 = vld [vmem:[%s8388_s8 + $0x20] sm:$0x1] }
 0x114   : > { %7355 = vmatmul.msk.bf16.vlgmr.msrb.gmra.mxu2 %vm706_vm1, %v8429_v25  ;;  %7338 = vmatmul.msk.bf16.vlgmr.msrb.gmra.mxu1 %vm706_vm1, %v8416_v5  ;;  %v2247_v25 = vrot.slane %v8165_v48, 5  ;;  %v2188_v5 = vld [vmem:[%s8388_s8 + $0xc] sm:$0xe] }
 0x115   : > { %7303 = vmatmul.msk.bf16.gmra.mxu3 %vm706_vm1, %v8928_v1  ;;  %v7306_v4 = vrot.slane %v2188_v5, 9 }
 0x116   : > { %v805_v55 = vpop.f32.mrf.mxu0  ;;  %v2249_v12 = vrot.slane %v2247_v25, 4 }
 0x117   : > { %v1026_v56 = vadd.f32 %v1025_v46, %v805_v55  ;;  %v1286_v21 = vpop.f32.mrf.mxu2  ;;  %v8166_v46 = vld [vmem:[%s8388_s8 + $0x14] sm:$0x1] }
 0x118   : > { %v1935_v41 = vpop.f32.mrf.mxu3  ;;  %v2250_v53 = vrot.slane %v8166_v46, 5 }
 0x119   : > { %v8936_v14 = vadd.f32 %v1935_v41, %v1340_v30  ;;  %v1341_v47 = vadd.f32 %v1283_v45, %v1026_v56  ;;  %v1030_v50 = vpop.f32.mrf.mxu1  ;;  %v2248_v45 = vsel %vm8862_vm7, %v7306_v4, %v2247_v25  ;;  %v7388_v30 = vrot.slane %v7372_v54, 9 }
 0x11a   : > { %v2251_v0 = vsel %vm8862_vm7, %v2249_v12, %v2250_v53  ;;  %v2189_v53 = vld [vmem:[%s8388_s8 + $0x18] sm:$0xe] }
 0x11e   : > { %v808_v34 = vpop.f32.mrf.mxu0 }
 0x11f   : > { %v1029_v40 = vadd.f32 %v1028_v26, %v808_v34  ;;  %v1288_v61 = vpop.f32.mrf.mxu2  ;;  %v2833_v26 = vrot.slane %v2831_v19, 4  ;;  %v2832_v34 = vsel %vm8862_vm7, %v7388_v30, %v2831_v19 }
 0x120   : > { %v1937_v32 = vpop.f32.mrf.mxu3 }
 0x121   : > { %v8940_v62 = vadd.f32 %v1937_v32, %v1341_v47  ;;  %7322 = vmatmul.msk.bf16.vlgmr.msrb.gmra.mxu0 %vm706_vm1, %v8885_v63  ;;  %v1342_v39 = vadd.f32 %v1286_v21, %v1029_v40  ;;  %v1033_v7 = vpop.f32.mrf.mxu1  ;;  %v2354_v47 = vunpack.c.l.b16 %v2248_v45  ;;  %v2835_v48 = vsel %vm8862_vm7, %v2833_v26, %v2834_v15  ;;  %v8169_v32 = vld [vmem:[%s8388_s8 + $0x1c] sm:$0xf]  ;;  %v7373_v26 = vld [vmem:[%s8388_s8 + $0x24] sm:$0xe] }
 0x122   : > { %v2938_v40 = vunpack.c.l.b16 %v2832_v34  ;;  %v2939_v5 = vunpack.c.l.b16 %v2835_v48  ;;  %v2254_v46 = vrot.slane %v8169_v32, 5  ;;  %v2257_v15 = vrot.slane %v8170_v31, 5 }
 0x124   : > { %7356 = vmatmul.msk.bf16.gmra.mxu2 %vm706_vm1, %v8454_v13  ;;  %7339 = vmatmul.msk.bf16.gmra.mxu1 %vm706_vm1, %v8447_v59  ;;  %v2969_v27 = vpack.c.b16 %v2939_v5, %v2938_v40  ;;  %v2256_v45 = vrot.slane %v2254_v46, 4 }
 0x125   : > { %7404 = vmatmul.msk.bf16.vlgmr.msrb.gmra.mxu3 %vm706_vm1, %v8891_v11  ;;  %v2355_v11 = vunpack.c.l.b16 %v2251_v0  ;;  %v8171_v0 = vld [vmem:[%s8388_s8 + $0x28] sm:$0xf] }
 0x126   : > { %v810_v63 = vpop.f32.mrf.mxu0  ;;  %v2838_v30 = vrot.slane %v8171_v0, 5 }
 0x127   : > { %v1031_v55 = vadd.f32 %v1030_v50, %v810_v63  ;;  %v1291_v13 = vpop.f32.mrf.mxu2  ;;  %v2385_v25 = vpack.c.b16 %v2355_v11, %v2354_v47  ;;  %v7307_v63 = vrot.slane %v2189_v53, 9  ;;  %v7389_v47 = vrot.slane %v7373_v26, 9 }
 0x128   : > { %v1940_v56 = vpop.f32.mrf.mxu3  ;;  %v2840_v11 = vrot.slane %v2838_v30, 4 }
 0x129   : > { %v8958_v59 = vadd.f32 %v1940_v56, %v1342_v39  ;;  %v1343_v21 = vadd.f32 %v1288_v61, %v1031_v55  ;;  %v1035_v41 = vpop.f32.mrf.mxu1  ;;  %v2839_v32 = vsel %vm8862_vm7, %v7389_v47, %v2838_v30 }
 0x12a   : > { %v2940_v53 = vunpack.c.l.b16 %v2839_v32 }
 0x12e   : > { %v813_v50 = vpop.f32.mrf.mxu0 }
 0x12f   : > { %v1034_v39 = vadd.f32 %v1033_v7, %v813_v50  ;;  %v1293_v61 = vpop.f32.mrf.mxu2  ;;  %v8172_v7 = vld [vmem:[%s8388_s8 + $0x2c] sm:$0x1] }
 0x130   : > { %v1942_v4 = vpop.f32.mrf.mxu3  ;;  %v2841_v55 = vrot.slane %v8172_v7, 5  ;;  %v8174_v7 = vld [vmem:[%s8388_s8 + $0x2c] sm:$0x1] }
 0x131   : > { %v8966_v12 = vadd.f32 %v1942_v4, %v1343_v21  ;;  %7323 = vmatmul.msk.bf16.gmra.mxu0 %vm706_vm1, %v2385_v25  ;;  %v1344_v19 = vadd.f32 %v1291_v13, %v1034_v39  ;;  %v1038_v54 = vpop.f32.mrf.mxu1  ;;  %v2255_v13 = vsel %vm8862_vm7, %v7307_v63, %v2254_v46  ;;  %v2258_v21 = vsel %vm8862_vm7, %v2256_v45, %v2257_v15  ;;  %v2190_v15 = vld [vmem:[%s8388_s8 + $0x24] sm:$0xe] }
 0x132   : > { %v2356_v5 = vunpack.c.l.b16 %v2255_v13  ;;  %v2357_v50 = vunpack.c.l.b16 %v2258_v21  ;;  %v2842_v46 = vsel %vm8862_vm7, %v2840_v11, %v2841_v55  ;;  %v2264_v55 = vrot.slane %v8174_v7, 5  ;;  %v8175_v21 = vld [vmem:[%s8388_s8 + $0x34] sm:$0xf]  ;;  %v7374_v11 = vld [vmem:[%s8388_s8 + $0x30] sm:$0xe] }
 0x133   : > { %v2941_v4 = vunpack.c.l.b16 %v2842_v46  ;;  %v2845_v47 = vrot.slane %v8175_v21, 5 }
 0x134   : > { %7357 = vmatmul.msk.bf16.gmra.mxu2 %vm706_vm1, %v8480_v57  ;;  %7340 = vmatmul.msk.bf16.gmra.mxu1 %vm706_vm1, %v8473_v44  ;;  %v2386_v39 = vpack.c.b16 %v2357_v50, %v2356_v5  ;;  %v7390_v5 = vrot.slane %v7374_v11, 9 }
 0x135   : > { %7405 = vmatmul.msk.bf16.gmra.mxu3 %vm706_vm1, %v2969_v27  ;;  %v8173_v27 = vld [vmem:[%s8388_s8 + $0x28] sm:$0xf]  ;;  %v2970_v0 = vpack.c.b16 %v2941_v4, %v2940_v53  ;;  %v2847_v50 = vrot.slane %v2845_v47, 4 }
 0x136   : > { %v815_v56 = vpop.f32.mrf.mxu0  ;;  %v2261_v31 = vrot.slane %v8173_v27, 5  ;;  %v2846_v27 = vsel %vm8862_vm7, %v7390_v5, %v2845_v47 }
 0x137   : > { %v1036_v34 = vadd.f32 %v1035_v41, %v815_v56  ;;  %v1296_v48 = vpop.f32.mrf.mxu2  ;;  %v7308_v56 = vrot.slane %v2190_v15, 9  ;;  %v2942_v15 = vunpack.c.l.b16 %v2846_v27 }
 0x138   : > { %v1945_v57 = vpop.f32.mrf.mxu3  ;;  %v2263_v13 = vrot.slane %v2261_v31, 4 }
 0x139   : > { %v8982_v25 = vadd.f32 %v1945_v57, %v1344_v19  ;;  %v1345_v44 = vadd.f32 %v1293_v61, %v1036_v34  ;;  %v1040_v40 = vpop.f32.mrf.mxu1 }
 0x13e   : > { %v818_v41 = vpop.f32.mrf.mxu0 }
 0x13f   : > { %v1039_v19 = vadd.f32 %v1038_v54, %v818_v41  ;;  %v1298_v61 = vpop.f32.mrf.mxu2  ;;  %v8176_v54 = vld [vmem:[%s8388_s8 + $0x38] sm:$0x1] }
 0x140   : > { %v1947_v63 = vpop.f32.mrf.mxu3  ;;  %v2848_v34 = vrot.slane %v8176_v54, 5  ;;  %v8178_v54 = vld [vmem:[%s8388_s8 + $0x38] sm:$0x1] }
 0x141   : > { %v8990_v45 = vadd.f32 %v1947_v63, %v1345_v44  ;;  %7324 = vmatmul.msk.bf16.gmra.mxu0 %vm706_vm1, %v2386_v39  ;;  %v1346_v30 = vadd.f32 %v1296_v48, %v1039_v19  ;;  %v1043_v26 = vpop.f32.mrf.mxu1  ;;  %v2262_v48 = vsel %vm8862_vm7, %v7308_v56, %v2261_v31  ;;  %v2265_v44 = vsel %vm8862_vm7, %v2263_v13, %v2264_v55  ;;  %v2191_v55 = vld [vmem:[%s8388_s8 + $0x30] sm:$0xe] }
 0x142   : > { %v2358_v4 = vunpack.c.l.b16 %v2262_v48  ;;  %v2359_v41 = vunpack.c.l.b16 %v2265_v44  ;;  %v2849_v31 = vsel %vm8862_vm7, %v2847_v50, %v2848_v34  ;;  %v2271_v34 = vrot.slane %v8178_v54, 5  ;;  %v8179_v44 = vld [vmem:[%s8388_s8 + $0x40] sm:$0xf]  ;;  %v7375_v50 = vld [vmem:[%s8388_s8 + $0x3c] sm:$0xe] }
 0x143   : > { %v2943_v63 = vunpack.c.l.b16 %v2849_v31  ;;  %v2852_v5 = vrot.slane %v8179_v44, 5 }
 0x144   : > { %7358 = vmatmul.msk.bf16.gmra.mxu2 %vm706_vm1, %v8506_v49  ;;  %7341 = vmatmul.msk.bf16.gmra.mxu1 %vm706_vm1, %v8499_v35  ;;  %v2387_v19 = vpack.c.b16 %v2359_v41, %v2358_v4  ;;  %v7391_v4 = vrot.slane %v7375_v50, 9 }
 0x145   : > { %7406 = vmatmul.msk.bf16.gmra.mxu3 %vm706_vm1, %v2970_v0  ;;  %v8177_v0 = vld [vmem:[%s8388_s8 + $0x34] sm:$0xf]  ;;  %v2971_v21 = vpack.c.b16 %v2943_v63, %v2942_v15  ;;  %v2854_v41 = vrot.slane %v2852_v5, 4 }
 0x146   : > { %v820_v57 = vpop.f32.mrf.mxu0  ;;  %v2268_v7 = vrot.slane %v8177_v0, 5  ;;  %v2853_v0 = vsel %vm8862_vm7, %v7391_v4, %v2852_v5 }
 0x147   : > { %v1041_v32 = vadd.f32 %v1040_v40, %v820_v57  ;;  %v1301_v46 = vpop.f32.mrf.mxu2  ;;  %v7309_v57 = vrot.slane %v2191_v55, 9  ;;  %v2944_v55 = vunpack.c.l.b16 %v2853_v0 }
 0x148   : > { %v1950_v49 = vpop.f32.mrf.mxu3  ;;  %v2270_v48 = vrot.slane %v2268_v7, 4 }
 0x149   : > { %v9006_v39 = vadd.f32 %v1950_v49, %v1346_v30  ;;  %v1347_v35 = vadd.f32 %v1298_v61, %v1041_v32  ;;  %v1045_v53 = vpop.f32.mrf.mxu1 }
 0x14e   : > { %v823_v40 = vpop.f32.mrf.mxu0 }
 0x14f   : > { %v1044_v30 = vadd.f32 %v1043_v26, %v823_v40  ;;  %v1303_v61 = vpop.f32.mrf.mxu2  ;;  %v8180_v26 = vld [vmem:[%s8388_s8 + $0x44] sm:$0x1] }
 0x150   : > { %v1952_v56 = vpop.f32.mrf.mxu3  ;;  %v2855_v32 = vrot.slane %v8180_v26, 5  ;;  %v8182_v26 = vld [vmem:[%s8388_s8 + $0x44] sm:$0x1] }
 0x151   : > { %v9014_v13 = vadd.f32 %v1952_v56, %v1347_v35  ;;  %7325 = vmatmul.msk.bf16.gmra.mxu0 %vm706_vm1, %v2387_v19  ;;  %v1348_v47 = vadd.f32 %v1301_v46, %v1044_v30  ;;  %v1048_v11 = vpop.f32.mrf.mxu1  ;;  %v2269_v46 = vsel %vm8862_vm7, %v7309_v57, %v2268_v7  ;;  %v2272_v35 = vsel %vm8862_vm7, %v2270_v48, %v2271_v34  ;;  %v2192_v34 = vld [vmem:[%s8388_s8 + $0x3c] sm:$0xe] }
 0x152   : > { %v2360_v63 = vunpack.c.l.b16 %v2269_v46  ;;  %v2361_v40 = vunpack.c.l.b16 %v2272_v35  ;;  %v2856_v7 = vsel %vm8862_vm7, %v2854_v41, %v2855_v32  ;;  %v2278_v32 = vrot.slane %v8182_v26, 5  ;;  %v8183_v35 = vld [vmem:[%s8388_s8 + $0x4c] sm:$0xf]  ;;  %v7376_v41 = vld [vmem:[%s8388_s8 + $0x48] sm:$0xe] }
 0x153   : > { %v2945_v56 = vunpack.c.l.b16 %v2856_v7  ;;  %v2859_v4 = vrot.slane %v8183_v35, 5 }
 0x154   : > { %7359 = vmatmul.msk.bf16.gmra.mxu2 %vm706_vm1, %v8532_v36  ;;  %7342 = vmatmul.msk.bf16.gmra.mxu1 %vm706_vm1, %v8525_v18  ;;  %v2388_v30 = vpack.c.b16 %v2361_v40, %v2360_v63  ;;  %v7392_v63 = vrot.slane %v7376_v41, 9 }
 0x155   : > { %7407 = vmatmul.msk.bf16.gmra.mxu3 %vm706_vm1, %v2971_v21  ;;  %v8181_v21 = vld [vmem:[%s8388_s8 + $0x40] sm:$0xf]  ;;  %v2972_v44 = vpack.c.b16 %v2945_v56, %v2944_v55  ;;  %v2861_v40 = vrot.slane %v2859_v4, 4 }
 0x156   : > { %v825_v49 = vpop.f32.mrf.mxu0  ;;  %v2275_v54 = vrot.slane %v8181_v21, 5  ;;  %v2860_v21 = vsel %vm8862_vm7, %v7392_v63, %v2859_v4 }
 0x157   : > { %v1046_v27 = vadd.f32 %v1045_v53, %v825_v49  ;;  %v1306_v31 = vpop.f32.mrf.mxu2  ;;  %v7310_v49 = vrot.slane %v2192_v34, 9  ;;  %v2946_v34 = vunpack.c.l.b16 %v2860_v21 }
 0x158   : > { %v1955_v36 = vpop.f32.mrf.mxu3  ;;  %v2277_v46 = vrot.slane %v2275_v54, 4 }
 0x159   : > { %v9030_v19 = vadd.f32 %v1955_v36, %v1348_v47  ;;  %v1349_v18 = vadd.f32 %v1303_v61, %v1046_v27  ;;  %v1050_v15 = vpop.f32.mrf.mxu1 }
 0x15e   : > { %v828_v53 = vpop.f32.mrf.mxu0 }
 0x15f   : > { %v1049_v47 = vadd.f32 %v1048_v11, %v828_v53  ;;  %v1308_v61 = vpop.f32.mrf.mxu2  ;;  %v8184_v11 = vld [vmem:[%s8388_s8 + $0x50] sm:$0x1] }
 0x160   : > { %v1957_v57 = vpop.f32.mrf.mxu3  ;;  %v2862_v27 = vrot.slane %v8184_v11, 5  ;;  %v8186_v11 = vld [vmem:[%s8388_s8 + $0x50] sm:$0x1] }
 0x161   : > { %v9038_v48 = vadd.f32 %v1957_v57, %v1349_v18  ;;  %7326 = vmatmul.msk.bf16.gmra.mxu0 %vm706_vm1, %v2388_v30  ;;  %v1350_v5 = vadd.f32 %v1306_v31, %v1049_v47  ;;  %v1053_v50 = vpop.f32.mrf.mxu1  ;;  %v2276_v31 = vsel %vm8862_vm7, %v7310_v49, %v2275_v54  ;;  %v2279_v18 = vsel %vm8862_vm7, %v2277_v46, %v2278_v32  ;;  %v2193_v32 = vld [vmem:[%s8388_s8 + $0x48] sm:$0xe] }
 0x162   : > { %v2362_v56 = vunpack.c.l.b16 %v2276_v31  ;;  %v2363_v53 = vunpack.c.l.b16 %v2279_v18  ;;  %v2863_v54 = vsel %vm8862_vm7, %v2861_v40, %v2862_v27  ;;  %v2285_v27 = vrot.slane %v8186_v11, 5  ;;  %v8187_v18 = vld [vmem:[%s8388_s8 + $0x58] sm:$0xf]  ;;  %v7377_v40 = vld [vmem:[%s8388_s8 + $0x54] sm:$0xe] }
 0x163   : > { %v2947_v57 = vunpack.c.l.b16 %v2863_v54  ;;  %v2866_v63 = vrot.slane %v8187_v18, 5 }
 0x164   : > { %7360 = vmatmul.msk.bf16.gmra.mxu2 %vm706_vm1, %v8559_v24  ;;  %7343 = vmatmul.msk.bf16.gmra.mxu1 %vm706_vm1, %v8551_v8  ;;  %v2389_v47 = vpack.c.b16 %v2363_v53, %v2362_v56  ;;  %v7393_v56 = vrot.slane %v7377_v40, 9 }
 0x165   : > { %7408 = vmatmul.msk.bf16.gmra.mxu3 %vm706_vm1, %v2972_v44  ;;  %v8185_v44 = vld [vmem:[%s8388_s8 + $0x4c] sm:$0xf]  ;;  %v2973_v35 = vpack.c.b16 %v2947_v57, %v2946_v34  ;;  %v2868_v53 = vrot.slane %v2866_v63, 4 }
 0x166   : > { %v830_v36 = vpop.f32.mrf.mxu0  ;;  %v2282_v26 = vrot.slane %v8185_v44, 5  ;;  %v2867_v44 = vsel %vm8862_vm7, %v7393_v56, %v2866_v63 }
 0x167   : > { %v1051_v0 = vadd.f32 %v1050_v15, %v830_v36  ;;  %v1311_v7 = vpop.f32.mrf.mxu2  ;;  %v7311_v36 = vrot.slane %v2193_v32, 9  ;;  %v2948_v32 = vunpack.c.l.b16 %v2867_v44 }
 0x168   : > { %v1960_v24 = vpop.f32.mrf.mxu3  ;;  %v2284_v31 = vrot.slane %v2282_v26, 4 }
 0x169   : > { %v9054_v30 = vadd.f32 %v1960_v24, %v1350_v5  ;;  %v1351_v8 = vadd.f32 %v1308_v61, %v1051_v0  ;;  %v1055_v55 = vpop.f32.mrf.mxu1 }
 0x16e   : > { %v833_v15 = vpop.f32.mrf.mxu0 }
 0x16f   : > { %v1054_v5 = vadd.f32 %v1053_v50, %v833_v15  ;;  %v1313_v61 = vpop.f32.mrf.mxu2  ;;  %v8188_v50 = vld [vmem:[%s8388_s8 + $0x5c] sm:$0x1] }
 0x170   : > { %v1962_v49 = vpop.f32.mrf.mxu3  ;;  %v2869_v0 = vrot.slane %v8188_v50, 5  ;;  %v8190_v50 = vld [vmem:[%s8388_s8 + $0x5c] sm:$0x1] }
 0x171   : > { %v9062_v46 = vadd.f32 %v1962_v49, %v1351_v8  ;;  %7327 = vmatmul.msk.bf16.gmra.mxu0 %vm706_vm1, %v2389_v47  ;;  %v1352_v4 = vadd.f32 %v1311_v7, %v1054_v5  ;;  %v1058_v41 = vpop.f32.mrf.mxu1  ;;  %v2283_v7 = vsel %vm8862_vm7, %v7311_v36, %v2282_v26  ;;  %v2286_v8 = vsel %vm8862_vm7, %v2284_v31, %v2285_v27  ;;  %v2194_v27 = vld [vmem:[%s8388_s8 + $0x54] sm:$0xe] }
 0x172   : > { %v2364_v57 = vunpack.c.l.b16 %v2283_v7  ;;  %v2365_v15 = vunpack.c.l.b16 %v2286_v8  ;;  %v2870_v26 = vsel %vm8862_vm7, %v2868_v53, %v2869_v0  ;;  %v2292_v0 = vrot.slane %v8190_v50, 5  ;;  %v8191_v8 = vld [vmem:[%s8388_s8 + $0x64] sm:$0xf]  ;;  %v7378_v53 = vld [vmem:[%s8388_s8 + $0x60] sm:$0xe] }
 0x173   : > { %v2949_v49 = vunpack.c.l.b16 %v2870_v26  ;;  %v2873_v56 = vrot.slane %v8191_v8, 5 }
 0x174   : > { %7361 = vmatmul.msk.bf16.gmra.mxu2 %vm706_vm1, %v8584_v23  ;;  %7344 = vmatmul.msk.bf16.gmra.mxu1 %vm706_vm1, %v8578_v10  ;;  %v2390_v5 = vpack.c.b16 %v2365_v15, %v2364_v57  ;;  %v7394_v57 = vrot.slane %v7378_v53, 9 }
 0x175   : > { %7409 = vmatmul.msk.bf16.gmra.mxu3 %vm706_vm1, %v2973_v35  ;;  %v8189_v35 = vld [vmem:[%s8388_s8 + $0x58] sm:$0xf]  ;;  %v2974_v18 = vpack.c.b16 %v2949_v49, %v2948_v32  ;;  %v2875_v15 = vrot.slane %v2873_v56, 4 }
 0x176   : > { %v835_v24 = vpop.f32.mrf.mxu0  ;;  %v2289_v11 = vrot.slane %v8189_v35, 5  ;;  %v2874_v35 = vsel %vm8862_vm7, %v7394_v57, %v2873_v56 }
 0x177   : > { %v1056_v21 = vadd.f32 %v1055_v55, %v835_v24  ;;  %v1316_v54 = vpop.f32.mrf.mxu2  ;;  %v7312_v24 = vrot.slane %v2194_v27, 9  ;;  %v2950_v27 = vunpack.c.l.b16 %v2874_v35 }
 0x178   : > { %v1965_v23 = vpop.f32.mrf.mxu3  ;;  %v2291_v7 = vrot.slane %v2289_v11, 4 }
 0x179   : > { %v9078_v47 = vadd.f32 %v1965_v23, %v1352_v4  ;;  %v1353_v10 = vadd.f32 %v1313_v61, %v1056_v21  ;;  %v1060_v34 = vpop.f32.mrf.mxu1 }
 0x17e   : > { %v838_v55 = vpop.f32.mrf.mxu0 }
 0x17f   : > { %v1059_v4 = vadd.f32 %v1058_v41, %v838_v55  ;;  %v1318_v61 = vpop.f32.mrf.mxu2  ;;  %v8192_v41 = vld [vmem:[%s8388_s8 + $0x68] sm:$0x1] }
 0x180   : > { %v1967_v36 = vpop.f32.mrf.mxu3  ;;  %v2876_v21 = vrot.slane %v8192_v41, 5  ;;  %v8194_v41 = vld [vmem:[%s8388_s8 + $0x68] sm:$0x1] }
 0x181   : > { %v9086_v31 = vadd.f32 %v1967_v36, %v1353_v10  ;;  %7328 = vmatmul.msk.bf16.gmra.mxu0 %vm706_vm1, %v2390_v5  ;;  %v1354_v63 = vadd.f32 %v1316_v54, %v1059_v4  ;;  %v1063_v40 = vpop.f32.mrf.mxu1  ;;  %v2290_v54 = vsel %vm8862_vm7, %v7312_v24, %v2289_v11  ;;  %v2293_v10 = vsel %vm8862_vm7, %v2291_v7, %v2292_v0  ;;  %v2195_v0 = vld [vmem:[%s8388_s8 + $0x60] sm:$0xe] }
 0x182   : > { %v2366_v49 = vunpack.c.l.b16 %v2290_v54  ;;  %v2367_v55 = vunpack.c.l.b16 %v2293_v10  ;;  %v2877_v11 = vsel %vm8862_vm7, %v2875_v15, %v2876_v21  ;;  %v2299_v21 = vrot.slane %v8194_v41, 5  ;;  %v8195_v10 = vld [vmem:[%s8388_s8 + $0x70] sm:$0xf]  ;;  %v7379_v15 = vld [vmem:[%s8388_s8 + $0x6c] sm:$0xe] }
 0x183   : > { %v2951_v36 = vunpack.c.l.b16 %v2877_v11  ;;  %v2880_v57 = vrot.slane %v8195_v10, 5 }
 0x184   : > { %7362 = vmatmul.msk.bf16.gmra.mxu2 %vm706_vm1, %v8607_v9  ;;  %7345 = vmatmul.msk.bf16.gmra.mxu1 %vm706_vm1, %v8603_v58  ;;  %v2391_v4 = vpack.c.b16 %v2367_v55, %v2366_v49  ;;  %v7395_v49 = vrot.slane %v7379_v15, 9 }
 0x185   : > { %7410 = vmatmul.msk.bf16.gmra.mxu3 %vm706_vm1, %v2974_v18  ;;  %v8193_v18 = vld [vmem:[%s8388_s8 + $0x64] sm:$0xf]  ;;  %v2975_v8 = vpack.c.b16 %v2951_v36, %v2950_v27  ;;  %v2882_v55 = vrot.slane %v2880_v57, 4 }
 0x186   : > { %v840_v23 = vpop.f32.mrf.mxu0  ;;  %v2296_v50 = vrot.slane %v8193_v18, 5  ;;  %v2881_v18 = vsel %vm8862_vm7, %v7395_v49, %v2880_v57  ;;  %v8198_v57 = vld [vmem:[%s8388_s8 + $0x74] sm:$0x1]  ;;  %v8200_v49 = vld [vmem:[%s8388_s8 + $0x80] sm:$0x1] }
 0x187   : > { %v1061_v44 = vadd.f32 %v1060_v34, %v840_v23  ;;  %v1321_v26 = vpop.f32.mrf.mxu2  ;;  %v7313_v23 = vrot.slane %v2195_v0, 9  ;;  %v2952_v0 = vunpack.c.l.b16 %v2881_v18  ;;  %v2306_v15 = vrot.slane %v8198_v57, 5 }
 0x188   : > { %v1970_v9 = vpop.f32.mrf.mxu3  ;;  %v2298_v54 = vrot.slane %v2296_v50, 4 }
 0x189   : > { %v9102_v5 = vadd.f32 %v1970_v9, %v1354_v63  ;;  %v1355_v58 = vadd.f32 %v1318_v61, %v1061_v44  ;;  %v1065_v32 = vpop.f32.mrf.mxu1 }
 0x18e   : > { %v843_v34 = vpop.f32.mrf.mxu0 }
 0x18f   : > { %v1064_v63 = vadd.f32 %v1063_v40, %v843_v34  ;;  %v1323_v61 = vpop.f32.mrf.mxu2  ;;  %v8196_v40 = vld [vmem:[%s8388_s8 + $0x74] sm:$0x1] }
 0x190   : > { %v1972_v24 = vpop.f32.mrf.mxu3  ;;  %v2883_v44 = vrot.slane %v8196_v40, 5 }
 0x191   : > { %v9110_v7 = vadd.f32 %v1972_v24, %v1355_v58  ;;  %7329 = vmatmul.msk.bf16.gmra.mxu0 %vm706_vm1, %v2391_v4  ;;  %v1356_v56 = vadd.f32 %v1321_v26, %v1064_v63  ;;  %v2552_v53 = vpop.f32.mrf.mxu1  ;;  %v2297_v26 = vsel %vm8862_vm7, %v7313_v23, %v2296_v50  ;;  %v2300_v58 = vsel %vm8862_vm7, %v2298_v54, %v2299_v21 }
 0x192   : > { %v2368_v36 = vunpack.c.l.b16 %v2297_v26  ;;  %v2369_v34 = vunpack.c.l.b16 %v2300_v58  ;;  %v2884_v50 = vsel %vm8862_vm7, %v2882_v55, %v2883_v44  ;;  %v7380_v58 = vld [vmem:[%s8388_s8 + $0x78] sm:$0xe]  ;;  %v2890_v55 = vrot.slane %v8200_v49, 5 }
 0x194   : > { %7363 = vmatmul.msk.bf16.gmra.mxu2 %vm706_vm1, %v8636_v28  ;;  %7346 = vmatmul.msk.bf16.gmra.mxu1 %vm706_vm1, %v8630_v6  ;;  %v2392_v63 = vpack.c.b16 %v2369_v34, %v2368_v36  ;;  %v7396_v34 = vrot.slane %v7380_v58, 9  ;;  %v8202_v58 = vld [vmem:[%s8388_s8 + $0x80] sm:$0x1] }
 0x195   : > { %7411 = vmatmul.msk.bf16.gmra.mxu3 %vm706_vm1, %v2975_v8  ;;  %v8197_v8 = vld [vmem:[%s8388_s8 + $0x70] sm:$0xf]  ;;  %v2313_v49 = vrot.slane %v8202_v58, 5 }
 0x196   : > { %v845_v9 = vpop.f32.mrf.mxu0 }
 0x197   : > { %v1066_v35 = vadd.f32 %v1065_v32, %v845_v9  ;;  %v2646_v11 = vpop.f32.mrf.mxu2  ;;  %v2953_v32 = vunpack.c.l.b16 %v2884_v50  ;;  %v8199_v9 = vld [vmem:[%s8388_s8 + $0x7c] sm:$0xf] }
 0x198   : > { %v1975_v28 = vpop.f32.mrf.mxu3  ;;  %v2887_v26 = vrot.slane %v8199_v9, 5  ;;  %v2197_v9 = vld [vmem:[%s8388_s8 + $0x78] sm:$0xe] }
 0x199   : > { %v9126_v4 = vadd.f32 %v1975_v28, %v1356_v56  ;;  %v1357_v6 = vadd.f32 %v1323_v61, %v1066_v35  ;;  %v2554_v27 = vpop.f32.mrf.mxu1  ;;  %v2303_v56 = vrot.slane %v8197_v8, 5  ;;  %v2196_v61 = vld [vmem:[%s8388_s8 + $0x6c] sm:$0xe]  ;;  %v2976_v54 = vpack.c.b16 %v2953_v32, %v2952_v0 }
 0x19a   : > { %v7314_v40 = vrot.slane %v2196_v61, 9  ;;  %v2889_v18 = vrot.slane %v2887_v26, 4  ;;  %v2888_v32 = vsel %vm8862_vm7, %v7396_v34, %v2887_v26 }
 0x19b   : > { %11493 = vst [vmem:[#allocation17_spill] sm:$0xff] %v9126_v4  ;;  %v2305_v44 = vrot.slane %v2303_v56, 4 }
 0x19d   : > { %v2307_v36 = vsel %vm8862_vm7, %v2305_v44, %v2306_v15  ;;  %v8201_v15 = vld [vmem:[%s8388_s8 + $0x7c] sm:$0xf] }
 0x19e   : > { %v2460_v24 = vpop.f32.mrf.mxu0 }
 0x19f   : > { %v2648_v41 = vpop.f32.mrf.mxu2  ;;  %v2553_v35 = vadd.f32 %v2552_v53, %v2460_v24  ;;  %v2371_v53 = vunpack.c.l.b16 %v2307_v36  ;;  %v2891_v24 = vsel %vm8862_vm7, %v2889_v18, %v2890_v55  ;;  %v7315_v36 = vrot.slane %v2197_v9, 9  ;;  %v7381_v18 = vld [vmem:[%s8388_s8 + $0x84] sm:$0xe] }
 0x1a0   : > { %v1977_v21 = vpop.f32.mrf.mxu3 }
 0x1a1   : > { %v9134_v23 = vadd.f32 %v1977_v21, %v1357_v6  ;;  %7330 = vmatmul.msk.bf16.gmra.mxu0 %vm706_vm1, %v2392_v63  ;;  %v2557_v10 = vpop.f32.mrf.mxu1  ;;  %v2304_v6 = vsel %vm8862_vm7, %v7314_v40, %v2303_v56  ;;  %v2726_v63 = vadd.f32 %v2646_v11, %v2553_v35  ;;  %v2954_v21 = vunpack.c.l.b16 %v2888_v32 }
 0x1a2   : > { %v2370_v0 = vunpack.c.l.b16 %v2304_v6  ;;  %v2310_v40 = vrot.slane %v8201_v15, 5 }
 0x1a3   : > { %11494 = vst [vmem:[#allocation18_spill] sm:$0xff] %v9134_v23 }
 0x1a4   : > { %7364 = vmatmul.msk.bf16.gmra.mxu2 %vm706_vm1, %v8665_v33  ;;  %7347 = vmatmul.msk.bf16.gmra.mxu1 %vm706_vm1, %v8659_v22  ;;  %v2393_v61 = vpack.c.b16 %v2371_v53, %v2370_v0  ;;  %v2312_v34 = vrot.slane %v2310_v40, 4 }
 0x1a5   : > { %7412 = vmatmul.msk.bf16.gmra.mxu3 %vm706_vm1, %v2976_v54  ;;  %v2955_v54 = vunpack.c.l.b16 %v2891_v24  ;;  %v8204_v24 = vld [vmem:[%s8388_s8 + $0x8c] sm:$0x1] }
 0x1a6   : > { %v2462_v28 = vpop.f32.mrf.mxu0 }
 0x1a7   : > { %v2651_v50 = vpop.f32.mrf.mxu2  ;;  %v2555_v8 = vadd.f32 %v2554_v27, %v2462_v28  ;;  %v2977_v28 = vpack.c.b16 %v2955_v54, %v2954_v21 }
 0x1a8   : > { %v3044_v33 = vpop.f32.mrf.mxu3 }
 0x1a9   : > { %v2559_v22 = vpop.f32.mrf.mxu1  ;;  %v3124_v56 = vadd.f32 %v3044_v33, %v2726_v63  ;;  %v2727_v11 = vadd.f32 %v2648_v41, %v2555_v8  ;;  %v8203_v33 = vld [vmem:[%s8388_s8 + $0x88] sm:$0xf]  ;;  %v2897_v8 = vrot.slane %v8204_v24, 5 }
 0x1aa   : > { %v2894_v41 = vrot.slane %v8203_v33, 5  ;;  %v8205_v24 = vld [vmem:[%s8388_s8 + $0x88] sm:$0xf] }
 0x1ab   : > { %v3226_v35 = vmul.f32 %v3124_v56, %v3124_v56  ;;  %v3156_v63 = vsel %vm2012_vm8, %v3124_v56, 0.0 }
 0x1ae   : > { %v2465_v57 = vpop.f32.mrf.mxu0 }
 0x1af   : > { %v2653_v44 = vpop.f32.mrf.mxu2  ;;  %v2558_v27 = vadd.f32 %v2557_v10, %v2465_v57  ;;  %v3258_v10 = vsel %vm2012_vm8, %v3226_v35, 0.0 }
 0x1b0   : > { %v3046_v26 = vpop.f32.mrf.mxu3 }
 0x1b1   : > { %v3125_v55 = vadd.f32 %v3046_v26, %v2727_v11  ;;  %7331 = vmatmul.msk.bf16.gmra.mxu0 %vm706_vm1, %v2393_v61  ;;  %v2562_v6 = vpop.f32.mrf.mxu1  ;;  %v2728_v21 = vadd.f32 %v2651_v50, %v2558_v27  ;;  %v2311_v11 = vsel %vm8862_vm7, %v7315_v36, %v2310_v40 }
 0x1b3   : > { %v3157_v0 = vsel %vm2012_vm8, %v3125_v55, 0.0  ;;  %v3227_v53 = vmul.f32 %v3125_v55, %v3125_v55  ;;  %v8001_v32 = vpack.i.bf16 %v3125_v55, %v3124_v56  ;;  %v7397_v56 = vrot.slane %v7381_v18, 9 }
 0x1b4   : > { %v3158_v15 = vadd.f32 %v3157_v0, %v3156_v63  ;;  %7365 = vmatmul.msk.bf16.gmra.mxu2 %vm706_vm1, %v8705_v20  ;;  %7348 = vmatmul.msk.bf16.gmra.mxu1 %vm706_vm1, %v8696_v17  ;;  %v2314_v20 = vsel %vm8862_vm7, %v2312_v34, %v2313_v49  ;;  %v2896_v17 = vrot.slane %v2894_v41, 4  ;;  %v2372_v55 = vunpack.c.l.b16 %v2311_v11 }
 0x1b5   : > { %v3259_v61 = vsel %vm2012_vm8, %v3227_v53, 0.0  ;;  %7413 = vmatmul.msk.bf16.gmra.mxu3 %vm706_vm1, %v2977_v28  ;;  %8002 = vrot.lane.b32.xlu0 %v8001_v32, %s8313_s21  ;;  %v2373_v28 = vunpack.c.l.b16 %v2314_v20  ;;  %v2895_v50 = vsel %vm8862_vm7, %v7397_v56, %v2894_v41  ;;  %v2317_v41 = vrot.slane %v8205_v24, 5 }
 0x1b6   : > { %v3260_v54 = vadd.f32 %v3259_v61, %v3258_v10  ;;  %v2467_v57 = vpop.f32.mrf.mxu0  ;;  %v2898_v27 = vsel %vm8862_vm7, %v2896_v17, %v2897_v8  ;;  %v2956_v63 = vunpack.c.l.b16 %v2895_v50  ;;  %v2198_v8 = vld [vmem:[%s8388_s8 + $0x84] sm:$0xe] }
 0x1b7   : > { %v2656_v9 = vpop.f32.mrf.mxu2  ;;  %v2560_v18 = vadd.f32 %v2559_v22, %v2467_v57  ;;  %v2394_v33 = vpack.c.b16 %v2373_v28, %v2372_v55  ;;  %v2957_v0 = vunpack.c.l.b16 %v2898_v27  ;;  %v8206_v57 = vld [vmem:[%s8388_s8 + $0x8c] sm:$0x1]  ;;  %v7316_v17 = vrot.slane %v2198_v8, 9  ;;  %v8207_v55 = vld [vmem:[%s8388_s8 + $0x94] sm:$0xf] }
 0x1b8   : > { %v3049_v58 = vpop.f32.mrf.mxu3  ;;  %v2320_v20 = vrot.slane %v8206_v57, 5  ;;  %v2901_v28 = vrot.slane %v8207_v55, 5 }
 0x1b9   : > { %v3126_v26 = vadd.f32 %v3049_v58, %v2728_v21  ;;  %v2564_v35 = vpop.f32.mrf.mxu1  ;;  %v2729_v10 = vadd.f32 %v2653_v44, %v2560_v18  ;;  %v2978_v22 = vpack.c.b16 %v2957_v0, %v2956_v63  ;;  %v7382_v58 = vld [vmem:[%s8388_s8 + $0x90] sm:$0xe] }
 0x1bb   : > { %v3159_v40 = vsel %vm2012_vm8, %v3126_v26, 0.0  ;;  %v3228_v36 = vmul.f32 %v3126_v26, %v3126_v26 }
 0x1bc   : > { %v3160_v49 = vadd.f32 %v3159_v40, %v3158_v15 }
 0x1bd   : > { %v3261_v34 = vsel %vm2012_vm8, %v3228_v36, 0.0 }
 0x1be   : > { %v3262_v53 = vadd.f32 %v3261_v34, %v3260_v54  ;;  %v2470_v32 = vpop.f32.mrf.mxu0  ;;  %v2319_v54 = vrot.slane %v2317_v41, 4 }
 0x1bf   : > { %v2658_v61 = vpop.f32.mrf.mxu2  ;;  %v2563_v11 = vadd.f32 %v2562_v6, %v2470_v32  ;;  %v8208_v6 = vld [vmem:[%s8388_s8 + $0x98] sm:$0x1] }
 0x1c0   : > { %v3051_v21 = vpop.f32.mrf.mxu3  ;;  %v2904_v36 = vrot.slane %v8208_v6, 5  ;;  %v2199_v6 = vld [vmem:[%s8388_s8 + $0x90] sm:$0xe] }
 0x1c1   : > { %v3127_v56 = vadd.f32 %v3051_v21, %v2729_v10  ;;  %7332 = vmatmul.msk.bf16.gmra.mxu0 %vm706_vm1, %v2394_v33  ;;  %v2567_v15 = vpop.f32.mrf.mxu1  ;;  %v2730_v34 = vadd.f32 %v2656_v9, %v2563_v11  ;;  %v7398_v33 = vrot.slane %v7382_v58, 9 }
 0x1c3   : > { %v3161_v50 = vsel %vm2012_vm8, %v3127_v56, 0.0  ;;  %v3229_v44 = vmul.f32 %v3127_v56, %v3127_v56  ;;  %v8006_v27 = vpack.i.bf16 %v3127_v56, %v3126_v26  ;;  %v2318_v26 = vsel %vm8862_vm7, %v7316_v17, %v2317_v41 }
 0x1c4   : > { %v3162_v40 = vadd.f32 %v3161_v50, %v3160_v49  ;;  %7366 = vmatmul.msk.bf16.gmra.mxu2 %vm706_vm1, %v8734_v42  ;;  %7349 = vmatmul.msk.bf16.gmra.mxu1 %vm706_vm1, %v8728_v37  ;;  %v2321_v42 = vsel %vm8862_vm7, %v2319_v54, %v2320_v20  ;;  %v2903_v49 = vrot.slane %v2901_v28, 4  ;;  %v2374_v8 = vunpack.c.l.b16 %v2318_v26  ;;  %v8209_v50 = vld [vmem:[%s8388_s8 + $0x94] sm:$0xf] }
 0x1c5   : > { %v3263_v18 = vsel %vm2012_vm8, %v3229_v44, 0.0  ;;  %7414 = vmatmul.msk.bf16.gmra.mxu3 %vm706_vm1, %v2978_v22  ;;  %8007 = vrot.lane.b32.xlu0 %v8006_v27, %s8313_s21  ;;  %v2375_v21 = vunpack.c.l.b16 %v2321_v42  ;;  %v2902_v9 = vsel %vm8862_vm7, %v7398_v33, %v2901_v28  ;;  %v2324_v28 = vrot.slane %v8209_v50, 5  ;;  %v8210_v33 = vld [vmem:[%s8388_s8 + $0xa0] sm:$0xf] }
 0x1c6   : > { %v3264_v63 = vadd.f32 %v3263_v18, %v3262_v53  ;;  %v2472_v0 = vpop.f32.mrf.mxu0  ;;  %v2905_v53 = vsel %vm8862_vm7, %v2903_v49, %v2904_v36  ;;  %v2958_v17 = vunpack.c.l.b16 %v2902_v9  ;;  %v7317_v26 = vrot.slane %v2199_v6, 9 }
 0x1c7   : > { %v2661_v37 = vpop.f32.mrf.mxu2  ;;  %v2565_v11 = vadd.f32 %v2564_v35, %v2472_v0  ;;  %v2395_v20 = vpack.c.b16 %v2375_v21, %v2374_v8  ;;  %v2959_v54 = vunpack.c.l.b16 %v2905_v53  ;;  %v2908_v0 = vrot.slane %v8210_v33, 5 }
 0x1c8   : > { %v3054_v32 = vpop.f32.mrf.mxu3  ;;  %v2326_v42 = vrot.slane %v2324_v28, 4 }
 0x1c9   : > { %v3128_v24 = vadd.f32 %v3054_v32, %v2730_v34  ;;  %v2569_v10 = vpop.f32.mrf.mxu1  ;;  %v2731_v44 = vadd.f32 %v2658_v61, %v2565_v11  ;;  %v2979_v35 = vpack.c.b16 %v2959_v54, %v2958_v17  ;;  %v7383_v32 = vld [vmem:[%s8388_s8 + $0x9c] sm:$0xe]  ;;  %v2910_v11 = vrot.slane %v2908_v0, 4 }
 0x1cb   : > { %v3163_v41 = vsel %vm2012_vm8, %v3128_v24, 0.0  ;;  %v3230_v56 = vmul.f32 %v3128_v24, %v3128_v24 }
 0x1cc   : > { %v3164_v22 = vadd.f32 %v3163_v41, %v3162_v40 }
 0x1cd   : > { %v3265_v57 = vsel %vm2012_vm8, %v3230_v56, 0.0  ;;  %v7399_v56 = vrot.slane %v7383_v32, 9 }
 0x1ce   : > { %v3266_v58 = vadd.f32 %v3265_v57, %v3264_v63  ;;  %v2475_v55 = vpop.f32.mrf.mxu0  ;;  %v8211_v63 = vld [vmem:[%s8388_s8 + $0x98] sm:$0x1] }
 0x1cf   : > { %v2663_v27 = vpop.f32.mrf.mxu2  ;;  %v2568_v34 = vadd.f32 %v2567_v15, %v2475_v55  ;;  %v2327_v49 = vrot.slane %v8211_v63, 5  ;;  %v11495_v15 = vld [vmem:[#allocation9_spill] sm:$0xff] }
 0x1d0   : > { %v3056_v36 = vpop.f32.mrf.mxu3 }
 0x1d1   : > { %v3129_v18 = vadd.f32 %v3056_v36, %v2731_v44  ;;  %7333 = vmatmul.msk.bf16.gmra.mxu0 %vm706_vm1, %v2395_v20  ;;  %v2572_v40 = vpop.f32.mrf.mxu1  ;;  %v2732_v41 = vadd.f32 %v2661_v37, %v2568_v34  ;;  %v2909_v37 = vsel %vm8862_vm7, %v7399_v56, %v2908_v0 }
 0x1d3   : > { %v3165_v8 = vsel %vm2012_vm8, %v3129_v18, 0.0  ;;  %v3231_v61 = vmul.f32 %v3129_v18, %v3129_v18  ;;  %v8011_v21 = vpack.i.bf16 %v3129_v18, %v3128_v24  ;;  %v2325_v24 = vsel %vm8862_vm7, %v7317_v26, %v2324_v28 }
 0x1d4   : > { %v3166_v9 = vadd.f32 %v3165_v8, %v3164_v22  ;;  %7367 = vmatmul.msk.bf16.gmra.mxu2 %vm706_vm1, %v8779_v43  ;;  %7350 = vmatmul.msk.bf16.gmra.mxu1 %vm706_vm1, %v11495_v15  ;;  %v2328_v43 = vsel %vm8862_vm7, %v2326_v42, %v2327_v49  ;;  %v8212_v22 = vld [vmem:[%s8388_s8 + $0xa4] sm:$0x1]  ;;  %v2376_v6 = vunpack.c.l.b16 %v2325_v24  ;;  %v2960_v42 = vunpack.c.l.b16 %v2909_v37  ;;  %v8213_v8 = vld [vmem:[%s8388_s8 + $0xa0] sm:$0xf]  ;;  %v2200_v15 = vld [vmem:[%s8388_s8 + $0x9c] sm:$0xe] }
 0x1d5   : > { %v3267_v53 = vsel %vm2012_vm8, %v3231_v61, 0.0  ;;  %7415 = vmatmul.msk.bf16.gmra.mxu3 %vm706_vm1, %v2979_v35  ;;  %8012 = vrot.lane.b32.xlu1 %v8011_v21, %s8313_s21  ;;  %v2911_v17 = vrot.slane %v8212_v22, 5  ;;  %v2377_v36 = vunpack.c.l.b16 %v2328_v43  ;;  %v2331_v0 = vrot.slane %v8213_v8, 5  ;;  %v11496_v37 = vld [vmem:[#allocation13_spill] sm:$0xff] }
 0x1d6   : > { %v3268_v57 = vadd.f32 %v3267_v53, %v3266_v58  ;;  %v2477_v20 = vpop.f32.mrf.mxu0  ;;  %v7318_v24 = vrot.slane %v2200_v15, 9 }
 0x1d7   : > { %v2666_v54 = vpop.f32.mrf.mxu2  ;;  %v2912_v58 = vsel %vm8862_vm7, %v2910_v11, %v2911_v17  ;;  %v2570_v34 = vadd.f32 %v2569_v10, %v2477_v20  ;;  %v2396_v26 = vpack.c.b16 %v2377_v36, %v2376_v6  ;;  %v8214_v11 = vld [vmem:[%s8388_s8 + $0xac] sm:$0xf]  ;;  %v2333_v43 = vrot.slane %v2331_v0, 4  ;;  %v7384_v17 = vld [vmem:[%s8388_s8 + $0xa8] sm:$0xe] }
 0x1d8   : > { %v3059_v55 = vpop.f32.mrf.mxu3  ;;  %v2961_v63 = vunpack.c.l.b16 %v2912_v58  ;;  %v2915_v20 = vrot.slane %v8214_v11, 5 }
 0x1d9   : > { %v3130_v50 = vadd.f32 %v3059_v55, %v2732_v41  ;;  %v2574_v44 = vpop.f32.mrf.mxu1  ;;  %v2733_v61 = vadd.f32 %v2663_v27, %v2570_v34 }
 0x1da   : > { %v2980_v10 = vpack.c.b16 %v2961_v63, %v2960_v42  ;;  %v2917_v34 = vrot.slane %v2915_v20, 4  ;;  %v8216_v42 = vld [vmem:[%s8388_s8 + $0xb0] sm:$0x1] }
 0x1db   : > { %v3167_v28 = vsel %vm2012_vm8, %v3130_v50, 0.0  ;;  %v3232_v18 = vmul.f32 %v3130_v50, %v3130_v50  ;;  %v2918_v63 = vrot.slane %v8216_v42, 5  ;;  %v8219_v42 = vld [vmem:[%s8388_s8 + $0xb0] sm:$0x1] }
 0x1dc   : > { %v3168_v35 = vadd.f32 %v3167_v28, %v3166_v9 }
 0x1dd   : > { %v3269_v33 = vsel %vm2012_vm8, %v3232_v18, 0.0  ;;  %v7400_v18 = vrot.slane %v7384_v17, 9 }
 0x1de   : > { %v3270_v49 = vadd.f32 %v3269_v33, %v3268_v57  ;;  %v2480_v32 = vpop.f32.mrf.mxu0  ;;  %v8215_v57 = vld [vmem:[%s8388_s8 + $0xa4] sm:$0x1] }
 0x1df   : > { %v2668_v21 = vpop.f32.mrf.mxu2  ;;  %v2573_v56 = vadd.f32 %v2572_v40, %v2480_v32  ;;  %v2334_v22 = vrot.slane %v8215_v57, 5  ;;  %v11497_v40 = vld [vmem:[#allocation12_spill] sm:$0xff] }
 0x1e0   : > { %v3061_v53 = vpop.f32.mrf.mxu3 }
 0x1e1   : > { %v3131_v41 = vadd.f32 %v3061_v53, %v2733_v61  ;;  %7334 = vmatmul.msk.bf16.gmra.mxu0 %vm706_vm1, %v2396_v26  ;;  %v2577_v9 = vpop.f32.mrf.mxu1  ;;  %v2734_v28 = vadd.f32 %v2666_v54, %v2573_v56 }
 0x1e3   : > { %v3169_v55 = vsel %vm2012_vm8, %v3131_v41, 0.0  ;;  %v3233_v27 = vmul.f32 %v3131_v41, %v3131_v41  ;;  %v8016_v6 = vpack.i.bf16 %v3131_v41, %v3130_v50  ;;  %v2332_v50 = vsel %vm8862_vm7, %v7318_v24, %v2331_v0 }
 0x1e4   : > { %v3170_v36 = vadd.f32 %v3169_v55, %v3168_v35  ;;  %7368 = vmatmul.msk.bf16.gmra.mxu2 %vm706_vm1, %v11496_v37  ;;  %7351 = vmatmul.msk.bf16.gmra.mxu1 %vm706_vm1, %v11497_v40  ;;  %v2335_v35 = vsel %vm8862_vm7, %v2333_v43, %v2334_v22  ;;  %v2378_v54 = vunpack.c.l.b16 %v2332_v50  ;;  %v2919_v0 = vsel %vm8862_vm7, %v2917_v34, %v2918_v63  ;;  %v8218_v37 = vld [vmem:[%s8388_s8 + $0xb8] sm:$0xf] }
 0x1e5   : > { %v3271_v58 = vsel %vm2012_vm8, %v3233_v27, 0.0  ;;  %7416 = vmatmul.msk.bf16.gmra.mxu3 %vm706_vm1, %v2980_v10  ;;  %8017 = vrot.lane.b32.xlu1 %v8016_v6, %s8313_s21  ;;  %v2379_v53 = vunpack.c.l.b16 %v2335_v35  ;;  %v2963_v22 = vunpack.c.l.b16 %v2919_v0  ;;  %v2201_v27 = vld [vmem:[%s8388_s8 + $0xa8] sm:$0xe]  ;;  %v8217_v6 = vld [vmem:[%s8388_s8 + $0xac] sm:$0xf]  ;;  %v2922_v40 = vrot.slane %v8218_v37, 5 }
 0x1e6   : > { %v3272_v33 = vadd.f32 %v3271_v58, %v3270_v49  ;;  %v2482_v26 = vpop.f32.mrf.mxu0  ;;  %v2916_v49 = vsel %vm8862_vm7, %v7400_v18, %v2915_v20  ;;  %v2338_v20 = vrot.slane %v8217_v6, 5  ;;  %v7385_v18 = vld [vmem:[%s8388_s8 + $0xb4] sm:$0xe]  ;;  %v2341_v63 = vrot.slane %v8219_v42, 5  ;;  %v8220_v0 = vld [vmem:[%s8388_s8 + $0xbc] sm:$0x1] }
 0x1e7   : > { %v2671_v32 = vpop.f32.mrf.mxu2  ;;  %v2575_v10 = vadd.f32 %v2574_v44, %v2482_v26  ;;  %v2397_v43 = vpack.c.b16 %v2379_v53, %v2378_v54  ;;  %v2962_v57 = vunpack.c.l.b16 %v2916_v49  ;;  %v2924_v54 = vrot.slane %v2922_v40, 4 }
 0x1e8   : > { %v3064_v8 = vpop.f32.mrf.mxu3  ;;  %v2340_v35 = vrot.slane %v2338_v20, 4 }
 0x1e9   : > { %v3132_v61 = vadd.f32 %v3064_v8, %v2734_v28  ;;  %v9250_v15 = vpop.f32.mrf.mxu1  ;;  %v2735_v58 = vadd.f32 %v2668_v21, %v2575_v10  ;;  %v2981_v26 = vpack.c.b16 %v2963_v22, %v2962_v57  ;;  %v7401_v8 = vrot.slane %v7385_v18, 9  ;;  %v7420_v22 = vld [vmem:[%s8388_s8 + $0xc] sm:$0xf] }
 0x1ea   : > { %v3604_v6 = vshrl.u32 %v7420_v22, 16 }
 0x1eb   : > { %v3171_v41 = vsel %vm2012_vm8, %v3132_v61, 0.0  ;;  %v3234_v56 = vmul.f32 %v3132_v61, %v3132_v61 }
 0x1ec   : > { %v3172_v11 = vadd.f32 %v3171_v41, %v3170_v36  ;;  %v2925_v41 = vrot.slane %v8220_v0, 5 }
 0x1ed   : > { %v3273_v24 = vsel %vm2012_vm8, %v3234_v56, 0.0 }
 0x1ee   : > { %v3274_v17 = vadd.f32 %v3273_v24, %v3272_v33  ;;  %v2485_v55 = vpop.f32.mrf.mxu0  ;;  %v7319_v33 = vrot.slane %v2201_v27, 9 }
 0x1ef   : > { %v9261_v28 = vpop.f32.mrf.mxu2  ;;  %v2578_v34 = vadd.f32 %v2577_v9, %v2485_v55  ;;  %v7421_v55 = vld [vmem:[%s8388_s8 + $0x10] sm:$0xf] }
 0x1f0   : > { %v3066_v44 = vpop.f32.mrf.mxu3  ;;  %v3613_v18 = vshll.u32 %v7421_v55, 16 }
 0x1f1   : > { %v3133_v36 = vadd.f32 %v3066_v44, %v2735_v58  ;;  %7335 = vmatmul.msk.bf16.gmra.mxu0 %vm706_vm1, %v2397_v43  ;;  %v9265_v50 = vpop.f32.mrf.mxu1  ;;  %v2736_v10 = vadd.f32 %v2671_v32, %v2578_v34  ;;  %v3617_v44 = vshrl.u32 %v7421_v55, 16 }
 0x1f3   : > { %v3173_v21 = vsel %vm2012_vm8, %v3133_v36, 0.0  ;;  %v3235_v53 = vmul.f32 %v3133_v36, %v3133_v36  ;;  %v8021_v49 = vpack.i.bf16 %v3133_v36, %v3132_v61  ;;  %v2339_v61 = vsel %vm8862_vm7, %v7319_v33, %v2338_v20 }
 0x1f4   : > { %v3174_v9 = vadd.f32 %v3173_v21, %v3172_v11  ;;  %7369 = vmatmul.msk.bf16.gmra.mxu2 %vm706_vm1, %v8856_v2  ;;  %7352 = vmatmul.msk.bf16.gmra.mxu1 %vm706_vm1, %v8854_v3  ;;  %v2342_v11 = vsel %vm8862_vm7, %v2340_v35, %v2341_v63  ;;  %v2923_v3 = vsel %vm8862_vm7, %v7401_v8, %v2922_v40  ;;  %v2380_v27 = vunpack.c.l.b16 %v2339_v61  ;;  %v9299_v35 = vld [vmem:[%s8388_s8 + $0xb8] sm:$0xf] }
 0x1f5   : > { %v3275_v56 = vsel %vm2012_vm8, %v3235_v53, 0.0  ;;  %7417 = vmatmul.msk.bf16.gmra.mxu3 %vm706_vm1, %v2981_v26  ;;  %8022 = vrot.lane.b32.xlu2 %v8021_v49, %s8313_s21  ;;  %v2926_v2 = vsel %vm8862_vm7, %v2924_v54, %v2925_v41  ;;  %v2381_v58 = vunpack.c.l.b16 %v2342_v11  ;;  %v2964_v40 = vunpack.c.l.b16 %v2923_v3  ;;  %v7679_v63 = vld [vmem:[%s8388_s8 + $0x18] sm:$0xf]  ;;  %v2202_v54 = vld [vmem:[%s8388_s8 + $0xb4] sm:$0xe] }
 0x1f6   : > { %v3276_v24 = vadd.f32 %v3275_v56, %v3274_v17  ;;  %v2487_v43 = vpop.f32.mrf.mxu0  ;;  %v3607_v17 = vshll.u32 %v7420_v22, 16  ;;  %v2965_v36 = vunpack.c.l.b16 %v2926_v2  ;;  %v2345_v42 = vrot.slane %v9299_v35, 5  ;;  %v8222_v11 = vld [vmem:[%s8388_s8 + $0xc4] sm:$0xf]  ;;  %v7453_v2 = vld [vmem:[%s8388_s8 + $0x14] sm:$0x1] }
 0x1f7   : > { %v9281_v57 = vpop.f32.mrf.mxu2  ;;  %v2580_v33 = vadd.f32 %v9250_v15, %v2487_v43  ;;  %v3606_v21 = vrot.slane %v3604_v6, 4  ;;  %v2398_v0 = vpack.c.b16 %v2381_v58, %v2380_v27  ;;  %v9305_v41 = vrot.slane %v3613_v18, 5  ;;  %v7680_v15 = vld [vmem:[%s8388_s8 + $0x1c] sm:$0xf] }
 0x1f8   : > { %v3069_v32 = vpop.f32.mrf.mxu3  ;;  %v3609_v53 = vrot.slane %v3607_v17, 5  ;;  %v3619_v56 = vrot.slane %v3617_v44, 4  ;;  %v2982_v43 = vpack.c.b16 %v2965_v36, %v2964_v40  ;;  %v2929_v3 = vrot.slane %v8222_v11, 5  ;;  %v7386_v17 = vld [vmem:[%s8388_s8 + $0xc0] sm:$0xe] }
 0x1f9   : > { %v9289_v20 = vadd.f32 %v3069_v32, %v2736_v10  ;;  %v9291_v37 = vpop.f32.mrf.mxu1  ;;  %v4736_v22 = vshrl.u32 %v7679_v63, 16  ;;  %v7320_v32 = vrot.slane %v2202_v54, 9  ;;  %v2347_v6 = vrot.slane %v2345_v42, 4  ;;  %v8223_v18 = vld [vmem:[%s8388_s8 + $0xbc] sm:$0x1] }
 0x1fa   : > { %v4739_v27 = vshll.u32 %v7679_v63, 16  ;;  %v2348_v44 = vrot.slane %v8223_v18, 5  ;;  %v7402_v54 = vrot.slane %v7386_v17, 9  ;;  %v8224_v11 = vld [vmem:[%s8388_s8 + $0xc8] sm:$0x1] }
 0x1fb   : > { %v3175_v34 = vsel %vm2012_vm8, %v9289_v20, 0.0  ;;  %v3236_v26 = vmul.f32 %v9289_v20, %v9289_v20  ;;  %v2932_v63 = vrot.slane %v8224_v11, 5  ;;  %v4738_v23 = vrot.slane %v4736_v22, 4  ;;  %v7422_v11 = vld [vmem:[%s8388_s8 + $0x18] sm:$0xf] }
 0x1fc   : > { %v3176_v8 = vadd.f32 %v3175_v34, %v3174_v9  ;;  %v2737_v9 = vadd.f32 %v9261_v28, %v2580_v33  ;;  %v3610_v34 = vor.u32 %v3609_v53, %v3606_v21  ;;  %v3620_v28 = vor.u32 %v3619_v56, %v9305_v41 }
 0x1fd   : > { %v3277_v49 = vsel %vm2012_vm8, %v3236_v26, 0.0  ;;  %v4749_v26 = vshrl.u32 %v7680_v15, 16  ;;  %v3623_v33 = vshll.u32 %v7453_v2, 16 }
 0x1fe   : > { %v3278_v10 = vadd.f32 %v3277_v49, %v3276_v24  ;;  %v2490_v61 = vpop.f32.mrf.mxu0  ;;  %v4745_v24 = vshll.u32 %v7680_v15, 16  ;;  %v2931_v49 = vrot.slane %v2929_v3, 4  ;;  %v4741_v15 = vrot.slane %v4739_v27, 5 }
 0x1ff   : > { %v9311_v55 = vpop.f32.mrf.mxu2  ;;  %v2583_v36 = vadd.f32 %v9265_v50, %v2490_v61  ;;  %v4751_v61 = vrot.slane %v4749_v26, 4  ;;  %v3621_v22 = vrot.slane %v3620_v28, 4  ;;  %v2349_v27 = vsel %vm8862_vm7, %v2347_v6, %v2348_v44  ;;  %v7744_v44 = vld [vmem:[%s11404_s1 + $0x18] sm:$0x3] }
 0x200   : > { %v3071_v58 = vpop.f32.mrf.mxu3  ;;  %v9327_v56 = vrot.slane %v4745_v24, 5  ;;  %v5866_v28 = vsel %vm755_vm0, %v7744_v44, 0 }
 0x201   : > { %v3135_v40 = vadd.f32 %v3071_v58, %v2737_v9  ;;  %7336 = vmatmul.msk.bf16.gmra.mxu0 %vm706_vm1, %v2398_v0  ;;  %v9317_v35 = vpop.f32.mrf.mxu1  ;;  %v3611_v0 = vrot.slane %v3610_v34, 4  ;;  %v7681_v9 = vld [vmem:[%s8388_s8 + $0x20] sm:$0x1]  ;;  %v2930_v58 = vsel %vm8862_vm7, %v7402_v54, %v2929_v3  ;;  %v4742_v3 = vor.u32 %v4741_v15, %v4738_v23  ;;  %5875 = vmatpush.bf16.msrb.mxu1 %v5866_v28 }
 0x202   : > { %v4752_v26 = vor.u32 %v4751_v61, %v9327_v56 }
 0x203   : > { %v3177_v18 = vsel %vm2012_vm8, %v3135_v40, 0.0  ;;  %v3237_v21 = vmul.f32 %v3135_v40, %v3135_v40  ;;  %v8026_v53 = vpack.i.bf16 %v3135_v40, %v9289_v20  ;;  %v2738_v20 = vadd.f32 %v9281_v57, %v2583_v36  ;;  %v7859_v57 = vld [vmem:[%s11404_s1 + $0x1e] sm:$0x3] }
 0x204   : > { %v3178_v50 = vadd.f32 %v3177_v18, %v3176_v8  ;;  %7370 = vmatmul.msk.bf16.gmra.mxu2 %vm706_vm1, %v8928_v1  ;;  %7353 = vmatmul.msk.bf16.gmra.mxu1 %vm706_vm1, %v8922_v29  ;;  %v3625_v8 = vrot.slane %v3623_v33, 5  ;;  %v2346_v29 = vsel %vm8862_vm7, %v7320_v32, %v2345_v42  ;;  %v2933_v42 = vsel %vm8862_vm7, %v2931_v49, %v2932_v63 }
 0x205   : > { %v3279_v2 = vsel %vm2012_vm8, %v3237_v21, 0.0  ;;  %7418 = vmatmul.msk.bf16.gmra.mxu3 %vm706_vm1, %v2982_v43  ;;  %8027 = vrot.lane.b32.xlu2 %v8026_v53, %s8313_s21  ;;  %v7810_v43 = vld [vmem:[%s11404_s1 + $0x1c] sm:$0x3]  ;;  %v6358_v6 = vsel %vm755_vm0, %v7859_v57, 0  ;;  %v4755_v40 = vshll.u32 %v7681_v9, 16  ;;  %v2382_v54 = vunpack.c.l.b16 %v2346_v29 }
 0x206   : > { %v3280_v17 = vadd.f32 %v3279_v2, %v3278_v10  ;;  %v2492_v1 = vpop.f32.mrf.mxu0  ;;  %v7777_v10 = vld [vmem:[%s11404_s1 + $0x1a] sm:$0x3]  ;;  %v5960_v32 = vsel %vm755_vm0, %v7810_v43, 0  ;;  %6367 = vmatpush.bf16.msrb.mxu3 %v6358_v6  ;;  %v2383_v49 = vunpack.c.l.b16 %v2349_v27  ;;  %v2966_v63 = vunpack.c.l.b16 %v2930_v58  ;;  %v7683_v6 = vld [vmem:[%s8388_s8 + $0x28] sm:$0xf] }
 0x207   : > { %v9349_v34 = vpop.f32.mrf.mxu2  ;;  %5969 = vmatpush.bf16.msrb.mxu2 %v5960_v32  ;;  %v5774_v36 = vsel %vm755_vm0, %v7777_v10, 0  ;;  %v2967_v18 = vunpack.c.l.b16 %v2933_v42  ;;  %v3616_v21 = vsel %vm8404_vm4, %v3611_v0, %v9305_v41  ;;  %v3626_v53 = vsel %vm8404_vm4, %v3621_v22, %v3625_v8  ;;  %v7423_v22 = vld [vmem:[%s8388_s8 + $0x1c] sm:$0xf]  ;;  %v7682_v42 = vld [vmem:[%s8388_s8 + $0x24] sm:$0xf] }
 0x208   : > { %v3074_v24 = vpop.f32.mrf.mxu3  ;;  %5783 = vmatpush.bf16.msrb.mxu0 %v5774_v36  ;;  %v2585_v2 = vadd.f32 %v9291_v37, %v2492_v1  ;;  %v4753_v29 = vrot.slane %v4752_v26, 4  ;;  %v4757_v27 = vrot.slane %v4755_v40, 5  ;;  %v3628_v58 = vshrl.u32 %v7422_v11, 16  ;;  %v7943_v26 = vld [vmem:[%s8388_s8 + $0xc] sm:$0xff] }
 0x209   : > { %v9361_v33 = vadd.f32 %v3074_v24, %v2738_v20  ;;  %v9363_v23 = vpop.f32.mrf.mxu1  ;;  %v4743_v20 = vrot.slane %v4742_v3, 4  ;;  %v2399_v0 = vpack.c.b16 %v2383_v49, %v2382_v54  ;;  %v3631_v8 = vshll.u32 %v7422_v11, 16  ;;  %v7959_v24 = vld [vmem:[%s8388_s8 + $0x18] sm:$0xff]  ;;  %v7454_v11 = vld [vmem:[%s8388_s8 + $0x20] sm:$0x1] }
 0x20a   : > { %v2983_v10 = vpack.c.b16 %v2967_v18, %v2966_v63  ;;  %v2739_v32 = vadd.f32 %v9311_v55, %v2585_v2  ;;  %v3990_v1 = vunpack.c.l.b16 %v3626_v53  ;;  %v3630_v40 = vrot.slane %v3628_v58, 4 }
 0x20b   : > { %v3179_v15 = vsel %vm2012_vm8, %v9361_v33, 0.0  ;;  %v3238_v61 = vmul.f32 %v9361_v33, %v9361_v33  ;;  %v4748_v3 = vsel %vm8404_vm4, %v4743_v20, %v9327_v56  ;;  %v3637_v36 = vshll.u32 %v7423_v22, 16 }
 0x20c   : > { %v3180_v9 = vadd.f32 %v3179_v15, %v3178_v50  ;;  %v3989_v50 = vunpack.c.l.b16 %v3616_v21  ;;  %v3641_v28 = vshrl.u32 %v7423_v22, 16  ;;  %v3633_v63 = vrot.slane %v3631_v8, 5 }
 0x20d   : > { %v3281_v41 = vsel %vm2012_vm8, %v3238_v61, 0.0  ;;  %v4760_v56 = vshrl.u32 %v7682_v42, 16  ;;  %v5121_v18 = vunpack.c.l.b16 %v4748_v3  ;;  %v4763_v21 = vshll.u32 %v7682_v42, 16  ;;  %v7684_v42 = vld [vmem:[%s8388_s8 + $0x2c] sm:$0x1] }
 0x20e   : > { %v3282_v43 = vadd.f32 %v3281_v41, %v3280_v17  ;;  %v2495_v57 = vpop.f32.mrf.mxu0  ;;  %v4758_v17 = vsel %vm8404_vm4, %v4753_v29, %v4757_v27  ;;  %v4769_v53 = vshll.u32 %v7683_v6, 16  ;;  %v4773_v15 = vshrl.u32 %v7683_v6, 16 }
 0x20f   : > { %v9380_v37 = vpop.f32.mrf.mxu2  ;;  %v2588_v54 = vadd.f32 %v9317_v35, %v2495_v57  ;;  %v5122_v29 = vunpack.c.l.b16 %v4758_v17  ;;  %v9399_v35 = vrot.slane %v3637_v36, 5  ;;  %v3643_v58 = vrot.slane %v3641_v28, 4  ;;  %v7424_v17 = vld [vmem:[%s8388_s8 + $0x24] sm:$0xf] }
 0x210   : > { %v3076_v44 = vpop.f32.mrf.mxu3  ;;  %v3647_v41 = vshll.u32 %v7454_v11, 16  ;;  %v3634_v22 = vor.u32 %v3633_v63, %v3630_v40  ;;  %v4762_v8 = vrot.slane %v4760_v56, 4  ;;  %v9406_v3 = vrot.slane %v4769_v53, 5 }
 0x211   : > { %v3137_v55 = vadd.f32 %v3076_v44, %v2739_v32  ;;  %7337 = vmatmul.msk.bf16.gmra.mxu0 %vm706_vm1, %v2399_v0  ;;  %v9392_v49 = vpop.f32.mrf.mxu1  ;;  %v4765_v32 = vrot.slane %v4763_v21, 5  ;;  %v4775_v6 = vrot.slane %v4773_v15, 4  ;;  %v3644_v40 = vor.u32 %v3643_v58, %v9399_v35  ;;  %v7686_v15 = vld [vmem:[%s8388_s8 + $0x34] sm:$0xf] }
 0x212   : > { %v9420_v36 = vrot.slane %v3647_v41, 5  ;;  %v4779_v28 = vshll.u32 %v7684_v42, 16  ;;  %v9425_v63 = vrot.slane %v3634_v22, 4  ;;  %v3652_v21 = vshrl.u32 %v7424_v17, 16 }
 0x213   : > { %v3181_v61 = vsel %vm2012_vm8, %v3137_v55, 0.0  ;;  %v3239_v2 = vmul.f32 %v3137_v55, %v3137_v55  ;;  %v8031_v20 = vpack.i.bf16 %v3137_v55, %v9361_v33  ;;  %v2740_v33 = vadd.f32 %v9349_v34, %v2588_v54  ;;  %v7425_v55 = vld [vmem:[%s8388_s8 + $0x28] sm:$0xf]  ;;  %v7685_v54 = vld [vmem:[%s8388_s8 + $0x30] sm:$0xf] }
 0x214   : > { %v3182_v27 = vadd.f32 %v3181_v61, %v3180_v9  ;;  %7663 = vmatmul.msk.bf16.vlgmr.msra.gmra.mxu2 %vm706_vm1, %v7959_v24  ;;  %7550 = vmatmul.msk.bf16.vlgmr.msra.gmra.mxu1 %vm706_vm1, %v7943_v26  ;;  %v9410_v26 = vpack.c.b16 %v3990_v1, %v3989_v50  ;;  %v4766_v50 = vor.u32 %v4765_v32, %v4762_v8  ;;  %v3655_v53 = vshll.u32 %v7424_v17, 16 }
 0x215   : > { %v3283_v0 = vsel %vm2012_vm8, %v3239_v2, 0.0  ;;  %7419 = vmatmul.msk.bf16.gmra.mxu3 %vm706_vm1, %v2983_v10  ;;  %8032 = vrot.lane.b32.xlu0 %v8031_v20, %s8313_s21  ;;  %v9412_v10 = vpack.c.b16 %v5122_v29, %v5121_v18  ;;  %v4776_v1 = vor.u32 %v4775_v6, %v9406_v3  ;;  %v3661_v2 = vshll.u32 %v7425_v55, 16 }
 0x216   : > { %v3284_v9 = vadd.f32 %v3283_v0, %v3282_v43  ;;  %v2497_v57 = vpop.f32.mrf.mxu0  ;;  %v3665_v20 = vshrl.u32 %v7425_v55, 16  ;;  %v4784_v29 = vshrl.u32 %v7685_v54, 16  ;;  %v3645_v58 = vrot.slane %v3644_v40, 4 }
 0x217   : > { %v9408_v44 = vpop.f32.mrf.mxu2  ;;  %v2590_v11 = vadd.f32 %v9363_v23, %v2497_v57  ;;  %v4781_v41 = vrot.slane %v4779_v28, 5  ;;  %v4787_v0 = vshll.u32 %v7685_v54, 16  ;;  %v4767_v8 = vrot.slane %v4766_v50, 4  ;;  %v7960_v28 = vld [vmem:[%s8388_s8 + $0x24] sm:$0xff] }
 0x218   : > { %v3079_v24 = vpop.f32.mrf.mxu3  ;;  %v4777_v57 = vrot.slane %v4776_v1, 4  ;;  %v4793_v42 = vshll.u32 %v7686_v15, 16  ;;  %v3657_v17 = vrot.slane %v3655_v53, 5  ;;  %v4797_v55 = vshrl.u32 %v7686_v15, 16 }
 0x219   : > { %v9415_v34 = vadd.f32 %v3079_v24, %v2740_v33  ;;  %v9417_v43 = vpop.f32.mrf.mxu1  ;;  %v2741_v32 = vadd.f32 %v9380_v37, %v2590_v11  ;;  %v3654_v24 = vrot.slane %v3652_v21, 4  ;;  %v9441_v54 = vrot.slane %v3661_v2, 5  ;;  %v7687_v11 = vld [vmem:[%s8388_s8 + $0x38] sm:$0x1] }
 0x21a   : > { %v4786_v50 = vrot.slane %v4784_v29, 4  ;;  %v9448_v21 = vrot.slane %v4793_v42, 5  ;;  %v4799_v53 = vrot.slane %v4797_v55, 4  ;;  %v3650_v15 = vsel %vm8404_vm4, %v3645_v58, %v9420_v36 }
 0x21b   : > { %v3183_v56 = vsel %vm2012_vm8, %v9415_v34, 0.0  ;;  %v3240_v18 = vmul.f32 %v9415_v34, %v9415_v34  ;;  %v4772_v2 = vsel %vm8404_vm4, %v4767_v8, %v9406_v3  ;;  %v3658_v42 = vor.u32 %v3657_v17, %v3654_v24 }
 0x21c   : > { %v3184_v61 = vadd.f32 %v3183_v56, %v3182_v27  ;;  %v7455_v27 = vld [vmem:[%s8388_s8 + $0x2c] sm:$0x1]  ;;  %v4800_v58 = vor.u32 %v4799_v53, %v9448_v21  ;;  %v5123_v55 = vunpack.c.l.b16 %v4772_v2 }
 0x21d   : > { %v3285_v23 = vsel %vm2012_vm8, %v3240_v18, 0.0  ;;  %v7944_v18 = vld [vmem:[%s8388_s8 + $0x18] sm:$0xff]  ;;  %v11498_v2 = vld [vmem:[#allocation3_spill] sm:$0xff] }
 0x21e   : > { %v3286_v33 = vadd.f32 %v3285_v23, %v3284_v9  ;;  %v2500_v22 = vpop.f32.mrf.mxu0  ;;  %v3667_v9 = vrot.slane %v3665_v20, 4  ;;  %v4789_v23 = vrot.slane %v4787_v0, 5  ;;  %v3671_v20 = vshll.u32 %v7455_v27, 16 }
 0x21f   : > { %v9435_v6 = vpop.f32.mrf.mxu2  ;;  %v2593_v40 = vadd.f32 %v9392_v49, %v2500_v22  ;;  %v3640_v49 = vsel %vm8404_vm4, %v9425_v63, %v9399_v35  ;;  %v4782_v35 = vsel %vm8404_vm4, %v4777_v57, %v4781_v41  ;;  %v4803_v63 = vshll.u32 %v7687_v11, 16 }
 0x220   : > { %v3081_v56 = vpop.f32.mrf.mxu3  ;;  %v3668_v36 = vor.u32 %v3667_v9, %v9441_v54  ;;  %v3991_v41 = vunpack.c.l.b16 %v3640_v49  ;;  %v3992_v57 = vunpack.c.l.b16 %v3650_v15  ;;  %v4801_v49 = vrot.slane %v4800_v58, 4 }
 0x221   : > { %v3139_v1 = vadd.f32 %v3081_v56, %v2741_v32  ;;  %7470 = vmatmul.msk.bf16.vlgmr.msra.gmra.mxu0 %vm706_vm1, %v9410_v26  ;;  %v9445_v37 = vpop.f32.mrf.mxu1  ;;  %v5124_v56 = vunpack.c.l.b16 %v4782_v35 }
 0x222   : > { %v9496_v58 = vpack.c.b16 %v3992_v57, %v3991_v41  ;;  %v7688_v41 = vld [vmem:[%s8388_s8 + $0x3c] sm:$0xf] }
 0x223   : > { %v3185_v29 = vsel %vm2012_vm8, %v3139_v1, 0.0  ;;  %v3241_v0 = vmul.f32 %v3139_v1, %v3139_v1  ;;  %v8036_v22 = vpack.i.bf16 %v3139_v1, %v9415_v34  ;;  %v2742_v34 = vadd.f32 %v9408_v44, %v2593_v40 }
 0x224   : > { %v3186_v32 = vadd.f32 %v3185_v29, %v3184_v61  ;;  %7664 = vmatmul.msk.bf16.gmra.mxu2 %vm706_vm1, %v7960_v28  ;;  %7551 = vmatmul.msk.bf16.gmra.mxu1 %vm706_vm1, %v7944_v18  ;;  %v4790_v61 = vor.u32 %v4789_v23, %v4786_v50  ;;  %v3659_v28 = vrot.slane %v3658_v42, 4  ;;  %v3673_v18 = vrot.slane %v3671_v20, 5  ;;  %v11499_v29 = vld [vmem:[#allocation2_spill] sm:$0xff]  ;;  %11500 = vst [vmem:[#allocation9_spill] sm:$0xff] %v9496_v58 }
 0x225   : > { %v3287_v3 = vsel %vm2012_vm8, %v3241_v0, 0.0  ;;  %7728 = vmatmul.msk.bf16.vlgmr.msra.gmra.mxu3 %vm706_vm1, %v9412_v10  ;;  %8037 = vrot.lane.b32.xlu1 %v8036_v22, %s8313_s21  ;;  %v3669_v40 = vrot.slane %v3668_v36, 4  ;;  %v4805_v50 = vrot.slane %v4803_v63, 5 }
 0x226   : > { %v3288_v8 = vadd.f32 %v3287_v3, %v3286_v33  ;;  %v2502_v27 = vpop.f32.mrf.mxu0  ;;  %v7426_v33 = vld [vmem:[%s8388_s8 + $0x30] sm:$0xf]  ;;  %v4791_v53 = vrot.slane %v4790_v61, 4 }
 0x227   : > { %v8003_v24 = vpop.permute.xlu0 %8002  ;;  %v9474_v17 = vpop.f32.mrf.mxu2  ;;  %v3676_v15 = vshrl.u32 %v7426_v33, 16  ;;  %v2595_v22 = vadd.f32 %v9417_v43, %v2502_v27  ;;  %v3679_v42 = vshll.u32 %v7426_v33, 16  ;;  %v3664_v27 = vsel %vm8404_vm4, %v3659_v28, %v9441_v54 }
 0x228   : > { %v8005_v9 = vunpack.i.h.bf16 %v8003_v24  ;;  %v8004_v1 = vunpack.i.l.bf16 %v8003_v24  ;;  %v3084_v44 = vpop.f32.mrf.mxu3  ;;  %v4806_v33 = vsel %vm8404_vm4, %v4801_v49, %v4805_v50  ;;  %v9515_v28 = vpack.c.b16 %v5124_v56, %v5123_v55 }
 0x229   : > { %v9477_v11 = vadd.f32 %v3084_v44, %v2742_v34  ;;  %v9479_v23 = vpop.f32.mrf.mxu1  ;;  %v7427_v34 = vld [vmem:[%s8388_s8 + $0x34] sm:$0xf]  ;;  %v3678_v24 = vrot.slane %v3676_v15, 4  ;;  %v2743_v54 = vadd.f32 %v9435_v6, %v2595_v22  ;;  %v5126_v56 = vunpack.c.l.b16 %v4806_v33 }
 0x22a   : > { %v3457_v20 = vsel %vm2012_vm8, %v11498_v2, %v8005_v9  ;;  %v3456_v0 = vsel %vm2012_vm8, %v11499_v29, %v8004_v1  ;;  %v3681_v9 = vrot.slane %v3679_v42, 5  ;;  %v3674_v1 = vsel %vm8404_vm4, %v3669_v40, %v3673_v18  ;;  %11501 = vst [vmem:[#allocation13_spill] sm:$0xff] %v9515_v28  ;;  %v7456_v40 = vld [vmem:[%s8388_s8 + $0x38] sm:$0x1]  ;;  %v7961_v42 = vld [vmem:[%s8388_s8 + $0x30] sm:$0xff] }
 0x22b   : > { %v3489_v35 = vpack.c.bf16 %v3457_v20, %v3457_v20  ;;  %v3488_v36 = vpack.c.bf16 %v3456_v0, %v3456_v0  ;;  %v3187_v63 = vsel %vm2012_vm8, %v9477_v11, 0.0  ;;  %v3242_v3 = vmul.f32 %v9477_v11, %v9477_v11 }
 0x22c   : > { %v3188_v61 = vadd.f32 %v3187_v63, %v3186_v32  ;;  %v4796_v32 = vsel %vm8404_vm4, %v4791_v53, %v9448_v21  ;;  %v3685_v15 = vshll.u32 %v7427_v34, 16  ;;  %v3689_v20 = vshrl.u32 %v7427_v34, 16  ;;  %v7689_v21 = vld [vmem:[%s8388_s8 + $0x40] sm:$0xf] }
 0x22d   : > { %3522 = vst.msk [vmem:[%s9484_s6 + $0x4] sm:$0xf] %vm3520_vm9, %v3489_v35  ;;  %v3289_v43 = vsel %vm2012_vm8, %v3242_v3, 0.0  ;;  %v3682_v0 = vor.u32 %v3681_v9, %v3678_v24  ;;  %v7945_v35 = vld [vmem:[%s8388_s8 + $0x24] sm:$0xff]  ;;  %v4808_v63 = vshrl.u32 %v7688_v41, 16  ;;  %v4811_v3 = vshll.u32 %v7688_v41, 16 }
 0x22e   : > { %3521 = vst.msk [vmem:[%s9484_s6] sm:$0xf] %vm3520_vm9, %v3488_v36  ;;  %v3290_v57 = vadd.f32 %v3289_v43, %v3288_v8  ;;  %v2505_v44 = vpop.f32.mrf.mxu0  ;;  %v3993_v36 = vunpack.c.l.b16 %v3664_v27  ;;  %v3994_v8 = vunpack.c.l.b16 %v3674_v1  ;;  %v5125_v55 = vunpack.c.l.b16 %v4796_v32 }
 0x22f   : > { %v9517_v18 = vpop.f32.mrf.mxu2  ;;  %v2598_v50 = vadd.f32 %v9445_v37, %v2505_v44  ;;  %v9528_v49 = vrot.slane %v3685_v15, 5  ;;  %v3691_v22 = vrot.slane %v3689_v20, 4  ;;  %v3695_v34 = vshll.u32 %v7456_v40, 16 }
 0x230   : > { %v3086_v53 = vpop.f32.mrf.mxu3  ;;  %v4817_v24 = vshll.u32 %v7689_v21, 16  ;;  %v9532_v41 = vrot.slane %v3682_v0, 4  ;;  %v4810_v32 = vrot.slane %v4808_v63, 4  ;;  %v4813_v44 = vrot.slane %v4811_v3, 5  ;;  %v7690_v0 = vld [vmem:[%s8388_s8 + $0x44] sm:$0x1] }
 0x231   : > { %v3141_v43 = vadd.f32 %v3086_v53, %v2743_v54  ;;  %7471 = vmatmul.msk.bf16.gmra.mxu0 %vm706_vm1, %v9496_v58  ;;  %v9526_v6 = vpop.f32.mrf.mxu1  ;;  %v4821_v33 = vshrl.u32 %v7689_v21, 16  ;;  %v9543_v40 = vpack.c.b16 %v5126_v56, %v5125_v55  ;;  %v7429_v55 = vld [vmem:[%s8388_s8 + $0x40] sm:$0xf]  ;;  %v7457_v58 = vld [vmem:[%s8388_s8 + $0x44] sm:$0x1] }
 0x232   : > { %v4814_v3 = vor.u32 %v4813_v44, %v4810_v32 }
 0x233   : > { %v3189_v9 = vsel %vm2012_vm8, %v3141_v43, 0.0  ;;  %v3243_v27 = vmul.f32 %v3141_v43, %v3141_v43  ;;  %v8041_v1 = vpack.i.bf16 %v3141_v43, %v9477_v11  ;;  %v2744_v11 = vadd.f32 %v9474_v17, %v2598_v50  ;;  %11503 = vst [vmem:[#allocation19_spill] sm:$0xff] %v9543_v40  ;;  %v7428_v50 = vld [vmem:[%s8388_s8 + $0x3c] sm:$0xf] }
 0x234   : > { %v3190_v37 = vadd.f32 %v3189_v9, %v3188_v61  ;;  %7665 = vmatmul.msk.bf16.gmra.mxu2 %vm706_vm1, %v7961_v42  ;;  %7552 = vmatmul.msk.bf16.gmra.mxu1 %vm706_vm1, %v7945_v35  ;;  %v9541_v61 = vpack.c.b16 %v3994_v8, %v3993_v36  ;;  %v3692_v35 = vor.u32 %v3691_v22, %v9528_v49  ;;  %v9553_v17 = vrot.slane %v3695_v34, 5 }
 0x235   : > { %v3291_v15 = vsel %vm2012_vm8, %v3243_v27, 0.0  ;;  %7729 = vmatmul.msk.bf16.gmra.mxu3 %vm706_vm1, %v9515_v28  ;;  %8042 = vrot.lane.b32.xlu2 %v8041_v1, %s8313_s21  ;;  %v4823_v43 = vrot.slane %v4821_v33, 4  ;;  %v4827_v22 = vshll.u32 %v7690_v0, 16  ;;  %v3700_v34 = vshrl.u32 %v7428_v50, 16  ;;  %v7691_v0 = vld [vmem:[%s8388_s8 + $0x48] sm:$0xf] }
 0x236   : > { %v3292_v20 = vadd.f32 %v3291_v15, %v3290_v57  ;;  %v2507_v54 = vpop.f32.mrf.mxu0  ;;  %11502 = vst [vmem:[#allocation12_spill] sm:$0xff] %v9541_v61  ;;  %v9555_v57 = vrot.slane %v4817_v24, 5  ;;  %v11504_v24 = vld [vmem:[#allocation5_spill] sm:$0xff]  ;;  %v11505_v15 = vld [vmem:[#allocation4_spill] sm:$0xff]  ;;  %v3703_v44 = vshll.u32 %v7428_v50, 16  ;;  %v3709_v33 = vshll.u32 %v7429_v55, 16 }
 0x237   : > { %v8008_v53 = vpop.permute.xlu0 %8007  ;;  %v9546_v21 = vpop.f32.mrf.mxu2  ;;  %v2600_v9 = vadd.f32 %v9479_v23, %v2507_v54  ;;  %v3693_v42 = vrot.slane %v3692_v35, 4  ;;  %v4815_v2 = vrot.slane %v4814_v3, 4  ;;  %v4829_v50 = vrot.slane %v4827_v22, 5  ;;  %v7962_v28 = vld [vmem:[%s8388_s8 + $0x3c] sm:$0xff] }
 0x238   : > { %v8010_v63 = vunpack.i.h.bf16 %v8008_v53  ;;  %v8009_v36 = vunpack.i.l.bf16 %v8008_v53  ;;  %v3089_v8 = vpop.f32.mrf.mxu3  ;;  %v4832_v35 = vshrl.u32 %v7691_v0, 16  ;;  %v4835_v3 = vshll.u32 %v7691_v0, 16 }
 0x239   : > { %v9559_v56 = vadd.f32 %v3089_v8, %v2744_v11  ;;  %v9562_v27 = vpop.f32.mrf.mxu1 }
 0x23a   : > { %v3459_v1 = vsel %vm2012_vm8, %v11504_v24, %v8010_v63  ;;  %v3458_v32 = vsel %vm2012_vm8, %v11505_v15, %v8009_v36  ;;  %v4824_v63 = vor.u32 %v4823_v43, %v9555_v57  ;;  %v7692_v24 = vld [vmem:[%s8388_s8 + $0x4c] sm:$0xf] }
 0x23b   : > { %v3491_v53 = vpack.c.bf16 %v3459_v1, %v3459_v1  ;;  %v3490_v11 = vpack.c.bf16 %v3458_v32, %v3458_v32  ;;  %v3191_v23 = vsel %vm2012_vm8, %v9559_v56, 0.0  ;;  %v3244_v54 = vmul.f32 %v9559_v56, %v9559_v56 }
 0x23c   : > { %v3192_v8 = vadd.f32 %v3191_v23, %v3190_v37  ;;  %v3702_v1 = vrot.slane %v3700_v34, 4  ;;  %v3713_v32 = vshrl.u32 %v7429_v55, 16  ;;  %v3705_v37 = vrot.slane %v3703_v44, 5  ;;  %v7946_v55 = vld [vmem:[%s8388_s8 + $0x30] sm:$0xff] }
 0x23d   : > { %3524 = vst.msk [vmem:[%s9484_s6 + $0x14] sm:$0xf] %vm3520_vm9, %v3491_v53  ;;  %v3293_v36 = vsel %vm2012_vm8, %v3244_v54, 0.0  ;;  %v2745_v23 = vadd.f32 %v9517_v18, %v2600_v9  ;;  %v9584_v53 = vrot.slane %v3709_v33, 5  ;;  %v4841_v54 = vshll.u32 %v7692_v24, 16 }
 0x23e   : > { %3523 = vst.msk [vmem:[%s9484_s6 + $0x10] sm:$0xf] %vm3520_vm9, %v3490_v11  ;;  %v3294_v15 = vadd.f32 %v3293_v36, %v3292_v20  ;;  %v2510_v29 = vpop.f32.mrf.mxu0  ;;  %v3715_v22 = vrot.slane %v3713_v32, 4  ;;  %v4825_v4 = vrot.slane %v4824_v63, 4  ;;  %v4834_v11 = vrot.slane %v4832_v35, 4 }
 0x23f   : > { %v9581_v43 = vpop.f32.mrf.mxu2  ;;  %v4837_v20 = vrot.slane %v4835_v3, 5  ;;  %v4845_v36 = vshrl.u32 %v7692_v24, 16  ;;  %v2603_v0 = vadd.f32 %v9526_v6, %v2510_v29  ;;  %v3698_v9 = vsel %vm8404_vm4, %v3693_v42, %v9553_v17  ;;  %v7693_v33 = vld [vmem:[%s8388_s8 + $0x50] sm:$0x1] }
 0x240   : > { %v3091_v34 = vpop.f32.mrf.mxu3  ;;  %v9597_v32 = vrot.slane %v4841_v54, 5  ;;  %v4820_v63 = vsel %vm8404_vm4, %v4815_v2, %v9555_v57  ;;  %v3706_v24 = vor.u32 %v3705_v37, %v3702_v1  ;;  %v3719_v35 = vshll.u32 %v7457_v58, 16 }
 0x241   : > { %v3143_v44 = vadd.f32 %v3091_v34, %v2745_v23  ;;  %7472 = vmatmul.msk.bf16.gmra.mxu0 %vm706_vm1, %v9541_v61  ;;  %v9591_v18 = vpop.f32.mrf.mxu1  ;;  %v4847_v3 = vrot.slane %v4845_v36, 4  ;;  %v3716_v34 = vor.u32 %v3715_v22, %v9584_v53  ;;  %v4830_v42 = vsel %vm8404_vm4, %v4825_v4, %v4829_v50 }
 0x242   : > { %v4838_v17 = vor.u32 %v4837_v20, %v4834_v11  ;;  %v4851_v2 = vshll.u32 %v7693_v33, 16  ;;  %v2746_v57 = vadd.f32 %v9546_v21, %v2603_v0  ;;  %v11506_v4 = vsel %vm8404_vm4, %v9532_v41, %v9528_v49  ;;  %v7430_v41 = vld [vmem:[%s8388_s8 + $0x48] sm:$0xf] }
 0x243   : > { %v3193_v29 = vsel %vm2012_vm8, %v3143_v44, 0.0  ;;  %v3245_v6 = vmul.f32 %v3143_v44, %v3143_v44  ;;  %v8046_v23 = vpack.i.bf16 %v3143_v44, %v9559_v56  ;;  %v4848_v56 = vor.u32 %v4847_v3, %v9597_v32 }
 0x244   : > { %v3194_v61 = vadd.f32 %v3193_v29, %v3192_v8  ;;  %7666 = vmatmul.msk.bf16.gmra.mxu2 %vm706_vm1, %v7962_v28  ;;  %7553 = vmatmul.msk.bf16.gmra.mxu1 %vm706_vm1, %v7946_v55  ;;  %v3995_v50 = vunpack.c.l.b16 %v11506_v4  ;;  %v3996_v1 = vunpack.c.l.b16 %v3698_v9  ;;  %v5127_v37 = vunpack.c.l.b16 %v4820_v63  ;;  %v7431_v9 = vld [vmem:[%s8388_s8 + $0x4c] sm:$0xf] }
 0x245   : > { %v3295_v58 = vsel %vm2012_vm8, %v3245_v6, 0.0  ;;  %7730 = vmatmul.msk.bf16.gmra.mxu3 %vm706_vm1, %v9543_v40  ;;  %8047 = vrot.lane.b32.xlu0 %v8046_v23, %s8313_s21  ;;  %v5128_v55 = vunpack.c.l.b16 %v4830_v42  ;;  %v9622_v11 = vrot.slane %v3706_v24, 4  ;;  %v9624_v21 = vrot.slane %v3716_v34, 4  ;;  %v11507_v29 = vld [vmem:[#allocation7_spill] sm:$0xff]  ;;  %v11508_v23 = vld [vmem:[#allocation6_spill] sm:$0xff] }
 0x246   : > { %v3296_v8 = vadd.f32 %v3295_v58, %v3294_v15  ;;  %v2512_v28 = vpop.f32.mrf.mxu0  ;;  %v9626_v15 = vrot.slane %v3719_v35, 5  ;;  %v9628_v0 = vrot.slane %v4838_v17, 4  ;;  %v9630_v49 = vrot.slane %v4851_v2, 5 }
 0x247   : > { %v8013_v22 = vpop.permute.xlu1 %8012  ;;  %v9620_v54 = vpop.f32.mrf.mxu2  ;;  %v2605_v63 = vadd.f32 %v9562_v27, %v2512_v28  ;;  %v9639_v3 = vrot.slane %v4848_v56, 4  ;;  %v3724_v35 = vshrl.u32 %v7430_v41, 16  ;;  %v3727_v42 = vshll.u32 %v7430_v41, 16 }
 0x248   : > { %v8015_v20 = vunpack.i.h.bf16 %v8013_v22  ;;  %v8014_v36 = vunpack.i.l.bf16 %v8013_v22  ;;  %v3094_v44 = vpop.f32.mrf.mxu3  ;;  %v3733_v17 = vshll.u32 %v7431_v9, 16  ;;  %v9649_v28 = vpack.c.b16 %v3996_v1, %v3995_v50  ;;  %v7458_v1 = vld [vmem:[%s8388_s8 + $0x50] sm:$0x1] }
 0x249   : > { %v9634_v33 = vadd.f32 %v3094_v44, %v2746_v57  ;;  %v9637_v24 = vpop.f32.mrf.mxu1  ;;  %v9654_v22 = vpack.c.b16 %v5128_v55, %v5127_v37  ;;  %v7694_v44 = vld [vmem:[%s8388_s8 + $0x54] sm:$0xf]  ;;  %v3722_v50 = vsel %vm8404_vm4, %v9624_v21, %v9626_v15  ;;  %v3726_v37 = vrot.slane %v3724_v35, 4  ;;  %v7695_v15 = vld [vmem:[%s8388_s8 + $0x58] sm:$0xf] }
 0x24a   : > { %v3461_v6 = vsel %vm2012_vm8, %v11507_v29, %v8015_v20  ;;  %v3460_v34 = vsel %vm2012_vm8, %v11508_v23, %v8014_v36  ;;  %11509 = vst [vmem:[#allocation20_spill] sm:$0xff] %v9649_v28  ;;  %v3712_v20 = vsel %vm8404_vm4, %v9622_v11, %v9584_v53  ;;  %v3737_v36 = vshrl.u32 %v7431_v9, 16 }
 0x24b   : > { %v3493_v2 = vpack.c.bf16 %v3461_v6, %v3461_v6  ;;  %v3492_v58 = vpack.c.bf16 %v3460_v34, %v3460_v34  ;;  %v3195_v27 = vsel %vm2012_vm8, %v9634_v33, 0.0  ;;  %v3246_v57 = vmul.f32 %v9634_v33, %v9634_v33  ;;  %11510 = vst [vmem:[#allocation21_spill] sm:$0xff] %v9654_v22 }
 0x24c   : > { %v3196_v56 = vadd.f32 %v3195_v27, %v3194_v61  ;;  %v3729_v55 = vrot.slane %v3727_v42, 5  ;;  %v2747_v53 = vadd.f32 %v9581_v43, %v2605_v63  ;;  %v4854_v9 = vsel %vm8404_vm4, %v9639_v3, %v9630_v49  ;;  %v7963_v63 = vld [vmem:[%s8388_s8 + $0x48] sm:$0xff]  ;;  %v11511_v3 = vld [vmem:[#allocation14_spill] sm:$0xff] }
 0x24d   : > { %3526 = vst.msk [vmem:[%s9484_s6 + $0x24] sm:$0xf] %vm3520_vm9, %v3493_v2  ;;  %v3297_v4 = vsel %vm2012_vm8, %v3246_v57, 0.0  ;;  %v9679_v21 = vrot.slane %v3733_v17, 5  ;;  %v7947_v2 = vld [vmem:[%s8388_s8 + $0x3c] sm:$0xff]  ;;  %v3743_v57 = vshll.u32 %v7458_v1, 16 }
 0x24e   : > { %3525 = vst.msk [vmem:[%s9484_s6 + $0x20] sm:$0xf] %vm3520_vm9, %v3492_v58  ;;  %v3298_v41 = vadd.f32 %v3297_v4, %v3296_v8  ;;  %v2515_v61 = vpop.f32.mrf.mxu0  ;;  %v4844_v8 = vsel %vm8404_vm4, %v9628_v0, %v9597_v32  ;;  %v4856_v58 = vshrl.u32 %v7694_v44, 16  ;;  %v3739_v0 = vrot.slane %v3737_v36, 4  ;;  %v11512_v4 = vld [vmem:[#allocation11_spill] sm:$0xff] }
 0x24f   : > { %v8023_v6 = vpop.permute.xlu2 %8022  ;;  %v9669_v11 = vpop.f32.mrf.mxu2  ;;  %v2608_v43 = vadd.f32 %v9591_v18, %v2515_v61  ;;  %v4859_v49 = vshll.u32 %v7694_v44, 16  ;;  %v3730_v18 = vor.u32 %v3729_v55, %v3726_v37  ;;  %v4865_v61 = vshll.u32 %v7695_v15, 16 }
 0x250   : > { %v8025_v35 = vunpack.i.h.bf16 %v8023_v6  ;;  %v8024_v34 = vunpack.i.l.bf16 %v8023_v6  ;;  %v3096_v42 = vpop.f32.mrf.mxu3  ;;  %v4858_v44 = vrot.slane %v4856_v58, 4  ;;  %v3740_v55 = vor.u32 %v3739_v0, %v9679_v21 }
 0x251   : > { %v3145_v27 = vadd.f32 %v3096_v42, %v2747_v53  ;;  %7473 = vmatmul.msk.bf16.gmra.mxu0 %vm706_vm1, %v9649_v28  ;;  %v9687_v32 = vpop.f32.mrf.mxu1  ;;  %v2748_v1 = vadd.f32 %v9620_v54, %v2608_v43  ;;  %v9709_v58 = vrot.slane %v3743_v57, 5  ;;  %v11513_v57 = vld [vmem:[#allocation10_spill] sm:$0xff] }
 0x252   : > { %v3465_v17 = vsel %vm2012_vm8, %v11511_v3, %v8025_v35  ;;  %v3464_v6 = vsel %vm2012_vm8, %v11512_v4, %v8024_v34  ;;  %v4869_v35 = vshrl.u32 %v7695_v15, 16  ;;  %v3997_v34 = vunpack.c.l.b16 %v3712_v20  ;;  %v11517_v4 = vld [vmem:[#allocation15_spill] sm:$0xff] }
 0x253   : > { %v3497_v29 = vpack.c.bf16 %v3465_v17, %v3465_v17  ;;  %v3496_v53 = vpack.c.bf16 %v3464_v6, %v3464_v6  ;;  %v3197_v42 = vsel %vm2012_vm8, %v3145_v27, 0.0  ;;  %v3247_v28 = vmul.f32 %v3145_v27, %v3145_v27 }
 0x254   : > { %v3198_v23 = vadd.f32 %v3197_v42, %v3196_v56  ;;  %v8051_v36 = vpack.i.bf16 %v3145_v27, %v9634_v33  ;;  %7667 = vmatmul.msk.bf16.gmra.mxu2 %vm706_vm1, %v7963_v63  ;;  %7554 = vmatmul.msk.bf16.gmra.mxu1 %vm706_vm1, %v7947_v2  ;;  %v4861_v56 = vrot.slane %v4859_v49, 5  ;;  %v5130_v2 = vunpack.c.l.b16 %v4854_v9  ;;  %v7696_v27 = vld [vmem:[%s8388_s8 + $0x5c] sm:$0x1]  ;;  %v7432_v9 = vld [vmem:[%s8388_s8 + $0x54] sm:$0xf] }
 0x255   : > { %3530 = vst.msk [vmem:[%s9484_s6 + $0x44] sm:$0xf] %vm3520_vm9, %v3497_v29  ;;  %v3299_v37 = vsel %vm2012_vm8, %v3247_v28, 0.0  ;;  %7731 = vmatmul.msk.bf16.gmra.mxu3 %vm706_vm1, %v9654_v22  ;;  %v3998_v29 = vunpack.c.l.b16 %v3722_v50  ;;  %v5129_v28 = vunpack.c.l.b16 %v4844_v8  ;;  %v9712_v17 = vrot.slane %v3730_v18, 4 }
 0x256   : > { %3529 = vst.msk [vmem:[%s9484_s6 + $0x40] sm:$0xf] %vm3520_vm9, %v3496_v53  ;;  %v3300_v54 = vadd.f32 %v3299_v37, %v3298_v41  ;;  %8052 = vrot.lane.b32.xlu1 %v8051_v36, %s8313_s21  ;;  %v2517_v33 = vpop.f32.mrf.mxu0  ;;  %v9714_v41 = vrot.slane %v4865_v61, 5  ;;  %v9720_v53 = vrot.slane %v3740_v55, 4  ;;  %v4862_v50 = vor.u32 %v4861_v56, %v4858_v44  ;;  %v11514_v36 = vld [vmem:[#allocation8_spill] sm:$0xff] }
 0x257   : > { %v8018_v43 = vpop.permute.xlu1 %8017  ;;  %v9707_v63 = vpop.f32.mrf.mxu2  ;;  %v4871_v8 = vrot.slane %v4869_v35, 4  ;;  %v2610_v18 = vadd.f32 %v9637_v24, %v2517_v33  ;;  %v4875_v61 = vshll.u32 %v7696_v27, 16  ;;  %v3748_v35 = vshrl.u32 %v7432_v9, 16 }
 0x258   : > { %v8020_v0 = vunpack.i.h.bf16 %v8018_v43  ;;  %v8019_v15 = vunpack.i.l.bf16 %v8018_v43  ;;  %v3099_v49 = vpop.f32.mrf.mxu3  ;;  %v3751_v3 = vshll.u32 %v7432_v9, 16 }
 0x259   : > { %v9716_v6 = vadd.f32 %v3099_v49, %v2748_v1  ;;  %v9718_v20 = vpop.f32.mrf.mxu1  ;;  %v7433_v1 = vld [vmem:[%s8388_s8 + $0x58] sm:$0xf]  ;;  %v4872_v24 = vor.u32 %v4871_v8, %v9714_v41  ;;  %v9754_v8 = vrot.slane %v4862_v50, 4  ;;  %v7459_v50 = vld [vmem:[%s8388_s8 + $0x5c] sm:$0x1] }
 0x25a   : > { %v3463_v42 = vsel %vm2012_vm8, %v11513_v57, %v8020_v0  ;;  %v3462_v37 = vsel %vm2012_vm8, %v11514_v36, %v8019_v15  ;;  %v9736_v15 = vpack.c.b16 %v3998_v29, %v3997_v34  ;;  %v3757_v33 = vshll.u32 %v7433_v1, 16  ;;  %v7698_v57 = vld [vmem:[%s8388_s8 + $0x64] sm:$0xf] }
 0x25b   : > { %v3495_v43 = vpack.c.bf16 %v3463_v42, %v3463_v42  ;;  %v3494_v49 = vpack.c.bf16 %v3462_v37, %v3462_v37  ;;  %v3199_v55 = vsel %vm2012_vm8, %v9716_v6, 0.0  ;;  %v3248_v44 = vmul.f32 %v9716_v6, %v9716_v6 }
 0x25c   : > { %v3200_v56 = vadd.f32 %v3199_v55, %v3198_v23  ;;  %11515 = vst [vmem:[#allocation22_spill] sm:$0xff] %v9736_v15  ;;  %v9741_v37 = vpack.c.b16 %v5130_v2, %v5129_v28  ;;  %v3736_v23 = vsel %vm8404_vm4, %v9712_v17, %v9679_v21  ;;  %v3761_v9 = vshrl.u32 %v7433_v1, 16  ;;  %v7697_v2 = vld [vmem:[%s8388_s8 + $0x60] sm:$0xf]  ;;  %v7964_v17 = vld [vmem:[%s8388_s8 + $0x54] sm:$0xff]  ;;  %v7948_v1 = vld [vmem:[%s8388_s8 + $0x48] sm:$0xff] }
 0x25d   : > { %3528 = vst.msk [vmem:[%s9484_s6 + $0x34] sm:$0xf] %vm3520_vm9, %v3495_v43  ;;  %v3301_v0 = vsel %vm2012_vm8, %v3248_v44, 0.0  ;;  %v2749_v34 = vadd.f32 %v9669_v11, %v2610_v18  ;;  %v9756_v28 = vrot.slane %v4875_v61, 5  ;;  %v3750_v44 = vrot.slane %v3748_v35, 4 }
 0x25e   : > { %3527 = vst.msk [vmem:[%s9484_s6 + $0x30] sm:$0xf] %vm3520_vm9, %v3494_v49  ;;  %v3302_v27 = vadd.f32 %v3301_v0, %v3300_v54  ;;  %v2520_v42 = vpop.f32.mrf.mxu0  ;;  %v3746_v54 = vsel %vm8404_vm4, %v9720_v53, %v9709_v58  ;;  %v3753_v11 = vrot.slane %v3751_v3, 5  ;;  %v4873_v53 = vrot.slane %v4872_v24, 4 }
 0x25f   : > { %11516 = vst [vmem:[#allocation23_spill] sm:$0xff] %v9741_v37  ;;  %v8028_v43 = vpop.permute.xlu2 %8027  ;;  %v9748_v29 = vpop.f32.mrf.mxu2  ;;  %v2613_v0 = vadd.f32 %v9687_v32, %v2520_v42  ;;  %v9767_v61 = vrot.slane %v3757_v33, 5  ;;  %v3763_v35 = vrot.slane %v3761_v9, 4 }
 0x260   : > { %v8030_v49 = vunpack.i.h.bf16 %v8028_v43  ;;  %v8029_v55 = vunpack.i.l.bf16 %v8028_v43  ;;  %v3101_v21 = vpop.f32.mrf.mxu3 }
 0x261   : > { %v3147_v18 = vadd.f32 %v3101_v21, %v2749_v34  ;;  %7474 = vmatmul.msk.bf16.gmra.mxu0 %vm706_vm1, %v9736_v15  ;;  %v9764_v58 = vpop.f32.mrf.mxu1  ;;  %v4880_v34 = vshrl.u32 %v7697_v2, 16 }
 0x262   : > { %v3467_v43 = vsel %vm2012_vm8, %v8877_v16, %v8030_v49  ;;  %v3466_v3 = vsel %vm2012_vm8, %v11517_v4, %v8029_v55  ;;  %v3754_v49 = vor.u32 %v3753_v11, %v3750_v44  ;;  %v3767_v16 = vshll.u32 %v7459_v50, 16 }
 0x263   : > { %v3499_v21 = vpack.c.bf16 %v3467_v43, %v3467_v43  ;;  %v3498_v32 = vpack.c.bf16 %v3466_v3, %v3466_v3  ;;  %v3201_v42 = vsel %vm2012_vm8, %v3147_v18, 0.0  ;;  %v3249_v15 = vmul.f32 %v3147_v18, %v3147_v18  ;;  %v7699_v3 = vld [vmem:[%s8388_s8 + $0x68] sm:$0x1] }
 0x264   : > { %v3202_v24 = vadd.f32 %v3201_v42, %v3200_v56  ;;  %v8056_v33 = vpack.i.bf16 %v3147_v18, %v9716_v6  ;;  %7668 = vmatmul.msk.bf16.gmra.mxu2 %vm706_vm1, %v7964_v17  ;;  %7555 = vmatmul.msk.bf16.gmra.mxu1 %vm706_vm1, %v7948_v1  ;;  %v2750_v55 = vadd.f32 %v9707_v63, %v2613_v0  ;;  %v4882_v43 = vrot.slane %v4880_v34, 4  ;;  %v7434_v34 = vld [vmem:[%s8388_s8 + $0x60] sm:$0xf] }
 0x265   : > { %3532 = vst.msk [vmem:[%s9484_s6 + $0x54] sm:$0xf] %vm3520_vm9, %v3499_v21  ;;  %v3303_v9 = vsel %vm2012_vm8, %v3249_v15, 0.0  ;;  %7732 = vmatmul.msk.bf16.gmra.mxu3 %vm706_vm1, %v9741_v37  ;;  %v4883_v56 = vshll.u32 %v7697_v2, 16  ;;  %v3764_v1 = vor.u32 %v3763_v35, %v9767_v61  ;;  %v4889_v44 = vshll.u32 %v7698_v57, 16 }
 0x266   : > { %3531 = vst.msk [vmem:[%s9484_s6 + $0x50] sm:$0xf] %vm3520_vm9, %v3498_v32  ;;  %v3304_v6 = vadd.f32 %v3303_v9, %v3302_v27  ;;  %8057 = vrot.lane.b32.xlu2 %v8056_v33, %s8313_s21  ;;  %v2522_v17 = vpop.f32.mrf.mxu0  ;;  %v4893_v11 = vshrl.u32 %v7698_v57, 16  ;;  %v3999_v15 = vunpack.c.l.b16 %v3736_v23  ;;  %v4000_v50 = vunpack.c.l.b16 %v3746_v54 }
 0x267   : > { %v9788_v18 = vpop.f32.mrf.mxu2  ;;  %v4885_v21 = vrot.slane %v4883_v56, 5  ;;  %v4868_v27 = vsel %vm8404_vm4, %v9754_v8, %v9714_v41  ;;  %v4878_v2 = vsel %vm8404_vm4, %v4873_v53, %v9756_v28  ;;  %v4891_v0 = vrot.slane %v4889_v44, 5 }
 0x268   : > { %v3104_v63 = vpop.f32.mrf.mxu3  ;;  %v4895_v35 = vrot.slane %v4893_v11, 4  ;;  %v3755_v23 = vrot.slane %v3754_v49, 4  ;;  %v3769_v54 = vrot.slane %v3767_v16, 5  ;;  %v2615_v33 = vadd.f32 %v9718_v20, %v2522_v17 }
 0x269   : > { %v3148_v57 = vadd.f32 %v3104_v63, %v2750_v55  ;;  %v9799_v32 = vpop.f32.mrf.mxu1  ;;  %v4886_v42 = vor.u32 %v4885_v21, %v4882_v43  ;;  %v3765_v9 = vrot.slane %v3764_v1, 4  ;;  %v4899_v37 = vshll.u32 %v7699_v3, 16 }
 0x26a   : > { %v4896_v56 = vor.u32 %v4895_v35, %v4891_v0  ;;  %v3772_v4 = vshrl.u32 %v7434_v34, 16  ;;  %v3775_v28 = vshll.u32 %v7434_v34, 16  ;;  %v5131_v44 = vunpack.c.l.b16 %v4868_v27  ;;  %v7965_v35 = vld [vmem:[%s8388_s8 + $0x60] sm:$0xff]  ;;  %v7949_v34 = vld [vmem:[%s8388_s8 + $0x54] sm:$0xff] }
 0x26b   : > { %v3203_v41 = vsel %vm2012_vm8, %v3148_v57, 0.0  ;;  %v3250_v8 = vmul.f32 %v3148_v57, %v3148_v57  ;;  %v5132_v11 = vunpack.c.l.b16 %v4878_v2  ;;  %v9804_v49 = vpack.c.b16 %v4000_v50, %v3999_v15  ;;  %v7435_v15 = vld [vmem:[%s8388_s8 + $0x64] sm:$0xf] }
 0x26c   : > { %v3204_v53 = vadd.f32 %v3203_v41, %v3202_v24  ;;  %v4887_v16 = vrot.slane %v4886_v42, 4  ;;  %v3760_v17 = vsel %vm8404_vm4, %v3755_v23, %v9767_v61  ;;  %v4897_v1 = vrot.slane %v4896_v56, 4  ;;  %v7701_v41 = vld [vmem:[%s8388_s8 + $0x70] sm:$0xf] }
 0x26d   : > { %v3305_v55 = vsel %vm2012_vm8, %v3250_v8, 0.0  ;;  %11518 = vst [vmem:[#allocation24_spill] sm:$0xff] %v9804_v49  ;;  %v4901_v3 = vrot.slane %v4899_v37, 5  ;;  %v2751_v21 = vadd.f32 %v9748_v29, %v2615_v33  ;;  %v3770_v63 = vsel %vm8404_vm4, %v3765_v9, %v3769_v54 }
 0x26e   : > { %v3306_v20 = vadd.f32 %v3305_v55, %v3304_v6  ;;  %v2525_v43 = vpop.f32.mrf.mxu0  ;;  %v3774_v50 = vrot.slane %v3772_v4, 4  ;;  %v3777_v27 = vrot.slane %v3775_v28, 5  ;;  %v9815_v2 = vpack.c.b16 %v5132_v11, %v5131_v44  ;;  %v7700_v4 = vld [vmem:[%s8388_s8 + $0x6c] sm:$0xf] }
 0x26f   : > { %v9810_v24 = vpop.f32.mrf.mxu2  ;;  %v2618_v37 = vadd.f32 %v9764_v58, %v2525_v43  ;;  %v4001_v23 = vunpack.c.l.b16 %v3760_v17  ;;  %v4892_v54 = vsel %vm8404_vm4, %v4887_v16, %v4891_v0  ;;  %v4002_v42 = vunpack.c.l.b16 %v3770_v63 }
 0x270   : > { %v3106_v6 = vpop.f32.mrf.mxu3  ;;  %11519 = vst [vmem:[#allocation25_spill] sm:$0xff] %v9815_v2  ;;  %v4902_v33 = vsel %vm8404_vm4, %v4897_v1, %v4901_v3  ;;  %v3781_v9 = vshll.u32 %v7435_v15, 16  ;;  %v3785_v56 = vshrl.u32 %v7435_v15, 16  ;;  %v3778_v44 = vor.u32 %v3777_v27, %v3774_v50 }
 0x271   : > { %v3149_v61 = vadd.f32 %v3106_v6, %v2751_v21  ;;  %7475 = vmatmul.msk.bf16.gmra.mxu0 %vm706_vm1, %v9804_v49  ;;  %v9822_v29 = vpop.f32.mrf.mxu1  ;;  %v5133_v0 = vunpack.c.l.b16 %v4892_v54  ;;  %v4904_v55 = vshrl.u32 %v7700_v4, 16  ;;  %v4907_v16 = vshll.u32 %v7700_v4, 16  ;;  %v7460_v21 = vld [vmem:[%s8388_s8 + $0x68] sm:$0x1]  ;;  %v7437_v54 = vld [vmem:[%s8388_s8 + $0x70] sm:$0xf] }
 0x272   : > { %v5134_v17 = vunpack.c.l.b16 %v4902_v33  ;;  %v4917_v63 = vshrl.u32 %v7701_v41, 16  ;;  %v9841_v50 = vrot.slane %v3778_v44, 4  ;;  %v9843_v27 = vrot.slane %v3781_v9, 5 }
 0x273   : > { %v3205_v8 = vsel %vm2012_vm8, %v3149_v61, 0.0  ;;  %v3251_v58 = vmul.f32 %v3149_v61, %v3149_v61  ;;  %v8061_v28 = vpack.i.bf16 %v3149_v61, %v3148_v57  ;;  %v2752_v57 = vadd.f32 %v9788_v18, %v2618_v37  ;;  %v7436_v37 = vld [vmem:[%s8388_s8 + $0x6c] sm:$0xf] }
 0x274   : > { %v3206_v11 = vadd.f32 %v3205_v8, %v3204_v53  ;;  %7669 = vmatmul.msk.bf16.gmra.mxu2 %vm706_vm1, %v7965_v35  ;;  %7556 = vmatmul.msk.bf16.gmra.mxu1 %vm706_vm1, %v7949_v34  ;;  %v4913_v53 = vshll.u32 %v7701_v41, 16  ;;  %v3787_v6 = vrot.slane %v3785_v56, 4  ;;  %v9845_v34 = vpack.c.b16 %v4002_v42, %v4001_v23  ;;  %v7702_v56 = vld [vmem:[%s8388_s8 + $0x74] sm:$0x1] }
 0x275   : > { %v3307_v43 = vsel %vm2012_vm8, %v3251_v58, 0.0  ;;  %7733 = vmatmul.msk.bf16.gmra.mxu3 %vm706_vm1, %v9815_v2  ;;  %8062 = vrot.lane.b32.xlu0 %v8061_v28, %s8313_s21  ;;  %v4906_v61 = vrot.slane %v4904_v55, 4  ;;  %v4909_v18 = vrot.slane %v4907_v16, 5  ;;  %v9853_v33 = vpack.c.b16 %v5134_v17, %v5133_v0  ;;  %v7703_v0 = vld [vmem:[%s8388_s8 + $0x78] sm:$0xf] }
 0x276   : > { %v3308_v1 = vadd.f32 %v3307_v43, %v3306_v20  ;;  %v2527_v3 = vpop.f32.mrf.mxu0  ;;  %v3791_v41 = vshll.u32 %v7460_v21, 16  ;;  %v9855_v8 = vrot.slane %v4913_v53, 5  ;;  %v4919_v58 = vrot.slane %v4917_v63, 4 }
 0x277   : > { %v9839_v15 = vpop.f32.mrf.mxu2  ;;  %v2620_v9 = vadd.f32 %v9799_v32, %v2527_v3  ;;  %v3796_v23 = vshrl.u32 %v7436_v37, 16  ;;  %v3799_v42 = vshll.u32 %v7436_v37, 16  ;;  %v3805_v55 = vshll.u32 %v7437_v54, 16 }
 0x278   : > { %v3109_v35 = vpop.f32.mrf.mxu3  ;;  %v3809_v16 = vshrl.u32 %v7437_v54, 16  ;;  %v3784_v32 = vsel %vm8404_vm4, %v9841_v50, %v9843_v27  ;;  %v4910_v17 = vor.u32 %v4909_v18, %v4906_v61  ;;  %v4923_v3 = vshll.u32 %v7702_v56, 16 }
 0x279   : > { %v9849_v20 = vadd.f32 %v3109_v35, %v2752_v57  ;;  %v9851_v4 = vpop.f32.mrf.mxu1  ;;  %v3788_v57 = vor.u32 %v3787_v6, %v9843_v27  ;;  %v3798_v21 = vrot.slane %v3796_v23, 4  ;;  %v3801_v63 = vrot.slane %v3799_v42, 5  ;;  %v7704_v35 = vld [vmem:[%s8388_s8 + $0x7c] sm:$0xf]  ;;  %v7461_v27 = vld [vmem:[%s8388_s8 + $0x74] sm:$0x1] }
 0x27a   : > { %v4928_v49 = vshrl.u32 %v7703_v0, 16  ;;  %v2753_v2 = vadd.f32 %v9810_v24, %v2620_v9  ;;  %v9876_v6 = vrot.slane %v3805_v55, 5  ;;  %v3811_v61 = vrot.slane %v3809_v16, 4  ;;  %v7966_v23 = vld [vmem:[%s8388_s8 + $0x6c] sm:$0xff] }
 0x27b   : > { %v3207_v28 = vsel %vm2012_vm8, %v9849_v20, 0.0  ;;  %v3252_v44 = vmul.f32 %v9849_v20, %v9849_v20  ;;  %v4931_v18 = vshll.u32 %v7703_v0, 16  ;;  %v3789_v42 = vrot.slane %v3788_v57, 4 }
 0x27c   : > { %v3208_v43 = vadd.f32 %v3207_v28, %v3206_v11  ;;  %v3793_v11 = vrot.slane %v3791_v41, 5  ;;  %v4920_v28 = vor.u32 %v4919_v58, %v9855_v8  ;;  %v4911_v22 = vrot.slane %v4910_v17, 4 }
 0x27d   : > { %v3309_v53 = vsel %vm2012_vm8, %v3252_v44, 0.0  ;;  %v7950_v44 = vld [vmem:[%s8388_s8 + $0x60] sm:$0xff]  ;;  %v4925_v9 = vrot.slane %v4923_v3, 5  ;;  %v3802_v55 = vor.u32 %v3801_v63, %v3798_v21  ;;  %v3815_v16 = vshll.u32 %v7461_v27, 16 }
 0x27e   : > { %v3310_v37 = vadd.f32 %v3309_v53, %v3308_v1  ;;  %v2530_v54 = vpop.f32.mrf.mxu0  ;;  %v4937_v1 = vshll.u32 %v7704_v35, 16  ;;  %v4941_v53 = vshrl.u32 %v7704_v35, 16  ;;  %v4921_v36 = vrot.slane %v4920_v28, 4 }
 0x27f   : > { %v9873_v50 = vpop.f32.mrf.mxu2  ;;  %v2623_v58 = vadd.f32 %v9822_v29, %v2530_v54  ;;  %v4930_v0 = vrot.slane %v4928_v49, 4  ;;  %v4933_v40 = vrot.slane %v4931_v18, 5  ;;  %v3794_v3 = vsel %vm8404_vm4, %v3789_v42, %v3793_v11  ;;  %v7705_v54 = vld [vmem:[%s8388_s8 + $0x80] sm:$0x1] }
 0x280   : > { %v3111_v56 = vpop.f32.mrf.mxu3  ;;  %v9892_v21 = vrot.slane %v4937_v1, 5  ;;  %v4943_v49 = vrot.slane %v4941_v53, 4  ;;  %v4916_v11 = vsel %vm8404_vm4, %v4911_v22, %v9855_v8  ;;  %v4004_v42 = vunpack.c.l.b16 %v3794_v3 }
 0x281   : > { %v3151_v41 = vadd.f32 %v3111_v56, %v2753_v2  ;;  %7476 = vmatmul.msk.bf16.gmra.mxu0 %vm706_vm1, %v9845_v34  ;;  %v9883_v24 = vpop.f32.mrf.mxu1  ;;  %v3812_v2 = vor.u32 %v3811_v61, %v9876_v6  ;;  %v4926_v61 = vsel %vm8404_vm4, %v4921_v36, %v4925_v9  ;;  %v4934_v18 = vor.u32 %v4933_v40, %v4930_v0 }
 0x282   : > { %v5135_v36 = vunpack.c.l.b16 %v4916_v11  ;;  %v5136_v40 = vunpack.c.l.b16 %v4926_v61 }
 0x283   : > { %v3209_v57 = vsel %vm2012_vm8, %v3151_v41, 0.0  ;;  %v3253_v17 = vmul.f32 %v3151_v41, %v3151_v41  ;;  %v8066_v35 = vpack.i.bf16 %v3151_v41, %v9849_v20  ;;  %v2754_v20 = vadd.f32 %v9839_v15, %v2623_v58 }
 0x284   : > { %v3210_v29 = vadd.f32 %v3209_v57, %v3208_v43  ;;  %7670 = vmatmul.msk.bf16.gmra.mxu2 %vm706_vm1, %v7966_v23  ;;  %7557 = vmatmul.msk.bf16.gmra.mxu1 %vm706_vm1, %v7950_v44  ;;  %v3803_v43 = vrot.slane %v3802_v55, 4  ;;  %v4003_v44 = vunpack.c.l.b16 %v3784_v32  ;;  %v3813_v1 = vrot.slane %v3812_v2, 4 }
 0x285   : > { %v3311_v63 = vsel %vm2012_vm8, %v3253_v17, 0.0  ;;  %7734 = vmatmul.msk.bf16.gmra.mxu3 %vm706_vm1, %v9853_v33  ;;  %8067 = vrot.lane.b32.xlu1 %v8066_v35, %s8313_s21  ;;  %v3817_v15 = vrot.slane %v3815_v16, 5  ;;  %v4944_v58 = vor.u32 %v4943_v49, %v9892_v21  ;;  %v4947_v55 = vshll.u32 %v7705_v54, 16  ;;  %v7438_v17 = vld [vmem:[%s8388_s8 + $0x78] sm:$0xf] }
 0x286   : > { %v3312_v28 = vadd.f32 %v3311_v63, %v3310_v37  ;;  %v2532_v27 = vpop.f32.mrf.mxu0  ;;  %v3808_v8 = vsel %vm8404_vm4, %v3803_v43, %v9876_v6  ;;  %v9920_v0 = vrot.slane %v4934_v18, 4  ;;  %v9934_v54 = vpack.c.b16 %v4004_v42, %v4003_v44  ;;  %v7706_v42 = vld [vmem:[%s8388_s8 + $0x84] sm:$0xf] }
 0x287   : > { %v8033_v56 = vpop.permute.xlu0 %8032  ;;  %v9905_v23 = vpop.f32.mrf.mxu2  ;;  %v2625_v16 = vadd.f32 %v9851_v4, %v2532_v27  ;;  %v3818_v63 = vsel %vm8404_vm4, %v3813_v1, %v3817_v15  ;;  %v4949_v43 = vrot.slane %v4947_v55, 5  ;;  %v7439_v27 = vld [vmem:[%s8388_s8 + $0x7c] sm:$0xf]  ;;  %v3820_v11 = vshrl.u32 %v7438_v17, 16 }
 0x288   : > { %v8035_v53 = vunpack.i.h.bf16 %v8033_v56  ;;  %v8034_v41 = vunpack.i.l.bf16 %v8033_v56  ;;  %v3114_v37 = vpop.f32.mrf.mxu3  ;;  %11520 = vst [vmem:[#allocation26_spill] sm:$0xff] %v9934_v54  ;;  %v9939_v18 = vpack.c.b16 %v5136_v40, %v5135_v36  ;;  %v3823_v56 = vshll.u32 %v7438_v17, 16  ;;  %v7967_v36 = vld [vmem:[%s8388_s8 + $0x78] sm:$0xff]  ;;  %v7951_v40 = vld [vmem:[%s8388_s8 + $0x6c] sm:$0xff] }
 0x289   : > { %v9908_v57 = vadd.f32 %v3114_v37, %v2754_v20  ;;  %v9910_v22 = vpop.f32.mrf.mxu1  ;;  %v9929_v20 = vrot.slane %v4944_v58, 4  ;;  %v2755_v15 = vadd.f32 %v9873_v50, %v2625_v16  ;;  %v4006_v37 = vunpack.c.l.b16 %v3818_v63 }
 0x28a   : > { %v3469_v32 = vsel %vm2012_vm8, %v8924_v60, %v8035_v53  ;;  %v3468_v9 = vsel %vm2012_vm8, %v8915_v51, %v8034_v41  ;;  %v4005_v41 = vunpack.c.l.b16 %v3808_v8  ;;  %v4940_v44 = vsel %vm8404_vm4, %v9920_v0, %v9892_v21 }
 0x28b   : > { %v3501_v35 = vpack.c.bf16 %v3469_v32, %v3469_v32  ;;  %v3500_v2 = vpack.c.bf16 %v3468_v9, %v3468_v9  ;;  %v3211_v3 = vsel %vm2012_vm8, %v9908_v57, 0.0  ;;  %v3254_v6 = vmul.f32 %v9908_v57, %v9908_v57 }
 0x28c   : > { %v3212_v49 = vadd.f32 %v3211_v3, %v3210_v29  ;;  %v4950_v50 = vsel %vm8404_vm4, %v9929_v20, %v4949_v43  ;;  %v3829_v32 = vshll.u32 %v7439_v27, 16  ;;  %v3822_v21 = vrot.slane %v3820_v11, 4  ;;  %v7707_v3 = vld [vmem:[%s8388_s8 + $0x88] sm:$0xf] }
 0x28d   : > { %3534 = vst.msk [vmem:[%s9484_s6 + $0x64] sm:$0xf] %vm3520_vm9, %v3501_v35  ;;  %v3313_v4 = vsel %vm2012_vm8, %v3254_v6, 0.0  ;;  %v3833_v0 = vshrl.u32 %v7439_v27, 16  ;;  %v4952_v6 = vshrl.u32 %v7706_v42, 16 }
 0x28e   : > { %3533 = vst.msk [vmem:[%s9484_s6 + $0x60] sm:$0xf] %vm3520_vm9, %v3500_v2  ;;  %v3314_v29 = vadd.f32 %v3313_v4, %v3312_v28  ;;  %v2535_v61 = vpop.f32.mrf.mxu0  ;;  %v3825_v2 = vrot.slane %v3823_v56, 5  ;;  %v7462_v27 = vld [vmem:[%s8388_s8 + $0x80] sm:$0x1] }
 0x28f   : > { %v8043_v1 = vpop.permute.xlu2 %8042  ;;  %v9942_v53 = vpop.f32.mrf.mxu2  ;;  %v2628_v8 = vadd.f32 %v9883_v24, %v2535_v61  ;;  %v9969_v61 = vrot.slane %v3829_v32, 5  ;;  %v5137_v32 = vunpack.c.l.b16 %v4940_v44 }
 0x290   : > { %v8045_v58 = vunpack.i.h.bf16 %v8043_v1  ;;  %v8044_v28 = vunpack.i.l.bf16 %v8043_v1  ;;  %v3116_v55 = vpop.f32.mrf.mxu3  ;;  %v4955_v1 = vshll.u32 %v7706_v42, 16 }
 0x291   : > { %v3153_v9 = vadd.f32 %v3116_v55, %v2755_v15  ;;  %7477 = vmatmul.msk.bf16.gmra.mxu0 %vm706_vm1, %v9934_v54  ;;  %v9957_v16 = vpop.f32.mrf.mxu1  ;;  %v2756_v15 = vadd.f32 %v9905_v23, %v2628_v8  ;;  %v4965_v55 = vshrl.u32 %v7707_v3, 16  ;;  %v3826_v8 = vor.u32 %v3825_v2, %v3822_v21 }
 0x292   : > { %v3473_v17 = vsel %vm2012_vm8, %v8966_v12, %v8045_v58  ;;  %v3472_v35 = vsel %vm2012_vm8, %v8958_v59, %v8044_v28  ;;  %v4961_v58 = vshll.u32 %v7707_v3, 16 }
 0x293   : > { %v3505_v63 = vpack.c.bf16 %v3473_v17, %v3473_v17  ;;  %v3504_v24 = vpack.c.bf16 %v3472_v35, %v3472_v35  ;;  %v3213_v20 = vsel %vm2012_vm8, %v3153_v9, 0.0  ;;  %v3255_v43 = vmul.f32 %v3153_v9, %v3153_v9 }
 0x294   : > { %v3214_v4 = vadd.f32 %v3213_v20, %v3212_v49  ;;  %v8071_v11 = vpack.i.bf16 %v3153_v9, %v9908_v57  ;;  %7671 = vmatmul.msk.bf16.gmra.mxu2 %vm706_vm1, %v7967_v36  ;;  %7558 = vmatmul.msk.bf16.gmra.mxu1 %vm706_vm1, %v7951_v40  ;;  %v3835_v49 = vrot.slane %v3833_v0, 4  ;;  %v9980_v40 = vpack.c.b16 %v4006_v37, %v4005_v41  ;;  %v7440_v41 = vld [vmem:[%s8388_s8 + $0x84] sm:$0xf] }
 0x295   : > { %3538 = vst.msk [vmem:[%s9484_s6 + $0x84] sm:$0xf] %vm3520_vm9, %v3505_v63  ;;  %v3315_v56 = vsel %vm2012_vm8, %v3255_v43, 0.0  ;;  %7735 = vmatmul.msk.bf16.gmra.mxu3 %vm706_vm1, %v9939_v18  ;;  %v5138_v9 = vunpack.c.l.b16 %v4950_v50  ;;  %v3839_v17 = vshll.u32 %v7462_v27, 16  ;;  %v4954_v0 = vrot.slane %v4952_v6, 4 }
 0x296   : > { %3537 = vst.msk [vmem:[%s9484_s6 + $0x80] sm:$0xf] %vm3520_vm9, %v3504_v24  ;;  %v3316_v57 = vadd.f32 %v3315_v56, %v3314_v29  ;;  %8072 = vrot.lane.b32.xlu2 %v8071_v11, %s8313_s21  ;;  %v2537_v28 = vpop.f32.mrf.mxu0  ;;  %v3836_v3 = vor.u32 %v3835_v49, %v9969_v61  ;;  %v4957_v20 = vrot.slane %v4955_v1, 5  ;;  %v9987_v43 = vrot.slane %v4961_v58, 5  ;;  %v7708_v1 = vld [vmem:[%s8388_s8 + $0x8c] sm:$0x1] }
 0x297   : > { %v8038_v36 = vpop.permute.xlu1 %8037  ;;  %v4575_v42 = vpop.f32.mrf.mxu2  ;;  %11521 = vst [vmem:[#allocation27_spill] sm:$0xff] %v9980_v40  ;;  %v2630_v50 = vadd.f32 %v9910_v22, %v2537_v28  ;;  %v4967_v21 = vrot.slane %v4965_v55, 4  ;;  %v7441_v56 = vld [vmem:[%s8388_s8 + $0x88] sm:$0xf]  ;;  %v3841_v49 = vrot.slane %v3839_v17, 5  ;;  %v3844_v58 = vshrl.u32 %v7440_v41, 16 }
 0x298   : > { %v8040_v35 = vunpack.i.h.bf16 %v8038_v36  ;;  %v8039_v63 = vunpack.i.l.bf16 %v8038_v36  ;;  %v3119_v23 = vpop.f32.mrf.mxu3  ;;  %v3847_v36 = vshll.u32 %v7440_v41, 16  ;;  %v3827_v28 = vrot.slane %v3826_v8, 4 }
 0x299   : > { %v9982_v29 = vadd.f32 %v3119_v23, %v2756_v15  ;;  %v9984_v24 = vpop.f32.mrf.mxu1  ;;  %v3837_v55 = vrot.slane %v3836_v3, 4  ;;  %v2757_v17 = vadd.f32 %v9942_v53, %v2630_v50  ;;  %v10009_v3 = vpack.c.b16 %v5138_v9, %v5137_v32  ;;  %v7709_v50 = vld [vmem:[%s8388_s8 + $0x90] sm:$0xf] }
 0x29a   : > { %v3471_v37 = vsel %vm2012_vm8, %v8940_v62, %v8040_v35  ;;  %v3470_v44 = vsel %vm2012_vm8, %v8936_v14, %v8039_v63  ;;  %v4958_v35 = vor.u32 %v4957_v20, %v4954_v0  ;;  %v3849_v8 = vrot.slane %v3847_v36, 5  ;;  %v7968_v0 = vld [vmem:[%s8388_s8 + $0x84] sm:$0xff]  ;;  %v7952_v20 = vld [vmem:[%s8388_s8 + $0x78] sm:$0xff] }
 0x29b   : > { %v3503_v2 = vpack.c.bf16 %v3471_v37, %v3471_v37  ;;  %v3502_v6 = vpack.c.bf16 %v3470_v44, %v3470_v44  ;;  %v3215_v11 = vsel %vm2012_vm8, %v9982_v29, 0.0  ;;  %v3256_v27 = vmul.f32 %v9982_v29, %v9982_v29  ;;  %11522 = vst [vmem:[#allocation28_spill] sm:$0xff] %v10009_v3 }
 0x29c   : > { %v3216_v15 = vadd.f32 %v3215_v11, %v3214_v4  ;;  %v4968_v37 = vor.u32 %v4967_v21, %v9987_v43  ;;  %v4971_v44 = vshll.u32 %v7708_v1, 16  ;;  %v3853_v4 = vshll.u32 %v7441_v56, 16 }
 0x29d   : > { %3536 = vst.msk [vmem:[%s9484_s6 + $0x74] sm:$0xf] %vm3520_vm9, %v3503_v2  ;;  %v3317_v22 = vsel %vm2012_vm8, %v3256_v27, 0.0  ;;  %v3846_v11 = vrot.slane %v3844_v58, 4  ;;  %v3832_v53 = vsel %vm8404_vm4, %v3827_v28, %v9969_v61  ;;  %v4959_v32 = vrot.slane %v4958_v35, 4 }
 0x29e   : > { %3535 = vst.msk [vmem:[%s9484_s6 + $0x70] sm:$0xf] %vm3520_vm9, %v3502_v6  ;;  %v3318_v63 = vadd.f32 %v3317_v22, %v3316_v57  ;;  %v4097_v23 = vpop.f32.mrf.mxu0  ;;  %v3857_v57 = vshrl.u32 %v7441_v56, 16  ;;  %v4969_v9 = vrot.slane %v4968_v37, 4  ;;  %v4973_v58 = vrot.slane %v4971_v44, 5 }
 0x29f   : > { %v4318_v41 = vadd.f32 %v9957_v16, %v4097_v23  ;;  %v4577_v2 = vpop.f32.mrf.mxu2  ;;  %v3842_v16 = vsel %vm8404_vm4, %v3837_v55, %v3841_v49  ;;  %v10021_v36 = vrot.slane %v3853_v4, 5  ;;  %v7710_v56 = vld [vmem:[%s8388_s8 + $0x94] sm:$0xf]  ;;  %v7463_v61 = vld [vmem:[%s8388_s8 + $0x8c] sm:$0x1]  ;;  %v4976_v28 = vshrl.u32 %v7709_v50, 16 }
 0x2a0   : > { %v3121_v27 = vpop.f32.mrf.mxu3  ;;  %v3859_v49 = vrot.slane %v3857_v57, 4  ;;  %v4979_v55 = vshll.u32 %v7709_v50, 16  ;;  %v4985_v37 = vshll.u32 %v7710_v56, 16  ;;  %v4007_v4 = vunpack.c.l.b16 %v3832_v53 }
 0x2a1   : > { %v3155_v6 = vadd.f32 %v3121_v27, %v2757_v17  ;;  %7478 = vmatmul.msk.bf16.gmra.mxu0 %vm706_vm1, %v9980_v40  ;;  %v4655_v21 = vadd.f32 %v4575_v42, %v4318_v41  ;;  %v4322_v1 = vpop.f32.mrf.mxu1  ;;  %v3850_v17 = vor.u32 %v3849_v8, %v3846_v11  ;;  %v4008_v11 = vunpack.c.l.b16 %v3842_v16 }
 0x2a2   : > { %v3863_v57 = vshll.u32 %v7463_v61, 16  ;;  %v3860_v50 = vor.u32 %v3859_v49, %v10021_v36  ;;  %v4978_v53 = vrot.slane %v4976_v28, 4  ;;  %v4981_v16 = vrot.slane %v4979_v55, 5 }
 0x2a3   : > { %v3217_v22 = vsel %vm2012_vm8, %v3155_v6, 0.0  ;;  %v3257_v23 = vmul.f32 %v3155_v6, %v3155_v6  ;;  %v8076_v42 = vpack.i.bf16 %v3155_v6, %v9982_v29  ;;  %v4989_v29 = vshrl.u32 %v7710_v56, 16 }
 0x2a4   : > { %v10026_v41 = vadd.f32 %v3217_v22, %v3216_v15  ;;  %7672 = vmatmul.msk.bf16.gmra.mxu2 %vm706_vm1, %v7968_v0  ;;  %7559 = vmatmul.msk.bf16.gmra.mxu1 %vm706_vm1, %v7952_v20  ;;  %v4964_v0 = vsel %vm8404_vm4, %v4959_v32, %v9987_v43  ;;  %v4974_v20 = vsel %vm8404_vm4, %v4969_v9, %v4973_v58  ;;  %v7442_v43 = vld [vmem:[%s8388_s8 + $0x90] sm:$0xf]  ;;  %v7711_v32 = vld [vmem:[%s8388_s8 + $0x98] sm:$0x1]  ;;  %v7443_v58 = vld [vmem:[%s8388_s8 + $0x94] sm:$0xf] }
 0x2a5   : > { %v3319_v35 = vsel %vm2012_vm8, %v3257_v23, 0.0  ;;  %7736 = vmatmul.msk.bf16.gmra.mxu3 %vm706_vm1, %v10009_v3  ;;  %8077 = vrot.lane.b32.xlu0 %v8076_v42, %s8313_s21  ;;  %v10048_v23 = vrot.slane %v4985_v37, 5  ;;  %v4991_v42 = vrot.slane %v4989_v29, 4  ;;  %v5140_v9 = vunpack.c.l.b16 %v4974_v20 }
 0x2a6   : > { %11523 = vst [vmem:[#allocation29_spill] sm:$0xff] %v10026_v41  ;;  %v10035_v44 = vadd.f32 %v3319_v35, %v3318_v63  ;;  %v4099_v15 = vpop.f32.mrf.mxu0  ;;  %v3851_v63 = vrot.slane %v3850_v17, 4  ;;  %v5139_v35 = vunpack.c.l.b16 %v4964_v0  ;;  %v3868_v61 = vshrl.u32 %v7442_v43, 16 }
 0x2a7   : > { %v4320_v8 = vadd.f32 %v9984_v24, %v4099_v15  ;;  %v4580_v27 = vpop.f32.mrf.mxu2  ;;  %v3861_v15 = vrot.slane %v3860_v50, 4  ;;  %v3865_v17 = vrot.slane %v3863_v57, 5  ;;  %v4982_v49 = vor.u32 %v4981_v16, %v4978_v53 }
 0x2a8   : > { %11524 = vst [vmem:[#allocation30_spill] sm:$0xff] %v10035_v44  ;;  %v5229_v6 = vpop.f32.mrf.mxu3  ;;  %v3871_v28 = vshll.u32 %v7442_v43, 16  ;;  %v4992_v55 = vor.u32 %v4991_v42, %v10048_v23  ;;  %v4995_v37 = vshll.u32 %v7711_v32, 16  ;;  %v3881_v0 = vshrl.u32 %v7443_v58, 16  ;;  %v7969_v43 = vld [vmem:[%s8388_s8 + $0x90] sm:$0xff] }
 0x2a9   : > { %v10044_v56 = vadd.f32 %v5229_v6, %v4655_v21  ;;  %v4656_v24 = vadd.f32 %v4577_v2, %v4320_v8  ;;  %v10046_v22 = vpop.f32.mrf.mxu1  ;;  %v10053_v21 = vpack.c.b16 %v4008_v11, %v4007_v4  ;;  %v3856_v2 = vsel %vm8404_vm4, %v3851_v63, %v10021_v36  ;;  %v7712_v4 = vld [vmem:[%s8388_s8 + $0x9c] sm:$0xf]  ;;  %v7953_v36 = vld [vmem:[%s8388_s8 + $0x84] sm:$0xff] }
 0x2aa   : > { %v3877_v8 = vshll.u32 %v7443_v58, 16  ;;  %v10059_v6 = vpack.c.b16 %v5140_v9, %v5139_v35  ;;  %v3870_v50 = vrot.slane %v3868_v61, 4  ;;  %v3873_v53 = vrot.slane %v3871_v28, 5 }
 0x2ab   : > { %11525 = vst [vmem:[#allocation31_spill] sm:$0xff] %v10044_v56  ;;  %v5411_v11 = vmul.f32 %v10044_v56, %v10044_v56  ;;  %v3866_v63 = vsel %vm8404_vm4, %v3861_v15, %v3865_v17  ;;  %v10068_v42 = vunpack.c.l.b16 %v3856_v2  ;;  %v4993_v58 = vrot.slane %v4992_v55, 4 }
 0x2ac   : > { %11526 = vst [vmem:[#allocation32_spill] sm:$0xff] %v10053_v21  ;;  %v4997_v61 = vrot.slane %v4995_v37, 5  ;;  %v5341_v28 = vsel %vm2012_vm8, %v10044_v56, 0.0  ;;  %v10079_v44 = vrot.slane %v3877_v8, 5  ;;  %v3883_v15 = vrot.slane %v3881_v0, 4 }
 0x2ad   : > { %11527 = vst [vmem:[#allocation33_spill] sm:$0xff] %v10059_v6  ;;  %v5000_v17 = vshrl.u32 %v7712_v4, 16  ;;  %v3874_v2 = vor.u32 %v3873_v53, %v3870_v50  ;;  %v5443_v55 = vsel %vm2012_vm8, %v5411_v11, 0.0 }
 0x2ae   : > { %v4102_v29 = vpop.f32.mrf.mxu0  ;;  %v4998_v50 = vsel %vm8404_vm4, %v4993_v58, %v4997_v61 }
 0x2af   : > { %v4323_v20 = vadd.f32 %v4322_v1, %v4102_v29  ;;  %v4582_v57 = vpop.f32.mrf.mxu2  ;;  %v4983_v1 = vrot.slane %v4982_v49, 4  ;;  %v7464_v29 = vld [vmem:[%s8388_s8 + $0x98] sm:$0x1]  ;;  %v5002_v0 = vrot.slane %v5000_v17, 4 }
 0x2b0   : > { %v5231_v16 = vpop.f32.mrf.mxu3  ;;  %v3887_v53 = vshll.u32 %v7464_v29, 16  ;;  %v7714_v29 = vld [vmem:[%s8388_s8 + $0xa4] sm:$0x1] }
 0x2b1   : > { %v10070_v32 = vadd.f32 %v5231_v16, %v4656_v24  ;;  %7479 = vmatmul.msk.bf16.gmra.mxu0 %vm706_vm1, %v10053_v21  ;;  %v4657_v35 = vadd.f32 %v4580_v27, %v4323_v20  ;;  %v10074_v9 = vpop.f32.mrf.mxu1  ;;  %v7713_v27 = vld [vmem:[%s8388_s8 + $0xa0] sm:$0xf]  ;;  %v5003_v20 = vshll.u32 %v7712_v4, 16  ;;  %v4988_v8 = vsel %vm8404_vm4, %v4983_v1, %v10048_v23 }
 0x2b2   : > { %v5141_v56 = vunpack.c.l.b16 %v4988_v8 }
 0x2b3   : > { %11528 = vst [vmem:[#allocation34_spill] sm:$0xff] %v10070_v32  ;;  %v5342_v24 = vsel %vm2012_vm8, %v10070_v32, 0.0  ;;  %v5412_v49 = vmul.f32 %v10070_v32, %v10070_v32  ;;  %v5005_v4 = vrot.slane %v5003_v20, 5  ;;  %v3875_v32 = vrot.slane %v3874_v2, 4 }
 0x2b4   : > { %v10087_v37 = vadd.f32 %v5342_v24, %v5341_v28  ;;  %7673 = vmatmul.msk.bf16.gmra.mxu2 %vm706_vm1, %v7969_v43  ;;  %7560 = vmatmul.msk.bf16.gmra.mxu1 %vm706_vm1, %v7953_v36  ;;  %v3884_v36 = vor.u32 %v3883_v15, %v10079_v44  ;;  %v5009_v28 = vshll.u32 %v7713_v27, 16  ;;  %v5013_v24 = vshrl.u32 %v7713_v27, 16 }
 0x2b5   : > { %v5444_v16 = vsel %vm2012_vm8, %v5412_v49, 0.0  ;;  %7737 = vmatmul.msk.bf16.gmra.mxu3 %vm706_vm1, %v10059_v6  ;;  %v4010_v49 = vunpack.c.l.b16 %v3866_v63  ;;  %v5006_v20 = vor.u32 %v5005_v4, %v5002_v0  ;;  %v5142_v6 = vunpack.c.l.b16 %v4998_v50  ;;  %v7445_v50 = vld [vmem:[%s8388_s8 + $0xa0] sm:$0xf] }
 0x2b6   : > { %v10099_v11 = vadd.f32 %v5444_v16, %v5443_v55  ;;  %v4104_v43 = vpop.f32.mrf.mxu0  ;;  %v10104_v55 = vrot.slane %v5009_v28, 5  ;;  %v3885_v8 = vrot.slane %v3884_v36, 4  ;;  %v3889_v0 = vrot.slane %v3887_v53, 5 }
 0x2b7   : > { %v8048_v23 = vpop.permute.xlu0 %8047  ;;  %v4325_v1 = vadd.f32 %v10046_v22, %v4104_v43  ;;  %v4585_v17 = vpop.f32.mrf.mxu2  ;;  %v5015_v22 = vrot.slane %v5013_v24, 4  ;;  %v7444_v43 = vld [vmem:[%s8388_s8 + $0x9c] sm:$0xf]  ;;  %v10125_v53 = vpack.c.b16 %v4010_v49, %v10068_v42  ;;  %v10127_v36 = vpack.c.b16 %v5142_v6, %v5141_v56 }
 0x2b8   : > { %v8050_v21 = vunpack.i.h.bf16 %v8048_v23  ;;  %v8049_v58 = vunpack.i.l.bf16 %v8048_v23  ;;  %v5234_v61 = vpop.f32.mrf.mxu3  ;;  %v5007_v23 = vrot.slane %v5006_v20, 4  ;;  %v3905_v20 = vshrl.u32 %v7445_v50, 16 }
 0x2b9   : > { %v10106_v16 = vadd.f32 %v5234_v61, %v4657_v35  ;;  %v4658_v15 = vadd.f32 %v4582_v57, %v4325_v1  ;;  %v10108_v27 = vpop.f32.mrf.mxu1  ;;  %v3880_v57 = vsel %vm8404_vm4, %v3875_v32, %v10079_v44  ;;  %v5019_v35 = vshll.u32 %v7714_v29, 16  ;;  %11530 = vst [vmem:[#allocation36_spill] sm:$0xff] %v10125_v53 }
 0x2ba   : > { %v3475_v63 = vsel %vm2012_vm8, %v8990_v45, %v8050_v21  ;;  %v3474_v2 = vsel %vm2012_vm8, %v8982_v25, %v8049_v58  ;;  %v5016_v21 = vor.u32 %v5015_v22, %v10104_v55  ;;  %v3892_v1 = vshrl.u32 %v7444_v43, 16  ;;  %11531 = vst [vmem:[#allocation37_spill] sm:$0xff] %v10127_v36 }
 0x2bb   : > { %11529 = vst [vmem:[#allocation35_spill] sm:$0xff] %v10106_v16  ;;  %v3507_v4 = vpack.c.bf16 %v3475_v63, %v3475_v63  ;;  %v3506_v28 = vpack.c.bf16 %v3474_v2, %v3474_v2  ;;  %v5413_v24 = vmul.f32 %v10106_v16, %v10106_v16  ;;  %v3895_v58 = vshll.u32 %v7444_v43, 16  ;;  %v7715_v43 = vld [vmem:[%s8388_s8 + $0xa8] sm:$0xf] }
 0x2bc   : > { %v3890_v32 = vsel %vm8404_vm4, %v3885_v8, %v3889_v0  ;;  %v10133_v61 = vunpack.c.l.b16 %v3880_v57  ;;  %v3901_v29 = vshll.u32 %v7445_v50, 16  ;;  %v5344_v22 = vsel %vm2012_vm8, %v10106_v16, 0.0  ;;  %v7954_v8 = vld [vmem:[%s8388_s8 + $0x90] sm:$0xff] }
 0x2bd   : > { %3540 = vst.msk [vmem:[%s9484_s6 + $0x94] sm:$0xf] %vm3520_vm9, %v3507_v4  ;;  %v5017_v6 = vrot.slane %v5016_v21, 4  ;;  %v5021_v49 = vrot.slane %v5019_v35, 5  ;;  %v5446_v63 = vsel %vm2012_vm8, %v5413_v24, 0.0  ;;  %v5012_v0 = vsel %vm8404_vm4, %v5007_v23, %v10104_v55 }
 0x2be   : > { %3539 = vst.msk [vmem:[%s9484_s6 + $0x90] sm:$0xf] %vm3520_vm9, %v3506_v28  ;;  %v4107_v44 = vpop.f32.mrf.mxu0  ;;  %v7970_v28 = vld [vmem:[%s8388_s8 + $0x9c] sm:$0xff]  ;;  %v3894_v57 = vrot.slane %v3892_v1, 4  ;;  %v3897_v50 = vrot.slane %v3895_v58, 5  ;;  %v10152_v40 = vrot.slane %v3901_v29, 5 }
 0x2bf   : > { %v4328_v42 = vadd.f32 %v10074_v9, %v4107_v44  ;;  %v4587_v56 = vpop.f32.mrf.mxu2  ;;  %v7465_v21 = vld [vmem:[%s8388_s8 + $0xa4] sm:$0x1]  ;;  %v3907_v3 = vrot.slane %v3905_v20, 4  ;;  %v5024_v41 = vshrl.u32 %v7715_v43, 16  ;;  %v5027_v54 = vshll.u32 %v7715_v43, 16 }
 0x2c0   : > { %v8058_v2 = vpop.permute.xlu2 %8057  ;;  %v5236_v4 = vpop.f32.mrf.mxu3  ;;  %v7716_v1 = vld [vmem:[%s8388_s8 + $0xac] sm:$0xf]  ;;  %v3898_v20 = vor.u32 %v3897_v50, %v3894_v57  ;;  %v5447_v57 = vadd.f32 %v5446_v63, %v10099_v11 }
 0x2c1   : > { %v8060_v16 = vunpack.i.h.bf16 %v8058_v2  ;;  %v8059_v9 = vunpack.i.l.bf16 %v8058_v2  ;;  %v10145_v44 = vadd.f32 %v5236_v4, %v4658_v15  ;;  %7480 = vmatmul.msk.bf16.gmra.mxu0 %vm706_vm1, %v10125_v53  ;;  %v4659_v35 = vadd.f32 %v4585_v17, %v4328_v42  ;;  %v10149_v24 = vpop.f32.mrf.mxu1  ;;  %v7467_v53 = vld [vmem:[%s8388_s8 + $0xbc] sm:$0x1] }
 0x2c2   : > { %v5022_v17 = vsel %vm8404_vm4, %v5017_v6, %v5021_v49  ;;  %v5345_v42 = vadd.f32 %v5344_v22, %v10087_v37  ;;  %v4012_v2 = vunpack.c.l.b16 %v3890_v32  ;;  %v5143_v6 = vunpack.c.l.b16 %v5012_v0 }
 0x2c3   : > { %11532 = vst [vmem:[#allocation38_spill] sm:$0xff] %v10145_v44  ;;  %v3479_v55 = vsel %vm2012_vm8, %v9038_v48, %v8060_v16  ;;  %v3478_v15 = vsel %vm2012_vm8, %v9030_v19, %v8059_v9  ;;  %v5414_v23 = vmul.f32 %v10145_v44, %v10145_v44  ;;  %v3911_v16 = vshll.u32 %v7465_v21, 16 }
 0x2c4   : > { %v3511_v58 = vpack.c.bf16 %v3479_v55, %v3479_v55  ;;  %v3510_v29 = vpack.c.bf16 %v3478_v15, %v3478_v15  ;;  %7674 = vmatmul.msk.bf16.gmra.mxu2 %vm706_vm1, %v7970_v28  ;;  %7561 = vmatmul.msk.bf16.gmra.mxu1 %vm706_vm1, %v7954_v8  ;;  %v5346_v43 = vsel %vm2012_vm8, %v10145_v44, 0.0  ;;  %v3908_v4 = vor.u32 %v3907_v3, %v10152_v40 }
 0x2c5   : > { %7738 = vmatmul.msk.bf16.gmra.mxu3 %vm706_vm1, %v10127_v36  ;;  %v5026_v28 = vrot.slane %v5024_v41, 4  ;;  %v5029_v9 = vrot.slane %v5027_v54, 5  ;;  %v5033_v8 = vshll.u32 %v7716_v1, 16  ;;  %v5448_v37 = vsel %vm2012_vm8, %v5414_v23, 0.0 }
 0x2c6   : > { %3544 = vst.msk [vmem:[%s9484_s6 + $0xb4] sm:$0xf] %vm3520_vm9, %v3511_v58  ;;  %v4109_v49 = vpop.f32.mrf.mxu0  ;;  %v5144_v21 = vunpack.c.l.b16 %v5022_v17  ;;  %v5347_v32 = vadd.f32 %v5346_v43, %v5345_v42  ;;  %v3899_v15 = vrot.slane %v3898_v20, 4  ;;  %v3913_v58 = vrot.slane %v3911_v16, 5 }
 0x2c7   : > { %3543 = vst.msk [vmem:[%s9484_s6 + $0xb0] sm:$0xf] %vm3520_vm9, %v3510_v29  ;;  %v4330_v22 = vadd.f32 %v10108_v27, %v4109_v49  ;;  %v4590_v50 = vpop.f32.mrf.mxu2  ;;  %v5037_v44 = vshrl.u32 %v7716_v1, 16  ;;  %v5449_v23 = vadd.f32 %v5448_v37, %v5447_v57  ;;  %v3909_v27 = vrot.slane %v3908_v4, 4  ;;  %v7717_v49 = vld [vmem:[%s8388_s8 + $0xb0] sm:$0x1] }
 0x2c8   : > { %v8053_v0 = vpop.permute.xlu1 %8052  ;;  %v5239_v55 = vpop.f32.mrf.mxu3  ;;  %v5030_v29 = vor.u32 %v5029_v9, %v5026_v28  ;;  %v10182_v17 = vrot.slane %v5033_v8, 5  ;;  %v10195_v9 = vpack.c.b16 %v4012_v2, %v10133_v61  ;;  %v7446_v8 = vld [vmem:[%s8388_s8 + $0xa8] sm:$0xf]  ;;  %v5043_v61 = vshll.u32 %v7717_v49, 16  ;;  %v7718_v49 = vld [vmem:[%s8388_s8 + $0xb4] sm:$0xf] }
 0x2c9   : > { %v8055_v3 = vunpack.i.h.bf16 %v8053_v0  ;;  %v8054_v54 = vunpack.i.l.bf16 %v8053_v0  ;;  %v10178_v41 = vadd.f32 %v5239_v55, %v4659_v35  ;;  %v4660_v11 = vadd.f32 %v4587_v56, %v4330_v22  ;;  %v10180_v63 = vpop.f32.mrf.mxu1  ;;  %v7447_v22 = vld [vmem:[%s8388_s8 + $0xac] sm:$0xf] }
 0x2ca   : > { %v5039_v4 = vrot.slane %v5037_v44, 4  ;;  %11534 = vst [vmem:[#allocation40_spill] sm:$0xff] %v10195_v9  ;;  %v3904_v44 = vsel %vm8404_vm4, %v3899_v15, %v10152_v40  ;;  %v3919_v15 = vshll.u32 %v7446_v8, 16 }
 0x2cb   : > { %11533 = vst [vmem:[#allocation39_spill] sm:$0xff] %v10178_v41  ;;  %v3477_v20 = vsel %vm2012_vm8, %v9014_v13, %v8055_v3  ;;  %v3476_v1 = vsel %vm2012_vm8, %v9006_v39, %v8054_v54  ;;  %v5348_v56 = vsel %vm2012_vm8, %v10178_v41, 0.0  ;;  %v5415_v35 = vmul.f32 %v10178_v41, %v10178_v41  ;;  %v7971_v3 = vld [vmem:[%s8388_s8 + $0xa8] sm:$0xff]  ;;  %v7955_v54 = vld [vmem:[%s8388_s8 + $0x9c] sm:$0xff] }
 0x2cc   : > { %v3509_v16 = vpack.c.bf16 %v3477_v20, %v3477_v20  ;;  %v3508_v42 = vpack.c.bf16 %v3476_v1, %v3476_v1  ;;  %v5349_v43 = vadd.f32 %v5348_v56, %v5347_v32  ;;  %v10204_v32 = vpack.c.b16 %v5144_v21, %v5143_v6 }
 0x2cd   : > { %v5450_v28 = vsel %vm2012_vm8, %v5415_v35, 0.0  ;;  %v5031_v20 = vrot.slane %v5030_v29, 4  ;;  %v5040_v1 = vor.u32 %v5039_v4, %v10182_v17  ;;  %v3925_v56 = vshll.u32 %v7447_v22, 16 }
 0x2ce   : > { %3542 = vst.msk [vmem:[%s9484_s6 + $0xa4] sm:$0xf] %vm3520_vm9, %v3509_v16  ;;  %v5451_v57 = vadd.f32 %v5450_v28, %v5449_v23  ;;  %v4112_v37 = vpop.f32.mrf.mxu0  ;;  %v3914_v23 = vsel %vm8404_vm4, %v3909_v27, %v3913_v58  ;;  %v4013_v35 = vunpack.c.l.b16 %v3904_v44  ;;  %v7466_v16 = vld [vmem:[%s8388_s8 + $0xb0] sm:$0x1]  ;;  %v5045_v29 = vrot.slane %v5043_v61, 5 }
 0x2cf   : > { %3541 = vst.msk [vmem:[%s9484_s6 + $0xa0] sm:$0xf] %vm3520_vm9, %v3508_v42  ;;  %v4333_v0 = vadd.f32 %v10149_v24, %v4112_v37  ;;  %v4592_v55 = vpop.f32.mrf.mxu2  ;;  %v3916_v24 = vshrl.u32 %v7446_v8, 16  ;;  %v3929_v42 = vshrl.u32 %v7447_v22, 16  ;;  %v5041_v28 = vrot.slane %v5040_v1, 4 }
 0x2d0   : > { %11535 = vst [vmem:[#allocation41_spill] sm:$0xff] %v10204_v32  ;;  %v5241_v2 = vpop.f32.mrf.mxu3  ;;  %v7719_v37 = vld [vmem:[%s8388_s8 + $0xb8] sm:$0xf]  ;;  %v10235_v44 = vrot.slane %v3925_v56, 5 }
 0x2d1   : > { %v10214_v6 = vadd.f32 %v5241_v2, %v4660_v11  ;;  %7481 = vmatmul.msk.bf16.gmra.mxu0 %vm706_vm1, %v10195_v9  ;;  %v4661_v21 = vadd.f32 %v4590_v50, %v4333_v0  ;;  %v10218_v40 = vpop.f32.mrf.mxu1  ;;  %v4014_v11 = vunpack.c.l.b16 %v3914_v23  ;;  %v5036_v50 = vsel %vm8404_vm4, %v5031_v20, %v10182_v17 }
 0x2d2   : > { %v3918_v8 = vrot.slane %v3916_v24, 4  ;;  %v3921_v0 = vrot.slane %v3919_v15, 5  ;;  %v5051_v23 = vshll.u32 %v7718_v49, 16  ;;  %v5057_v1 = vshll.u32 %v7719_v37, 16 }
 0x2d3   : > { %11536 = vst [vmem:[#allocation42_spill] sm:$0xff] %v10214_v6  ;;  %v5350_v58 = vsel %vm2012_vm8, %v10214_v6, 0.0  ;;  %v5416_v27 = vmul.f32 %v10214_v6, %v10214_v6  ;;  %v5061_v24 = vshrl.u32 %v7719_v37, 16  ;;  %v5145_v15 = vunpack.c.l.b16 %v5036_v50  ;;  %v7449_v6 = vld [vmem:[%s8388_s8 + $0xb8] sm:$0xf] }
 0x2d4   : > { %v5351_v4 = vadd.f32 %v5350_v58, %v5349_v43  ;;  %7675 = vmatmul.msk.bf16.gmra.mxu2 %vm706_vm1, %v7971_v3  ;;  %7562 = vmatmul.msk.bf16.gmra.mxu1 %vm706_vm1, %v7955_v54  ;;  %v3935_v43 = vshll.u32 %v7466_v16, 16  ;;  %v3931_v3 = vrot.slane %v3929_v42, 4  ;;  %v5048_v54 = vshrl.u32 %v7718_v49, 16 }
 0x2d5   : > { %v5452_v22 = vsel %vm2012_vm8, %v5416_v27, 0.0  ;;  %7739 = vmatmul.msk.bf16.gmra.mxu3 %vm706_vm1, %v10204_v32  ;;  %v10238_v27 = vpack.c.b16 %v4014_v11, %v4013_v35  ;;  %v5046_v42 = vsel %vm8404_vm4, %v5041_v28, %v5045_v29  ;;  %v3922_v49 = vor.u32 %v3921_v0, %v3918_v8 }
 0x2d6   : > { %v5453_v61 = vadd.f32 %v5452_v22, %v5451_v57  ;;  %v4114_v2 = vpop.f32.mrf.mxu0  ;;  %v7448_v22 = vld [vmem:[%s8388_s8 + $0xb4] sm:$0xf]  ;;  %v5050_v41 = vrot.slane %v5048_v54, 4  ;;  %v5053_v37 = vrot.slane %v5051_v23, 5  ;;  %v10254_v11 = vrot.slane %v5057_v1, 5 }
 0x2d7   : > { %v4335_v17 = vadd.f32 %v10180_v63, %v4114_v2  ;;  %v4595_v20 = vpop.f32.mrf.mxu2  ;;  %v3932_v63 = vor.u32 %v3931_v3, %v10235_v44  ;;  %v3937_v2 = vrot.slane %v3935_v43, 5  ;;  %v5063_v50 = vrot.slane %v5061_v24, 4 }
 0x2d8   : > { %v5244_v58 = vpop.f32.mrf.mxu3  ;;  %v5146_v29 = vunpack.c.l.b16 %v5046_v42  ;;  %v3940_v28 = vshrl.u32 %v7448_v22, 16  ;;  %v3943_v8 = vshll.u32 %v7448_v22, 16  ;;  %v3923_v43 = vrot.slane %v3922_v49, 4 }
 0x2d9   : > { %v10240_v56 = vadd.f32 %v5244_v58, %v4661_v21  ;;  %v4662_v16 = vadd.f32 %v4592_v55, %v4335_v17  ;;  %v10242_v57 = vpop.f32.mrf.mxu1  ;;  %v7720_v55 = vld [vmem:[%s8388_s8 + $0xbc] sm:$0x1]  ;;  %v3949_v3 = vshll.u32 %v7449_v6, 16  ;;  %v3953_v54 = vshrl.u32 %v7449_v6, 16 }
 0x2da   : > { %v3933_v9 = vrot.slane %v3932_v63, 4  ;;  %v5067_v32 = vshll.u32 %v7720_v55, 16  ;;  %v5064_v24 = vor.u32 %v5063_v50, %v10254_v11  ;;  %v10259_v22 = vpack.c.b16 %v5146_v29, %v5145_v15 }
 0x2db   : > { %11537 = vst [vmem:[#allocation43_spill] sm:$0xff] %v10240_v56  ;;  %v5352_v35 = vsel %vm2012_vm8, %v10240_v56, 0.0  ;;  %v5417_v21 = vmul.f32 %v10240_v56, %v10240_v56  ;;  %v5054_v56 = vor.u32 %v5053_v37, %v5050_v41  ;;  %v3942_v49 = vrot.slane %v3940_v28, 4  ;;  %v7721_v37 = vld [vmem:[%s8388_s8 + $0xc0] sm:$0xf] }
 0x2dc   : > { %v5353_v17 = vadd.f32 %v5352_v35, %v5351_v4  ;;  %v7972_v35 = vld [vmem:[%s8388_s8 + $0xb4] sm:$0xff]  ;;  %v3945_v36 = vrot.slane %v3943_v8, 5  ;;  %v3955_v63 = vrot.slane %v3953_v54, 4  ;;  %v3928_v15 = vsel %vm8404_vm4, %v3923_v43, %v10235_v44 }
 0x2dd   : > { %v5454_v0 = vsel %vm2012_vm8, %v5417_v21, 0.0  ;;  %v7956_v21 = vld [vmem:[%s8388_s8 + $0xa8] sm:$0xff]  ;;  %v3938_v55 = vsel %vm8404_vm4, %v3933_v9, %v3937_v2  ;;  %v5055_v50 = vrot.slane %v5054_v56, 4  ;;  %v5065_v28 = vrot.slane %v5064_v24, 4 }
 0x2de   : > { %v5455_v23 = vadd.f32 %v5454_v0, %v5453_v61  ;;  %v4117_v58 = vpop.f32.mrf.mxu0  ;;  %v10270_v61 = vrot.slane %v3949_v3, 5  ;;  %v3959_v8 = vshll.u32 %v7467_v53, 16  ;;  %v7722_v0 = vld [vmem:[%s8388_s8 + $0xc4] sm:$0xf]  ;;  %v3946_v44 = vor.u32 %v3945_v36, %v3942_v49 }
 0x2df   : > { %v4338_v1 = vadd.f32 %v10218_v40, %v4117_v58  ;;  %v4597_v4 = vpop.f32.mrf.mxu2  ;;  %v5072_v43 = vshrl.u32 %v7721_v37, 16  ;;  %v5075_v2 = vshll.u32 %v7721_v37, 16  ;;  %v4016_v53 = vunpack.c.l.b16 %v3938_v55 }
 0x2e0   : > { %v5246_v42 = vpop.f32.mrf.mxu3  ;;  %v3956_v56 = vor.u32 %v3955_v63, %v10270_v61  ;;  %v3961_v49 = vrot.slane %v3959_v8, 5 }
 0x2e1   : > { %v10264_v6 = vadd.f32 %v5246_v42, %v4662_v16  ;;  %7482 = vmatmul.msk.bf16.gmra.mxu0 %vm706_vm1, %v10238_v27  ;;  %v4663_v41 = vadd.f32 %v4595_v20, %v4338_v1  ;;  %v10268_v40 = vpop.f32.mrf.mxu1  ;;  %v5069_v16 = vrot.slane %v5067_v32, 5  ;;  %v4015_v32 = vunpack.c.l.b16 %v3928_v15 }
 0x2e2   : > { %v5081_v1 = vshll.u32 %v7722_v0, 16  ;;  %v3947_v15 = vrot.slane %v3946_v44, 4  ;;  %v5074_v55 = vrot.slane %v5072_v43, 4 }
 0x2e3   : > { %11538 = vst [vmem:[#allocation44_spill] sm:$0xff] %v10264_v6  ;;  %v5354_v29 = vsel %vm2012_vm8, %v10264_v6, 0.0  ;;  %v5418_v20 = vmul.f32 %v10264_v6, %v10264_v6 }
 0x2e4   : > { %v5355_v3 = vadd.f32 %v5354_v29, %v5353_v17  ;;  %7676 = vmatmul.msk.bf16.gmra.mxu2 %vm706_vm1, %v7972_v35  ;;  %7563 = vmatmul.msk.bf16.gmra.mxu1 %vm706_vm1, %v7956_v21  ;;  %v5085_v17 = vshrl.u32 %v7722_v0, 16  ;;  %v5060_v35 = vsel %vm8404_vm4, %v5055_v50, %v10254_v11  ;;  %v5070_v21 = vsel %vm8404_vm4, %v5065_v28, %v5069_v16 }
 0x2e5   : > { %v5456_v9 = vsel %vm2012_vm8, %v5418_v20, 0.0  ;;  %7740 = vmatmul.msk.bf16.gmra.mxu3 %vm706_vm1, %v10259_v22  ;;  %v10304_v16 = vrot.slane %v5081_v1, 5 }
 0x2e6   : > { %v5457_v54 = vadd.f32 %v5456_v9, %v5455_v23  ;;  %v4119_v58 = vpop.f32.mrf.mxu0  ;;  %v7723_v9 = vld [vmem:[%s8388_s8 + $0xc8] sm:$0x1]  ;;  %v5087_v28 = vrot.slane %v5085_v17, 4  ;;  %v10313_v17 = vpack.c.b16 %v4016_v53, %v4015_v32  ;;  %v7450_v32 = vld [vmem:[%s8388_s8 + $0xc0] sm:$0xf] }
 0x2e7   : > { %v8063_v24 = vpop.permute.xlu0 %8062  ;;  %v4340_v42 = vadd.f32 %v10242_v57, %v4119_v58  ;;  %v4600_v36 = vpop.f32.mrf.mxu2  ;;  %v3957_v57 = vrot.slane %v3956_v56, 4  ;;  %v5077_v58 = vrot.slane %v5075_v2, 5  ;;  %v5147_v56 = vunpack.c.l.b16 %v5060_v35 }
 0x2e8   : > { %v8065_v63 = vunpack.i.h.bf16 %v8063_v24  ;;  %v8064_v37 = vunpack.i.l.bf16 %v8063_v24  ;;  %v5249_v23 = vpop.f32.mrf.mxu3  ;;  %v5148_v2 = vunpack.c.l.b16 %v5070_v21  ;;  %v5091_v24 = vshll.u32 %v7723_v9, 16 }
 0x2e9   : > { %v10295_v29 = vadd.f32 %v5249_v23, %v4663_v41  ;;  %v4664_v20 = vadd.f32 %v4597_v4, %v4340_v42  ;;  %v10297_v0 = vpop.f32.mrf.mxu1  ;;  %v3952_v42 = vsel %vm8404_vm4, %v3947_v15, %v10270_v61  ;;  %v5078_v21 = vor.u32 %v5077_v58, %v5074_v55  ;;  %v7973_v61 = vld [vmem:[%s8388_s8 + $0xc0] sm:$0xff]  ;;  %v7957_v15 = vld [vmem:[%s8388_s8 + $0xb4] sm:$0xff] }
 0x2ea   : > { %v3481_v11 = vsel %vm2012_vm8, %v9062_v46, %v8065_v63  ;;  %v3480_v50 = vsel %vm2012_vm8, %v9054_v30, %v8064_v37  ;;  %v3962_v63 = vsel %vm8404_vm4, %v3957_v57, %v3961_v49  ;;  %v5088_v37 = vor.u32 %v5087_v28, %v10304_v16  ;;  %v7451_v58 = vld [vmem:[%s8388_s8 + $0xc4] sm:$0xf] }
 0x2eb   : > { %11539 = vst [vmem:[#allocation45_spill] sm:$0xff] %v10295_v29  ;;  %v3513_v8 = vpack.c.bf16 %v3481_v11, %v3481_v11  ;;  %v3512_v41 = vpack.c.bf16 %v3480_v50, %v3480_v50  ;;  %v5356_v4 = vsel %vm2012_vm8, %v10295_v29, 0.0  ;;  %v5419_v44 = vmul.f32 %v10295_v29, %v10295_v29  ;;  %v7958_v29 = vld [vmem:[%s8388_s8 + $0xc0] sm:$0xff] }
 0x2ec   : > { %v5357_v43 = vadd.f32 %v5356_v4, %v5355_v3  ;;  %v10325_v50 = vpack.c.b16 %v5148_v2, %v5147_v56  ;;  %v4018_v49 = vunpack.c.l.b16 %v3962_v63  ;;  %v5093_v57 = vrot.slane %v5091_v24, 5 }
 0x2ed   : > { %3546 = vst.msk [vmem:[%s9484_s6 + $0xc4] sm:$0xf] %vm3520_vm9, %v3513_v8  ;;  %v5458_v1 = vsel %vm2012_vm8, %v5419_v44, 0.0  ;;  %v4017_v8 = vunpack.c.l.b16 %v3952_v42  ;;  %v5079_v28 = vrot.slane %v5078_v21, 4  ;;  %v5089_v44 = vrot.slane %v5088_v37, 4 }
 0x2ee   : > { %3545 = vst.msk [vmem:[%s9484_s6 + $0xc0] sm:$0xf] %vm3520_vm9, %v3512_v41  ;;  %v5459_v3 = vadd.f32 %v5458_v1, %v5457_v54  ;;  %v4122_v35 = vpop.f32.mrf.mxu0  ;;  %v3964_v56 = vshrl.u32 %v7450_v32, 16  ;;  %v3967_v2 = vshll.u32 %v7450_v32, 16  ;;  %v3973_v21 = vshll.u32 %v7451_v58, 16 }
 0x2ef   : > { %v4343_v23 = vadd.f32 %v10268_v40, %v4122_v35  ;;  %v4602_v9 = vpop.f32.mrf.mxu2  ;;  %v7724_v32 = vld [vmem:[%s8388_s8 + $0xcc] sm:$0xf] }
 0x2f0   : > { %v8073_v53 = vpop.permute.xlu2 %8072  ;;  %v5251_v11 = vpop.f32.mrf.mxu3 }
 0x2f1   : > { %v8075_v41 = vunpack.i.h.bf16 %v8073_v53  ;;  %v8074_v54 = vunpack.i.l.bf16 %v8073_v53  ;;  %v10329_v4 = vadd.f32 %v5251_v11, %v4664_v20  ;;  %7483 = vmatmul.msk.bf16.gmra.mxu0 %vm706_vm1, %v10313_v17  ;;  %v4665_v40 = vadd.f32 %v4600_v36, %v4343_v23  ;;  %v10333_v55 = vpop.f32.mrf.mxu1 }
 0x2f2   : > { %v3977_v23 = vshrl.u32 %v7451_v58, 16  ;;  %v5094_v58 = vsel %vm8404_vm4, %v5089_v44, %v5093_v57 }
 0x2f3   : > { %11540 = vst [vmem:[#allocation46_spill] sm:$0xff] %v10329_v4  ;;  %v3485_v24 = vsel %vm2012_vm8, %v9110_v7, %v8075_v41  ;;  %v3484_v20 = vsel %vm2012_vm8, %v9102_v5, %v8074_v54  ;;  %v5358_v1 = vsel %vm2012_vm8, %v10329_v4, 0.0  ;;  %v5420_v36 = vmul.f32 %v10329_v4, %v10329_v4 }
 0x2f4   : > { %v3517_v42 = vpack.c.bf16 %v3485_v24, %v3485_v24  ;;  %v3516_v63 = vpack.c.bf16 %v3484_v20, %v3484_v20  ;;  %v5359_v35 = vadd.f32 %v5358_v1, %v5357_v43  ;;  %7677 = vmatmul.msk.bf16.gmra.mxu2 %vm706_vm1, %v7973_v61  ;;  %7564 = vmatmul.msk.bf16.gmra.mxu1 %vm706_vm1, %v7957_v15  ;;  %v3966_v24 = vrot.slane %v3964_v56, 4  ;;  %v7468_v56 = vld [vmem:[%s8388_s8 + $0xc8] sm:$0x1] }
 0x2f5   : > { %v5460_v37 = vsel %vm2012_vm8, %v5420_v36, 0.0  ;;  %7741 = vmatmul.msk.bf16.gmra.mxu3 %vm706_vm1, %v10325_v50  ;;  %v10352_v41 = vpack.c.b16 %v4018_v49, %v4017_v8  ;;  %v5084_v43 = vsel %vm8404_vm4, %v5079_v28, %v10304_v16  ;;  %v3969_v20 = vrot.slane %v3967_v2, 5 }
 0x2f6   : > { %3550 = vst.msk [vmem:[%s9484_s6 + $0xe4] sm:$0xf] %vm3520_vm9, %v3517_v42  ;;  %v5461_v53 = vadd.f32 %v5460_v37, %v5459_v3  ;;  %v4124_v11 = vpop.f32.mrf.mxu0  ;;  %v7725_v3 = vld [vmem:[%s8388_s8 + $0xd0] sm:$0xf]  ;;  %v10363_v36 = vrot.slane %v3973_v21, 5  ;;  %v5096_v42 = vshrl.u32 %v7724_v32, 16 }
 0x2f7   : > { %11541 = vst [vmem:[#allocation47_spill] sm:$0xff] %v10352_v41  ;;  %v8068_v61 = vpop.permute.xlu1 %8067  ;;  %v4345_v15 = vadd.f32 %v10297_v0, %v4124_v11  ;;  %v4605_v54 = vpop.f32.mrf.mxu2  ;;  %v3979_v0 = vrot.slane %v3977_v23, 4  ;;  %v5099_v37 = vshll.u32 %v7724_v32, 16  ;;  %v5105_v2 = vshll.u32 %v7725_v3, 16 }
 0x2f8   : > { %3549 = vst.msk [vmem:[%s9484_s6 + $0xe0] sm:$0xf] %vm3520_vm9, %v3516_v63  ;;  %v8070_v1 = vunpack.i.h.bf16 %v8068_v61  ;;  %v8069_v8 = vunpack.i.l.bf16 %v8068_v61  ;;  %v5254_v49 = vpop.f32.mrf.mxu3  ;;  %v5109_v11 = vshrl.u32 %v7725_v3, 16  ;;  %v5149_v32 = vunpack.c.l.b16 %v5084_v43 }
 0x2f9   : > { %v10365_v16 = vadd.f32 %v5254_v49, %v4665_v40  ;;  %v4666_v28 = vadd.f32 %v4602_v9, %v4345_v15  ;;  %v4349_v63 = vpop.f32.mrf.mxu1  ;;  %v5150_v15 = vunpack.c.l.b16 %v5094_v58  ;;  %v3980_v3 = vor.u32 %v3979_v0, %v10363_v36 }
 0x2fa   : > { %v3483_v57 = vsel %vm2012_vm8, %v9086_v31, %v8070_v1  ;;  %v3482_v44 = vsel %vm2012_vm8, %v9078_v47, %v8069_v8  ;;  %v3970_v1 = vor.u32 %v3969_v20, %v3966_v24  ;;  %v3983_v49 = vshll.u32 %v7468_v56, 16  ;;  %v7726_v20 = vld [vmem:[%s8388_s8 + $0xd4] sm:$0x1] }
 0x2fb   : > { %11542 = vst [vmem:[#allocation48_spill] sm:$0xff] %v10365_v16  ;;  %v3515_v21 = vpack.c.bf16 %v3483_v57, %v3483_v57  ;;  %v3514_v61 = vpack.c.bf16 %v3482_v44, %v3482_v44  ;;  %v5360_v40 = vsel %vm2012_vm8, %v10365_v16, 0.0  ;;  %v5421_v9 = vmul.f32 %v10365_v16, %v10365_v16 }
 0x2fc   : > { %v5361_v23 = vadd.f32 %v5360_v40, %v5359_v35  ;;  %v5098_v57 = vrot.slane %v5096_v42, 4  ;;  %v5101_v16 = vrot.slane %v5099_v37, 5  ;;  %v5107_v35 = vrot.slane %v5105_v2, 5 }
 0x2fd   : > { %3548 = vst.msk [vmem:[%s9484_s6 + $0xd4] sm:$0xf] %vm3520_vm9, %v3515_v21  ;;  %v5462_v8 = vsel %vm2012_vm8, %v5421_v9, 0.0  ;;  %v5111_v43 = vrot.slane %v5109_v11, 4  ;;  %v10384_v40 = vpack.c.b16 %v5150_v15, %v5149_v32  ;;  %v7974_v9 = vld [vmem:[%s8388_s8 + $0xcc] sm:$0xff]  ;;  %v3971_v4 = vrot.slane %v3970_v1, 4 }
 0x2fe   : > { %3547 = vst.msk [vmem:[%s9484_s6 + $0xd0] sm:$0xf] %vm3520_vm9, %v3514_v61  ;;  %v5463_v44 = vadd.f32 %v5462_v8, %v5461_v53  ;;  %v4127_v6 = vpop.f32.mrf.mxu0  ;;  %v3981_v37 = vrot.slane %v3980_v3, 4  ;;  %v3985_v56 = vrot.slane %v3983_v49, 5  ;;  %v5102_v2 = vor.u32 %v5101_v16, %v5098_v57 }
 0x2ff   : > { %v4348_v58 = vadd.f32 %v10333_v55, %v4127_v6  ;;  %v4607_v24 = vpop.f32.mrf.mxu2  ;;  %v5112_v11 = vor.u32 %v5111_v43, %v5107_v35  ;;  %v5115_v6 = vshll.u32 %v7726_v20, 16 }
 0x300   : > { %v5256_v21 = vpop.f32.mrf.mxu3  ;;  %v3986_v16 = vsel %vm8404_vm4, %v3981_v37, %v3985_v56  ;;  %v5103_v8 = vrot.slane %v5102_v2, 4 }
 0x301   : > { %v10388_v0 = vadd.f32 %v5256_v21, %v4666_v28  ;;  %7484 = vmatmul.msk.bf16.gmra.mxu0 %vm706_vm1, %v10352_v41  ;;  %v4667_v53 = vadd.f32 %v4605_v54, %v4348_v58  ;;  %v4352_v42 = vpop.f32.mrf.mxu1  ;;  %v3976_v54 = vsel %vm8404_vm4, %v3971_v4, %v10363_v36  ;;  %v5117_v3 = vrot.slane %v5115_v6, 5  ;;  %v7745_v6 = vld [vmem:[%s8388_s8 + $0xc] sm:$0xe] }
 0x302   : > { %v4019_v21 = vunpack.c.l.b16 %v3976_v54  ;;  %v5108_v4 = vsel %vm8404_vm4, %v5103_v8, %v5107_v35 }
 0x303   : > { %11543 = vst [vmem:[#allocation49_spill] sm:$0xff] %v10388_v0  ;;  %v5362_v55 = vsel %vm2012_vm8, %v10388_v0, 0.0  ;;  %v5422_v61 = vmul.f32 %v10388_v0, %v10388_v0  ;;  %v5151_v56 = vunpack.c.l.b16 %v5108_v4 }
 0x304   : > { %v5363_v32 = vadd.f32 %v5362_v55, %v5361_v23  ;;  %7678 = vmatmul.msk.bf16.gmra.mxu2 %vm706_vm1, %v7974_v9  ;;  %7565 = vmatmul.msk.bf16.gmra.mxu1 %vm706_vm1, %v7958_v29  ;;  %v5113_v23 = vrot.slane %v5112_v11, 4  ;;  %v4020_v9 = vunpack.c.l.b16 %v3986_v16  ;;  %v5565_v55 = vrot.slane %v8225_v38, 5  ;;  %v8226_v16 = vld [vmem:[%s8388_s8 + $0x1c] sm:$0xf] }
 0x305   : > { %v5464_v28 = vsel %vm2012_vm8, %v5422_v61, 0.0  ;;  %7742 = vmatmul.msk.bf16.gmra.mxu3 %vm706_vm1, %v10384_v40 }
 0x306   : > { %v5465_v15 = vadd.f32 %v5464_v28, %v5463_v44  ;;  %v4129_v1 = vpop.f32.mrf.mxu0  ;;  %v5118_v36 = vsel %vm8404_vm4, %v5113_v23, %v5117_v3  ;;  %v10417_v37 = vpack.c.b16 %v4020_v9, %v4019_v21  ;;  %v7761_v3 = vrot.slane %v7745_v6, 9  ;;  %v8227_v21 = vld [vmem:[%s8388_s8 + $0x14] sm:$0x1] }
 0x307   : > { %v4350_v49 = vadd.f32 %v4349_v63, %v4129_v1  ;;  %v4610_v57 = vpop.f32.mrf.mxu2  ;;  %v5152_v2 = vunpack.c.l.b16 %v5118_v36  ;;  %v6149_v1 = vrot.slane %v8226_v16, 5  ;;  %v5568_v9 = vrot.slane %v8227_v21, 5 }
 0x308   : > { %v5259_v29 = vpop.f32.mrf.mxu3  ;;  %11545 = vst [vmem:[#allocation51_spill] sm:$0xff] %v10417_v37 }
 0x309   : > { %v10406_v43 = vadd.f32 %v5259_v29, %v4667_v53  ;;  %v4668_v58 = vadd.f32 %v4607_v24, %v4350_v49  ;;  %v4354_v20 = vpop.f32.mrf.mxu1  ;;  %v7827_v49 = vld [vmem:[%s8388_s8 + $0x18] sm:$0xe]  ;;  %v5567_v29 = vrot.slane %v5565_v55, 4 }
 0x30b   : > { %11544 = vst [vmem:[#allocation50_spill] sm:$0xff] %v10406_v43  ;;  %v5364_v63 = vsel %vm2012_vm8, %v10406_v43, 0.0  ;;  %v5423_v44 = vmul.f32 %v10406_v43, %v10406_v43 }
 0x30c   : > { %v5365_v53 = vadd.f32 %v5364_v63, %v5363_v32  ;;  %v10426_v32 = vpack.c.b16 %v5152_v2, %v5151_v56  ;;  %v5566_v63 = vsel %vm8862_vm7, %v7761_v3, %v5565_v55 }
 0x30d   : > { %v5466_v24 = vsel %vm2012_vm8, %v5423_v44, 0.0  ;;  %v6151_v44 = vrot.slane %v6149_v1, 4  ;;  %v5677_v16 = vunpack.c.l.b16 %v5566_v63 }
 0x30e   : > { %v5467_v11 = vadd.f32 %v5466_v24, %v5465_v15  ;;  %v4132_v35 = vpop.f32.mrf.mxu0  ;;  %11547 = vst [vmem:[#allocation53_spill] sm:$0xff] %v10426_v32  ;;  %v8228_v24 = vld [vmem:[%s8388_s8 + $0x20] sm:$0x1] }
 0x30f   : > { %v4353_v61 = vadd.f32 %v4352_v42, %v4132_v35  ;;  %v4612_v28 = vpop.f32.mrf.mxu2  ;;  %v6152_v56 = vrot.slane %v8228_v24, 5 }
 0x310   : > { %v5261_v54 = vpop.f32.mrf.mxu3 }
 0x311   : > { %v10422_v8 = vadd.f32 %v5261_v54, %v4668_v58  ;;  %7485 = vmatmul.msk.bf16.gmra.mxu0 %vm706_vm1, %v10417_v37  ;;  %v4669_v23 = vadd.f32 %v4610_v57, %v4353_v61  ;;  %v4357_v15 = vpop.f32.mrf.mxu1  ;;  %v7843_v57 = vrot.slane %v7827_v49, 9  ;;  %v7748_v37 = vld [vmem:[%s8388_s8 + $0x30] sm:$0xe] }
 0x313   : > { %11546 = vst [vmem:[#allocation52_spill] sm:$0xff] %v10422_v8  ;;  %v5366_v42 = vsel %vm2012_vm8, %v10422_v8, 0.0  ;;  %v5424_v58 = vmul.f32 %v10422_v8, %v10422_v8  ;;  %v6150_v49 = vsel %vm8862_vm7, %v7843_v57, %v6149_v1 }
 0x314   : > { %v5367_v4 = vadd.f32 %v5366_v42, %v5365_v53  ;;  %7811 = vmatmul.msk.bf16.vlgmr.msrb.gmra.mxu2 %vm706_vm1, %v9412_v10  ;;  %7794 = vmatmul.msk.bf16.vlgmr.msrb.gmra.mxu1 %vm706_vm1, %v9410_v26  ;;  %v5569_v10 = vsel %vm8862_vm7, %v5567_v29, %v5568_v9  ;;  %v6153_v29 = vsel %vm8862_vm7, %v6151_v44, %v6152_v56  ;;  %v11549_v9 = vld [vmem:[#allocation17_spill] sm:$0xff]  ;;  %v11550_v42 = vld [vmem:[#allocation18_spill] sm:$0xff]  ;;  %v6261_v57 = vunpack.c.l.b16 %v6150_v49 }
 0x315   : > { %v5468_v36 = vsel %vm2012_vm8, %v5424_v58, 0.0  ;;  %7743 = vmatmul.msk.bf16.gmra.mxu3 %vm706_vm1, %v10426_v32  ;;  %v5678_v21 = vunpack.c.l.b16 %v5569_v10  ;;  %v6262_v24 = vunpack.c.l.b16 %v6153_v29  ;;  %v8237_v32 = vld [vmem:[%s8388_s8 + $0x34] sm:$0xf] }
 0x316   : > { %v5469_v2 = vadd.f32 %v5468_v36, %v5467_v11  ;;  %v4134_v53 = vpop.f32.mrf.mxu0  ;;  %v5586_v41 = vrot.slane %v8237_v32, 5 }
 0x317   : > { %v8078_v35 = vpop.permute.xlu0 %8077  ;;  %v4355_v6 = vadd.f32 %v4354_v20, %v4134_v53  ;;  %v4615_v26 = vpop.f32.mrf.mxu2  ;;  %v5709_v56 = vpack.c.b16 %v5678_v21, %v5677_v16  ;;  %v6293_v49 = vpack.c.b16 %v6262_v24, %v6261_v57  ;;  %v11552_v24 = vld [vmem:[#allocation13_spill] sm:$0xff] }
 0x318   : > { %v8080_v38 = vunpack.i.h.bf16 %v8078_v35  ;;  %v8079_v61 = vunpack.i.l.bf16 %v8078_v35  ;;  %v5264_v54 = vpop.f32.mrf.mxu3  ;;  %v7746_v35 = vld [vmem:[%s8388_s8 + $0x18] sm:$0xe] }
 0x319   : > { %v10448_v55 = vadd.f32 %v5264_v54, %v4669_v23  ;;  %v4670_v3 = vadd.f32 %v4612_v28, %v4355_v6  ;;  %v4359_v11 = vpop.f32.mrf.mxu1  ;;  %v8229_v6 = vld [vmem:[%s8388_s8 + $0x1c] sm:$0xf]  ;;  %v7762_v21 = vrot.slane %v7746_v35, 9 }
 0x31a   : > { %v3486_v20 = vsel %vm2012_vm8, %v11549_v9, %v8079_v61  ;;  %v3487_v58 = vsel %vm2012_vm8, %v11550_v42, %v8080_v38  ;;  %v5572_v38 = vrot.slane %v8229_v6, 5  ;;  %v8232_v6 = vld [vmem:[%s8388_s8 + $0x2c] sm:$0x1] }
 0x31b   : > { %11548 = vst [vmem:[#allocation54_spill] sm:$0xff] %v10448_v55  ;;  %v3518_v36 = vpack.c.bf16 %v3486_v20, %v3486_v20  ;;  %v3519_v63 = vpack.c.bf16 %v3487_v58, %v3487_v58  ;;  %v5368_v1 = vsel %vm2012_vm8, %v10448_v55, 0.0  ;;  %v5425_v28 = vmul.f32 %v10448_v55, %v10448_v55  ;;  %v7828_v58 = vld [vmem:[%s8388_s8 + $0x24] sm:$0xe] }
 0x31c   : > { %v5369_v23 = vadd.f32 %v5368_v1, %v5367_v4  ;;  %v8231_v1 = vld [vmem:[%s8388_s8 + $0x20] sm:$0x1] }
 0x31d   : > { %3551 = vst.msk [vmem:[%s9484_s6 + $0xf0] sm:$0xf] %vm3520_vm9, %v3518_v36  ;;  %v5470_v44 = vsel %vm2012_vm8, %v5425_v28, 0.0  ;;  %v8230_v36 = vld [vmem:[%s8388_s8 + $0x28] sm:$0xf]  ;;  %v5575_v28 = vrot.slane %v8231_v1, 5 }
 0x31e   : > { %3552 = vst.msk [vmem:[%s9484_s6 + $0xf4] sm:$0xf] %vm3520_vm9, %v3519_v63  ;;  %v5471_v53 = vadd.f32 %v5470_v44, %v5469_v2  ;;  %v4137_v10 = vpop.f32.mrf.mxu0  ;;  %v6156_v2 = vrot.slane %v8230_v36, 5  ;;  %v5574_v63 = vrot.slane %v5572_v38, 4  ;;  %v7844_v44 = vrot.slane %v7828_v58, 9 }
 0x31f   : > { %v4358_v61 = vadd.f32 %v4357_v15, %v4137_v10  ;;  %v4617_v54 = vpop.f32.mrf.mxu2  ;;  %v5573_v10 = vsel %vm8862_vm7, %v7762_v21, %v5572_v38 }
 0x320   : > { %v5266_v4 = vpop.f32.mrf.mxu3  ;;  %v6158_v35 = vrot.slane %v6156_v2, 4  ;;  %v6157_v58 = vsel %vm8862_vm7, %v7844_v44, %v6156_v2 }
 0x321   : > { %v10467_v29 = vadd.f32 %v5266_v4, %v4670_v3  ;;  %7778 = vmatmul.msk.bf16.vlgmr.msrb.gmra.mxu0 %vm706_vm1, %v5709_v56  ;;  %v4671_v20 = vadd.f32 %v4615_v26, %v4358_v61  ;;  %v4362_v16 = vpop.f32.mrf.mxu1  ;;  %v11553_v26 = vld [vmem:[#allocation9_spill] sm:$0xff]  ;;  %v6159_v61 = vrot.slane %v8232_v6, 5  ;;  %v7747_v6 = vld [vmem:[%s8388_s8 + $0x24] sm:$0xe] }
 0x323   : > { %11551 = vst [vmem:[#allocation17_spill] sm:$0xff] %v10467_v29  ;;  %v5370_v15 = vsel %vm2012_vm8, %v10467_v29, 0.0  ;;  %v5426_v57 = vmul.f32 %v10467_v29, %v10467_v29 }
 0x324   : > { %v5371_v3 = vadd.f32 %v5370_v15, %v5369_v23  ;;  %7812 = vmatmul.msk.bf16.gmra.mxu2 %vm706_vm1, %v11552_v24  ;;  %7795 = vmatmul.msk.bf16.gmra.mxu1 %vm706_vm1, %v11553_v26  ;;  %v5576_v23 = vsel %vm8862_vm7, %v5574_v63, %v5575_v28  ;;  %v5679_v26 = vunpack.c.l.b16 %v5573_v10 }
 0x325   : > { %v5472_v56 = vsel %vm2012_vm8, %v5426_v57, 0.0  ;;  %7860 = vmatmul.msk.bf16.vlgmr.msrb.gmra.mxu3 %vm706_vm1, %v6293_v49  ;;  %v5680_v57 = vunpack.c.l.b16 %v5576_v23 }
 0x326   : > { %v5473_v4 = vadd.f32 %v5472_v56, %v5471_v53  ;;  %v4139_v36 = vpop.f32.mrf.mxu0  ;;  %v6160_v53 = vsel %vm8862_vm7, %v6158_v35, %v6159_v61  ;;  %v6263_v56 = vunpack.c.l.b16 %v6157_v58 }
 0x327   : > { %v4360_v1 = vadd.f32 %v4359_v11, %v4139_v36  ;;  %v4620_v15 = vpop.f32.mrf.mxu2  ;;  %v6264_v10 = vunpack.c.l.b16 %v6160_v53  ;;  %v8233_v36 = vld [vmem:[%s8388_s8 + $0x28] sm:$0xf]  ;;  %v7763_v53 = vrot.slane %v7747_v6, 9 }
 0x328   : > { %v5269_v24 = vpop.f32.mrf.mxu3  ;;  %v5579_v35 = vrot.slane %v8233_v36, 5 }
 0x329   : > { %v10490_v49 = vadd.f32 %v5269_v24, %v4671_v20  ;;  %v4672_v38 = vadd.f32 %v4617_v54, %v4360_v1  ;;  %v4364_v21 = vpop.f32.mrf.mxu1  ;;  %v5710_v20 = vpack.c.b16 %v5680_v57, %v5679_v26  ;;  %v6294_v24 = vpack.c.b16 %v6264_v10, %v6263_v56  ;;  %v7829_v26 = vld [vmem:[%s8388_s8 + $0x30] sm:$0xe]  ;;  %v11556_v10 = vld [vmem:[#allocation19_spill] sm:$0xff] }
 0x32a   : > { %v5580_v6 = vsel %vm8862_vm7, %v7763_v53, %v5579_v35 }
 0x32b   : > { %11554 = vst [vmem:[#allocation18_spill] sm:$0xff] %v10490_v49  ;;  %v5372_v63 = vsel %vm2012_vm8, %v10490_v49, 0.0  ;;  %v5427_v11 = vmul.f32 %v10490_v49, %v10490_v49  ;;  %v5681_v8 = vunpack.c.l.b16 %v5580_v6 }
 0x32c   : > { %v5373_v28 = vadd.f32 %v5372_v63, %v5371_v3  ;;  %v5581_v63 = vrot.slane %v5579_v35, 4 }
 0x32d   : > { %v5474_v2 = vsel %vm2012_vm8, %v5427_v11, 0.0  ;;  %v8235_v11 = vld [vmem:[%s8388_s8 + $0x2c] sm:$0x1] }
 0x32e   : > { %v5475_v54 = vadd.f32 %v5474_v2, %v5473_v4  ;;  %v4142_v44 = vpop.f32.mrf.mxu0  ;;  %v8234_v4 = vld [vmem:[%s8388_s8 + $0x34] sm:$0xf]  ;;  %v5582_v2 = vrot.slane %v8235_v11, 5  ;;  %v11559_v11 = vld [vmem:[#allocation3_spill] sm:$0xff] }
 0x32f   : > { %v4363_v61 = vadd.f32 %v4362_v16, %v4142_v44  ;;  %v4622_v23 = vpop.f32.mrf.mxu2  ;;  %v6163_v57 = vrot.slane %v8234_v4, 5  ;;  %v11558_v4 = vld [vmem:[#allocation2_spill] sm:$0xff] }
 0x330   : > { %v5271_v1 = vpop.f32.mrf.mxu3 }
 0x331   : > { %v10501_v43 = vadd.f32 %v5271_v1, %v4672_v38  ;;  %7779 = vmatmul.msk.bf16.gmra.mxu0 %vm706_vm1, %v5710_v20  ;;  %v4673_v3 = vadd.f32 %v4620_v15, %v4363_v61  ;;  %v10504_v58 = vpop.f32.mrf.mxu1  ;;  %v11557_v15 = vld [vmem:[#allocation12_spill] sm:$0xff]  ;;  %v7845_v20 = vrot.slane %v7829_v26, 9  ;;  %v6165_v36 = vrot.slane %v6163_v57, 4  ;;  %v8236_v61 = vld [vmem:[%s8388_s8 + $0x38] sm:$0x1] }
 0x332   : > { %v6166_v1 = vrot.slane %v8236_v61, 5  ;;  %v5583_v26 = vsel %vm8862_vm7, %v5581_v63, %v5582_v2  ;;  %v2013_v61 = vsel %vm2012_vm8, %v11558_v4, 0.0 }
 0x333   : > { %11555 = vst [vmem:[#allocation13_spill] sm:$0xff] %v10501_v43  ;;  %v5374_v16 = vsel %vm2012_vm8, %v10501_v43, 0.0  ;;  %v5428_v38 = vmul.f32 %v10501_v43, %v10501_v43  ;;  %v5682_v2 = vunpack.c.l.b16 %v5583_v26 }
 0x334   : > { %v5375_v56 = vadd.f32 %v5374_v16, %v5373_v28  ;;  %7813 = vmatmul.msk.bf16.gmra.mxu2 %vm706_vm1, %v11556_v10  ;;  %7796 = vmatmul.msk.bf16.gmra.mxu1 %vm706_vm1, %v11557_v15  ;;  %v2083_v28 = vmul.f32 %v11558_v4, %v11558_v4  ;;  %v2084_v16 = vmul.f32 %v11559_v11, %v11559_v11 }
 0x335   : > { %v5476_v44 = vsel %vm2012_vm8, %v5428_v38, 0.0  ;;  %7861 = vmatmul.msk.bf16.gmra.mxu3 %vm706_vm1, %v6294_v24  ;;  %v2014_v24 = vsel %vm2012_vm8, %v11559_v11, 0.0  ;;  %v11560_v38 = vld [vmem:[#allocation4_spill] sm:$0xff]  ;;  %v6167_v11 = vsel %vm8862_vm7, %v6165_v36, %v6166_v1  ;;  %v11563_v36 = vld [vmem:[#allocation6_spill] sm:$0xff] }
 0x336   : > { %v5477_v10 = vadd.f32 %v5476_v44, %v5475_v54  ;;  %v4144_v49 = vpop.f32.mrf.mxu0  ;;  %v2085_v35 = vmul.f32 %v11560_v38, %v11560_v38  ;;  %v6164_v54 = vsel %vm8862_vm7, %v7845_v20, %v6163_v57  ;;  %v2116_v29 = vsel %vm2012_vm8, %v2084_v16, 0.0 }
 0x337   : > { %v4365_v53 = vadd.f32 %v4364_v21, %v4144_v49  ;;  %v4625_v15 = vpop.f32.mrf.mxu2  ;;  %v2115_v49 = vsel %vm2012_vm8, %v2083_v28, 0.0  ;;  %v2015_v21 = vadd.f32 %v2014_v24, %v2013_v61  ;;  %v2016_v6 = vsel %vm2012_vm8, %v11560_v38, 0.0 }
 0x338   : > { %v5274_v43 = vpop.f32.mrf.mxu3  ;;  %v2118_v57 = vsel %vm2012_vm8, %v2085_v35, 0.0  ;;  %v2087_v1 = vmul.f32 %v11563_v36, %v11563_v36  ;;  %v6265_v28 = vunpack.c.l.b16 %v6164_v54  ;;  %v6266_v16 = vunpack.c.l.b16 %v6167_v11 }
 0x339   : > { %v10536_v44 = vadd.f32 %v5274_v43, %v4673_v3  ;;  %v4674_v55 = vadd.f32 %v4622_v23, %v4365_v53  ;;  %v10538_v63 = vpop.f32.mrf.mxu1  ;;  %v11562_v43 = vld [vmem:[#allocation5_spill] sm:$0xff]  ;;  %v2117_v26 = vadd.f32 %v2116_v29, %v2115_v49  ;;  %v5711_v35 = vpack.c.b16 %v5682_v2, %v5681_v8 }
 0x33a   : > { %v2086_v23 = vmul.f32 %v11562_v43, %v11562_v43  ;;  %v2018_v24 = vsel %vm2012_vm8, %v11562_v43, 0.0  ;;  %v2017_v53 = vadd.f32 %v2016_v6, %v2015_v21  ;;  %v2020_v29 = vsel %vm2012_vm8, %v11563_v36, 0.0 }
 0x33b   : > { %11561 = vst [vmem:[#allocation9_spill] sm:$0xff] %v10536_v44  ;;  %v5376_v3 = vsel %vm2012_vm8, %v10536_v44, 0.0  ;;  %v5429_v20 = vmul.f32 %v10536_v44, %v10536_v44  ;;  %v2119_v44 = vadd.f32 %v2118_v57, %v2117_v26  ;;  %v2122_v8 = vsel %vm2012_vm8, %v2087_v1, 0.0  ;;  %v8239_v1 = vld [vmem:[%s8388_s8 + $0x38] sm:$0x1] }
 0x33c   : > { %v5377_v4 = vadd.f32 %v5376_v3, %v5375_v56  ;;  %v2120_v56 = vsel %vm2012_vm8, %v2086_v23, 0.0  ;;  %v2019_v49 = vadd.f32 %v2018_v24, %v2017_v53  ;;  %v6295_v32 = vpack.c.b16 %v6266_v16, %v6265_v28  ;;  %v7830_v3 = vld [vmem:[%s8388_s8 + $0x3c] sm:$0xe] }
 0x33d   : > { %v5478_v38 = vsel %vm2012_vm8, %v5429_v20, 0.0  ;;  %v7764_v23 = vrot.slane %v7748_v37, 9  ;;  %v2121_v20 = vadd.f32 %v2120_v56, %v2119_v44  ;;  %v5588_v26 = vrot.slane %v5586_v41, 4  ;;  %v11567_v53 = vld [vmem:[#allocation21_spill] sm:$0xff]  ;;  %v11568_v56 = vld [vmem:[#allocation20_spill] sm:$0xff] }
 0x33e   : > { %v5479_v61 = vadd.f32 %v5478_v38, %v5477_v10  ;;  %v4147_v0 = vpop.f32.mrf.mxu0  ;;  %v11564_v10 = vld [vmem:[#allocation7_spill] sm:$0xff]  ;;  %v2021_v36 = vadd.f32 %v2020_v29, %v2019_v49  ;;  %v5589_v24 = vrot.slane %v8239_v1, 5  ;;  %v7846_v29 = vrot.slane %v7830_v3, 9 }
 0x33f   : > { %v4368_v54 = vadd.f32 %v10504_v58, %v4147_v0  ;;  %v4627_v11 = vpop.f32.mrf.mxu2  ;;  %v2088_v2 = vmul.f32 %v11564_v10, %v11564_v10  ;;  %v8238_v0 = vld [vmem:[%s8388_s8 + $0x40] sm:$0xf]  ;;  %v2022_v28 = vsel %vm2012_vm8, %v11564_v10, 0.0  ;;  %v2123_v38 = vadd.f32 %v2122_v8, %v2121_v20 }
 0x340   : > { %v5276_v21 = vpop.f32.mrf.mxu3  ;;  %v6170_v58 = vrot.slane %v8238_v0, 5  ;;  %v5587_v49 = vsel %vm8862_vm7, %v7764_v23, %v5586_v41  ;;  %v2023_v0 = vadd.f32 %v2022_v28, %v2021_v36  ;;  %v11570_v28 = vld [vmem:[#allocation11_spill] sm:$0xff] }
 0x341   : > { %v10567_v6 = vadd.f32 %v5276_v21, %v4674_v55  ;;  %7780 = vmatmul.msk.bf16.gmra.mxu0 %vm706_vm1, %v5711_v35  ;;  %v4675_v57 = vadd.f32 %v4625_v15, %v4368_v54  ;;  %v10570_v43 = vpop.f32.mrf.mxu1  ;;  %v11566_v55 = vld [vmem:[#allocation8_spill] sm:$0xff]  ;;  %v2124_v44 = vsel %vm2012_vm8, %v2088_v2, 0.0  ;;  %v8240_v21 = vld [vmem:[%s8388_s8 + $0x44] sm:$0x1] }
 0x342   : > { %v2089_v16 = vmul.f32 %v11566_v55, %v11566_v55  ;;  %v6172_v10 = vrot.slane %v6170_v58, 4  ;;  %v6173_v8 = vrot.slane %v8240_v21, 5  ;;  %v11569_v2 = vld [vmem:[#allocation10_spill] sm:$0xff]  ;;  %v2125_v3 = vadd.f32 %v2124_v44, %v2123_v38 }
 0x343   : > { %11565 = vst [vmem:[#allocation19_spill] sm:$0xff] %v10567_v6  ;;  %v5378_v15 = vsel %vm2012_vm8, %v10567_v6, 0.0  ;;  %v5430_v37 = vmul.f32 %v10567_v6, %v10567_v6  ;;  %v2026_v36 = vsel %vm2012_vm8, %v11569_v2, 0.0  ;;  %v8241_v6 = vld [vmem:[%s8388_s8 + $0x40] sm:$0xf] }
 0x344   : > { %v5379_v35 = vadd.f32 %v5378_v15, %v5377_v4  ;;  %7814 = vmatmul.msk.bf16.gmra.mxu2 %vm706_vm1, %v11567_v53  ;;  %7797 = vmatmul.msk.bf16.gmra.mxu1 %vm706_vm1, %v11568_v56  ;;  %v2090_v4 = vmul.f32 %v11569_v2, %v11569_v2  ;;  %v5590_v15 = vsel %vm8862_vm7, %v5588_v26, %v5589_v24  ;;  %v5683_v56 = vunpack.c.l.b16 %v5587_v49  ;;  %v11572_v49 = vld [vmem:[#allocation14_spill] sm:$0xff] }
 0x345   : > { %v5480_v54 = vsel %vm2012_vm8, %v5430_v37, 0.0  ;;  %7862 = vmatmul.msk.bf16.gmra.mxu3 %vm706_vm1, %v6295_v32  ;;  %v2024_v37 = vsel %vm2012_vm8, %v11566_v55, 0.0  ;;  %v2126_v32 = vsel %vm2012_vm8, %v2089_v16, 0.0  ;;  %v2091_v53 = vmul.f32 %v11570_v28, %v11570_v28 }
 0x346   : > { %v5481_v20 = vadd.f32 %v5480_v54, %v5479_v61  ;;  %v4149_v1 = vpop.f32.mrf.mxu0  ;;  %v6171_v26 = vsel %vm8862_vm7, %v7846_v29, %v6170_v58  ;;  %v5684_v16 = vunpack.c.l.b16 %v5590_v15  ;;  %v2025_v44 = vadd.f32 %v2024_v37, %v2023_v0 }
 0x347   : > { %v4370_v41 = vadd.f32 %v10538_v63, %v4149_v1  ;;  %v4630_v23 = vpop.f32.mrf.mxu2  ;;  %v6174_v63 = vsel %vm8862_vm7, %v6172_v10, %v6173_v8  ;;  %v2127_v54 = vadd.f32 %v2126_v32, %v2125_v3  ;;  %v2128_v21 = vsel %vm2012_vm8, %v2090_v4, 0.0 }
 0x348   : > { %v5279_v61 = vpop.f32.mrf.mxu3  ;;  %v2028_v2 = vsel %vm2012_vm8, %v11570_v28, 0.0  ;;  %v2092_v58 = vmul.f32 %v11572_v49, %v11572_v49  ;;  %v2027_v29 = vadd.f32 %v2026_v36, %v2025_v44  ;;  %v6267_v8 = vunpack.c.l.b16 %v6171_v26  ;;  %v11573_v36 = vld [vmem:[#allocation15_spill] sm:$0xff] }
 0x349   : > { %v10607_v24 = vadd.f32 %v5279_v61, %v4675_v57  ;;  %v4676_v38 = vadd.f32 %v4627_v11, %v4370_v41  ;;  %v10609_v55 = vpop.f32.mrf.mxu1  ;;  %v6268_v0 = vunpack.c.l.b16 %v6174_v63  ;;  %v2130_v4 = vsel %vm2012_vm8, %v2091_v53, 0.0  ;;  %v7749_v61 = vld [vmem:[%s8388_s8 + $0x3c] sm:$0xe] }
 0x34a   : > { %v2030_v1 = vsel %vm2012_vm8, %v11572_v49, 0.0  ;;  %v5712_v3 = vpack.c.b16 %v5684_v16, %v5683_v56  ;;  %v2129_v37 = vadd.f32 %v2128_v21, %v2127_v54  ;;  %v2029_v32 = vadd.f32 %v2028_v2, %v2027_v29 }
 0x34b   : > { %11571 = vst [vmem:[#allocation12_spill] sm:$0xff] %v10607_v24  ;;  %v5380_v11 = vsel %vm2012_vm8, %v10607_v24, 0.0  ;;  %v5431_v57 = vmul.f32 %v10607_v24, %v10607_v24  ;;  %v5593_v24 = vrot.slane %v8241_v6, 5  ;;  %v2093_v53 = vmul.f32 %v11573_v36, %v11573_v36 }
 0x34c   : > { %v5381_v10 = vadd.f32 %v5380_v11, %v5379_v35  ;;  %v2132_v35 = vsel %vm2012_vm8, %v2092_v58, 0.0  ;;  %v2131_v44 = vadd.f32 %v2130_v4, %v2129_v37  ;;  %v2031_v56 = vadd.f32 %v2030_v1, %v2029_v32  ;;  %v7831_v58 = vld [vmem:[%s8388_s8 + $0x48] sm:$0xe]  ;;  %v8242_v11 = vld [vmem:[%s8388_s8 + $0x4c] sm:$0xf] }
 0x34d   : > { %v5482_v15 = vsel %vm2012_vm8, %v5431_v57, 0.0  ;;  %v6296_v54 = vpack.c.b16 %v6268_v0, %v6267_v8  ;;  %v7765_v49 = vrot.slane %v7749_v61, 9  ;;  %v5595_v29 = vrot.slane %v5593_v24, 4  ;;  %v8243_v4 = vld [vmem:[%s8388_s8 + $0x44] sm:$0x1]  ;;  %v11574_v8 = vld [vmem:[#allocation16_spill] sm:$0xff] }
 0x34e   : > { %v5483_v41 = vadd.f32 %v5482_v15, %v5481_v20  ;;  %v4152_v28 = vpop.f32.mrf.mxu0  ;;  %v2032_v20 = vsel %vm2012_vm8, %v11573_v36, 0.0  ;;  %v2133_v57 = vadd.f32 %v2132_v35, %v2131_v44  ;;  %v5596_v1 = vrot.slane %v8243_v4, 5  ;;  %v11576_v61 = vld [vmem:[#allocation22_spill] sm:$0xff]  ;;  %v8244_v44 = vld [vmem:[%s8388_s8 + $0x50] sm:$0x1] }
 0x34f   : > { %v4373_v26 = vadd.f32 %v10570_v43, %v4152_v28  ;;  %v4632_v63 = vpop.f32.mrf.mxu2  ;;  %v6177_v43 = vrot.slane %v8242_v11, 5  ;;  %v2033_v15 = vadd.f32 %v2032_v20, %v2031_v56  ;;  %v2134_v37 = vsel %vm2012_vm8, %v2093_v53, 0.0  ;;  %v11575_v28 = vld [vmem:[#allocation23_spill] sm:$0xff] }
 0x350   : > { %v5281_v16 = vpop.f32.mrf.mxu3  ;;  %v2034_v0 = vsel %vm2012_vm8, %v11574_v8, 0.0  ;;  %v7847_v35 = vrot.slane %v7831_v58, 9  ;;  %v5594_v53 = vsel %vm8862_vm7, %v7765_v49, %v5593_v24  ;;  %v6180_v56 = vrot.slane %v8244_v44, 5 }
 0x351   : > { %v10634_v21 = vadd.f32 %v5281_v16, %v4676_v38  ;;  %7781 = vmatmul.msk.bf16.gmra.mxu0 %vm706_vm1, %v5712_v3  ;;  %v4677_v6 = vadd.f32 %v4630_v23, %v4373_v26  ;;  %v10637_v2 = vpop.f32.mrf.mxu1  ;;  %v2094_v3 = vmul.f32 %v11574_v8, %v11574_v8  ;;  %v6179_v26 = vrot.slane %v6177_v43, 4 }
 0x352   : > { %v5597_v11 = vsel %vm8862_vm7, %v5595_v29, %v5596_v1  ;;  %v2135_v58 = vadd.f32 %v2134_v37, %v2133_v57  ;;  %v2035_v4 = vadd.f32 %v2034_v0, %v2033_v15 }
 0x353   : > { %v5382_v38 = vsel %vm2012_vm8, %v10634_v21, 0.0  ;;  %v5432_v23 = vmul.f32 %v10634_v21, %v10634_v21  ;;  %v2136_v49 = vsel %vm2012_vm8, %v2094_v3, 0.0  ;;  %v5686_v1 = vunpack.c.l.b16 %v5597_v11 }
 0x354   : > { %v10651_v32 = vadd.f32 %v5382_v38, %v5381_v10  ;;  %7815 = vmatmul.msk.bf16.gmra.mxu2 %vm706_vm1, %v11575_v28  ;;  %7798 = vmatmul.msk.bf16.gmra.mxu1 %vm706_vm1, %v11576_v61  ;;  %v2095_v10 = vmul.f32 %v8915_v51, %v8915_v51  ;;  %v6178_v28 = vsel %vm8862_vm7, %v7847_v35, %v6177_v43 }
 0x355   : > { %v5484_v36 = vsel %vm2012_vm8, %v5432_v23, 0.0  ;;  %7863 = vmatmul.msk.bf16.gmra.mxu3 %vm706_vm1, %v6296_v54  ;;  %v2096_v54 = vmul.f32 %v8924_v60, %v8924_v60  ;;  %v2036_v23 = vsel %vm2012_vm8, %v8915_v51, 0.0  ;;  %v2038_v51 = vsel %vm2012_vm8, %v8924_v60, 0.0  ;;  %v7750_v60 = vld [vmem:[%s8388_s8 + $0x48] sm:$0xe] }
 0x356   : > { %v10664_v20 = vadd.f32 %v5484_v36, %v5483_v41  ;;  %v4154_v16 = vpop.f32.mrf.mxu0  ;;  %v5685_v41 = vunpack.c.l.b16 %v5594_v53  ;;  %v2138_v15 = vsel %vm2012_vm8, %v2095_v10, 0.0  ;;  %v2137_v37 = vadd.f32 %v2136_v49, %v2135_v58  ;;  %v8245_v10 = vld [vmem:[%s8388_s8 + $0x4c] sm:$0xf] }
 0x357   : > { %v4375_v38 = vadd.f32 %v10609_v55, %v4154_v16  ;;  %v4635_v24 = vpop.f32.mrf.mxu2  ;;  %v6181_v55 = vsel %vm8862_vm7, %v6179_v26, %v6180_v56  ;;  %v2037_v0 = vadd.f32 %v2036_v23, %v2035_v4  ;;  %v2140_v43 = vsel %vm2012_vm8, %v2096_v54, 0.0 }
 0x358   : > { %v5284_v8 = vpop.f32.mrf.mxu3  ;;  %v2098_v3 = vmul.f32 %v8940_v62, %v8940_v62  ;;  %v6269_v35 = vunpack.c.l.b16 %v6178_v28  ;;  %v6270_v36 = vunpack.c.l.b16 %v6181_v55  ;;  %v2139_v53 = vadd.f32 %v2138_v15, %v2137_v37 }
 0x359   : > { %v10676_v61 = vadd.f32 %v5284_v8, %v4677_v6  ;;  %v4678_v57 = vadd.f32 %v4632_v63, %v4375_v38  ;;  %v10678_v29 = vpop.f32.mrf.mxu1  ;;  %v2097_v63 = vmul.f32 %v8936_v14, %v8936_v14  ;;  %v2040_v6 = vsel %vm2012_vm8, %v8936_v14, 0.0 }
 0x35a   : > { %v2039_v26 = vadd.f32 %v2038_v51, %v2037_v0  ;;  %v5713_v44 = vpack.c.b16 %v5686_v1, %v5685_v41  ;;  %v5600_v16 = vrot.slane %v8245_v10, 5  ;;  %v2141_v11 = vadd.f32 %v2140_v43, %v2139_v53  ;;  %v8246_v51 = vld [vmem:[%s8388_s8 + $0x58] sm:$0xf]  ;;  %v8248_v10 = vld [vmem:[%s8388_s8 + $0x5c] sm:$0x1] }
 0x35b   : > { %v2142_v4 = vsel %vm2012_vm8, %v2097_v63, 0.0  ;;  %v2042_v38 = vsel %vm2012_vm8, %v8940_v62, 0.0  ;;  %v2144_v49 = vsel %vm2012_vm8, %v2098_v3, 0.0  ;;  %v2099_v23 = vmul.f32 %v8958_v59, %v8958_v59  ;;  %v8247_v63 = vld [vmem:[%s8388_s8 + $0x50] sm:$0x1]  ;;  %v11577_v53 = vld [vmem:[#allocation25_spill] sm:$0xff] }
 0x35c   : > { %v2041_v58 = vadd.f32 %v2040_v6, %v2039_v26  ;;  %v6297_v41 = vpack.c.b16 %v6270_v36, %v6269_v35  ;;  %v7766_v15 = vrot.slane %v7750_v60, 9  ;;  %v6184_v37 = vrot.slane %v8246_v51, 5  ;;  %v11578_v26 = vld [vmem:[#allocation24_spill] sm:$0xff] }
 0x35d   : > { %v2143_v0 = vadd.f32 %v2142_v4, %v2141_v11  ;;  %v2044_v62 = vsel %vm2012_vm8, %v8958_v59, 0.0  ;;  %v5602_v43 = vrot.slane %v5600_v16, 4  ;;  %v5603_v6 = vrot.slane %v8247_v63, 5 }
 0x35e   : > { %v4157_v56 = vpop.f32.mrf.mxu0  ;;  %v2043_v3 = vadd.f32 %v2042_v38, %v2041_v58  ;;  %v2046_v36 = vsel %vm2012_vm8, %v8966_v12, 0.0  ;;  %v6186_v60 = vrot.slane %v6184_v37, 4  ;;  %v6187_v11 = vrot.slane %v8248_v10, 5 }
 0x35f   : > { %v4378_v14 = vadd.f32 %v10637_v2, %v4157_v56  ;;  %v4637_v54 = vpop.f32.mrf.mxu2  ;;  %v7832_v2 = vld [vmem:[%s8388_s8 + $0x54] sm:$0xe]  ;;  %v2145_v35 = vadd.f32 %v2144_v49, %v2143_v0  ;;  %v5601_v56 = vsel %vm8862_vm7, %v7766_v15, %v5600_v16  ;;  %v2101_v58 = vmul.f32 %v8982_v25, %v8982_v25 }
 0x360   : > { %v5286_v8 = vpop.f32.mrf.mxu3  ;;  %v7848_v59 = vrot.slane %v7832_v2, 9  ;;  %v5604_v4 = vsel %vm8862_vm7, %v5602_v43, %v5603_v6  ;;  %v2048_v16 = vsel %vm2012_vm8, %v8982_v25, 0.0  ;;  %v5687_v2 = vunpack.c.l.b16 %v5601_v56  ;;  %v8249_v56 = vld [vmem:[%s8388_s8 + $0x58] sm:$0xf] }
 0x361   : > { %v10701_v28 = vadd.f32 %v5286_v8, %v4678_v57  ;;  %7782 = vmatmul.msk.bf16.gmra.mxu0 %vm706_vm1, %v5713_v44  ;;  %v4679_v1 = vadd.f32 %v4635_v24, %v4378_v14  ;;  %v4382_v55 = vpop.f32.mrf.mxu1  ;;  %v2100_v57 = vmul.f32 %v8966_v12, %v8966_v12  ;;  %v2146_v24 = vsel %vm2012_vm8, %v2099_v23, 0.0 }
 0x362   : > { %v2045_v44 = vadd.f32 %v2044_v62, %v2043_v3  ;;  %v2147_v14 = vadd.f32 %v2146_v24, %v2145_v35  ;;  %v6185_v51 = vsel %vm8862_vm7, %v7848_v59, %v6184_v37  ;;  %v5688_v63 = vunpack.c.l.b16 %v5604_v4 }
 0x363   : > { %v2148_v49 = vsel %vm2012_vm8, %v2100_v57, 0.0  ;;  %v2150_v25 = vsel %vm2012_vm8, %v2101_v58, 0.0  ;;  %v2050_v57 = vsel %vm2012_vm8, %v8990_v45, 0.0 }
 0x364   : > { %7816 = vmatmul.msk.bf16.gmra.mxu2 %vm706_vm1, %v11577_v53  ;;  %7799 = vmatmul.msk.bf16.gmra.mxu1 %vm706_vm1, %v11578_v26  ;;  %v2047_v38 = vadd.f32 %v2046_v36, %v2045_v44  ;;  %v2149_v6 = vadd.f32 %v2148_v49, %v2147_v14  ;;  %v2052_v36 = vsel %vm2012_vm8, %v9006_v39, 0.0  ;;  %v5714_v53 = vpack.c.b16 %v5688_v63, %v5687_v2  ;;  %v7751_v44 = vld [vmem:[%s8388_s8 + $0x54] sm:$0xe] }
 0x365   : > { %7864 = vmatmul.msk.bf16.gmra.mxu3 %vm706_vm1, %v6297_v41  ;;  %v2102_v41 = vmul.f32 %v8990_v45, %v8990_v45  ;;  %v2054_v45 = vsel %vm2012_vm8, %v9014_v13, 0.0  ;;  %v2056_v14 = vsel %vm2012_vm8, %v9030_v19, 0.0  ;;  %v2105_v63 = vmul.f32 %v9030_v19, %v9030_v19 }
 0x366   : > { %v4159_v12 = vpop.f32.mrf.mxu0  ;;  %v2049_v3 = vadd.f32 %v2048_v16, %v2047_v38  ;;  %v2151_v24 = vadd.f32 %v2150_v25, %v2149_v6  ;;  %v8251_v25 = vld [vmem:[%s8388_s8 + $0x5c] sm:$0x1] }
 0x367   : > { %v4380_v23 = vadd.f32 %v10678_v29, %v4159_v12  ;;  %v4640_v8 = vpop.f32.mrf.mxu2  ;;  %v6188_v29 = vsel %vm8862_vm7, %v6186_v60, %v6187_v11  ;;  %v2152_v37 = vsel %vm2012_vm8, %v2102_v41, 0.0  ;;  %v5607_v60 = vrot.slane %v8249_v56, 5 }
 0x368   : > { %v5289_v15 = vpop.f32.mrf.mxu3  ;;  %v6272_v35 = vunpack.c.l.b16 %v6188_v29  ;;  %v2051_v26 = vadd.f32 %v2050_v57, %v2049_v3  ;;  %v2153_v10 = vadd.f32 %v2152_v37, %v2151_v24  ;;  %v2104_v11 = vmul.f32 %v9014_v13, %v9014_v13  ;;  %v7833_v13 = vld [vmem:[%s8388_s8 + $0x60] sm:$0xe]  ;;  %v8252_v24 = vld [vmem:[%s8388_s8 + $0x68] sm:$0x1] }
 0x369   : > { %v10734_v0 = vadd.f32 %v5289_v15, %v4679_v1  ;;  %v4680_v62 = vadd.f32 %v4637_v54, %v4380_v23  ;;  %v10736_v43 = vpop.f32.mrf.mxu1  ;;  %v2103_v54 = vmul.f32 %v9006_v39, %v9006_v39  ;;  %v6271_v1 = vunpack.c.l.b16 %v6185_v51 }
 0x36a   : > { %v2053_v4 = vadd.f32 %v2052_v36, %v2051_v26  ;;  %v7767_v15 = vrot.slane %v7751_v44, 9  ;;  %v5609_v29 = vrot.slane %v5607_v60, 4  ;;  %v5610_v6 = vrot.slane %v8251_v25, 5 }
 0x36b   : > { %v2154_v39 = vsel %vm2012_vm8, %v2103_v54, 0.0  ;;  %v6298_v49 = vpack.c.b16 %v6272_v35, %v6271_v1  ;;  %v2058_v3 = vsel %vm2012_vm8, %v9038_v48, 0.0  ;;  %v7849_v19 = vrot.slane %v7833_v13, 9 }
 0x36c   : > { %v2055_v51 = vadd.f32 %v2054_v45, %v2053_v4  ;;  %v2155_v57 = vadd.f32 %v2154_v39, %v2153_v10  ;;  %v2060_v54 = vsel %vm2012_vm8, %v9054_v30, 0.0  ;;  %v5608_v1 = vsel %vm8862_vm7, %v7767_v15, %v5607_v60 }
 0x36d   : > { %v2107_v44 = vmul.f32 %v9054_v30, %v9054_v30  ;;  %v2062_v56 = vsel %vm2012_vm8, %v9062_v46, 0.0  ;;  %v5689_v4 = vunpack.c.l.b16 %v5608_v1  ;;  %v2110_v1 = vmul.f32 %v9086_v31, %v9086_v31 }
 0x36e   : > { %v4162_v59 = vpop.f32.mrf.mxu0  ;;  %v2057_v37 = vadd.f32 %v2056_v14, %v2055_v51 }
 0x36f   : > { %v4383_v58 = vadd.f32 %v4382_v55, %v4162_v59  ;;  %v4642_v12 = vpop.f32.mrf.mxu2  ;;  %v8250_v55 = vld [vmem:[%s8388_s8 + $0x64] sm:$0xf]  ;;  %v2162_v51 = vsel %vm2012_vm8, %v2107_v44, 0.0 }
 0x370   : > { %v5291_v38 = vpop.f32.mrf.mxu3  ;;  %v6191_v2 = vrot.slane %v8250_v55, 5  ;;  %v2059_v26 = vadd.f32 %v2058_v3, %v2057_v37  ;;  %v2108_v55 = vmul.f32 %v9062_v46, %v9062_v46  ;;  %v7752_v37 = vld [vmem:[%s8388_s8 + $0x60] sm:$0xe] }
 0x371   : > { %v10757_v23 = vadd.f32 %v5291_v38, %v4680_v62  ;;  %7783 = vmatmul.msk.bf16.gmra.mxu0 %vm706_vm1, %v5714_v53  ;;  %v4681_v16 = vadd.f32 %v4640_v8, %v4383_v58  ;;  %v10760_v41 = vpop.f32.mrf.mxu1  ;;  %v2156_v62 = vsel %vm2012_vm8, %v2104_v11, 0.0  ;;  %v2106_v8 = vmul.f32 %v9038_v48, %v9038_v48 }
 0x372   : > { %v6193_v35 = vrot.slane %v6191_v2, 4  ;;  %v6194_v48 = vrot.slane %v8252_v24, 5  ;;  %v2157_v36 = vadd.f32 %v2156_v62, %v2155_v57  ;;  %v2158_v53 = vsel %vm2012_vm8, %v2105_v63, 0.0 }
 0x373   : > { %v2160_v59 = vsel %vm2012_vm8, %v2106_v8, 0.0  ;;  %v2061_v45 = vadd.f32 %v2060_v54, %v2059_v26  ;;  %v2064_v11 = vsel %vm2012_vm8, %v9078_v47, 0.0  ;;  %v6192_v39 = vsel %vm8862_vm7, %v7849_v19, %v6191_v2  ;;  %v8253_v19 = vld [vmem:[%s8388_s8 + $0x64] sm:$0xf] }
 0x374   : > { %7817 = vmatmul.msk.bf16.gmra.mxu2 %vm706_vm1, %v9853_v33  ;;  %7800 = vmatmul.msk.bf16.gmra.mxu1 %vm706_vm1, %v9845_v34  ;;  %v5611_v34 = vsel %vm8862_vm7, %v5609_v29, %v5610_v6  ;;  %v6195_v15 = vsel %vm8862_vm7, %v6193_v35, %v6194_v48  ;;  %v6273_v29 = vunpack.c.l.b16 %v6192_v39  ;;  %v2068_v6 = vsel %vm2012_vm8, %v9102_v5, 0.0 }
 0x375   : > { %7865 = vmatmul.msk.bf16.gmra.mxu3 %vm706_vm1, %v6298_v49  ;;  %v5690_v30 = vunpack.c.l.b16 %v5611_v34  ;;  %v2063_v13 = vadd.f32 %v2062_v56, %v2061_v45  ;;  %v6274_v25 = vunpack.c.l.b16 %v6195_v15  ;;  %v2164_v8 = vsel %vm2012_vm8, %v2108_v55, 0.0  ;;  %v11579_v55 = vld [vmem:[#allocation26_spill] sm:$0xff] }
 0x376   : > { %v4164_v33 = vpop.f32.mrf.mxu0  ;;  %v5614_v54 = vrot.slane %v8253_v19, 5  ;;  %v2070_v35 = vsel %vm2012_vm8, %v9110_v7, 0.0  ;;  %v2072_v26 = vsel %vm2012_vm8, %v11549_v9, 0.0  ;;  %v7768_v56 = vrot.slane %v7752_v37, 9 }
 0x377   : > { %v4385_v60 = vadd.f32 %v10736_v43, %v4164_v33  ;;  %v4645_v10 = vpop.f32.mrf.mxu2  ;;  %v2159_v43 = vadd.f32 %v2158_v53, %v2157_v36  ;;  %v2065_v63 = vadd.f32 %v2064_v11, %v2063_v13  ;;  %v5715_v62 = vpack.c.b16 %v5690_v30, %v5689_v4 }
 0x378   : > { %v5294_v58 = vpop.f32.mrf.mxu3  ;;  %v2111_v53 = vmul.f32 %v9102_v5, %v9102_v5  ;;  %v6299_v34 = vpack.c.b16 %v6274_v25, %v6273_v29  ;;  %v5616_v4 = vrot.slane %v5614_v54, 4  ;;  %v8255_v5 = vld [vmem:[%s8388_s8 + $0x68] sm:$0x1]  ;;  %v2168_v30 = vsel %vm2012_vm8, %v2110_v1, 0.0 }
 0x379   : > { %v10795_v14 = vadd.f32 %v5294_v58, %v4681_v16  ;;  %v4682_v38 = vadd.f32 %v4642_v12, %v4385_v60  ;;  %v10797_v49 = vpop.f32.mrf.mxu1  ;;  %v2109_v16 = vmul.f32 %v9078_v47, %v9078_v47  ;;  %v2066_v12 = vsel %vm2012_vm8, %v9086_v31, 0.0  ;;  %v8254_v60 = vld [vmem:[%s8388_s8 + $0x70] sm:$0xf] }
 0x37a   : > { %v2161_v2 = vadd.f32 %v2160_v59, %v2159_v43  ;;  %v2067_v46 = vadd.f32 %v2066_v12, %v2065_v63  ;;  %v6198_v45 = vrot.slane %v8254_v60, 5  ;;  %v5617_v39 = vrot.slane %v8255_v5, 5  ;;  %v7753_v60 = vld [vmem:[%s8388_s8 + $0x6c] sm:$0xe] }
 0x37b   : > { %v2166_v47 = vsel %vm2012_vm8, %v2109_v16, 0.0  ;;  %v2113_v13 = vmul.f32 %v11549_v9, %v11549_v9  ;;  %v2170_v16 = vsel %vm2012_vm8, %v2111_v53, 0.0  ;;  %v5433_v53 = vmul.f32 %v10676_v61, %v10676_v61 }
 0x37c   : > { %v2163_v3 = vadd.f32 %v2162_v51, %v2161_v2  ;;  %v2069_v36 = vadd.f32 %v2068_v6, %v2067_v46  ;;  %v6200_v12 = vrot.slane %v6198_v45, 4  ;;  %v8256_v2 = vld [vmem:[%s8388_s8 + $0x74] sm:$0x1] }
 0x37d   : > { %v6201_v63 = vrot.slane %v8256_v2, 5 }
 0x37e   : > { %v4167_v57 = vpop.f32.mrf.mxu0  ;;  %v2165_v11 = vadd.f32 %v2164_v8, %v2163_v3  ;;  %v2071_v58 = vadd.f32 %v2070_v35, %v2069_v36 }
 0x37f   : > { %v4388_v24 = vadd.f32 %v10760_v41, %v4167_v57  ;;  %v4647_v48 = vpop.f32.mrf.mxu2  ;;  %v7834_v41 = vld [vmem:[%s8388_s8 + $0x6c] sm:$0xe]  ;;  %v2174_v57 = vsel %vm2012_vm8, %v2113_v13, 0.0 }
 0x380   : > { %v5296_v33 = vpop.f32.mrf.mxu3  ;;  %v2167_v15 = vadd.f32 %v2166_v47, %v2165_v11  ;;  %v2073_v43 = vadd.f32 %v2072_v26, %v2071_v58  ;;  %v7850_v51 = vrot.slane %v7834_v41, 9 }
 0x381   : > { %v10823_v59 = vadd.f32 %v5296_v33, %v4682_v38  ;;  %7784 = vmatmul.msk.bf16.gmra.mxu0 %vm706_vm1, %v5715_v62  ;;  %v4683_v31 = vadd.f32 %v4645_v10, %v4388_v24  ;;  %v10826_v44 = vpop.f32.mrf.mxu1  ;;  %v2112_v38 = vmul.f32 %v9110_v7, %v9110_v7  ;;  %v2074_v10 = vsel %vm2012_vm8, %v11550_v42, 0.0 }
 0x382   : > { %v5615_v7 = vsel %vm8862_vm7, %v7768_v56, %v5614_v54  ;;  %v2169_v29 = vadd.f32 %v2168_v30, %v2167_v15  ;;  %v2075_v25 = vadd.f32 %v2074_v10, %v2073_v43  ;;  %v2114_v62 = vmul.f32 %v11550_v42, %v11550_v42 }
 0x383   : > { %v2172_v6 = vsel %vm2012_vm8, %v2112_v38, 0.0  ;;  %v5691_v19 = vunpack.c.l.b16 %v5615_v7  ;;  %v6199_v54 = vsel %vm8862_vm7, %v7850_v51, %v6198_v45  ;;  %v6202_v42 = vsel %vm8862_vm7, %v6200_v12, %v6201_v63  ;;  %v8257_v45 = vld [vmem:[%s8388_s8 + $0x70] sm:$0xf]  ;;  %v8258_v7 = vld [vmem:[%s8388_s8 + $0x7c] sm:$0xf] }
 0x384   : > { %7818 = vmatmul.msk.bf16.gmra.mxu2 %vm706_vm1, %v9939_v18  ;;  %7801 = vmatmul.msk.bf16.gmra.mxu1 %vm706_vm1, %v11579_v55  ;;  %v5618_v18 = vsel %vm8862_vm7, %v5616_v4, %v5617_v39  ;;  %v2171_v46 = vadd.f32 %v2170_v16, %v2169_v29  ;;  %v2076_v36 = vrot.slane %v2075_v25, 4  ;;  %v2176_v26 = vsel %vm2012_vm8, %v2114_v62, 0.0 }
 0x385   : > { %7866 = vmatmul.msk.bf16.gmra.mxu3 %vm706_vm1, %v6299_v34  ;;  %v5692_v24 = vunpack.c.l.b16 %v5618_v18  ;;  %v5384_v33 = vsel %vm2012_vm8, %v10676_v61, 0.0  ;;  %v5434_v34 = vmul.f32 %v10701_v28, %v10701_v28  ;;  %v6276_v56 = vunpack.c.l.b16 %v6202_v42 }
 0x386   : > { %v4169_v9 = vpop.f32.mrf.mxu0  ;;  %v5621_v11 = vrot.slane %v8257_v45, 5  ;;  %v10871_v58 = vadd.f32 %v2076_v36, %v2075_v25  ;;  %v5385_v5 = vadd.f32 %v5384_v33, %v10651_v32  ;;  %v5486_v39 = vsel %vm2012_vm8, %v5433_v53, 0.0 }
 0x387   : > { %v4390_v3 = vadd.f32 %v10797_v49, %v4169_v9  ;;  %v4650_v8 = vpop.f32.mrf.mxu2  ;;  %v2173_v49 = vadd.f32 %v2172_v6, %v2171_v46  ;;  %v5716_v41 = vpack.c.b16 %v5692_v24, %v5691_v19  ;;  %v5386_v38 = vsel %vm2012_vm8, %v10701_v28, 0.0  ;;  %v8259_v9 = vld [vmem:[%s8388_s8 + $0x74] sm:$0x1] }
 0x388   : > { %v5299_v37 = vpop.f32.mrf.mxu3  ;;  %v5488_v10 = vsel %vm2012_vm8, %v5434_v34, 0.0  ;;  %v5435_v15 = vmul.f32 %v10734_v0, %v10734_v0  ;;  %v5388_v55 = vsel %vm2012_vm8, %v10734_v0, 0.0  ;;  %v7769_v16 = vrot.slane %v7753_v60, 9  ;;  %v8260_v34 = vld [vmem:[%s8388_s8 + $0x80] sm:$0x1] }
 0x389   : > { %v10856_v47 = vadd.f32 %v5299_v37, %v4683_v31  ;;  %v4684_v1 = vadd.f32 %v4647_v48, %v4390_v3  ;;  %v10858_v35 = vpop.f32.mrf.mxu1  ;;  %v2175_v48 = vadd.f32 %v2174_v57, %v2173_v49  ;;  %v6275_v31 = vunpack.c.l.b16 %v6199_v54  ;;  %v11580_v54 = vld [vmem:[#allocation29_spill] sm:$0xff]  ;;  %v11582_v49 = vld [vmem:[#allocation27_spill] sm:$0xff] }
 0x38a   : > { %v6205_v12 = vrot.slane %v8258_v7, 5  ;;  %v5623_v25 = vrot.slane %v5621_v11, 4  ;;  %v5624_v18 = vrot.slane %v8259_v9, 5  ;;  %v5487_v62 = vadd.f32 %v5486_v39, %v10664_v20  ;;  %v11581_v20 = vld [vmem:[#allocation28_spill] sm:$0xff] }
 0x38b   : > { %v10873_v4 = vadd.f32 %v2176_v26, %v2175_v48  ;;  %v6300_v51 = vpack.c.b16 %v6276_v56, %v6275_v31  ;;  %v5387_v3 = vadd.f32 %v5386_v38, %v5385_v5  ;;  %v5436_v46 = vmul.f32 %v10757_v23, %v10757_v23  ;;  %v11583_v31 = vld [vmem:[#allocation30_spill] sm:$0xff] }
 0x38c   : > { %v2078_v57 = vrot.slane %v10871_v58, 2  ;;  %v5490_v37 = vsel %vm2012_vm8, %v5435_v15, 0.0  ;;  %v5437_v19 = vmul.f32 %v10795_v14, %v10795_v14  ;;  %v5489_v24 = vadd.f32 %v5488_v10, %v5487_v62 }
 0x38d   : > { %v2178_v6 = vrot.slane %v10873_v4, 4  ;;  %v5389_v42 = vadd.f32 %v5388_v55, %v5387_v3  ;;  %v5622_v53 = vsel %vm8862_vm7, %v7769_v16, %v5621_v11  ;;  %v5625_v26 = vsel %vm8862_vm7, %v5623_v25, %v5624_v18 }
 0x38e   : > { %v4172_v30 = vpop.f32.mrf.mxu0  ;;  %v6207_v33 = vrot.slane %v6205_v12, 4  ;;  %v6208_v48 = vrot.slane %v8260_v34, 5  ;;  %v3321_v56 = vrot.slane %v11583_v31, 4  ;;  %v5492_v45 = vsel %vm2012_vm8, %v5436_v46, 0.0 }
 0x38f   : > { %v4393_v43 = vadd.f32 %v10826_v44, %v4172_v30  ;;  %v4652_v13 = vpop.f32.mrf.mxu2  ;;  %v7835_v44 = vld [vmem:[%s8388_s8 + $0x78] sm:$0xe]  ;;  %v5392_v39 = vsel %vm2012_vm8, %v10795_v14, 0.0  ;;  %v5494_v30 = vsel %vm2012_vm8, %v5437_v19, 0.0  ;;  %v5438_v11 = vmul.f32 %v10823_v59, %v10823_v59 }
 0x390   : > { %v5301_v32 = vpop.f32.mrf.mxu3  ;;  %v7851_v36 = vrot.slane %v7835_v44, 9  ;;  %v5394_v15 = vsel %vm2012_vm8, %v10823_v59, 0.0  ;;  %v5693_v55 = vunpack.c.l.b16 %v5622_v53  ;;  %v5439_v16 = vmul.f32 %v10856_v47, %v10856_v47  ;;  %v7754_v53 = vld [vmem:[%s8388_s8 + $0x78] sm:$0xe] }
 0x391   : > { %v10886_v2 = vadd.f32 %v5301_v32, %v4684_v1  ;;  %7785 = vmatmul.msk.bf16.gmra.mxu0 %vm706_vm1, %v5716_v41  ;;  %v4685_v63 = vadd.f32 %v4650_v8, %v4393_v43  ;;  %v10889_v29 = vpop.f32.mrf.mxu1  ;;  %v5390_v8 = vsel %vm2012_vm8, %v10757_v23, 0.0  ;;  %v3219_v1 = vrot.slane %v11580_v54, 4 }
 0x392   : > { %v5491_v41 = vadd.f32 %v5490_v37, %v5489_v24  ;;  %v5391_v60 = vadd.f32 %v5390_v8, %v5389_v42  ;;  %v5694_v32 = vunpack.c.l.b16 %v5625_v26  ;;  %v2179_v18 = vadd.f32 %v2178_v6, %v10873_v4  ;;  %v8261_v26 = vld [vmem:[%s8388_s8 + $0x7c] sm:$0xf] }
 0x393   : > { %v3220_v44 = vadd.f32 %v3219_v1, %v11580_v54  ;;  %v3322_v46 = vadd.f32 %v3321_v56, %v11583_v31  ;;  %v5498_v6 = vsel %vm2012_vm8, %v5439_v16, 0.0  ;;  %v5398_v54 = vsel %vm2012_vm8, %v10886_v2, 0.0 }
 0x394   : > { %7819 = vmatmul.msk.bf16.gmra.mxu2 %vm706_vm1, %v11581_v20  ;;  %7802 = vmatmul.msk.bf16.gmra.mxu1 %vm706_vm1, %v11582_v49  ;;  %v5493_v62 = vadd.f32 %v5492_v45, %v5491_v41  ;;  %v5393_v3 = vadd.f32 %v5392_v39, %v5391_v60  ;;  %v5717_v24 = vpack.c.b16 %v5694_v32, %v5693_v55  ;;  %v2180_v60 = vrot.slane %v2179_v18, 2 }
 0x395   : > { %7867 = vmatmul.msk.bf16.gmra.mxu3 %vm706_vm1, %v6300_v51  ;;  %v6206_v51 = vsel %vm8862_vm7, %v7851_v36, %v6205_v12  ;;  %v5496_v12 = vsel %vm2012_vm8, %v5438_v11, 0.0  ;;  %v10950_v42 = vadd.f32 %v2078_v57, %v10871_v58  ;;  %v3221_v34 = vrot.slane %v3220_v44, 2 }
 0x396   : > { %v4174_v5 = vpop.f32.mrf.mxu0  ;;  %v5495_v37 = vadd.f32 %v5494_v30, %v5493_v62  ;;  %v5395_v8 = vadd.f32 %v5394_v15, %v5393_v3  ;;  %v6277_v19 = vunpack.c.l.b16 %v6206_v51  ;;  %v7836_v15 = vld [vmem:[%s8388_s8 + $0x84] sm:$0xe] }
 0x397   : > { %v4395_v38 = vadd.f32 %v10858_v35, %v4174_v5  ;;  %v10922_v10 = vpop.f32.mrf.mxu2  ;;  %v6209_v35 = vsel %vm8862_vm7, %v6207_v33, %v6208_v48  ;;  %v5628_v33 = vrot.slane %v8261_v26, 5  ;;  %v3323_v48 = vrot.slane %v3322_v46, 2 }
 0x398   : > { %v5304_v43 = vpop.f32.mrf.mxu3  ;;  %v6278_v4 = vunpack.c.l.b16 %v6209_v35  ;;  %v5497_v20 = vadd.f32 %v5496_v12, %v5495_v37  ;;  %v8263_v35 = vld [vmem:[%s8388_s8 + $0x80] sm:$0x1]  ;;  %v3222_v3 = vadd.f32 %v3221_v34, %v3220_v44  ;;  %v2080_v34 = vrot.slane %v10950_v42, 1 }
 0x399   : > { %v10930_v7 = vadd.f32 %v5304_v43, %v4685_v63  ;;  %v4686_v25 = vadd.f32 %v4652_v13, %v4395_v38  ;;  %v10932_v9 = vpop.f32.mrf.mxu1  ;;  %v5396_v13 = vsel %vm2012_vm8, %v10856_v47, 0.0  ;;  %v5440_v63 = vmul.f32 %v10886_v2, %v10886_v2  ;;  %v8262_v43 = vld [vmem:[%s8388_s8 + $0x88] sm:$0xf] }
 0x39a   : > { %v5397_v49 = vadd.f32 %v5396_v13, %v5395_v8  ;;  %v5499_v58 = vadd.f32 %v5498_v6, %v5497_v20  ;;  %v6301_v5 = vpack.c.b16 %v6278_v4, %v6277_v19  ;;  %v7770_v38 = vrot.slane %v7754_v53, 9  ;;  %v11584_v19 = vld [vmem:[#allocation33_spill] sm:$0xff]  ;;  %v11585_v4 = vld [vmem:[#allocation32_spill] sm:$0xff] }
 0x39b   : > { %v5441_v1 = vmul.f32 %v10930_v7, %v10930_v7  ;;  %v5500_v31 = vsel %vm2012_vm8, %v5440_v63, 0.0  ;;  %v5400_v56 = vsel %vm2012_vm8, %v10930_v7, 0.0  ;;  %v6212_v55 = vrot.slane %v8262_v43, 5 }
 0x39c   : > { %v5399_v57 = vadd.f32 %v5398_v54, %v5397_v49  ;;  %v5501_v32 = vadd.f32 %v5500_v31, %v5499_v58  ;;  %v5630_v16 = vrot.slane %v5628_v33, 4  ;;  %v5631_v62 = vrot.slane %v8263_v35, 5 }
 0x39d   : > { %v5502_v39 = vsel %vm2012_vm8, %v5441_v1, 0.0  ;;  %v3324_v12 = vadd.f32 %v3323_v48, %v3322_v46  ;;  %v2181_v63 = vadd.f32 %v2180_v60, %v2179_v18  ;;  %v7852_v6 = vrot.slane %v7836_v15, 9  ;;  %v8264_v1 = vld [vmem:[%s8388_s8 + $0x8c] sm:$0x1] }
 0x39e   : > { %v5785_v36 = vpop.f32.mrf.mxu0  ;;  %v5401_v51 = vadd.f32 %v5400_v56, %v5399_v57  ;;  %v5503_v37 = vadd.f32 %v5502_v39, %v5501_v32  ;;  %v6214_v46 = vrot.slane %v6212_v55, 4  ;;  %v5629_v53 = vsel %vm8862_vm7, %v7770_v38, %v5628_v33 }
 0x39f   : > { %v10957_v41 = vpop.f32.mrf.mxu2  ;;  %v5878_v44 = vadd.f32 %v10889_v29, %v5785_v36  ;;  %v5632_v26 = vsel %vm8862_vm7, %v5630_v16, %v5631_v62  ;;  %v3223_v48 = vrot.slane %v3222_v3, 1  ;;  %v3325_v31 = vrot.slane %v3324_v12, 1 }
 0x3a0   : > { %v5306_v45 = vpop.f32.mrf.mxu3  ;;  %v2182_v29 = vrot.slane %v2181_v63, 1  ;;  %v6213_v57 = vsel %vm8862_vm7, %v7852_v6, %v6212_v55  ;;  %v5695_v33 = vunpack.c.l.b16 %v5629_v53  ;;  %v5696_v39 = vunpack.c.l.b16 %v5632_v26 }
 0x3a1   : > { %v10960_v30 = vadd.f32 %v5306_v45, %v4686_v25  ;;  %7786 = vmatmul.msk.bf16.gmra.mxu0 %vm706_vm1, %v5717_v24  ;;  %v10963_v11 = vpop.f32.mrf.mxu1  ;;  %v6215_v24 = vrot.slane %v8264_v1, 5  ;;  %v6051_v45 = vadd.f32 %v10922_v10, %v5878_v44  ;;  %v3224_v32 = vadd.f32 %v3223_v48, %v3222_v3  ;;  %v8265_v44 = vld [vmem:[%s8388_s8 + $0x88] sm:$0xf] }
 0x3a2   : > { %v6279_v55 = vunpack.c.l.b16 %v6213_v57  ;;  %v2081_v10 = vadd.f32 %v2080_v34, %v10950_v42 }
 0x3a3   : > { %v5402_v25 = vsel %vm2012_vm8, %v10960_v30, 0.0  ;;  %v5442_v13 = vmul.f32 %v10960_v30, %v10960_v30  ;;  %v6216_v38 = vsel %vm8862_vm7, %v6214_v46, %v6215_v24  ;;  %v5635_v46 = vrot.slane %v8265_v44, 5 }
 0x3a4   : > { %v5403_v8 = vadd.f32 %v5402_v25, %v5401_v51  ;;  %7820 = vmatmul.msk.bf16.gmra.mxu2 %vm706_vm1, %v11584_v19  ;;  %7803 = vmatmul.msk.bf16.gmra.mxu1 %vm706_vm1, %v11585_v4  ;;  %v3326_v51 = vadd.f32 %v3325_v31, %v3324_v12  ;;  %v6280_v25 = vunpack.c.l.b16 %v6216_v38  ;;  %v3225_v3 = vadd.f32 %v3224_v32, %v2081_v10  ;;  %v11587_v32 = vld [vmem:[#allocation36_spill] sm:$0xff] }
 0x3a5   : > { %v5504_v54 = vsel %vm2012_vm8, %v5442_v13, 0.0  ;;  %7868 = vmatmul.msk.bf16.gmra.mxu3 %vm706_vm1, %v6301_v5  ;;  %v2183_v13 = vadd.f32 %v2182_v29, %v2181_v63  ;;  %v7837_v29 = vld [vmem:[%s8388_s8 + $0x90] sm:$0xe] }
 0x3a6   : > { %v5404_v20 = vrot.slane %v5403_v8, 4  ;;  %v5505_v18 = vadd.f32 %v5504_v54, %v5503_v37  ;;  %v5787_v49 = vpop.f32.mrf.mxu0  ;;  %v7755_v54 = vld [vmem:[%s8388_s8 + $0x84] sm:$0xe]  ;;  %v6302_v63 = vpack.c.b16 %v6280_v25, %v6279_v55 }
 0x3a7   : > { %v10985_v56 = vpop.f32.mrf.mxu2  ;;  %v5880_v16 = vadd.f32 %v10932_v9, %v5787_v49  ;;  %v3327_v12 = vadd.f32 %v3326_v51, %v2183_v13  ;;  %v7771_v31 = vrot.slane %v7755_v54, 9  ;;  %v7853_v51 = vrot.slane %v7837_v29, 9  ;;  %v7756_v29 = vld [vmem:[%s8388_s8 + $0x90] sm:$0xe] }
 0x3a8   : > { %v5405_v36 = vadd.f32 %v5404_v20, %v5403_v8  ;;  %v5506_v60 = vrot.slane %v5505_v18, 4  ;;  %v6369_v58 = vpop.f32.mrf.mxu3  ;;  %v5718_v8 = vpack.c.b16 %v5696_v39, %v5695_v33 }
 0x3a9   : > { %v10990_v5 = vpop.f32.mrf.mxu1  ;;  %v6449_v37 = vadd.f32 %v6369_v58, %v6051_v45  ;;  %v6052_v9 = vadd.f32 %v10957_v41, %v5880_v16  ;;  %v8267_v58 = vld [vmem:[%s8388_s8 + $0x8c] sm:$0x1]  ;;  %v5636_v13 = vsel %vm8862_vm7, %v7771_v31, %v5635_v46 }
 0x3aa   : > { %v5406_v15 = vrot.slane %v5405_v36, 2  ;;  %v5507_v43 = vadd.f32 %v5506_v60, %v5505_v18  ;;  %v8266_v18 = vld [vmem:[%s8388_s8 + $0x94] sm:$0xf]  ;;  %v5637_v60 = vrot.slane %v5635_v46, 4  ;;  %v5638_v57 = vrot.slane %v8267_v58, 5 }
 0x3ab   : > { %v6219_v49 = vrot.slane %v8266_v18, 5  ;;  %v6551_v53 = vmul.f32 %v6449_v37, %v6449_v37  ;;  %v6481_v45 = vsel %vm2012_vm8, %v6449_v37, 0.0 }
 0x3ac   : > { %v5407_v35 = vadd.f32 %v5406_v15, %v5405_v36  ;;  %v5508_v62 = vrot.slane %v5507_v43, 2 }
 0x3ad   : > { %v6583_v16 = vsel %vm2012_vm8, %v6551_v53, 0.0  ;;  %v6221_v55 = vrot.slane %v6219_v49, 4 }
 0x3ae   : > { %v5408_v19 = vrot.slane %v5407_v35, 1  ;;  %v5509_v4 = vadd.f32 %v5508_v62, %v5507_v43  ;;  %v5790_v6 = vpop.f32.mrf.mxu0  ;;  %v11586_v43 = vld [vmem:[#allocation37_spill] sm:$0xff] }
 0x3af   : > { %v5978_v1 = vpop.f32.mrf.mxu2  ;;  %v5883_v34 = vadd.f32 %v10963_v11, %v5790_v6 }
 0x3b0   : > { %v5409_v24 = vadd.f32 %v5408_v19, %v5407_v35  ;;  %v5510_v20 = vrot.slane %v5509_v4, 1  ;;  %v6371_v42 = vpop.f32.mrf.mxu3 }
 0x3b1   : > { %v6450_v26 = vadd.f32 %v6371_v42, %v6052_v9  ;;  %7787 = vmatmul.msk.bf16.gmra.mxu0 %vm706_vm1, %v5718_v8  ;;  %v5887_v48 = vpop.f32.mrf.mxu1  ;;  %v6053_v62 = vadd.f32 %v10985_v56, %v5883_v34  ;;  %v8268_v8 = vld [vmem:[%s8388_s8 + $0x98] sm:$0x1]  ;;  %v6220_v56 = vsel %vm8862_vm7, %v7853_v51, %v6219_v49  ;;  %v8269_v49 = vld [vmem:[%s8388_s8 + $0x94] sm:$0xf]  ;;  %v7838_v51 = vld [vmem:[%s8388_s8 + $0x9c] sm:$0xe] }
 0x3b2   : > { %v11003_v36 = vadd.f32 %v5409_v24, %v3225_v3  ;;  %v5511_v41 = vadd.f32 %v5510_v20, %v5509_v4  ;;  %v6222_v19 = vrot.slane %v8268_v8, 5  ;;  %v5697_v3 = vunpack.c.l.b16 %v5636_v13 }
 0x3b3   : > { %v6482_v33 = vsel %vm2012_vm8, %v6450_v26, 0.0  ;;  %v6552_v39 = vmul.f32 %v6450_v26, %v6450_v26  ;;  %v8081_v38 = vpack.i.bf16 %v6450_v26, %v6449_v37  ;;  %v5639_v37 = vsel %vm8862_vm7, %v5637_v60, %v5638_v57 }
 0x3b4   : > { %v11008_v15 = vadd.f32 %v5511_v41, %v3327_v12  ;;  %v6483_v11 = vadd.f32 %v6482_v33, %v6481_v45  ;;  %7821 = vmatmul.msk.bf16.gmra.mxu2 %vm706_vm1, %v11586_v43  ;;  %7804 = vmatmul.msk.bf16.gmra.mxu1 %vm706_vm1, %v11587_v32  ;;  %v5698_v12 = vunpack.c.l.b16 %v5639_v37  ;;  %v6223_v9 = vsel %vm8862_vm7, %v6221_v55, %v6222_v19  ;;  %v8270_v43 = vld [vmem:[%s8388_s8 + $0x98] sm:$0x1] }
 0x3b5   : > { %v6584_v35 = vsel %vm2012_vm8, %v6552_v39, 0.0  ;;  %7869 = vmatmul.msk.bf16.gmra.mxu3 %vm706_vm1, %v6302_v63  ;;  %8082 = vrot.lane.b32.xlu1 %v8081_v38, %s8313_s21  ;;  %v6281_v53 = vunpack.c.l.b16 %v6220_v56  ;;  %v6282_v26 = vunpack.c.l.b16 %v6223_v9  ;;  %v5642_v41 = vrot.slane %v8269_v49, 5  ;;  %v8272_v56 = vld [vmem:[%s8388_s8 + $0xa4] sm:$0x1] }
 0x3b6   : > { %v6585_v25 = vadd.f32 %v6584_v35, %v6583_v16  ;;  %v5792_v10 = vpop.f32.mrf.mxu0  ;;  %v5719_v18 = vpack.c.b16 %v5698_v12, %v5697_v3  ;;  %v7772_v38 = vrot.slane %v7756_v29, 9  ;;  %v5645_v32 = vrot.slane %v8270_v43, 5  ;;  %v8271_v16 = vld [vmem:[%s8388_s8 + $0xa0] sm:$0xf] }
 0x3b7   : > { %v5981_v4 = vpop.f32.mrf.mxu2  ;;  %v5885_v20 = vadd.f32 %v10990_v5, %v5792_v10  ;;  %v6303_v5 = vpack.c.b16 %v6282_v26, %v6281_v53  ;;  %v6226_v35 = vrot.slane %v8271_v16, 5  ;;  %v11588_v10 = vld [vmem:[#allocation41_spill] sm:$0xff]  ;;  %v7854_v19 = vrot.slane %v7838_v51, 9 }
 0x3b8   : > { %v6374_v6 = vpop.f32.mrf.mxu3  ;;  %v5643_v8 = vsel %vm8862_vm7, %v7772_v38, %v5642_v41  ;;  %v6229_v9 = vrot.slane %v8272_v56, 5 }
 0x3b9   : > { %v6451_v54 = vadd.f32 %v6374_v6, %v6053_v62  ;;  %v5889_v44 = vpop.f32.mrf.mxu1  ;;  %v6054_v60 = vadd.f32 %v5978_v1, %v5885_v20  ;;  %v6228_v12 = vrot.slane %v6226_v35, 4 }
 0x3bb   : > { %v6484_v46 = vsel %vm2012_vm8, %v6451_v54, 0.0  ;;  %v6553_v24 = vmul.f32 %v6451_v54, %v6451_v54  ;;  %v6230_v53 = vsel %vm8862_vm7, %v6228_v12, %v6229_v9 }
 0x3bc   : > { %v6485_v42 = vadd.f32 %v6484_v46, %v6483_v11  ;;  %v5644_v11 = vrot.slane %v5642_v41, 4 }
 0x3bd   : > { %v6586_v63 = vsel %vm2012_vm8, %v6553_v24, 0.0 }
 0x3be   : > { %v6587_v34 = vadd.f32 %v6586_v63, %v6585_v25  ;;  %v5795_v31 = vpop.f32.mrf.mxu0  ;;  %v5646_v3 = vsel %vm8862_vm7, %v5644_v11, %v5645_v32  ;;  %v5699_v63 = vunpack.c.l.b16 %v5643_v8  ;;  %v7757_v32 = vld [vmem:[%s8388_s8 + $0x9c] sm:$0xe] }
 0x3bf   : > { %v5983_v58 = vpop.f32.mrf.mxu2  ;;  %v5888_v33 = vadd.f32 %v5887_v48, %v5795_v31  ;;  %v11589_v48 = vld [vmem:[#allocation40_spill] sm:$0xff] }
 0x3c0   : > { %v6376_v57 = vpop.f32.mrf.mxu3 }
 0x3c1   : > { %v6452_v45 = vadd.f32 %v6376_v57, %v6054_v60  ;;  %7788 = vmatmul.msk.bf16.gmra.mxu0 %vm706_vm1, %v5719_v18  ;;  %v5892_v39 = vpop.f32.mrf.mxu1  ;;  %v6055_v37 = vadd.f32 %v5981_v4, %v5888_v33  ;;  %v5700_v18 = vunpack.c.l.b16 %v5646_v3  ;;  %v6227_v4 = vsel %vm8862_vm7, %v7854_v19, %v6226_v35 }
 0x3c2   : > { %v6283_v60 = vunpack.c.l.b16 %v6227_v4  ;;  %v6284_v57 = vunpack.c.l.b16 %v6230_v53 }
 0x3c3   : > { %v6486_v62 = vsel %vm2012_vm8, %v6452_v45, 0.0  ;;  %v6554_v55 = vmul.f32 %v6452_v45, %v6452_v45  ;;  %v8086_v1 = vpack.i.bf16 %v6452_v45, %v6451_v54  ;;  %v5720_v41 = vpack.c.b16 %v5700_v18, %v5699_v63 }
 0x3c4   : > { %v6487_v25 = vadd.f32 %v6486_v62, %v6485_v42  ;;  %7822 = vmatmul.msk.bf16.gmra.mxu2 %vm706_vm1, %v11588_v10  ;;  %7805 = vmatmul.msk.bf16.gmra.mxu1 %vm706_vm1, %v11589_v48  ;;  %v8275_v48 = vld [vmem:[%s8388_s8 + $0xa4] sm:$0x1] }
 0x3c5   : > { %v6588_v13 = vsel %vm2012_vm8, %v6554_v55, 0.0  ;;  %7870 = vmatmul.msk.bf16.gmra.mxu3 %vm706_vm1, %v6303_v5  ;;  %8087 = vrot.lane.b32.xlu2 %v8086_v1, %s8313_s21  ;;  %v8273_v5 = vld [vmem:[%s8388_s8 + $0xa0] sm:$0xf]  ;;  %v8274_v55 = vld [vmem:[%s8388_s8 + $0xac] sm:$0xf] }
 0x3c6   : > { %v6589_v6 = vadd.f32 %v6588_v13, %v6587_v34  ;;  %v5797_v54 = vpop.f32.mrf.mxu0  ;;  %v5649_v38 = vrot.slane %v8273_v5, 5  ;;  %v6233_v1 = vrot.slane %v8274_v55, 5  ;;  %v5652_v13 = vrot.slane %v8275_v48, 5  ;;  %v8278_v48 = vld [vmem:[%s8388_s8 + $0xb8] sm:$0xf] }
 0x3c7   : > { %v5986_v46 = vpop.f32.mrf.mxu2  ;;  %v5890_v31 = vadd.f32 %v5889_v44, %v5797_v54  ;;  %v6304_v44 = vpack.c.b16 %v6284_v57, %v6283_v60 }
 0x3c8   : > { %v6379_v24 = vpop.f32.mrf.mxu3  ;;  %v5651_v10 = vrot.slane %v5649_v38, 4  ;;  %v6235_v12 = vrot.slane %v6233_v1, 4 }
 0x3c9   : > { %v6453_v20 = vadd.f32 %v6379_v24, %v6055_v37  ;;  %v5894_v42 = vpop.f32.mrf.mxu1  ;;  %v6056_v11 = vadd.f32 %v5983_v58, %v5890_v31  ;;  %v7839_v37 = vld [vmem:[%s8388_s8 + $0xa8] sm:$0xe] }
 0x3ca   : > { %v7855_v3 = vrot.slane %v7839_v37, 9 }
 0x3cb   : > { %v6488_v26 = vsel %vm2012_vm8, %v6453_v20, 0.0  ;;  %v6555_v34 = vmul.f32 %v6453_v20, %v6453_v20 }
 0x3cc   : > { %v6489_v29 = vadd.f32 %v6488_v26, %v6487_v25  ;;  %v7773_v25 = vrot.slane %v7757_v32, 9  ;;  %v8277_v32 = vld [vmem:[%s8388_s8 + $0xac] sm:$0xf] }
 0x3cd   : > { %v6590_v49 = vsel %vm2012_vm8, %v6555_v34, 0.0 }
 0x3ce   : > { %v6591_v45 = vadd.f32 %v6590_v49, %v6589_v6  ;;  %v5800_v33 = vpop.f32.mrf.mxu0  ;;  %v5650_v24 = vsel %vm8862_vm7, %v7773_v25, %v5649_v38 }
 0x3cf   : > { %v5988_v43 = vpop.f32.mrf.mxu2  ;;  %v5893_v35 = vadd.f32 %v5892_v39, %v5800_v33  ;;  %v5701_v26 = vunpack.c.l.b16 %v5650_v24 }
 0x3d0   : > { %v6381_v51 = vpop.f32.mrf.mxu3 }
 0x3d1   : > { %v6454_v16 = vadd.f32 %v6381_v51, %v6056_v11  ;;  %7789 = vmatmul.msk.bf16.gmra.mxu0 %vm706_vm1, %v5720_v41  ;;  %v5897_v62 = vpop.f32.mrf.mxu1  ;;  %v6057_v54 = vadd.f32 %v5986_v46, %v5893_v35  ;;  %v6234_v46 = vsel %vm8862_vm7, %v7855_v3, %v6233_v1  ;;  %v5656_v51 = vrot.slane %v8277_v32, 5 }
 0x3d2   : > { %v6285_v33 = vunpack.c.l.b16 %v6234_v46 }
 0x3d3   : > { %v6490_v8 = vsel %vm2012_vm8, %v6454_v16, 0.0  ;;  %v6556_v58 = vmul.f32 %v6454_v16, %v6454_v16  ;;  %v8091_v19 = vpack.i.bf16 %v6454_v16, %v6453_v20  ;;  %v8276_v20 = vld [vmem:[%s8388_s8 + $0xb0] sm:$0x1] }
 0x3d4   : > { %v6491_v6 = vadd.f32 %v6490_v8, %v6489_v29  ;;  %7823 = vmatmul.msk.bf16.gmra.mxu2 %vm706_vm1, %v10259_v22  ;;  %7806 = vmatmul.msk.bf16.gmra.mxu1 %vm706_vm1, %v10238_v27  ;;  %v5653_v22 = vsel %vm8862_vm7, %v5651_v10, %v5652_v13  ;;  %v6236_v63 = vrot.slane %v8276_v20, 5  ;;  %v6240_v13 = vrot.slane %v8278_v48, 5 }
 0x3d5   : > { %v6592_v39 = vsel %vm2012_vm8, %v6556_v58, 0.0  ;;  %7871 = vmatmul.msk.bf16.gmra.mxu3 %vm706_vm1, %v6304_v44  ;;  %8092 = vrot.lane.b32.xlu0 %v8091_v19, %s8313_s21  ;;  %v5702_v34 = vunpack.c.l.b16 %v5653_v22  ;;  %v7758_v44 = vld [vmem:[%s8388_s8 + $0xa8] sm:$0xe]  ;;  %v5658_v8 = vrot.slane %v5656_v51, 4  ;;  %v8279_v58 = vld [vmem:[%s8388_s8 + $0xb0] sm:$0x1] }
 0x3d6   : > { %v6593_v56 = vadd.f32 %v6592_v39, %v6591_v45  ;;  %v5802_v9 = vpop.f32.mrf.mxu0  ;;  %v6237_v31 = vsel %vm8862_vm7, %v6235_v12, %v6236_v63  ;;  %v7774_v37 = vrot.slane %v7758_v44, 9  ;;  %v5659_v19 = vrot.slane %v8279_v58, 5  ;;  %v8280_v63 = vld [vmem:[%s8388_s8 + $0xbc] sm:$0x1] }
 0x3d7   : > { %v5991_v27 = vpop.f32.mrf.mxu2  ;;  %v5895_v41 = vadd.f32 %v5894_v42, %v5802_v9  ;;  %v5721_v45 = vpack.c.b16 %v5702_v34, %v5701_v26  ;;  %v6286_v5 = vunpack.c.l.b16 %v6237_v31  ;;  %v6242_v9 = vrot.slane %v6240_v13, 4 }
 0x3d8   : > { %v6384_v18 = vpop.f32.mrf.mxu3  ;;  %v5657_v20 = vsel %vm8862_vm7, %v7774_v37, %v5656_v51  ;;  %v8281_v51 = vld [vmem:[%s8388_s8 + $0xb8] sm:$0xf]  ;;  %v8282_v37 = vld [vmem:[%s8388_s8 + $0xc4] sm:$0xf] }
 0x3d9   : > { %v6455_v4 = vadd.f32 %v6384_v18, %v6057_v54  ;;  %v5899_v53 = vpop.f32.mrf.mxu1  ;;  %v6058_v16 = vadd.f32 %v5988_v43, %v5895_v41  ;;  %v6305_v42 = vpack.c.b16 %v6286_v5, %v6285_v33  ;;  %v6243_v18 = vrot.slane %v8280_v63, 5  ;;  %v8284_v63 = vld [vmem:[%s8388_s8 + $0xc8] sm:$0x1] }
 0x3da   : > { %v5703_v46 = vunpack.c.l.b16 %v5657_v20 }
 0x3db   : > { %v6492_v29 = vsel %vm2012_vm8, %v6455_v4, 0.0  ;;  %v6557_v49 = vmul.f32 %v6455_v4, %v6455_v4 }
 0x3dc   : > { %v6493_v60 = vadd.f32 %v6492_v29, %v6491_v6  ;;  %v7840_v6 = vld [vmem:[%s8388_s8 + $0xb4] sm:$0xe]  ;;  %v6244_v29 = vsel %vm8862_vm7, %v6242_v9, %v6243_v18  ;;  %v6250_v18 = vrot.slane %v8284_v63, 5 }
 0x3dd   : > { %v6594_v57 = vsel %vm2012_vm8, %v6557_v49, 0.0 }
 0x3de   : > { %v6595_v38 = vadd.f32 %v6594_v57, %v6593_v56  ;;  %v5805_v11 = vpop.f32.mrf.mxu0  ;;  %v7856_v56 = vrot.slane %v7840_v6, 9  ;;  %v8283_v6 = vld [vmem:[%s8388_s8 + $0xbc] sm:$0x1] }
 0x3df   : > { %v5993_v35 = vpop.f32.mrf.mxu2  ;;  %v5898_v25 = vadd.f32 %v5897_v62, %v5805_v11 }
 0x3e0   : > { %v6386_v55 = vpop.f32.mrf.mxu3 }
 0x3e1   : > { %v6456_v1 = vadd.f32 %v6386_v55, %v6058_v16  ;;  %7790 = vmatmul.msk.bf16.gmra.mxu0 %vm706_vm1, %v5721_v45  ;;  %v5902_v10 = vpop.f32.mrf.mxu1  ;;  %v6059_v12 = vadd.f32 %v5991_v27, %v5898_v25  ;;  %v6241_v27 = vsel %vm8862_vm7, %v7856_v56, %v6240_v13  ;;  %v5663_v16 = vrot.slane %v8281_v51, 5 }
 0x3e2   : > { %v6287_v5 = vunpack.c.l.b16 %v6241_v27 }
 0x3e3   : > { %v6494_v39 = vsel %vm2012_vm8, %v6456_v1, 0.0  ;;  %v6558_v43 = vmul.f32 %v6456_v1, %v6456_v1  ;;  %v8096_v54 = vpack.i.bf16 %v6456_v1, %v6455_v4  ;;  %v7759_v1 = vld [vmem:[%s8388_s8 + $0xb4] sm:$0xe] }
 0x3e4   : > { %v6495_v3 = vadd.f32 %v6494_v39, %v6493_v60  ;;  %7824 = vmatmul.msk.bf16.gmra.mxu2 %vm706_vm1, %v10325_v50  ;;  %7807 = vmatmul.msk.bf16.gmra.mxu1 %vm706_vm1, %v10313_v17  ;;  %v5660_v50 = vsel %vm8862_vm7, %v5658_v8, %v5659_v19  ;;  %v6247_v8 = vrot.slane %v8282_v37, 5  ;;  %v7775_v58 = vrot.slane %v7759_v1, 9 }
 0x3e5   : > { %v6596_v62 = vsel %vm2012_vm8, %v6558_v43, 0.0  ;;  %7872 = vmatmul.msk.bf16.gmra.mxu3 %vm706_vm1, %v6305_v42  ;;  %8097 = vrot.lane.b32.xlu1 %v8096_v54, %s8313_s21  ;;  %v5704_v31 = vunpack.c.l.b16 %v5660_v50  ;;  %v5665_v19 = vrot.slane %v5663_v16, 4  ;;  %v5666_v39 = vrot.slane %v8283_v6, 5  ;;  %v7841_v43 = vld [vmem:[%s8388_s8 + $0xc0] sm:$0xe] }
 0x3e6   : > { %v6597_v24 = vadd.f32 %v6596_v62, %v6595_v38  ;;  %v5807_v22 = vpop.f32.mrf.mxu0  ;;  %v6288_v38 = vunpack.c.l.b16 %v6244_v29  ;;  %v7857_v9 = vrot.slane %v7841_v43, 9  ;;  %v5664_v50 = vsel %vm8862_vm7, %v7775_v58, %v5663_v16  ;;  %v8285_v16 = vld [vmem:[%s8388_s8 + $0xc4] sm:$0xf]  ;;  %v8286_v58 = vld [vmem:[%s8388_s8 + $0xd0] sm:$0xf] }
 0x3e7   : > { %v5996_v17 = vpop.f32.mrf.mxu2  ;;  %v5900_v60 = vadd.f32 %v5899_v53, %v5807_v22  ;;  %v5722_v33 = vpack.c.b16 %v5704_v31, %v5703_v46  ;;  %v5705_v27 = vunpack.c.l.b16 %v5664_v50  ;;  %v8287_v43 = vld [vmem:[%s8388_s8 + $0xc8] sm:$0x1] }
 0x3e8   : > { %v6389_v4 = vpop.f32.mrf.mxu3  ;;  %v6306_v53 = vpack.c.b16 %v6288_v38, %v6287_v5 }
 0x3e9   : > { %v6457_v26 = vadd.f32 %v6389_v4, %v6059_v12  ;;  %v5904_v34 = vpop.f32.mrf.mxu1  ;;  %v6060_v44 = vadd.f32 %v5993_v35, %v5900_v60 }
 0x3eb   : > { %v6496_v49 = vsel %vm2012_vm8, %v6457_v26, 0.0  ;;  %v6559_v41 = vmul.f32 %v6457_v26, %v6457_v26 }
 0x3ec   : > { %v6497_v57 = vadd.f32 %v6496_v49, %v6495_v3 }
 0x3ed   : > { %v6598_v45 = vsel %vm2012_vm8, %v6559_v41, 0.0 }
 0x3ee   : > { %v6599_v11 = vadd.f32 %v6598_v45, %v6597_v24  ;;  %v5810_v32 = vpop.f32.mrf.mxu0  ;;  %v6249_v24 = vrot.slane %v6247_v8, 4 }
 0x3ef   : > { %v5998_v55 = vpop.f32.mrf.mxu2  ;;  %v5903_v48 = vadd.f32 %v5902_v10, %v5810_v32  ;;  %v11590_v10 = vld [vmem:[#allocation47_spill] sm:$0xff] }
 0x3f0   : > { %v6391_v25 = vpop.f32.mrf.mxu3  ;;  %v6251_v49 = vsel %vm8862_vm7, %v6249_v24, %v6250_v18  ;;  %v8288_v18 = vld [vmem:[%s8388_s8 + $0xd4] sm:$0x1] }
 0x3f1   : > { %v6458_v42 = vadd.f32 %v6391_v25, %v6060_v44  ;;  %7791 = vmatmul.msk.bf16.gmra.mxu0 %vm706_vm1, %v5722_v33  ;;  %v5907_v13 = vpop.f32.mrf.mxu1  ;;  %v6061_v56 = vadd.f32 %v5996_v17, %v5903_v48  ;;  %v6248_v17 = vsel %vm8862_vm7, %v7857_v9, %v6247_v8  ;;  %v5670_v44 = vrot.slane %v8285_v16, 5 }
 0x3f2   : > { %v6289_v38 = vunpack.c.l.b16 %v6248_v17 }
 0x3f3   : > { %v6498_v54 = vsel %vm2012_vm8, %v6458_v42, 0.0  ;;  %v6560_v35 = vmul.f32 %v6458_v42, %v6458_v42  ;;  %v8101_v3 = vpack.i.bf16 %v6458_v42, %v6457_v26  ;;  %v7760_v42 = vld [vmem:[%s8388_s8 + $0xc0] sm:$0xe] }
 0x3f4   : > { %v6499_v62 = vadd.f32 %v6498_v54, %v6497_v57  ;;  %7825 = vmatmul.msk.bf16.gmra.mxu2 %vm706_vm1, %v10384_v40  ;;  %7808 = vmatmul.msk.bf16.gmra.mxu1 %vm706_vm1, %v11590_v10  ;;  %v5667_v40 = vsel %vm8862_vm7, %v5665_v19, %v5666_v39  ;;  %v6254_v19 = vrot.slane %v8286_v58, 5  ;;  %v7776_v6 = vrot.slane %v7760_v42, 9 }
 0x3f5   : > { %v6600_v12 = vsel %vm2012_vm8, %v6560_v35, 0.0  ;;  %7873 = vmatmul.msk.bf16.gmra.mxu3 %vm706_vm1, %v6306_v53  ;;  %8102 = vrot.lane.b32.xlu2 %v8101_v3, %s8313_s21  ;;  %v5706_v29 = vunpack.c.l.b16 %v5667_v40  ;;  %v5672_v39 = vrot.slane %v5670_v44, 4  ;;  %v5673_v54 = vrot.slane %v8287_v43, 5  ;;  %v7842_v35 = vld [vmem:[%s8388_s8 + $0xcc] sm:$0xe] }
 0x3f6   : > { %v6601_v22 = vadd.f32 %v6600_v12, %v6599_v11  ;;  %v5812_v20 = vpop.f32.mrf.mxu0  ;;  %v6290_v11 = vunpack.c.l.b16 %v6251_v49  ;;  %v11591_v12 = vld [vmem:[#allocation53_spill] sm:$0xff]  ;;  %v7858_v24 = vrot.slane %v7842_v35, 9  ;;  %v5671_v40 = vsel %vm8862_vm7, %v7776_v6, %v5670_v44 }
 0x3f7   : > { %v6001_v4 = vpop.f32.mrf.mxu2  ;;  %v5905_v57 = vadd.f32 %v5904_v34, %v5812_v20  ;;  %v5723_v5 = vpack.c.b16 %v5706_v29, %v5705_v27  ;;  %v5674_v63 = vsel %vm8862_vm7, %v5672_v39, %v5673_v54  ;;  %v5707_v49 = vunpack.c.l.b16 %v5671_v40 }
 0x3f8   : > { %v6394_v26 = vpop.f32.mrf.mxu3  ;;  %v6307_v34 = vpack.c.b16 %v6290_v11, %v6289_v38 }
 0x3f9   : > { %v6459_v46 = vadd.f32 %v6394_v26, %v6061_v56  ;;  %v5909_v31 = vpop.f32.mrf.mxu1  ;;  %v6062_v1 = vadd.f32 %v5998_v55, %v5905_v57  ;;  %v6257_v26 = vrot.slane %v8288_v18, 5 }
 0x3fb   : > { %v6500_v41 = vsel %vm2012_vm8, %v6459_v46, 0.0  ;;  %v6561_v60 = vmul.f32 %v6459_v46, %v6459_v46 }
 0x3fc   : > { %v6501_v45 = vadd.f32 %v6500_v41, %v6499_v62  ;;  %v5708_v41 = vunpack.c.l.b16 %v5674_v63 }
 0x3fd   : > { %v6602_v33 = vsel %vm2012_vm8, %v6561_v60, 0.0 }
 0x3fe   : > { %v6603_v32 = vadd.f32 %v6602_v33, %v6601_v22  ;;  %v5815_v51 = vpop.f32.mrf.mxu0  ;;  %v6256_v22 = vrot.slane %v6254_v19, 4  ;;  %v5724_v11 = vpack.c.b16 %v5708_v41, %v5707_v49 }
 0x3ff   : > { %v6003_v25 = vpop.f32.mrf.mxu2  ;;  %v5908_v37 = vadd.f32 %v5907_v13, %v5815_v51  ;;  %v11592_v13 = vld [vmem:[#allocation51_spill] sm:$0xff] }
 0x400   : > { %v6396_v48 = vpop.f32.mrf.mxu3  ;;  %v6258_v60 = vsel %vm8862_vm7, %v6256_v22, %v6257_v26 }
 0x401   : > { %v6460_v53 = vadd.f32 %v6396_v48, %v6062_v1  ;;  %7792 = vmatmul.msk.bf16.gmra.mxu0 %vm706_vm1, %v5723_v5  ;;  %v5912_v8 = vpop.f32.mrf.mxu1  ;;  %v6063_v9 = vadd.f32 %v6001_v4, %v5908_v37  ;;  %v6255_v4 = vsel %vm8862_vm7, %v7858_v24, %v6254_v19  ;;  %v6292_v51 = vunpack.c.l.b16 %v6258_v60 }
 0x403   : > { %v6502_v3 = vsel %vm2012_vm8, %v6460_v53, 0.0  ;;  %v6562_v55 = vmul.f32 %v6460_v53, %v6460_v53  ;;  %v8106_v62 = vpack.i.bf16 %v6460_v53, %v6459_v46 }
 0x404   : > { %v6503_v10 = vadd.f32 %v6502_v3, %v6501_v45  ;;  %7826 = vmatmul.msk.bf16.gmra.mxu2 %vm706_vm1, %v11591_v12  ;;  %7809 = vmatmul.msk.bf16.gmra.mxu1 %vm706_vm1, %v11592_v13 }
 0x405   : > { %v6604_v56 = vsel %vm2012_vm8, %v6562_v55, 0.0  ;;  %7874 = vmatmul.msk.bf16.gmra.mxu3 %vm706_vm1, %v6307_v34  ;;  %8107 = vrot.lane.b32.xlu0 %v8106_v62, %s8313_s21 }
 0x406   : > { %v6605_v20 = vadd.f32 %v6604_v56, %v6603_v32  ;;  %v5817_v50 = vpop.f32.mrf.mxu0  ;;  %v6291_v32 = vunpack.c.l.b16 %v6255_v4 }
 0x407   : > { %v6006_v46 = vpop.f32.mrf.mxu2  ;;  %v5910_v33 = vadd.f32 %v5909_v31, %v5817_v50 }
 0x408   : > { %v6399_v27 = vpop.f32.mrf.mxu3  ;;  %v6308_v52 = vpack.c.b16 %v6292_v51, %v6291_v32 }
 0x409   : > { %v6461_v29 = vadd.f32 %v6399_v27, %v6063_v9  ;;  %v5914_v17 = vpop.f32.mrf.mxu1  ;;  %v6064_v1 = vadd.f32 %v6003_v25, %v5910_v33 }
 0x40b   : > { %v6504_v57 = vsel %vm2012_vm8, %v6461_v29, 0.0  ;;  %v6563_v45 = vmul.f32 %v6461_v29, %v6461_v29 }
 0x40c   : > { %v6505_v5 = vadd.f32 %v6504_v57, %v6503_v10 }
 0x40d   : > { %v6606_v38 = vsel %vm2012_vm8, %v6563_v45, 0.0 }
 0x40e   : > { %v6607_v16 = vadd.f32 %v6606_v38, %v6605_v20  ;;  %v5820_v44 = vpop.f32.mrf.mxu0 }
 0x40f   : > { %v6008_v42 = vpop.f32.mrf.mxu2  ;;  %v5913_v37 = vadd.f32 %v5912_v8, %v5820_v44 }
 0x410   : > { %v6401_v48 = vpop.f32.mrf.mxu3 }
 0x411   : > { %v6462_v53 = vadd.f32 %v6401_v48, %v6064_v1  ;;  %7793 = vmatmul.msk.bf16.gmra.mxu0 %vm706_vm1, %v5724_v11  ;;  %v5917_v34 = vpop.f32.mrf.mxu1  ;;  %v6065_v25 = vadd.f32 %v6006_v46, %v5913_v37 }
 0x413   : > { %v6506_v58 = vsel %vm2012_vm8, %v6462_v53, 0.0  ;;  %v6564_v31 = vmul.f32 %v6462_v53, %v6462_v53  ;;  %v8111_v19 = vpack.i.bf16 %v6462_v53, %v6461_v29  ;;  %v11593_v29 = vld [vmem:[#allocation38_spill] sm:$0xff] }
 0x414   : > { %v6507_v6 = vadd.f32 %v6506_v58, %v6505_v5  ;;  %v11596_v58 = vld [vmem:[#allocation31_spill] sm:$0xff] }
 0x415   : > { %v6608_v39 = vsel %vm2012_vm8, %v6564_v31, 0.0  ;;  %7875 = vmatmul.msk.bf16.gmra.mxu3 %vm706_vm1, %v6308_v52  ;;  %8112 = vrot.lane.b32.xlu1 %v8111_v19, %s8313_s21  ;;  %v11595_v52 = vld [vmem:[#allocation34_spill] sm:$0xff] }
 0x416   : > { %v6609_v43 = vadd.f32 %v6608_v39, %v6607_v16  ;;  %v5822_v54 = vpop.f32.mrf.mxu0 }
 0x417   : > { %v6011_v35 = vpop.f32.mrf.mxu2  ;;  %v5915_v12 = vadd.f32 %v5914_v17, %v5822_v54  ;;  %v11594_v17 = vld [vmem:[#allocation35_spill] sm:$0xff] }
 0x418   : > { %v6404_v8 = vpop.f32.mrf.mxu3 }
 0x419   : > { %v6463_v3 = vadd.f32 %v6404_v8, %v6065_v25  ;;  %v5919_v55 = vpop.f32.mrf.mxu1  ;;  %v6066_v20 = vadd.f32 %v6008_v42, %v5915_v12 }
 0x41b   : > { %v6508_v62 = vsel %vm2012_vm8, %v6463_v3, 0.0  ;;  %v6565_v10 = vmul.f32 %v6463_v3, %v6463_v3 }
 0x41c   : > { %v6509_v13 = vadd.f32 %v6508_v62, %v6507_v6 }
 0x41d   : > { %v6610_v56 = vsel %vm2012_vm8, %v6565_v10, 0.0 }
 0x41e   : > { %v6611_v9 = vadd.f32 %v6610_v56, %v6609_v43  ;;  %v5825_v24 = vpop.f32.mrf.mxu0 }
 0x41f   : > { %v8088_v22 = vpop.permute.xlu2 %8087  ;;  %v6013_v50 = vpop.f32.mrf.mxu2  ;;  %v5918_v46 = vadd.f32 %v5917_v34, %v5825_v24 }
 0x420   : > { %v8090_v40 = vunpack.i.h.bf16 %v8088_v22  ;;  %v8089_v63 = vunpack.i.l.bf16 %v8088_v22  ;;  %v6406_v18 = vpop.f32.mrf.mxu3 }
 0x421   : > { %v6464_v26 = vadd.f32 %v6406_v18, %v6066_v20  ;;  %v5922_v27 = vpop.f32.mrf.mxu1  ;;  %v6067_v11 = vadd.f32 %v6011_v35, %v5918_v46 }
 0x422   : > { %v6784_v49 = vsel %vm2012_vm8, %v11593_v29, %v8090_v40  ;;  %v6783_v41 = vsel %vm2012_vm8, %v11594_v17, %v8089_v63 }
 0x423   : > { %v6816_v4 = vpack.c.bf16 %v6784_v49, %v6784_v49  ;;  %v6815_v60 = vpack.c.bf16 %v6783_v41, %v6783_v41  ;;  %v6510_v57 = vsel %vm2012_vm8, %v6464_v26, 0.0  ;;  %v6566_v45 = vmul.f32 %v6464_v26, %v6464_v26 }
 0x424   : > { %v6511_v33 = vadd.f32 %v6510_v57, %v6509_v13  ;;  %v8116_v5 = vpack.i.bf16 %v6464_v26, %v6463_v3 }
 0x425   : > { %7879 = vst.msk [vmem:[%s9484_s6 + $0x1c] sm:$0xf] %vm3520_vm9, %v6816_v4  ;;  %v6612_v38 = vsel %vm2012_vm8, %v6566_v45, 0.0 }
 0x426   : > { %7878 = vst.msk [vmem:[%s9484_s6 + $0x18] sm:$0xf] %vm3520_vm9, %v6815_v60  ;;  %v6613_v32 = vadd.f32 %v6612_v38, %v6611_v9  ;;  %8117 = vrot.lane.b32.xlu2 %v8116_v5, %s8313_s21  ;;  %v5827_v51 = vpop.f32.mrf.mxu0 }
 0x427   : > { %v8083_v16 = vpop.permute.xlu1 %8082  ;;  %v6016_v44 = vpop.f32.mrf.mxu2  ;;  %v5920_v19 = vadd.f32 %v5919_v55, %v5827_v51 }
 0x428   : > { %v8085_v1 = vunpack.i.h.bf16 %v8083_v16  ;;  %v8084_v42 = vunpack.i.l.bf16 %v8083_v16  ;;  %v6409_v48 = vpop.f32.mrf.mxu3 }
 0x429   : > { %v6465_v53 = vadd.f32 %v6409_v48, %v6067_v11  ;;  %v5924_v37 = vpop.f32.mrf.mxu1  ;;  %v6068_v62 = vadd.f32 %v6013_v50, %v5920_v19 }
 0x42a   : > { %v6782_v34 = vsel %vm2012_vm8, %v11595_v52, %v8085_v1  ;;  %v6781_v31 = vsel %vm2012_vm8, %v11596_v58, %v8084_v42 }
 0x42b   : > { %v6814_v6 = vpack.c.bf16 %v6782_v34, %v6782_v34  ;;  %v6813_v39 = vpack.c.bf16 %v6781_v31, %v6781_v31  ;;  %v6512_v25 = vsel %vm2012_vm8, %v6465_v53, 0.0  ;;  %v6567_v43 = vmul.f32 %v6465_v53, %v6465_v53 }
 0x42c   : > { %v6513_v54 = vadd.f32 %v6512_v25, %v6511_v33  ;;  %v11598_v25 = vld [vmem:[#allocation39_spill] sm:$0xff] }
 0x42d   : > { %7877 = vst.msk [vmem:[%s9484_s6 + $0xc] sm:$0xf] %vm3520_vm9, %v6814_v6  ;;  %v6614_v35 = vsel %vm2012_vm8, %v6567_v43, 0.0  ;;  %v11597_v6 = vld [vmem:[#allocation42_spill] sm:$0xff] }
 0x42e   : > { %7876 = vst.msk [vmem:[%s9484_s6 + $0x8] sm:$0xf] %vm3520_vm9, %v6813_v39  ;;  %v6615_v8 = vadd.f32 %v6614_v35, %v6613_v32  ;;  %v5830_v3 = vpop.f32.mrf.mxu0 }
 0x42f   : > { %v6018_v10 = vpop.f32.mrf.mxu2  ;;  %v5923_v56 = vadd.f32 %v5922_v27, %v5830_v3 }
 0x430   : > { %v6411_v12 = vpop.f32.mrf.mxu3 }
 0x431   : > { %v6466_v13 = vadd.f32 %v6411_v12, %v6068_v62  ;;  %v5927_v55 = vpop.f32.mrf.mxu1  ;;  %v6069_v63 = vadd.f32 %v6016_v44, %v5923_v56 }
 0x433   : > { %v6514_v9 = vsel %vm2012_vm8, %v6466_v13, 0.0  ;;  %v6568_v24 = vmul.f32 %v6466_v13, %v6466_v13  ;;  %v8121_v22 = vpack.i.bf16 %v6466_v13, %v6465_v53 }
 0x434   : > { %v6515_v20 = vadd.f32 %v6514_v9, %v6513_v54 }
 0x435   : > { %v6616_v40 = vsel %vm2012_vm8, %v6568_v24, 0.0  ;;  %8122 = vrot.lane.b32.xlu0 %v8121_v22, %s8313_s21 }
 0x436   : > { %v6617_v18 = vadd.f32 %v6616_v40, %v6615_v8  ;;  %v5832_v26 = vpop.f32.mrf.mxu0  ;;  %v11599_v40 = vld [vmem:[#allocation46_spill] sm:$0xff] }
 0x437   : > { %v6021_v46 = vpop.f32.mrf.mxu2  ;;  %v5925_v41 = vadd.f32 %v5924_v37, %v5832_v26 }
 0x438   : > { %v6414_v29 = vpop.f32.mrf.mxu3 }
 0x439   : > { %v6467_v50 = vadd.f32 %v6414_v29, %v6069_v63  ;;  %v5929_v49 = vpop.f32.mrf.mxu1  ;;  %v6070_v33 = vadd.f32 %v6018_v10, %v5925_v41 }
 0x43b   : > { %v6516_v17 = vsel %vm2012_vm8, %v6467_v50, 0.0  ;;  %v6569_v27 = vmul.f32 %v6467_v50, %v6467_v50 }
 0x43c   : > { %v6517_v4 = vadd.f32 %v6516_v17, %v6515_v20 }
 0x43d   : > { %v6618_v60 = vsel %vm2012_vm8, %v6569_v27, 0.0 }
 0x43e   : > { %v6619_v57 = vadd.f32 %v6618_v60, %v6617_v18  ;;  %v5835_v45 = vpop.f32.mrf.mxu0  ;;  %v11600_v18 = vld [vmem:[#allocation45_spill] sm:$0xff] }
 0x43f   : > { %v6023_v5 = vpop.f32.mrf.mxu2  ;;  %v5928_v19 = vadd.f32 %v5927_v55, %v5835_v45 }
 0x440   : > { %v6416_v38 = vpop.f32.mrf.mxu3 }
 0x441   : > { %v6468_v11 = vadd.f32 %v6416_v38, %v6070_v33  ;;  %v5932_v32 = vpop.f32.mrf.mxu1  ;;  %v6071_v62 = vadd.f32 %v6021_v46, %v5928_v19  ;;  %v11601_v33 = vld [vmem:[#allocation44_spill] sm:$0xff]  ;;  %v11602_v38 = vld [vmem:[#allocation43_spill] sm:$0xff] }
 0x443   : > { %v6518_v51 = vsel %vm2012_vm8, %v6468_v11, 0.0  ;;  %v6570_v16 = vmul.f32 %v6468_v11, %v6468_v11  ;;  %v8126_v44 = vpack.i.bf16 %v6468_v11, %v6467_v50 }
 0x444   : > { %v11190_v1 = vadd.f32 %v6518_v51, %v6517_v4 }
 0x445   : > { %v6620_v42 = vsel %vm2012_vm8, %v6570_v16, 0.0  ;;  %8127 = vrot.lane.b32.xlu1 %v8126_v44, %s8313_s21 }
 0x446   : > { %v11194_v48 = vadd.f32 %v6620_v42, %v6619_v57  ;;  %v5837_v53 = vpop.f32.mrf.mxu0 }
 0x447   : > { %v8093_v37 = vpop.permute.xlu0 %8092  ;;  %v6026_v52 = vpop.f32.mrf.mxu2  ;;  %v5930_v3 = vadd.f32 %v5929_v49, %v5837_v53 }
 0x448   : > { %v8095_v34 = vunpack.i.h.bf16 %v8093_v37  ;;  %v8094_v58 = vunpack.i.l.bf16 %v8093_v37  ;;  %v6419_v31 = vpop.f32.mrf.mxu3 }
 0x449   : > { %v5934_v54 = vpop.f32.mrf.mxu1  ;;  %v6072_v13 = vadd.f32 %v6023_v5, %v5930_v3  ;;  %v11206_v20 = vadd.f32 %v6419_v31, %v6071_v62 }
 0x44a   : > { %v6786_v39 = vsel %vm2012_vm8, %v11597_v6, %v8095_v34  ;;  %v6785_v43 = vsel %vm2012_vm8, %v11598_v25, %v8094_v58 }
 0x44b   : > { %v6818_v35 = vpack.c.bf16 %v6786_v39, %v6786_v39  ;;  %v6817_v8 = vpack.c.bf16 %v6785_v43, %v6785_v43 }
 0x44d   : > { %7881 = vst.msk [vmem:[%s9484_s6 + $0x2c] sm:$0xf] %vm3520_vm9, %v6818_v35 }
 0x44e   : > { %7880 = vst.msk [vmem:[%s9484_s6 + $0x28] sm:$0xf] %vm3520_vm9, %v6817_v8  ;;  %v5840_v10 = vpop.f32.mrf.mxu0 }
 0x44f   : > { %v8103_v12 = vpop.permute.xlu2 %8102  ;;  %v6028_v56 = vpop.f32.mrf.mxu2  ;;  %v5933_v45 = vadd.f32 %v5932_v32, %v5840_v10 }
 0x450   : > { %v8105_v55 = vunpack.i.h.bf16 %v8103_v12  ;;  %v8104_v9 = vunpack.i.l.bf16 %v8103_v12  ;;  %v6421_v24 = vpop.f32.mrf.mxu3 }
 0x451   : > { %v11204_v22 = vadd.f32 %v6421_v24, %v6072_v13  ;;  %v5937_v49 = vpop.f32.mrf.mxu1  ;;  %v6073_v42 = vadd.f32 %v6026_v52, %v5933_v45 }
 0x452   : > { %v6790_v63 = vsel %vm2012_vm8, %v11599_v40, %v8105_v55  ;;  %v6789_v26 = vsel %vm2012_vm8, %v11600_v18, %v8104_v9 }
 0x453   : > { %v6822_v46 = vpack.c.bf16 %v6790_v63, %v6790_v63  ;;  %v6821_v29 = vpack.c.bf16 %v6789_v26, %v6789_v26  ;;  %v8131_v50 = vpack.i.bf16 %v11204_v22, %v11206_v20 }
 0x455   : > { %7885 = vst.msk [vmem:[%s9484_s6 + $0x4c] sm:$0xf] %vm3520_vm9, %v6822_v46  ;;  %8132 = vrot.lane.b32.xlu2 %v8131_v50, %s8313_s21 }
 0x456   : > { %7884 = vst.msk [vmem:[%s9484_s6 + $0x48] sm:$0xf] %vm3520_vm9, %v6821_v29  ;;  %v5842_v17 = vpop.f32.mrf.mxu0  ;;  %v11603_v29 = vld [vmem:[#allocation49_spill] sm:$0xff] }
 0x457   : > { %v8098_v27 = vpop.permute.xlu1 %8097  ;;  %v6031_v41 = vpop.f32.mrf.mxu2  ;;  %v5935_v44 = vadd.f32 %v5934_v54, %v5842_v17 }
 0x458   : > { %v8100_v4 = vunpack.i.h.bf16 %v8098_v27  ;;  %v8099_v60 = vunpack.i.l.bf16 %v8098_v27  ;;  %v6424_v57 = vpop.f32.mrf.mxu3 }
 0x459   : > { %v5939_v37 = vpop.f32.mrf.mxu1  ;;  %v6074_v34 = vadd.f32 %v6028_v56, %v5935_v44  ;;  %v11227_v31 = vadd.f32 %v6424_v57, %v6073_v42 }
 0x45a   : > { %v6788_v5 = vsel %vm2012_vm8, %v11601_v33, %v8100_v4  ;;  %v6787_v11 = vsel %vm2012_vm8, %v11602_v38, %v8099_v60 }
 0x45b   : > { %v6820_v51 = vpack.c.bf16 %v6788_v5, %v6788_v5  ;;  %v6819_v16 = vpack.c.bf16 %v6787_v11, %v6787_v11 }
 0x45d   : > { %7883 = vst.msk [vmem:[%s9484_s6 + $0x3c] sm:$0xf] %vm3520_vm9, %v6820_v51 }
 0x45e   : > { %7882 = vst.msk [vmem:[%s9484_s6 + $0x38] sm:$0xf] %vm3520_vm9, %v6819_v16  ;;  %v5845_v53 = vpop.f32.mrf.mxu0 }
 0x45f   : > { %v6033_v19 = vpop.f32.mrf.mxu2  ;;  %v5938_v52 = vadd.f32 %v5937_v49, %v5845_v53  ;;  %v11604_v49 = vld [vmem:[#allocation48_spill] sm:$0xff]  ;;  %v11605_v53 = vld [vmem:[#allocation17_spill] sm:$0xff] }
 0x460   : > { %v6426_v58 = vpop.f32.mrf.mxu3 }
 0x461   : > { %v11229_v32 = vadd.f32 %v6426_v58, %v6074_v34  ;;  %v5942_v43 = vpop.f32.mrf.mxu1  ;;  %v6075_v8 = vadd.f32 %v6031_v41, %v5938_v52  ;;  %v11606_v34 = vld [vmem:[#allocation54_spill] sm:$0xff] }
 0x463   : > { %v8136_v6 = vpack.i.bf16 %v11229_v32, %v11227_v31 }
 0x465   : > { %8137 = vrot.lane.b32.xlu0 %v8136_v6, %s8313_s21 }
 0x466   : > { %v5847_v39 = vpop.f32.mrf.mxu0 }
 0x467   : > { %v5940_v54 = vadd.f32 %v5939_v37, %v5847_v39  ;;  %v6036_v35 = vpop.f32.mrf.mxu2 }
 0x468   : > { %v6429_v25 = vpop.f32.mrf.mxu3 }
 0x469   : > { %v6076_v62 = vadd.f32 %v6033_v19, %v5940_v54  ;;  %v11234_v12 = vadd.f32 %v6429_v25, %v6075_v8  ;;  %v5944_v56 = vpop.f32.mrf.mxu1 }
 0x46e   : > { %v5850_v3 = vpop.f32.mrf.mxu0 }
 0x46f   : > { %v6038_v9 = vpop.f32.mrf.mxu2  ;;  %v5943_v46 = vadd.f32 %v5942_v43, %v5850_v3  ;;  %v6571_v3 = vmul.f32 %v11206_v20, %v11206_v20 }
 0x470   : > { %v6431_v10 = vpop.f32.mrf.mxu3 }
 0x471   : > { %v11236_v13 = vadd.f32 %v6431_v10, %v6076_v62  ;;  %v5947_v60 = vpop.f32.mrf.mxu1  ;;  %v6077_v57 = vadd.f32 %v6036_v35, %v5943_v46  ;;  %v6520_v10 = vsel %vm2012_vm8, %v11206_v20, 0.0  ;;  %v6522_v20 = vsel %vm2012_vm8, %v11204_v22, 0.0 }
 0x473   : > { %v8141_v55 = vpack.i.bf16 %v11236_v13, %v11234_v12 }
 0x475   : > { %8142 = vrot.lane.b32.xlu1 %v8141_v55, %s8313_s21  ;;  %v11607_v55 = vld [vmem:[#allocation52_spill] sm:$0xff] }
 0x476   : > { %v5852_v24 = vpop.f32.mrf.mxu0 }
 0x477   : > { %v8108_v40 = vpop.permute.xlu0 %8107  ;;  %v5945_v4 = vadd.f32 %v5944_v56, %v5852_v24  ;;  %v6041_v33 = vpop.f32.mrf.mxu2  ;;  %v11608_v24 = vld [vmem:[#allocation50_spill] sm:$0xff] }
 0x478   : > { %v8110_v63 = vunpack.i.h.bf16 %v8108_v40  ;;  %v8109_v18 = vunpack.i.l.bf16 %v8108_v40  ;;  %v6434_v26 = vpop.f32.mrf.mxu3 }
 0x479   : > { %v6078_v5 = vadd.f32 %v6038_v9, %v5945_v4  ;;  %v11251_v42 = vadd.f32 %v6434_v26, %v6077_v57  ;;  %v5949_v25 = vpop.f32.mrf.mxu1  ;;  %v6524_v4 = vsel %vm2012_vm8, %v11227_v31, 0.0 }
 0x47a   : > { %v6792_v50 = vsel %vm2012_vm8, %v11603_v29, %v8110_v63  ;;  %v6791_v17 = vsel %vm2012_vm8, %v11604_v49, %v8109_v18  ;;  %v6572_v63 = vmul.f32 %v11204_v22, %v11204_v22  ;;  %v6573_v29 = vmul.f32 %v11227_v31, %v11227_v31 }
 0x47b   : > { %v6824_v27 = vpack.c.bf16 %v6792_v50, %v6792_v50  ;;  %v6823_v41 = vpack.c.bf16 %v6791_v17, %v6791_v17  ;;  %v6622_v50 = vsel %vm2012_vm8, %v6571_v3, 0.0  ;;  %v6521_v17 = vadd.f32 %v6520_v10, %v11190_v1 }
 0x47c   : > { %v6526_v1 = vsel %vm2012_vm8, %v11229_v32, 0.0  ;;  %v6532_v3 = vsel %vm2012_vm8, %v11251_v42, 0.0 }
 0x47d   : > { %7887 = vst.msk [vmem:[%s9484_s6 + $0x5c] sm:$0xf] %vm3520_vm9, %v6824_v27  ;;  %v6523_v22 = vadd.f32 %v6522_v20, %v6521_v17 }
 0x47e   : > { %7886 = vst.msk [vmem:[%s9484_s6 + $0x58] sm:$0xf] %vm3520_vm9, %v6823_v41  ;;  %v5855_v45 = vpop.f32.mrf.mxu0  ;;  %v6624_v41 = vsel %vm2012_vm8, %v6572_v63, 0.0 }
 0x47f   : > { %v5948_v62 = vadd.f32 %v5947_v60, %v5855_v45  ;;  %v6043_v56 = vpop.f32.mrf.mxu2  ;;  %v6574_v60 = vmul.f32 %v11229_v32, %v11229_v32  ;;  %v6623_v45 = vadd.f32 %v6622_v50, %v11194_v48  ;;  %v6528_v48 = vsel %vm2012_vm8, %v11234_v12, 0.0 }
 0x480   : > { %v8118_v38 = vpop.permute.xlu2 %8117  ;;  %v6436_v11 = vpop.f32.mrf.mxu3 }
 0x481   : > { %v8120_v51 = vunpack.i.h.bf16 %v8118_v38  ;;  %v8119_v16 = vunpack.i.l.bf16 %v8118_v38  ;;  %v11249_v44 = vadd.f32 %v6436_v11, %v6078_v5  ;;  %v6079_v49 = vadd.f32 %v6041_v33, %v5948_v62  ;;  %v5952_v33 = vpop.f32.mrf.mxu1 }
 0x482   : > { %v6626_v5 = vsel %vm2012_vm8, %v6573_v29, 0.0  ;;  %v6575_v11 = vmul.f32 %v11234_v12, %v11234_v12 }
 0x483   : > { %v6796_v37 = vsel %vm2012_vm8, %v11605_v53, %v8120_v51  ;;  %v6795_v58 = vsel %vm2012_vm8, %v11606_v34, %v8119_v16  ;;  %v8146_v39 = vpack.i.bf16 %v11249_v44, %v11251_v42  ;;  %v6625_v53 = vadd.f32 %v6624_v41, %v6623_v45 }
 0x484   : > { %v6828_v19 = vpack.c.bf16 %v6796_v37, %v6796_v37  ;;  %v6827_v6 = vpack.c.bf16 %v6795_v58, %v6795_v58  ;;  %v6525_v37 = vadd.f32 %v6524_v4, %v6523_v22  ;;  %v6628_v34 = vsel %vm2012_vm8, %v6574_v60, 0.0 }
 0x485   : > { %8147 = vrot.lane.b32.xlu2 %v8146_v39, %s8313_s21  ;;  %v6576_v58 = vmul.f32 %v11236_v13, %v11236_v13  ;;  %v6627_v32 = vadd.f32 %v6626_v5, %v6625_v53  ;;  %v6578_v62 = vmul.f32 %v11249_v44, %v11249_v44 }
 0x486   : > { %7891 = vst.msk [vmem:[%s9484_s6 + $0x7c] sm:$0xf] %vm3520_vm9, %v6828_v19  ;;  %v5857_v43 = vpop.f32.mrf.mxu0 }
 0x487   : > { %7890 = vst.msk [vmem:[%s9484_s6 + $0x78] sm:$0xf] %vm3520_vm9, %v6827_v6  ;;  %v8113_v52 = vpop.permute.xlu1 %8112  ;;  %v5950_v46 = vadd.f32 %v5949_v25, %v5857_v43  ;;  %v6527_v6 = vadd.f32 %v6526_v1, %v6525_v37  ;;  %v6046_v39 = vpop.f32.mrf.mxu2  ;;  %v6630_v25 = vsel %vm2012_vm8, %v6575_v11, 0.0  ;;  %v6530_v43 = vsel %vm2012_vm8, %v11236_v13, 0.0 }
 0x488   : > { %v8115_v54 = vunpack.i.h.bf16 %v8113_v52  ;;  %v8114_v35 = vunpack.i.l.bf16 %v8113_v52  ;;  %v6439_v8 = vpop.f32.mrf.mxu3  ;;  %v6577_v52 = vmul.f32 %v11251_v42, %v11251_v42  ;;  %v6636_v29 = vsel %vm2012_vm8, %v6578_v62, 0.0  ;;  %v11610_v62 = vld [vmem:[#allocation18_spill] sm:$0xff] }
 0x489   : > { %v6080_v57 = vadd.f32 %v6043_v56, %v5950_v46  ;;  %v6477_v51 = vadd.f32 %v6439_v8, %v6079_v49  ;;  %v6529_v12 = vadd.f32 %v6528_v48, %v6527_v6  ;;  %v6632_v8 = vsel %vm2012_vm8, %v6576_v58, 0.0  ;;  %v5954_v46 = vpop.f32.mrf.mxu1 }
 0x48a   : > { %v6794_v9 = vsel %vm2012_vm8, %v11607_v55, %v8115_v54  ;;  %v6793_v40 = vsel %vm2012_vm8, %v11608_v24, %v8114_v35  ;;  %v6629_v35 = vadd.f32 %v6628_v34, %v6627_v32  ;;  %v6534_v24 = vsel %vm2012_vm8, %v11249_v44, 0.0 }
 0x48b   : > { %v6826_v18 = vpack.c.bf16 %v6794_v9, %v6794_v9  ;;  %v6825_v26 = vpack.c.bf16 %v6793_v40, %v6793_v40  ;;  %v6531_v56 = vadd.f32 %v6530_v43, %v6529_v12  ;;  %v6634_v9 = vsel %vm2012_vm8, %v6577_v52, 0.0 }
 0x48c   : > { %v6631_v10 = vadd.f32 %v6630_v25, %v6629_v35  ;;  %v6579_v40 = vmul.f32 %v6477_v51, %v6477_v51  ;;  %v6536_v42 = vsel %vm2012_vm8, %v6477_v51, 0.0 }
 0x48d   : > { %7889 = vst.msk [vmem:[%s9484_s6 + $0x6c] sm:$0xf] %vm3520_vm9, %v6826_v18 }
 0x48e   : > { %7888 = vst.msk [vmem:[%s9484_s6 + $0x68] sm:$0xf] %vm3520_vm9, %v6825_v26  ;;  %v5860_v27 = vpop.f32.mrf.mxu0  ;;  %v6633_v18 = vadd.f32 %v6632_v8, %v6631_v10  ;;  %v6533_v26 = vadd.f32 %v6532_v3, %v6531_v56  ;;  %v11609_v8 = vld [vmem:[#allocation13_spill] sm:$0xff] }
 0x48f   : > { %v5953_v31 = vadd.f32 %v5952_v33, %v5860_v27  ;;  %v6638_v27 = vsel %vm2012_vm8, %v6579_v40, 0.0 }
 0x490   : > { %v6441_v38 = vpop.f32.mrf.mxu3  ;;  %v6635_v49 = vadd.f32 %v6634_v9, %v6633_v18  ;;  %v6535_v17 = vadd.f32 %v6534_v24, %v6533_v26 }
 0x491   : > { %v6478_v16 = vadd.f32 %v6441_v38, %v6080_v57  ;;  %v6081_v54 = vadd.f32 %v6046_v39, %v5953_v31  ;;  %v6048_v57 = vpop.f32.mrf.mxu2 }
 0x492   : > { %v6637_v60 = vadd.f32 %v6636_v29, %v6635_v49  ;;  %v6537_v44 = vadd.f32 %v6536_v42, %v6535_v17  ;;  %v11611_v49 = vld [vmem:[#allocation12_spill] sm:$0xff] }
 0x493   : > { %v8151_v19 = vpack.i.bf16 %v6478_v16, %v6477_v51  ;;  %v6580_v50 = vmul.f32 %v6478_v16, %v6478_v16  ;;  %v6538_v41 = vsel %vm2012_vm8, %v6478_v16, 0.0 }
 0x494   : > { %v6639_v1 = vadd.f32 %v6638_v27, %v6637_v60  ;;  %v6539_v33 = vadd.f32 %v6538_v41, %v6537_v44 }
 0x495   : > { %8152 = vrot.lane.b32.xlu0 %v8151_v19, %s8313_s21  ;;  %v6640_v45 = vsel %vm2012_vm8, %v6580_v50, 0.0 }
 0x496   : > { %v5862_v13 = vpop.f32.mrf.mxu0  ;;  %v6641_v31 = vadd.f32 %v6640_v45, %v6639_v1 }
 0x497   : > { %v5955_v20 = vadd.f32 %v5954_v46, %v5862_v13 }
 0x498   : > { %v6444_v55 = vpop.f32.mrf.mxu3 }
 0x499   : > { %v6479_v63 = vadd.f32 %v6444_v55, %v6081_v54  ;;  %v6082_v5 = vadd.f32 %v6048_v57, %v5955_v20  ;;  %v11612_v57 = vld [vmem:[#allocation19_spill] sm:$0xff] }
 0x49b   : > { %v6581_v4 = vmul.f32 %v6479_v63, %v6479_v63  ;;  %v6540_v22 = vsel %vm2012_vm8, %v6479_v63, 0.0 }
 0x49c   : > { %v6541_v53 = vadd.f32 %v6540_v22, %v6539_v33  ;;  %v11613_v22 = vld [vmem:[#allocation9_spill] sm:$0xff] }
 0x49d   : > { %v6642_v11 = vsel %vm2012_vm8, %v6581_v4, 0.0 }
 0x49e   : > { %v6643_v48 = vadd.f32 %v6642_v11, %v6641_v31 }
 0x4a0   : > { %v6446_v38 = vpop.f32.mrf.mxu3 }
 0x4a1   : > { %v6480_v51 = vadd.f32 %v6446_v38, %v6082_v5 }
 0x4a3   : > { %v6542_v37 = vsel %vm2012_vm8, %v6480_v51, 0.0  ;;  %v6582_v16 = vmul.f32 %v6480_v51, %v6480_v51  ;;  %v8156_v34 = vpack.i.bf16 %v6480_v51, %v6479_v63 }
 0x4a4   : > { %v6543_v58 = vadd.f32 %v6542_v37, %v6541_v53 }
 0x4a5   : > { %v6644_v19 = vsel %vm2012_vm8, %v6582_v16, 0.0  ;;  %8157 = vrot.lane.b32.xlu1 %v8156_v34, %s8313_s21 }
 0x4a6   : > { %v6544_v32 = vrot.slane %v6543_v58, 4  ;;  %v6645_v6 = vadd.f32 %v6644_v19, %v6643_v48 }
 0x4a7   : > { %v8123_v39 = vpop.permute.xlu0 %8122 }
 0x4a8   : > { %v6545_v25 = vadd.f32 %v6544_v32, %v6543_v58  ;;  %v6646_v43 = vrot.slane %v6645_v6, 4  ;;  %v8125_v52 = vunpack.i.h.bf16 %v8123_v39  ;;  %v8124_v54 = vunpack.i.l.bf16 %v8123_v39 }
 0x4aa   : > { %v6546_v35 = vrot.slane %v6545_v25, 2  ;;  %v6647_v12 = vadd.f32 %v6646_v43, %v6645_v6  ;;  %v6798_v3 = vsel %vm2012_vm8, %v11609_v8, %v8125_v52  ;;  %v6797_v10 = vsel %vm2012_vm8, %v11610_v62, %v8124_v54 }
 0x4ab   : > { %v6830_v56 = vpack.c.bf16 %v6798_v3, %v6798_v3  ;;  %v6829_v55 = vpack.c.bf16 %v6797_v10, %v6797_v10 }
 0x4ac   : > { %v6547_v13 = vadd.f32 %v6546_v35, %v6545_v25  ;;  %v6648_v9 = vrot.slane %v6647_v12, 2 }
 0x4ad   : > { %7893 = vst.msk [vmem:[%s9484_s6 + $0x8c] sm:$0xf] %vm3520_vm9, %v6830_v56 }
 0x4ae   : > { %v6548_v24 = vrot.slane %v6547_v13, 1  ;;  %v6649_v40 = vadd.f32 %v6648_v9, %v6647_v12  ;;  %7892 = vst.msk [vmem:[%s9484_s6 + $0x88] sm:$0xf] %vm3520_vm9, %v6829_v55 }
 0x4af   : > { %v8133_v26 = vpop.permute.xlu2 %8132 }
 0x4b0   : > { %v6549_v63 = vadd.f32 %v6548_v24, %v6547_v13  ;;  %v6650_v18 = vrot.slane %v6649_v40, 1  ;;  %v8135_v46 = vunpack.i.h.bf16 %v8133_v26  ;;  %v8134_v29 = vunpack.i.l.bf16 %v8133_v26 }
 0x4b2   : > { %v6550_v42 = vadd.f32 %v6549_v63, %v11003_v36  ;;  %v6651_v50 = vadd.f32 %v6650_v18, %v6649_v40  ;;  %v6802_v20 = vsel %vm2012_vm8, %v10634_v21, %v8135_v46  ;;  %v6801_v17 = vsel %vm2012_vm8, %v11611_v49, %v8134_v29 }
 0x4b3   : > { %v6834_v41 = vpack.c.bf16 %v6802_v20, %v6802_v20  ;;  %v6833_v4 = vpack.c.bf16 %v6801_v17, %v6801_v17 }
 0x4b4   : > { %v6652_v27 = vadd.f32 %v6651_v50, %v11008_v15 }
 0x4b5   : > { %7897 = vst.msk [vmem:[%s9484_s6 + $0xac] sm:$0xf] %vm3520_vm9, %v6834_v41 }
 0x4b6   : > { %v6879_v36 = vsel %vm6878_vm10, %v6550_v42, %v6652_v27  ;;  %7896 = vst.msk [vmem:[%s9484_s6 + $0xa8] sm:$0xf] %vm3520_vm9, %v6833_v4 }
 0x4b7   : > { %6881 = vst.msk [vmem:[%s214_s10] sm:$0x3] %vm6880_vm11, %v6879_v36  ;;  %v8128_v60 = vpop.permute.xlu1 %8127 }
 0x4b8   : > { %v8130_v21 = vunpack.i.h.bf16 %v8128_v60  ;;  %v8129_v44 = vunpack.i.l.bf16 %v8128_v60 }
 0x4ba   : > { %v6800_v45 = vsel %vm2012_vm8, %v11612_v57, %v8130_v21  ;;  %v6799_v15 = vsel %vm2012_vm8, %v11613_v22, %v8129_v44 }
 0x4bb   : > { %v6832_v5 = vpack.c.bf16 %v6800_v45, %v6800_v45  ;;  %v6831_v1 = vpack.c.bf16 %v6799_v15, %v6799_v15 }
 0x4bd   : > { %7895 = vst.msk [vmem:[%s9484_s6 + $0x9c] sm:$0xf] %vm3520_vm9, %v6832_v5 }
 0x4be   : > { %7894 = vst.msk [vmem:[%s9484_s6 + $0x98] sm:$0xf] %vm3520_vm9, %v6831_v1 }
 0x4d7   : > { %v8138_v33 = vpop.permute.xlu0 %8137 }
 0x4d8   : > { %v8140_v38 = vunpack.i.h.bf16 %v8138_v33  ;;  %v8139_v11 = vunpack.i.l.bf16 %v8138_v33 }
 0x4da   : > { %v6804_v51 = vsel %vm2012_vm8, %v10701_v28, %v8140_v38  ;;  %v6803_v31 = vsel %vm2012_vm8, %v10676_v61, %v8139_v11 }
 0x4db   : > { %v6836_v53 = vpack.c.bf16 %v6804_v51, %v6804_v51  ;;  %v6835_v37 = vpack.c.bf16 %v6803_v31, %v6803_v31 }
 0x4dd   : > { %7899 = vst.msk [vmem:[%s9484_s6 + $0xbc] sm:$0xf] %vm3520_vm9, %v6836_v53 }
 0x4de   : > { %7898 = vst.msk [vmem:[%s9484_s6 + $0xb8] sm:$0xf] %vm3520_vm9, %v6835_v37 }
 0x4df   : > { %v8148_v16 = vpop.permute.xlu2 %8147 }
 0x4e0   : > { %v8150_v34 = vunpack.i.h.bf16 %v8148_v16  ;;  %v8149_v48 = vunpack.i.l.bf16 %v8148_v16 }
 0x4e2   : > { %v6808_v58 = vsel %vm2012_vm8, %v10823_v59, %v8150_v34  ;;  %v6807_v28 = vsel %vm2012_vm8, %v10795_v14, %v8149_v48 }
 0x4e3   : > { %v6840_v19 = vpack.c.bf16 %v6808_v58, %v6808_v58  ;;  %v6839_v32 = vpack.c.bf16 %v6807_v28, %v6807_v28 }
 0x4e5   : > { %7903 = vst.msk [vmem:[%s9484_s6 + $0xdc] sm:$0xf] %vm3520_vm9, %v6840_v19 }
 0x4e6   : > { %7902 = vst.msk [vmem:[%s9484_s6 + $0xd8] sm:$0xf] %vm3520_vm9, %v6839_v32 }
 0x4e7   : > { %v8143_v61 = vpop.permute.xlu1 %8142 }
 0x4e8   : > { %v8145_v6 = vunpack.i.h.bf16 %v8143_v61  ;;  %v8144_v39 = vunpack.i.l.bf16 %v8143_v61 }
 0x4ea   : > { %v6806_v25 = vsel %vm2012_vm8, %v10757_v23, %v8145_v6  ;;  %v6805_v59 = vsel %vm2012_vm8, %v10734_v0, %v8144_v39 }
 0x4eb   : > { %v6838_v43 = vpack.c.bf16 %v6806_v25, %v6806_v25  ;;  %v6837_v52 = vpack.c.bf16 %v6805_v59, %v6805_v59 }
 0x4ed   : > { %7901 = vst.msk [vmem:[%s9484_s6 + $0xcc] sm:$0xf] %vm3520_vm9, %v6838_v43 }
 0x4ee   : > { %7900 = vst.msk [vmem:[%s9484_s6 + $0xc8] sm:$0xf] %vm3520_vm9, %v6837_v52 }
 0x507   : > { %v8153_v14 = vpop.permute.xlu0 %8152 }
 0x508   : > { %v8155_v54 = vunpack.i.h.bf16 %v8153_v14  ;;  %v8154_v35 = vunpack.i.l.bf16 %v8153_v14 }
 0x50a   : > { %v6810_v12 = vsel %vm2012_vm8, %v10886_v2, %v8155_v54  ;;  %v6809_v23 = vsel %vm2012_vm8, %v10856_v47, %v8154_v35 }
 0x50b   : > { %v6842_v8 = vpack.c.bf16 %v6810_v12, %v6810_v12  ;;  %v6841_v3 = vpack.c.bf16 %v6809_v23, %v6809_v23 }
 0x50d   : > { %7905 = vst.msk [vmem:[%s9484_s6 + $0xec] sm:$0xf] %vm3520_vm9, %v6842_v8 }
 0x50e   : > { %7904 = vst.msk [vmem:[%s9484_s6 + $0xe8] sm:$0xf] %vm3520_vm9, %v6841_v3 }
 0x517   : > { %v8158_v0 = vpop.permute.xlu1 %8157 }
 0x518   : > { %v8160_v62 = vunpack.i.h.bf16 %v8158_v0  ;;  %v8159_v10 = vunpack.i.l.bf16 %v8158_v0 }
 0x51a   : > { %v6811_v56 = vsel %vm2012_vm8, %v10930_v7, %v8159_v10  ;;  %v6812_v55 = vsel %vm2012_vm8, %v10960_v30, %v8160_v62 }
 0x51b   : > { %v6843_v13 = vpack.c.bf16 %v6811_v56, %v6811_v56  ;;  %v6844_v2 = vpack.c.bf16 %v6812_v55, %v6812_v55 }
 0x51d   : > { %7906 = vst.msk [vmem:[%s9484_s6 + $0xf8] sm:$0xf] %vm3520_vm9, %v6843_v13 }
 0x51e   : > { %7907 = vst.msk [vmem:[%s9484_s6 + $0xfc] sm:$0xf] %vm3520_vm9, %v6844_v2 }
 0x51f PF: > { %s14_s14 = sadd.s32 1, %s8311_s14   ;;  %s11614_s12 = smov %s8307_s13 }
 0x520   : > { %p11_p5 = scmp.ge.s32.totalorder %s14_s14, 4   ;;  %s11615_s13 = smov %s11617_s15 }
 0x522   :  { %13 = sbr.rel (!%p11_p5) target bundleno = 2 (0x2), region = 89 }

</bundles_post_ra>
